<compile_context>
chip_gen: v6e
topology: v6e:2x2x1
jax: 0.10.0
libtpu: 0.0.40
codegen_flags: <defaults>
</compile_context>

<pallas_src>
import math
import functools

import numpy as np
import jax
import jax.numpy as jnp
from jax.experimental import pallas as pl
from jax.experimental.pallas import tpu as pltpu

# ----------------------------- model config ---------------------------------
D_MODEL        = 32            # CONTEXT_ENCODER.D_MODEL == DMT.CONTEXT_D_MODEL
N_HEADS        = 4
HEAD_DIM       = D_MODEL // N_HEADS
FFN_DIM        = 64
N_ENC_LAYERS   = 2
N_DEC_LAYERS   = 2
N_QUERY        = 8             # denoising trajectory modes
T_FUTURE       = 8             # future timesteps per trajectory
TRAJ_DIM       = 2             # (x, y)
AGENT_FEAT_DIM = 8
MAP_FEAT_DIM   = 8
IN_FEAT_DIM    = AGENT_FEAT_DIM + MAP_FEAT_DIM
LN_EPS         = 1e-5
ATTN_SCALE     = 1.0 / math.sqrt(HEAD_DIM)
REG_OUT        = T_FUTURE * TRAJ_DIM          # 16
HEAD_OUT       = REG_OUT + 1                  # reg (16) + cls (1) fused head
OUT_LANES      = 128                          # lane-dense padded head output width
SLAB_LANES     = 128


# ------------------------ packed-parameter slab layouts -----------------------
def _build_layouts():
    """Static row layouts for the two packed VMEM slabs (weights / small params)."""
    w_layout, p_layout = {}, {}

    def add(layout, name, rows, cols, cursor):
        layout[name] = (cursor, rows, cols)
        return cursor + rows

    # ---- weight slab: every matrix, rows aligned to multiples of 8 sublanes ----
    wc = 0
    wc = add(w_layout, "in_w", IN_FEAT_DIM, D_MODEL, wc)      # [agent_w; map_w] stacked
    wc = add(w_layout, "traj_w", REG_OUT, D_MODEL, wc)
    wc = add(w_layout, "time_w1", D_MODEL, D_MODEL, wc)
    wc = add(w_layout, "time_w2", D_MODEL, D_MODEL, wc)
    wc = add(w_layout, "head_w", D_MODEL, OUT_LANES, wc)      # reg+cls, zero-padded
    for l in range(N_ENC_LAYERS):
        for nm in ("wq", "wk", "wv", "wo"):
            wc = add(w_layout, f"enc{l}_{nm}", D_MODEL, D_MODEL, wc)
        wc = add(w_layout, f"enc{l}_ffn_w1", D_MODEL, FFN_DIM, wc)
        wc = add(w_layout, f"enc{l}_ffn_w2", FFN_DIM, D_MODEL, wc)
    for l in range(N_DEC_LAYERS):
        for nm in ("sa_wq", "sa_wk", "sa_wv", "sa_wo",
                   "ca_wq", "ca_wk", "ca_wv", "ca_wo"):
            wc = add(w_layout, f"dec{l}_{nm}", D_MODEL, D_MODEL, wc)
        wc = add(w_layout, f"dec{l}_ffn_w1", D_MODEL, FFN_DIM, wc)
        wc = add(w_layout, f"dec{l}_ffn_w2", FFN_DIM, D_MODEL, wc)
    w_rows = ((wc + 7) // 8) * 8

    # ---- small-param slab: biases / LN params / query embedding, 1 row each ----
    pc = 0
    pc = add(p_layout, "query_emb", N_QUERY, D_MODEL, pc)     # 8 rows, 8-aligned
    pc = add(p_layout, "head_b", 1, OUT_LANES, pc)
    for nm in ("agent_b", "map_b", "traj_b", "time_b1", "time_b2"):
        pc = add(p_layout, nm, 1, D_MODEL, pc)
    for l in range(N_ENC_LAYERS):
        for nm in ("bq", "bk", "bv", "bo", "ln1_g", "ln1_b", "ln2_g", "ln2_b"):
            pc = add(p_layout, f"enc{l}_{nm}", 1, D_MODEL, pc)
        pc = add(p_layout, f"enc{l}_ffn_b1", 1, FFN_DIM, pc)
        pc = add(p_layout, f"enc{l}_ffn_b2", 1, D_MODEL, pc)
    for l in range(N_DEC_LAYERS):
        for nm in ("sa_bq", "sa_bk", "sa_bv", "sa_bo",
                   "ca_bq", "ca_bk", "ca_bv", "ca_bo",
                   "ln1_g", "ln1_b", "ln2_g", "ln2_b", "ln3_g", "ln3_b"):
            pc = add(p_layout, f"dec{l}_{nm}", 1, D_MODEL, pc)
        pc = add(p_layout, f"dec{l}_ffn_b1", 1, FFN_DIM, pc)
        pc = add(p_layout, f"dec{l}_ffn_b2", 1, D_MODEL, pc)
    p_rows = ((pc + 7) // 8) * 8

    return w_layout, w_rows, p_layout, p_rows


W_LAYOUT, W_ROWS, P_LAYOUT, P_ROWS = _build_layouts()


# --------------------------- the fused Pallas kernel --------------------------
def _dmt_kernel(ctx_in_ref, traj_ref, tsin_ref, w_ref, p_ref,
                enc_out_ref, head_out_ref, *, n_agents):
    f32, bf16 = jnp.float32, jnp.bfloat16
    S = ctx_in_ref.shape[0]

    def W(name):
        off, r, c = W_LAYOUT[name]
        return w_ref[off:off + r, 0:c]          # static slices, weight slab resident

    def P(name):
        off, r, c = P_LAYOUT[name]
        return p_ref[off:off + r, 0:c]

    def mm(a, b):
        # bf16 at the MXU, f32 accumulate; elementwise math stays f32 (v5e-safe).
        return jnp.dot(a.astype(bf16), b.astype(bf16), preferred_element_type=f32)

    def layer_norm(x, g, b):
        mu = jnp.mean(x, axis=-1, keepdims=True)
        var = jnp.mean(jnp.square(x - mu), axis=-1, keepdims=True)
        return (x - mu) * jax.lax.rsqrt(var + LN_EPS) * g + b

    # Static per-head lane masks: full-width head math, no 8-lane sub-vreg slicing.
    lane = jax.lax.broadcasted_iota(jnp.int32, (1, D_MODEL), 1)
    head_masks = [
        ((lane >= h * HEAD_DIM) & (lane < (h + 1) * HEAD_DIM)).astype(f32)
        for h in range(N_HEADS)
    ]

    def attend(q_all, k_all, v_all, wo, bo):
        # q_all:(Mq,D)  k_all,v_all:(Mk,D). (q*mask_h)@k^T == q_h@k_h^T;
        # (v*mask_h)@Wo == v_h@Wo[h-rows]; head merge folded into accumulation.
        out = jnp.zeros((q_all.shape[0], D_MODEL), f32) + bo
        for hm in head_masks:
            s = jax.lax.dot_general(
                (q_all * hm).astype(bf16), k_all.astype(bf16),
                (((1,), (1,)), ((), ())), preferred_element_type=f32) * ATTN_SCALE
            m = jnp.max(s, axis=-1, keepdims=True)
            p = jnp.exp(s - m)
            l = jnp.sum(p, axis=-1, keepdims=True)
            p = p * pl.reciprocal(l, approx=True)
            vw = mm(v_all * hm, wo)                     # (Mk, D) lane-dense
            out = out + mm(p, vw)
        return out

    def mha(xq, xkv, pfx):
        q = mm(xq, W(pfx + "_wq")) + P(pfx + "_bq")
        k = mm(xkv, W(pfx + "_wk")) + P(pfx + "_bk")
        v = mm(xkv, W(pfx + "_wv")) + P(pfx + "_bv")
        return attend(q, k, v, W(pfx + "_wo"), P(pfx + "_bo"))

    def ffn(x, pfx):
        h = jnp.maximum(mm(x, W(pfx + "_ffn_w1")) + P(pfx + "_ffn_b1"), 0.0)
        return mm(h, W(pfx + "_ffn_w2")) + P(pfx + "_ffn_b2")

    # ---------------- context encoder (one batch per grid step, dense attn) ------
    # TODO(synk): the original MTR encoder applies agent/map validity masks; no mask
    # inputs are modeled here, so all tokens are treated as valid.
    ctx = mm(ctx_in_ref[...], W("in_w"))                              # (S, D)
    row = jax.lax.broadcasted_iota(jnp.int32, (S, 1), 0)
    ctx = ctx + jnp.where(row < n_agents, P("agent_b"), P("map_b"))   # agent/map bias
    for l in range(N_ENC_LAYERS):
        pfx = f"enc{l}"
        a = mha(ctx, ctx, pfx)
        ctx = layer_norm(ctx + a, P(pfx + "_ln1_g"), P(pfx + "_ln1_b"))
        f = ffn(ctx, pfx)
        ctx = layer_norm(ctx + f, P(pfx + "_ln2_g"), P(pfx + "_ln2_b"))
    enc_out_ref[...] = ctx

    # --------------------------- denoising decoder (DMT) -------------------------
    t1 = jnp.maximum(mm(tsin_ref[...], W("time_w1")) + P("time_b1"), 0.0)
    t2 = mm(t1, W("time_w2")) + P("time_b2")                          # (1, D)
    q = (mm(traj_ref[...], W("traj_w")) + P("traj_b")
         + P("query_emb") + t2)                                       # (NQ, D)
    for l in range(N_DEC_LAYERS):
        pfx = f"dec{l}"
        a = mha(q, q, pfx + "_sa")
        q = layer_norm(q + a, P(pfx + "_ln1_g"), P(pfx + "_ln1_b"))
        c = mha(q, ctx, pfx + "_ca")
        q = layer_norm(q + c, P(pfx + "_ln2_g"), P(pfx + "_ln2_b"))
        f = ffn(q, pfx)
        q = layer_norm(q + f, P(pfx + "_ln3_g"), P(pfx + "_ln3_b"))

    # -------------- fused regression + cls head (lane-dense 128-wide store) ------
    head_out_ref[...] = mm(q, W("head_w")) + P("head_b")              # (NQ, 128)


# ------------------------------ JAX glue --------------------------------------
def timestep_embedding(t, dim):
    """Sinusoidal diffusion timestep embedding (plain JAX glue)."""
    half = dim // 2
    freqs = jnp.exp(-math.log(10000.0) * jnp.arange(half, dtype=jnp.float32) / half)
    args = t.astype(jnp.float32)[:, None] * freqs[None, :]
    return jnp.concatenate([jnp.sin(args), jnp.cos(args)], axis=-1)


def dmt_forward(wslab, pslab, obj_feature, map_feature, noisy_trajs, diffusion_t):
    """Eval-mode forward: context_encoder -> denoising_decoder (no loss)."""
    f32 = jnp.float32
    B, n_agents, _ = obj_feature.shape
    n_map = map_feature.shape[1]
    S = n_agents + n_map

    # Per-token feature layout: agent rows use cols [0:8], map rows cols [8:16];
    # in_w in the weight slab is the stacked [agent_w; map_w] so one matmul covers both.
    ctx_in = jnp.zeros((B, S, IN_FEAT_DIM), f32)
    ctx_in = ctx_in.at[:, :n_agents, :AGENT_FEAT_DIM].set(obj_feature.astype(f32))
    ctx_in = ctx_in.at[:, n_agents:, AGENT_FEAT_DIM:].set(map_feature.astype(f32))

    traj_in = noisy_trajs.reshape(B, N_QUERY, REG_OUT).astype(f32)
    t_sin = timestep_embedding(diffusion_t, D_MODEL).reshape(B, 1, D_MODEL)

    kernel = functools.partial(_dmt_kernel, n_agents=n_agents)

    enc_out, head_out = pl.pallas_call(
        kernel,
        out_shape=(
            jax.ShapeDtypeStruct((B, S, D_MODEL), f32),
            jax.ShapeDtypeStruct((B, N_QUERY, OUT_LANES), f32),
        ),
        grid_spec=pltpu.PrefetchScalarGridSpec(
            num_scalar_prefetch=0,
            grid=(B,),
            in_specs=[
                pl.BlockSpec((None, S, IN_FEAT_DIM), lambda b: (b, 0, 0)),
                pl.BlockSpec((None, N_QUERY, REG_OUT), lambda b: (b, 0, 0)),
                pl.BlockSpec((None, 1, D_MODEL), lambda b: (b, 0, 0)),
                # packed weight / small-param slabs: constant index_map -> DMA'd once,
                # VMEM-resident across all grid steps.
                pl.BlockSpec((W_ROWS, SLAB_LANES), lambda b: (0, 0)),
                pl.BlockSpec((P_ROWS, SLAB_LANES), lambda b: (0, 0)),
            ],
            out_specs=[
                pl.BlockSpec((None, S, D_MODEL), lambda b: (b, 0, 0)),
                pl.BlockSpec((None, N_QUERY, OUT_LANES), lambda b: (b, 0, 0)),
            ],
        ),
        compiler_params=pltpu.CompilerParams(
            dimension_semantics=("parallel",),
            vmem_limit_bytes=32 * 1024 * 1024,
        ),
    )(ctx_in, traj_in, t_sin, wslab, pslab)

    encoder_output = enc_out
    head = head_out[:, :, :HEAD_OUT]
    denoised_trajs = head[..., :REG_OUT].reshape(B, N_QUERY, T_FUTURE, TRAJ_DIM)
    cls_logits = head[..., REG_OUT]
    mode_scores = jax.nn.softmax(cls_logits, axis=-1)

    # TODO(synk): training branch (get_loss / CTC two-stage logic) has no Pallas
    # equivalent and is intentionally not implemented (eval forward only).
    return dict(
        encoder_output=encoder_output,
        denoised_trajs=denoised_trajs,
        cls_logits=cls_logits,
        mode_scores=mode_scores,
    )


# ------------------------------ parameters ------------------------------------
def init_params(key):
    """Logical (unpacked) parameters, one entry per slab-layout name."""
    n_rand = len(W_LAYOUT) + 1
    keys = iter(jax.random.split(key, n_rand + 4))
    params = {}
    for name, (_, r, c) in W_LAYOUT.items():
        cols = HEAD_OUT if name == "head_w" else c     # head_w padded at pack time
        params[name] = 0.02 * jax.random.normal(next(keys), (r, cols), jnp.float32)
    for name, (_, r, c) in P_LAYOUT.items():
        if name == "query_emb":
            params[name] = 0.02 * jax.random.normal(next(keys), (r, c), jnp.float32)
        elif ("ln" in name) and name.endswith("_g"):
            params[name] = jnp.ones((r, c), jnp.float32)
        else:
            params[name] = jnp.zeros((r, c), jnp.float32)
    return params


def pack_params(params):
    """Pack logical params into the two (rows, 128) VMEM slabs (done once, host-side)."""
    wslab = np.zeros((W_ROWS, SLAB_LANES), np.float32)
    pslab = np.zeros((P_ROWS, SLAB_LANES), np.float32)
    for name, (off, r, c) in W_LAYOUT.items():
        arr = np.asarray(params[name], np.float32).reshape(r, -1)
        assert arr.shape[1] <= c
        wslab[off:off + r, :arr.shape[1]] = arr
    for name, (off, r, c) in P_LAYOUT.items():
        arr = np.asarray(params[name], np.float32).reshape(r, -1)
        assert arr.shape[1] <= c
        pslab[off:off + r, :arr.shape[1]] = arr
    return jnp.asarray(wslab), jnp.asarray(pslab)


# --------------------------------- main ---------------------------------------
if __name__ == "__main__":
    key = jax.random.PRNGKey(0)
    kp, ko, km, kt, kd = jax.random.split(key, 5)

    params = init_params(kp)
    wslab, pslab = pack_params(params)            # one-time packing, off the hot path

    B, N_AGENTS, N_MAP = 2, 6, 10
    obj_feature = jax.random.normal(ko, (B, N_AGENTS, AGENT_FEAT_DIM), dtype=jnp.float32)
    map_feature = jax.random.normal(km, (B, N_MAP, MAP_FEAT_DIM), dtype=jnp.float32)
    noisy_trajs = jax.random.normal(kt, (B, N_QUERY, T_FUTURE, TRAJ_DIM), dtype=jnp.float32)
    diffusion_t = jax.random.randint(kd, (B,), 0, 1000)

    fwd = jax.jit(functools.partial(dmt_forward, wslab, pslab))
    out = fwd(obj_feature, map_feature, noisy_trajs, diffusion_t)
    jax.block_until_ready(out)

    assert out["encoder_output"].shape == (B, N_AGENTS + N_MAP, D_MODEL)
    assert out["denoised_trajs"].shape == (B, N_QUERY, T_FUTURE, TRAJ_DIM)
    assert out["mode_scores"].shape == (B, N_QUERY)
    assert bool(jnp.all(jnp.isfinite(out["denoised_trajs"])))
    assert bool(jnp.all(jnp.isfinite(out["mode_scores"])))

    print("KERNEL_OK")
</pallas_src>

<mosaic_0001>
module attributes {stable_mosaic.version = 11 : i64} {
  func.func @_dmt_kernel(%arg0: i32, %arg1: memref<1x16x16xf32, #tpu.memory_space<vmem>>, %arg2: memref<1x8x16xf32, #tpu.memory_space<vmem>>, %arg3: memref<1x1x32xf32, #tpu.memory_space<vmem>>, %arg4: memref<1280x128xf32, #tpu.memory_space<vmem>>, %arg5: memref<72x128xf32, #tpu.memory_space<vmem>>, %arg6: memref<1x16x32xf32, #tpu.memory_space<vmem>>, %arg7: memref<1x8x128xf32, #tpu.memory_space<vmem>>) attributes {dimension_semantics = [#tpu.dimension_semantics<parallel>], iteration_bounds = array<i64: 2>, scalar_prefetch = 0 : i64, scratch_operands = 0 : i64, tpu.core_type = #tpu.core_type<tc>, window_params = [{transform_indices = @transform_0, window_bounds = array<i64: 1, 16, 16>}, {transform_indices = @transform_1, window_bounds = array<i64: 1, 8, 16>}, {transform_indices = @transform_2, window_bounds = array<i64: 1, 1, 32>}, {pipeline_mode = #tpu.pipeline_mode<synchronous>, transform_indices = @transform_3, window_bounds = array<i64: 1280, 128>}, {pipeline_mode = #tpu.pipeline_mode<synchronous>, transform_indices = @transform_4, window_bounds = array<i64: 72, 128>}, {transform_indices = @transform_5, window_bounds = array<i64: 1, 16, 32>}, {transform_indices = @transform_6, window_bounds = array<i64: 1, 8, 128>}]} {
    %0 = tpu.iota {dimensions = array<i32: 1>} : vector<1x32xi32>
    %c0_i32 = arith.constant 0 : i32
    %1 = vector.broadcast %c0_i32 : i32 to vector<1x32xi32>
    %2 = arith.cmpi sge, %0, %1 : vector<1x32xi32>
    %c8_i32 = arith.constant 8 : i32
    %3 = vector.broadcast %c8_i32 : i32 to vector<1x32xi32>
    %4 = arith.cmpi slt, %0, %3 : vector<1x32xi32>
    %5 = arith.andi %2, %4 : vector<1x32xi1>
    %6 = arith.extui %5 : vector<1x32xi1> to vector<1x32xi32>
    %7 = arith.sitofp %6 : vector<1x32xi32> to vector<1x32xf32>
    %c8_i32_0 = arith.constant 8 : i32
    %8 = vector.broadcast %c8_i32_0 : i32 to vector<1x32xi32>
    %9 = arith.cmpi sge, %0, %8 : vector<1x32xi32>
    %c16_i32 = arith.constant 16 : i32
    %10 = vector.broadcast %c16_i32 : i32 to vector<1x32xi32>
    %11 = arith.cmpi slt, %0, %10 : vector<1x32xi32>
    %12 = arith.andi %9, %11 : vector<1x32xi1>
    %13 = arith.extui %12 : vector<1x32xi1> to vector<1x32xi32>
    %14 = arith.sitofp %13 : vector<1x32xi32> to vector<1x32xf32>
    %c16_i32_1 = arith.constant 16 : i32
    %15 = vector.broadcast %c16_i32_1 : i32 to vector<1x32xi32>
    %16 = arith.cmpi sge, %0, %15 : vector<1x32xi32>
    %c24_i32 = arith.constant 24 : i32
    %17 = vector.broadcast %c24_i32 : i32 to vector<1x32xi32>
    %18 = arith.cmpi slt, %0, %17 : vector<1x32xi32>
    %19 = arith.andi %16, %18 : vector<1x32xi1>
    %20 = arith.extui %19 : vector<1x32xi1> to vector<1x32xi32>
    %21 = arith.sitofp %20 : vector<1x32xi32> to vector<1x32xf32>
    %c24_i32_2 = arith.constant 24 : i32
    %22 = vector.broadcast %c24_i32_2 : i32 to vector<1x32xi32>
    %23 = arith.cmpi sge, %0, %22 : vector<1x32xi32>
    %c32_i32 = arith.constant 32 : i32
    %24 = vector.broadcast %c32_i32 : i32 to vector<1x32xi32>
    %25 = arith.cmpi slt, %0, %24 : vector<1x32xi32>
    %26 = arith.andi %23, %25 : vector<1x32xi1>
    %27 = arith.extui %26 : vector<1x32xi1> to vector<1x32xi32>
    %28 = arith.sitofp %27 : vector<1x32xi32> to vector<1x32xf32>
    %c0 = arith.constant 0 : index
    %c0_3 = arith.constant 0 : index
    %c0_4 = arith.constant 0 : index
    %29 = vector.load %arg1[%c0, %c0_3, %c0_4] : memref<1x16x16xf32, #tpu.memory_space<vmem>>, vector<1x16x16xf32>
    %30 = vector.shape_cast %29 : vector<1x16x16xf32> to vector<16x16xf32>
    %c0_5 = arith.constant 0 : index
    %c0_6 = arith.constant 0 : index
    %31 = vector.load %arg4[%c0_5, %c0_6] : memref<1280x128xf32, #tpu.memory_space<vmem>>, vector<16x32xf32>
    %32 = arith.truncf %30 : vector<16x16xf32> to vector<16x16xbf16>
    %33 = arith.truncf %31 : vector<16x32xf32> to vector<16x32xbf16>
    %cst = arith.constant dense<0.000000e+00> : vector<16x32xf32>
    %34 = tpu.matmul %32, %33, %cst {dimension_numbers = #tpu.dot_dimension_numbers<[1], [0], [0], [1], [0, 0, 1, 1], [], []>} : vector<16x16xbf16>, vector<16x32xbf16>, vector<16x32xf32> -> vector<16x32xf32>
    %35 = tpu.iota {dimensions = array<i32: 0>} : vector<16x1xi32>
    %c6_i32 = arith.constant 6 : i32
    %36 = vector.broadcast %c6_i32 : i32 to vector<16x1xi32>
    %37 = arith.cmpi slt, %35, %36 : vector<16x1xi32>
    %c9 = arith.constant 9 : index
    %c0_7 = arith.constant 0 : index
    %38 = vector.load %arg5[%c9, %c0_7] : memref<72x128xf32, #tpu.memory_space<vmem>>, vector<1x32xf32>
    %c10 = arith.constant 10 : index
    %c0_8 = arith.constant 0 : index
    %39 = vector.load %arg5[%c10, %c0_8] : memref<72x128xf32, #tpu.memory_space<vmem>>, vector<1x32xf32>
    %40 = vector.shape_cast %37 : vector<16x1xi1> to vector<16x1xi1>
    %41 = vector.broadcast %40 : vector<16x1xi1> to vector<16x32xi1>
    %42 = vector.shape_cast %38 : vector<1x32xf32> to vector<1x32xf32>
    %43 = vector.broadcast %42 : vector<1x32xf32> to vector<16x32xf32>
    %44 = vector.shape_cast %39 : vector<1x32xf32> to vector<1x32xf32>
    %45 = vector.broadcast %44 : vector<1x32xf32> to vector<16x32xf32>
    %46 = arith.select %41, %43, %45 : vector<16x32xi1>, vector<16x32xf32>
    %47 = arith.addf %34, %46 : vector<16x32xf32>
    %c128 = arith.constant 128 : index
    %c0_9 = arith.constant 0 : index
    %48 = vector.load %arg4[%c128, %c0_9] : memref<1280x128xf32, #tpu.memory_space<vmem>>, vector<32x32xf32>
    %49 = arith.truncf %47 : vector<16x32xf32> to vector<16x32xbf16>
    %50 = arith.truncf %48 : vector<32x32xf32> to vector<32x32xbf16>
    %cst_10 = arith.constant dense<0.000000e+00> : vector<16x32xf32>
    %51 = tpu.matmul %49, %50, %cst_10 {dimension_numbers = #tpu.dot_dimension_numbers<[1], [0], [0], [1], [0, 0, 1, 1], [], []>} : vector<16x32xbf16>, vector<32x32xbf16>, vector<16x32xf32> -> vector<16x32xf32>
    %c14 = arith.constant 14 : index
    %c0_11 = arith.constant 0 : index
    %52 = vector.load %arg5[%c14, %c0_11] : memref<72x128xf32, #tpu.memory_space<vmem>>, vector<1x32xf32>
    %53 = vector.broadcast %52 : vector<1x32xf32> to vector<16x32xf32>
    %54 = arith.addf %51, %53 : vector<16x32xf32>
    %c160 = arith.constant 160 : index
    %c0_12 = arith.constant 0 : index
    %55 = vector.load %arg4[%c160, %c0_12] : memref<1280x128xf32, #tpu.memory_space<vmem>>, vector<32x32xf32>
    %56 = arith.truncf %47 : vector<16x32xf32> to vector<16x32xbf16>
    %57 = arith.truncf %55 : vector<32x32xf32> to vector<32x32xbf16>
    %cst_13 = arith.constant dense<0.000000e+00> : vector<16x32xf32>
    %58 = tpu.matmul %56, %57, %cst_13 {dimension_numbers = #tpu.dot_dimension_numbers<[1], [0], [0], [1], [0, 0, 1, 1], [], []>} : vector<16x32xbf16>, vector<32x32xbf16>, vector<16x32xf32> -> vector<16x32xf32>
    %c15 = arith.constant 15 : index
    %c0_14 = arith.constant 0 : index
    %59 = vector.load %arg5[%c15, %c0_14] : memref<72x128xf32, #tpu.memory_space<vmem>>, vector<1x32xf32>
    %60 = vector.broadcast %59 : vector<1x32xf32> to vector<16x32xf32>
    %61 = arith.addf %58, %60 : vector<16x32xf32>
    %c192 = arith.constant 192 : index
    %c0_15 = arith.constant 0 : index
    %62 = vector.load %arg4[%c192, %c0_15] : memref<1280x128xf32, #tpu.memory_space<vmem>>, vector<32x32xf32>
    %63 = arith.truncf %47 : vector<16x32xf32> to vector<16x32xbf16>
    %64 = arith.truncf %62 : vector<32x32xf32> to vector<32x32xbf16>
    %cst_16 = arith.constant dense<0.000000e+00> : vector<16x32xf32>
    %65 = tpu.matmul %63, %64, %cst_16 {dimension_numbers = #tpu.dot_dimension_numbers<[1], [0], [0], [1], [0, 0, 1, 1], [], []>} : vector<16x32xbf16>, vector<32x32xbf16>, vector<16x32xf32> -> vector<16x32xf32>
    %c16 = arith.constant 16 : index
    %c0_17 = arith.constant 0 : index
    %66 = vector.load %arg5[%c16, %c0_17] : memref<72x128xf32, #tpu.memory_space<vmem>>, vector<1x32xf32>
    %67 = vector.broadcast %66 : vector<1x32xf32> to vector<16x32xf32>
    %68 = arith.addf %65, %67 : vector<16x32xf32>
    %c224 = arith.constant 224 : index
    %c0_18 = arith.constant 0 : index
    %69 = vector.load %arg4[%c224, %c0_18] : memref<1280x128xf32, #tpu.memory_space<vmem>>, vector<32x32xf32>
    %c17 = arith.constant 17 : index
    %c0_19 = arith.constant 0 : index
    %70 = vector.load %arg5[%c17, %c0_19] : memref<72x128xf32, #tpu.memory_space<vmem>>, vector<1x32xf32>
    %cst_20 = arith.constant 0.000000e+00 : f32
    %71 = vector.broadcast %cst_20 : f32 to vector<16x32xf32>
    %72 = vector.broadcast %70 : vector<1x32xf32> to vector<16x32xf32>
    %73 = arith.addf %71, %72 : vector<16x32xf32>
    %74 = vector.broadcast %7 : vector<1x32xf32> to vector<16x32xf32>
    %75 = arith.mulf %54, %74 : vector<16x32xf32>
    %76 = arith.truncf %75 : vector<16x32xf32> to vector<16x32xbf16>
    %77 = arith.truncf %61 : vector<16x32xf32> to vector<16x32xbf16>
    %cst_21 = arith.constant dense<0.000000e+00> : vector<16x16xf32>
    %78 = tpu.matmul %76, %77, %cst_21 {dimension_numbers = #tpu.dot_dimension_numbers<[1], [1], [0], [0], [0, 0, 1, 0], [], []>} : vector<16x32xbf16>, vector<16x32xbf16>, vector<16x16xf32> -> vector<16x16xf32>
    %cst_22 = arith.constant 0.353553385 : f32
    %79 = vector.broadcast %cst_22 : f32 to vector<16x16xf32>
    %80 = arith.mulf %78, %79 : vector<16x16xf32>
    %cst_23 = arith.constant dense<0xFF800000> : vector<16xf32>
    %81 = vector.multi_reduction <maximumf>, %80, %cst_23 [1] : vector<16x16xf32> to vector<16xf32>
    %82 = vector.shape_cast %81 : vector<16xf32> to vector<16x1xf32>
    %83 = vector.broadcast %82 : vector<16x1xf32> to vector<16x16xf32>
    %84 = arith.subf %80, %83 : vector<16x16xf32>
    %85 = math.exp %84 : vector<16x16xf32>
    %cst_24 = arith.constant dense<0.000000e+00> : vector<16xf32>
    %86 = vector.multi_reduction <add>, %85, %cst_24 [1] : vector<16x16xf32> to vector<16xf32>
    %87 = vector.shape_cast %86 : vector<16xf32> to vector<16x1xf32>
    %88 = tpu.reciprocal %87 {approx = true} : vector<16x1xf32> -> vector<16x1xf32>
    %89 = vector.broadcast %88 : vector<16x1xf32> to vector<16x16xf32>
    %90 = arith.mulf %85, %89 : vector<16x16xf32>
    %91 = vector.broadcast %7 : vector<1x32xf32> to vector<16x32xf32>
    %92 = arith.mulf %68, %91 : vector<16x32xf32>
    %93 = arith.truncf %92 : vector<16x32xf32> to vector<16x32xbf16>
    %94 = arith.truncf %69 : vector<32x32xf32> to vector<32x32xbf16>
    %cst_25 = arith.constant dense<0.000000e+00> : vector<16x32xf32>
    %95 = tpu.matmul %93, %94, %cst_25 {dimension_numbers = #tpu.dot_dimension_numbers<[1], [0], [0], [1], [0, 0, 1, 1], [], []>} : vector<16x32xbf16>, vector<32x32xbf16>, vector<16x32xf32> -> vector<16x32xf32>
    %96 = arith.truncf %90 : vector<16x16xf32> to vector<16x16xbf16>
    %97 = arith.truncf %95 : vector<16x32xf32> to vector<16x32xbf16>
    %cst_26 = arith.constant dense<0.000000e+00> : vector<16x32xf32>
    %98 = tpu.matmul %96, %97, %cst_26 {dimension_numbers = #tpu.dot_dimension_numbers<[1], [0], [0], [1], [0, 0, 1, 1], [], []>} : vector<16x16xbf16>, vector<16x32xbf16>, vector<16x32xf32> -> vector<16x32xf32>
    %99 = arith.addf %73, %98 : vector<16x32xf32>
    %100 = vector.broadcast %14 : vector<1x32xf32> to vector<16x32xf32>
    %101 = arith.mulf %54, %100 : vector<16x32xf32>
    %102 = arith.truncf %101 : vector<16x32xf32> to vector<16x32xbf16>
    %103 = arith.truncf %61 : vector<16x32xf32> to vector<16x32xbf16>
    %cst_27 = arith.constant dense<0.000000e+00> : vector<16x16xf32>
    %104 = tpu.matmul %102, %103, %cst_27 {dimension_numbers = #tpu.dot_dimension_numbers<[1], [1], [0], [0], [0, 0, 1, 0], [], []>} : vector<16x32xbf16>, vector<16x32xbf16>, vector<16x16xf32> -> vector<16x16xf32>
    %cst_28 = arith.constant 0.353553385 : f32
    %105 = vector.broadcast %cst_28 : f32 to vector<16x16xf32>
    %106 = arith.mulf %104, %105 : vector<16x16xf32>
    %cst_29 = arith.constant dense<0xFF800000> : vector<16xf32>
    %107 = vector.multi_reduction <maximumf>, %106, %cst_29 [1] : vector<16x16xf32> to vector<16xf32>
    %108 = vector.shape_cast %107 : vector<16xf32> to vector<16x1xf32>
    %109 = vector.broadcast %108 : vector<16x1xf32> to vector<16x16xf32>
    %110 = arith.subf %106, %109 : vector<16x16xf32>
    %111 = math.exp %110 : vector<16x16xf32>
    %cst_30 = arith.constant dense<0.000000e+00> : vector<16xf32>
    %112 = vector.multi_reduction <add>, %111, %cst_30 [1] : vector<16x16xf32> to vector<16xf32>
    %113 = vector.shape_cast %112 : vector<16xf32> to vector<16x1xf32>
    %114 = tpu.reciprocal %113 {approx = true} : vector<16x1xf32> -> vector<16x1xf32>
    %115 = vector.broadcast %114 : vector<16x1xf32> to vector<16x16xf32>
    %116 = arith.mulf %111, %115 : vector<16x16xf32>
    %117 = vector.broadcast %14 : vector<1x32xf32> to vector<16x32xf32>
    %118 = arith.mulf %68, %117 : vector<16x32xf32>
    %119 = arith.truncf %118 : vector<16x32xf32> to vector<16x32xbf16>
    %120 = arith.truncf %69 : vector<32x32xf32> to vector<32x32xbf16>
    %cst_31 = arith.constant dense<0.000000e+00> : vector<16x32xf32>
    %121 = tpu.matmul %119, %120, %cst_31 {dimension_numbers = #tpu.dot_dimension_numbers<[1], [0], [0], [1], [0, 0, 1, 1], [], []>} : vector<16x32xbf16>, vector<32x32xbf16>, vector<16x32xf32> -> vector<16x32xf32>
    %122 = arith.truncf %116 : vector<16x16xf32> to vector<16x16xbf16>
    %123 = arith.truncf %121 : vector<16x32xf32> to vector<16x32xbf16>
    %cst_32 = arith.constant dense<0.000000e+00> : vector<16x32xf32>
    %124 = tpu.matmul %122, %123, %cst_32 {dimension_numbers = #tpu.dot_dimension_numbers<[1], [0], [0], [1], [0, 0, 1, 1], [], []>} : vector<16x16xbf16>, vector<16x32xbf16>, vector<16x32xf32> -> vector<16x32xf32>
    %125 = arith.addf %99, %124 : vector<16x32xf32>
    %126 = vector.broadcast %21 : vector<1x32xf32> to vector<16x32xf32>
    %127 = arith.mulf %54, %126 : vector<16x32xf32>
    %128 = arith.truncf %127 : vector<16x32xf32> to vector<16x32xbf16>
    %129 = arith.truncf %61 : vector<16x32xf32> to vector<16x32xbf16>
    %cst_33 = arith.constant dense<0.000000e+00> : vector<16x16xf32>
    %130 = tpu.matmul %128, %129, %cst_33 {dimension_numbers = #tpu.dot_dimension_numbers<[1], [1], [0], [0], [0, 0, 1, 0], [], []>} : vector<16x32xbf16>, vector<16x32xbf16>, vector<16x16xf32> -> vector<16x16xf32>
    %cst_34 = arith.constant 0.353553385 : f32
    %131 = vector.broadcast %cst_34 : f32 to vector<16x16xf32>
    %132 = arith.mulf %130, %131 : vector<16x16xf32>
    %cst_35 = arith.constant dense<0xFF800000> : vector<16xf32>
    %133 = vector.multi_reduction <maximumf>, %132, %cst_35 [1] : vector<16x16xf32> to vector<16xf32>
    %134 = vector.shape_cast %133 : vector<16xf32> to vector<16x1xf32>
    %135 = vector.broadcast %134 : vector<16x1xf32> to vector<16x16xf32>
    %136 = arith.subf %132, %135 : vector<16x16xf32>
    %137 = math.exp %136 : vector<16x16xf32>
    %cst_36 = arith.constant dense<0.000000e+00> : vector<16xf32>
    %138 = vector.multi_reduction <add>, %137, %cst_36 [1] : vector<16x16xf32> to vector<16xf32>
    %139 = vector.shape_cast %138 : vector<16xf32> to vector<16x1xf32>
    %140 = tpu.reciprocal %139 {approx = true} : vector<16x1xf32> -> vector<16x1xf32>
    %141 = vector.broadcast %140 : vector<16x1xf32> to vector<16x16xf32>
    %142 = arith.mulf %137, %141 : vector<16x16xf32>
    %143 = vector.broadcast %21 : vector<1x32xf32> to vector<16x32xf32>
    %144 = arith.mulf %68, %143 : vector<16x32xf32>
    %145 = arith.truncf %144 : vector<16x32xf32> to vector<16x32xbf16>
    %146 = arith.truncf %69 : vector<32x32xf32> to vector<32x32xbf16>
    %cst_37 = arith.constant dense<0.000000e+00> : vector<16x32xf32>
    %147 = tpu.matmul %145, %146, %cst_37 {dimension_numbers = #tpu.dot_dimension_numbers<[1], [0], [0], [1], [0, 0, 1, 1], [], []>} : vector<16x32xbf16>, vector<32x32xbf16>, vector<16x32xf32> -> vector<16x32xf32>
    %148 = arith.truncf %142 : vector<16x16xf32> to vector<16x16xbf16>
    %149 = arith.truncf %147 : vector<16x32xf32> to vector<16x32xbf16>
    %cst_38 = arith.constant dense<0.000000e+00> : vector<16x32xf32>
    %150 = tpu.matmul %148, %149, %cst_38 {dimension_numbers = #tpu.dot_dimension_numbers<[1], [0], [0], [1], [0, 0, 1, 1], [], []>} : vector<16x16xbf16>, vector<16x32xbf16>, vector<16x32xf32> -> vector<16x32xf32>
    %151 = arith.addf %125, %150 : vector<16x32xf32>
    %152 = vector.broadcast %28 : vector<1x32xf32> to vector<16x32xf32>
    %153 = arith.mulf %54, %152 : vector<16x32xf32>
    %154 = arith.truncf %153 : vector<16x32xf32> to vector<16x32xbf16>
    %155 = arith.truncf %61 : vector<16x32xf32> to vector<16x32xbf16>
    %cst_39 = arith.constant dense<0.000000e+00> : vector<16x16xf32>
    %156 = tpu.matmul %154, %155, %cst_39 {dimension_numbers = #tpu.dot_dimension_numbers<[1], [1], [0], [0], [0, 0, 1, 0], [], []>} : vector<16x32xbf16>, vector<16x32xbf16>, vector<16x16xf32> -> vector<16x16xf32>
    %cst_40 = arith.constant 0.353553385 : f32
    %157 = vector.broadcast %cst_40 : f32 to vector<16x16xf32>
    %158 = arith.mulf %156, %157 : vector<16x16xf32>
    %cst_41 = arith.constant dense<0xFF800000> : vector<16xf32>
    %159 = vector.multi_reduction <maximumf>, %158, %cst_41 [1] : vector<16x16xf32> to vector<16xf32>
    %160 = vector.shape_cast %159 : vector<16xf32> to vector<16x1xf32>
    %161 = vector.broadcast %160 : vector<16x1xf32> to vector<16x16xf32>
    %162 = arith.subf %158, %161 : vector<16x16xf32>
    %163 = math.exp %162 : vector<16x16xf32>
    %cst_42 = arith.constant dense<0.000000e+00> : vector<16xf32>
    %164 = vector.multi_reduction <add>, %163, %cst_42 [1] : vector<16x16xf32> to vector<16xf32>
    %165 = vector.shape_cast %164 : vector<16xf32> to vector<16x1xf32>
    %166 = tpu.reciprocal %165 {approx = true} : vector<16x1xf32> -> vector<16x1xf32>
    %167 = vector.broadcast %166 : vector<16x1xf32> to vector<16x16xf32>
    %168 = arith.mulf %163, %167 : vector<16x16xf32>
    %169 = vector.broadcast %28 : vector<1x32xf32> to vector<16x32xf32>
    %170 = arith.mulf %68, %169 : vector<16x32xf32>
    %171 = arith.truncf %170 : vector<16x32xf32> to vector<16x32xbf16>
    %172 = arith.truncf %69 : vector<32x32xf32> to vector<32x32xbf16>
    %cst_43 = arith.constant dense<0.000000e+00> : vector<16x32xf32>
    %173 = tpu.matmul %171, %172, %cst_43 {dimension_numbers = #tpu.dot_dimension_numbers<[1], [0], [0], [1], [0, 0, 1, 1], [], []>} : vector<16x32xbf16>, vector<32x32xbf16>, vector<16x32xf32> -> vector<16x32xf32>
    %174 = arith.truncf %168 : vector<16x16xf32> to vector<16x16xbf16>
    %175 = arith.truncf %173 : vector<16x32xf32> to vector<16x32xbf16>
    %cst_44 = arith.constant dense<0.000000e+00> : vector<16x32xf32>
    %176 = tpu.matmul %174, %175, %cst_44 {dimension_numbers = #tpu.dot_dimension_numbers<[1], [0], [0], [1], [0, 0, 1, 1], [], []>} : vector<16x16xbf16>, vector<16x32xbf16>, vector<16x32xf32> -> vector<16x32xf32>
    %177 = arith.addf %151, %176 : vector<16x32xf32>
    %178 = arith.addf %47, %177 : vector<16x32xf32>
    %c18 = arith.constant 18 : index
    %c0_45 = arith.constant 0 : index
    %179 = vector.load %arg5[%c18, %c0_45] : memref<72x128xf32, #tpu.memory_space<vmem>>, vector<1x32xf32>
    %c19 = arith.constant 19 : index
    %c0_46 = arith.constant 0 : index
    %180 = vector.load %arg5[%c19, %c0_46] : memref<72x128xf32, #tpu.memory_space<vmem>>, vector<1x32xf32>
    %cst_47 = arith.constant dense<0.000000e+00> : vector<16xf32>
    %181 = vector.multi_reduction <add>, %178, %cst_47 [1] : vector<16x32xf32> to vector<16xf32>
    %182 = vector.shape_cast %181 : vector<16xf32> to vector<16x1xf32>
    %cst_48 = arith.constant 3.200000e+01 : f32
    %183 = vector.broadcast %cst_48 : f32 to vector<16x1xf32>
    %184 = arith.divf %182, %183 : vector<16x1xf32>
    %185 = vector.broadcast %184 : vector<16x1xf32> to vector<16x32xf32>
    %186 = arith.subf %178, %185 : vector<16x32xf32>
    %187 = arith.mulf %186, %186 : vector<16x32xf32>
    %cst_49 = arith.constant dense<0.000000e+00> : vector<16xf32>
    %188 = vector.multi_reduction <add>, %187, %cst_49 [1] : vector<16x32xf32> to vector<16xf32>
    %189 = vector.shape_cast %188 : vector<16xf32> to vector<16x1xf32>
    %cst_50 = arith.constant 3.200000e+01 : f32
    %190 = vector.broadcast %cst_50 : f32 to vector<16x1xf32>
    %191 = arith.divf %189, %190 : vector<16x1xf32>
    %192 = vector.broadcast %184 : vector<16x1xf32> to vector<16x32xf32>
    %193 = arith.subf %178, %192 : vector<16x32xf32>
    %cst_51 = arith.constant 9.99999974E-6 : f32
    %194 = vector.broadcast %cst_51 : f32 to vector<16x1xf32>
    %195 = arith.addf %191, %194 : vector<16x1xf32>
    %196 = math.rsqrt %195 : vector<16x1xf32>
    %197 = vector.broadcast %196 : vector<16x1xf32> to vector<16x32xf32>
    %198 = arith.mulf %193, %197 : vector<16x32xf32>
    %199 = vector.broadcast %179 : vector<1x32xf32> to vector<16x32xf32>
    %200 = arith.mulf %198, %199 : vector<16x32xf32>
    %201 = vector.broadcast %180 : vector<1x32xf32> to vector<16x32xf32>
    %202 = arith.addf %200, %201 : vector<16x32xf32>
    %c256 = arith.constant 256 : index
    %c0_52 = arith.constant 0 : index
    %203 = vector.load %arg4[%c256, %c0_52] : memref<1280x128xf32, #tpu.memory_space<vmem>>, vector<32x64xf32>
    %204 = arith.truncf %202 : vector<16x32xf32> to vector<16x32xbf16>
    %205 = arith.truncf %203 : vector<32x64xf32> to vector<32x64xbf16>
    %cst_53 = arith.constant dense<0.000000e+00> : vector<16x64xf32>
    %206 = tpu.matmul %204, %205, %cst_53 {dimension_numbers = #tpu.dot_dimension_numbers<[1], [0], [0], [1], [0, 0, 1, 1], [], []>} : vector<16x32xbf16>, vector<32x64xbf16>, vector<16x64xf32> -> vector<16x64xf32>
    %c22 = arith.constant 22 : index
    %c0_54 = arith.constant 0 : index
    %207 = vector.load %arg5[%c22, %c0_54] : memref<72x128xf32, #tpu.memory_space<vmem>>, vector<1x64xf32>
    %208 = vector.broadcast %207 : vector<1x64xf32> to vector<16x64xf32>
    %209 = arith.addf %206, %208 : vector<16x64xf32>
    %cst_55 = arith.constant 0.000000e+00 : f32
    %210 = vector.broadcast %cst_55 : f32 to vector<16x64xf32>
    %211 = arith.maximumf %209, %210 : vector<16x64xf32>
    %c288 = arith.constant 288 : index
    %c0_56 = arith.constant 0 : index
    %212 = vector.load %arg4[%c288, %c0_56] : memref<1280x128xf32, #tpu.memory_space<vmem>>, vector<64x32xf32>
    %213 = arith.truncf %211 : vector<16x64xf32> to vector<16x64xbf16>
    %214 = arith.truncf %212 : vector<64x32xf32> to vector<64x32xbf16>
    %cst_57 = arith.constant dense<0.000000e+00> : vector<16x32xf32>
    %215 = tpu.matmul %213, %214, %cst_57 {dimension_numbers = #tpu.dot_dimension_numbers<[1], [0], [0], [1], [0, 0, 1, 1], [], []>} : vector<16x64xbf16>, vector<64x32xbf16>, vector<16x32xf32> -> vector<16x32xf32>
    %c23 = arith.constant 23 : index
    %c0_58 = arith.constant 0 : index
    %216 = vector.load %arg5[%c23, %c0_58] : memref<72x128xf32, #tpu.memory_space<vmem>>, vector<1x32xf32>
    %217 = vector.broadcast %216 : vector<1x32xf32> to vector<16x32xf32>
    %218 = arith.addf %215, %217 : vector<16x32xf32>
    %219 = arith.addf %202, %218 : vector<16x32xf32>
    %c20 = arith.constant 20 : index
    %c0_59 = arith.constant 0 : index
    %220 = vector.load %arg5[%c20, %c0_59] : memref<72x128xf32, #tpu.memory_space<vmem>>, vector<1x32xf32>
    %c21 = arith.constant 21 : index
    %c0_60 = arith.constant 0 : index
    %221 = vector.load %arg5[%c21, %c0_60] : memref<72x128xf32, #tpu.memory_space<vmem>>, vector<1x32xf32>
    %cst_61 = arith.constant dense<0.000000e+00> : vector<16xf32>
    %222 = vector.multi_reduction <add>, %219, %cst_61 [1] : vector<16x32xf32> to vector<16xf32>
    %223 = vector.shape_cast %222 : vector<16xf32> to vector<16x1xf32>
    %cst_62 = arith.constant 3.200000e+01 : f32
    %224 = vector.broadcast %cst_62 : f32 to vector<16x1xf32>
    %225 = arith.divf %223, %224 : vector<16x1xf32>
    %226 = vector.broadcast %225 : vector<16x1xf32> to vector<16x32xf32>
    %227 = arith.subf %219, %226 : vector<16x32xf32>
    %228 = arith.mulf %227, %227 : vector<16x32xf32>
    %cst_63 = arith.constant dense<0.000000e+00> : vector<16xf32>
    %229 = vector.multi_reduction <add>, %228, %cst_63 [1] : vector<16x32xf32> to vector<16xf32>
    %230 = vector.shape_cast %229 : vector<16xf32> to vector<16x1xf32>
    %cst_64 = arith.constant 3.200000e+01 : f32
    %231 = vector.broadcast %cst_64 : f32 to vector<16x1xf32>
    %232 = arith.divf %230, %231 : vector<16x1xf32>
    %233 = vector.broadcast %225 : vector<16x1xf32> to vector<16x32xf32>
    %234 = arith.subf %219, %233 : vector<16x32xf32>
    %cst_65 = arith.constant 9.99999974E-6 : f32
    %235 = vector.broadcast %cst_65 : f32 to vector<16x1xf32>
    %236 = arith.addf %232, %235 : vector<16x1xf32>
    %237 = math.rsqrt %236 : vector<16x1xf32>
    %238 = vector.broadcast %237 : vector<16x1xf32> to vector<16x32xf32>
    %239 = arith.mulf %234, %238 : vector<16x32xf32>
    %240 = vector.broadcast %220 : vector<1x32xf32> to vector<16x32xf32>
    %241 = arith.mulf %239, %240 : vector<16x32xf32>
    %242 = vector.broadcast %221 : vector<1x32xf32> to vector<16x32xf32>
    %243 = arith.addf %241, %242 : vector<16x32xf32>
    %c352 = arith.constant 352 : index
    %c0_66 = arith.constant 0 : index
    %244 = vector.load %arg4[%c352, %c0_66] : memref<1280x128xf32, #tpu.memory_space<vmem>>, vector<32x32xf32>
    %245 = arith.truncf %243 : vector<16x32xf32> to vector<16x32xbf16>
    %246 = arith.truncf %244 : vector<32x32xf32> to vector<32x32xbf16>
    %cst_67 = arith.constant dense<0.000000e+00> : vector<16x32xf32>
    %247 = tpu.matmul %245, %246, %cst_67 {dimension_numbers = #tpu.dot_dimension_numbers<[1], [0], [0], [1], [0, 0, 1, 1], [], []>} : vector<16x32xbf16>, vector<32x32xbf16>, vector<16x32xf32> -> vector<16x32xf32>
    %c24 = arith.constant 24 : index
    %c0_68 = arith.constant 0 : index
    %248 = vector.load %arg5[%c24, %c0_68] : memref<72x128xf32, #tpu.memory_space<vmem>>, vector<1x32xf32>
    %249 = vector.broadcast %248 : vector<1x32xf32> to vector<16x32xf32>
    %250 = arith.addf %247, %249 : vector<16x32xf32>
    %c384 = arith.constant 384 : index
    %c0_69 = arith.constant 0 : index
    %251 = vector.load %arg4[%c384, %c0_69] : memref<1280x128xf32, #tpu.memory_space<vmem>>, vector<32x32xf32>
    %252 = arith.truncf %243 : vector<16x32xf32> to vector<16x32xbf16>
    %253 = arith.truncf %251 : vector<32x32xf32> to vector<32x32xbf16>
    %cst_70 = arith.constant dense<0.000000e+00> : vector<16x32xf32>
    %254 = tpu.matmul %252, %253, %cst_70 {dimension_numbers = #tpu.dot_dimension_numbers<[1], [0], [0], [1], [0, 0, 1, 1], [], []>} : vector<16x32xbf16>, vector<32x32xbf16>, vector<16x32xf32> -> vector<16x32xf32>
    %c25 = arith.constant 25 : index
    %c0_71 = arith.constant 0 : index
    %255 = vector.load %arg5[%c25, %c0_71] : memref<72x128xf32, #tpu.memory_space<vmem>>, vector<1x32xf32>
    %256 = vector.broadcast %255 : vector<1x32xf32> to vector<16x32xf32>
    %257 = arith.addf %254, %256 : vector<16x32xf32>
    %c416 = arith.constant 416 : index
    %c0_72 = arith.constant 0 : index
    %258 = vector.load %arg4[%c416, %c0_72] : memref<1280x128xf32, #tpu.memory_space<vmem>>, vector<32x32xf32>
    %259 = arith.truncf %243 : vector<16x32xf32> to vector<16x32xbf16>
    %260 = arith.truncf %258 : vector<32x32xf32> to vector<32x32xbf16>
    %cst_73 = arith.constant dense<0.000000e+00> : vector<16x32xf32>
    %261 = tpu.matmul %259, %260, %cst_73 {dimension_numbers = #tpu.dot_dimension_numbers<[1], [0], [0], [1], [0, 0, 1, 1], [], []>} : vector<16x32xbf16>, vector<32x32xbf16>, vector<16x32xf32> -> vector<16x32xf32>
    %c26 = arith.constant 26 : index
    %c0_74 = arith.constant 0 : index
    %262 = vector.load %arg5[%c26, %c0_74] : memref<72x128xf32, #tpu.memory_space<vmem>>, vector<1x32xf32>
    %263 = vector.broadcast %262 : vector<1x32xf32> to vector<16x32xf32>
    %264 = arith.addf %261, %263 : vector<16x32xf32>
    %c448 = arith.constant 448 : index
    %c0_75 = arith.constant 0 : index
    %265 = vector.load %arg4[%c448, %c0_75] : memref<1280x128xf32, #tpu.memory_space<vmem>>, vector<32x32xf32>
    %c27 = arith.constant 27 : index
    %c0_76 = arith.constant 0 : index
    %266 = vector.load %arg5[%c27, %c0_76] : memref<72x128xf32, #tpu.memory_space<vmem>>, vector<1x32xf32>
    %cst_77 = arith.constant 0.000000e+00 : f32
    %267 = vector.broadcast %cst_77 : f32 to vector<16x32xf32>
    %268 = vector.broadcast %266 : vector<1x32xf32> to vector<16x32xf32>
    %269 = arith.addf %267, %268 : vector<16x32xf32>
    %270 = vector.broadcast %7 : vector<1x32xf32> to vector<16x32xf32>
    %271 = arith.mulf %250, %270 : vector<16x32xf32>
    %272 = arith.truncf %271 : vector<16x32xf32> to vector<16x32xbf16>
    %273 = arith.truncf %257 : vector<16x32xf32> to vector<16x32xbf16>
    %cst_78 = arith.constant dense<0.000000e+00> : vector<16x16xf32>
    %274 = tpu.matmul %272, %273, %cst_78 {dimension_numbers = #tpu.dot_dimension_numbers<[1], [1], [0], [0], [0, 0, 1, 0], [], []>} : vector<16x32xbf16>, vector<16x32xbf16>, vector<16x16xf32> -> vector<16x16xf32>
    %cst_79 = arith.constant 0.353553385 : f32
    %275 = vector.broadcast %cst_79 : f32 to vector<16x16xf32>
    %276 = arith.mulf %274, %275 : vector<16x16xf32>
    %cst_80 = arith.constant dense<0xFF800000> : vector<16xf32>
    %277 = vector.multi_reduction <maximumf>, %276, %cst_80 [1] : vector<16x16xf32> to vector<16xf32>
    %278 = vector.shape_cast %277 : vector<16xf32> to vector<16x1xf32>
    %279 = vector.broadcast %278 : vector<16x1xf32> to vector<16x16xf32>
    %280 = arith.subf %276, %279 : vector<16x16xf32>
    %281 = math.exp %280 : vector<16x16xf32>
    %cst_81 = arith.constant dense<0.000000e+00> : vector<16xf32>
    %282 = vector.multi_reduction <add>, %281, %cst_81 [1] : vector<16x16xf32> to vector<16xf32>
    %283 = vector.shape_cast %282 : vector<16xf32> to vector<16x1xf32>
    %284 = tpu.reciprocal %283 {approx = true} : vector<16x1xf32> -> vector<16x1xf32>
    %285 = vector.broadcast %284 : vector<16x1xf32> to vector<16x16xf32>
    %286 = arith.mulf %281, %285 : vector<16x16xf32>
    %287 = vector.broadcast %7 : vector<1x32xf32> to vector<16x32xf32>
    %288 = arith.mulf %264, %287 : vector<16x32xf32>
    %289 = arith.truncf %288 : vector<16x32xf32> to vector<16x32xbf16>
    %290 = arith.truncf %265 : vector<32x32xf32> to vector<32x32xbf16>
    %cst_82 = arith.constant dense<0.000000e+00> : vector<16x32xf32>
    %291 = tpu.matmul %289, %290, %cst_82 {dimension_numbers = #tpu.dot_dimension_numbers<[1], [0], [0], [1], [0, 0, 1, 1], [], []>} : vector<16x32xbf16>, vector<32x32xbf16>, vector<16x32xf32> -> vector<16x32xf32>
    %292 = arith.truncf %286 : vector<16x16xf32> to vector<16x16xbf16>
    %293 = arith.truncf %291 : vector<16x32xf32> to vector<16x32xbf16>
    %cst_83 = arith.constant dense<0.000000e+00> : vector<16x32xf32>
    %294 = tpu.matmul %292, %293, %cst_83 {dimension_numbers = #tpu.dot_dimension_numbers<[1], [0], [0], [1], [0, 0, 1, 1], [], []>} : vector<16x16xbf16>, vector<16x32xbf16>, vector<16x32xf32> -> vector<16x32xf32>
    %295 = arith.addf %269, %294 : vector<16x32xf32>
    %296 = vector.broadcast %14 : vector<1x32xf32> to vector<16x32xf32>
    %297 = arith.mulf %250, %296 : vector<16x32xf32>
    %298 = arith.truncf %297 : vector<16x32xf32> to vector<16x32xbf16>
    %299 = arith.truncf %257 : vector<16x32xf32> to vector<16x32xbf16>
    %cst_84 = arith.constant dense<0.000000e+00> : vector<16x16xf32>
    %300 = tpu.matmul %298, %299, %cst_84 {dimension_numbers = #tpu.dot_dimension_numbers<[1], [1], [0], [0], [0, 0, 1, 0], [], []>} : vector<16x32xbf16>, vector<16x32xbf16>, vector<16x16xf32> -> vector<16x16xf32>
    %cst_85 = arith.constant 0.353553385 : f32
    %301 = vector.broadcast %cst_85 : f32 to vector<16x16xf32>
    %302 = arith.mulf %300, %301 : vector<16x16xf32>
    %cst_86 = arith.constant dense<0xFF800000> : vector<16xf32>
    %303 = vector.multi_reduction <maximumf>, %302, %cst_86 [1] : vector<16x16xf32> to vector<16xf32>
    %304 = vector.shape_cast %303 : vector<16xf32> to vector<16x1xf32>
    %305 = vector.broadcast %304 : vector<16x1xf32> to vector<16x16xf32>
    %306 = arith.subf %302, %305 : vector<16x16xf32>
    %307 = math.exp %306 : vector<16x16xf32>
    %cst_87 = arith.constant dense<0.000000e+00> : vector<16xf32>
    %308 = vector.multi_reduction <add>, %307, %cst_87 [1] : vector<16x16xf32> to vector<16xf32>
    %309 = vector.shape_cast %308 : vector<16xf32> to vector<16x1xf32>
    %310 = tpu.reciprocal %309 {approx = true} : vector<16x1xf32> -> vector<16x1xf32>
    %311 = vector.broadcast %310 : vector<16x1xf32> to vector<16x16xf32>
    %312 = arith.mulf %307, %311 : vector<16x16xf32>
    %313 = vector.broadcast %14 : vector<1x32xf32> to vector<16x32xf32>
    %314 = arith.mulf %264, %313 : vector<16x32xf32>
    %315 = arith.truncf %314 : vector<16x32xf32> to vector<16x32xbf16>
    %316 = arith.truncf %265 : vector<32x32xf32> to vector<32x32xbf16>
    %cst_88 = arith.constant dense<0.000000e+00> : vector<16x32xf32>
    %317 = tpu.matmul %315, %316, %cst_88 {dimension_numbers = #tpu.dot_dimension_numbers<[1], [0], [0], [1], [0, 0, 1, 1], [], []>} : vector<16x32xbf16>, vector<32x32xbf16>, vector<16x32xf32> -> vector<16x32xf32>
    %318 = arith.truncf %312 : vector<16x16xf32> to vector<16x16xbf16>
    %319 = arith.truncf %317 : vector<16x32xf32> to vector<16x32xbf16>
    %cst_89 = arith.constant dense<0.000000e+00> : vector<16x32xf32>
    %320 = tpu.matmul %318, %319, %cst_89 {dimension_numbers = #tpu.dot_dimension_numbers<[1], [0], [0], [1], [0, 0, 1, 1], [], []>} : vector<16x16xbf16>, vector<16x32xbf16>, vector<16x32xf32> -> vector<16x32xf32>
    %321 = arith.addf %295, %320 : vector<16x32xf32>
    %322 = vector.broadcast %21 : vector<1x32xf32> to vector<16x32xf32>
    %323 = arith.mulf %250, %322 : vector<16x32xf32>
    %324 = arith.truncf %323 : vector<16x32xf32> to vector<16x32xbf16>
    %325 = arith.truncf %257 : vector<16x32xf32> to vector<16x32xbf16>
    %cst_90 = arith.constant dense<0.000000e+00> : vector<16x16xf32>
    %326 = tpu.matmul %324, %325, %cst_90 {dimension_numbers = #tpu.dot_dimension_numbers<[1], [1], [0], [0], [0, 0, 1, 0], [], []>} : vector<16x32xbf16>, vector<16x32xbf16>, vector<16x16xf32> -> vector<16x16xf32>
    %cst_91 = arith.constant 0.353553385 : f32
    %327 = vector.broadcast %cst_91 : f32 to vector<16x16xf32>
    %328 = arith.mulf %326, %327 : vector<16x16xf32>
    %cst_92 = arith.constant dense<0xFF800000> : vector<16xf32>
    %329 = vector.multi_reduction <maximumf>, %328, %cst_92 [1] : vector<16x16xf32> to vector<16xf32>
    %330 = vector.shape_cast %329 : vector<16xf32> to vector<16x1xf32>
    %331 = vector.broadcast %330 : vector<16x1xf32> to vector<16x16xf32>
    %332 = arith.subf %328, %331 : vector<16x16xf32>
    %333 = math.exp %332 : vector<16x16xf32>
    %cst_93 = arith.constant dense<0.000000e+00> : vector<16xf32>
    %334 = vector.multi_reduction <add>, %333, %cst_93 [1] : vector<16x16xf32> to vector<16xf32>
    %335 = vector.shape_cast %334 : vector<16xf32> to vector<16x1xf32>
    %336 = tpu.reciprocal %335 {approx = true} : vector<16x1xf32> -> vector<16x1xf32>
    %337 = vector.broadcast %336 : vector<16x1xf32> to vector<16x16xf32>
    %338 = arith.mulf %333, %337 : vector<16x16xf32>
    %339 = vector.broadcast %21 : vector<1x32xf32> to vector<16x32xf32>
    %340 = arith.mulf %264, %339 : vector<16x32xf32>
    %341 = arith.truncf %340 : vector<16x32xf32> to vector<16x32xbf16>
    %342 = arith.truncf %265 : vector<32x32xf32> to vector<32x32xbf16>
    %cst_94 = arith.constant dense<0.000000e+00> : vector<16x32xf32>
    %343 = tpu.matmul %341, %342, %cst_94 {dimension_numbers = #tpu.dot_dimension_numbers<[1], [0], [0], [1], [0, 0, 1, 1], [], []>} : vector<16x32xbf16>, vector<32x32xbf16>, vector<16x32xf32> -> vector<16x32xf32>
    %344 = arith.truncf %338 : vector<16x16xf32> to vector<16x16xbf16>
    %345 = arith.truncf %343 : vector<16x32xf32> to vector<16x32xbf16>
    %cst_95 = arith.constant dense<0.000000e+00> : vector<16x32xf32>
    %346 = tpu.matmul %344, %345, %cst_95 {dimension_numbers = #tpu.dot_dimension_numbers<[1], [0], [0], [1], [0, 0, 1, 1], [], []>} : vector<16x16xbf16>, vector<16x32xbf16>, vector<16x32xf32> -> vector<16x32xf32>
    %347 = arith.addf %321, %346 : vector<16x32xf32>
    %348 = vector.broadcast %28 : vector<1x32xf32> to vector<16x32xf32>
    %349 = arith.mulf %250, %348 : vector<16x32xf32>
    %350 = arith.truncf %349 : vector<16x32xf32> to vector<16x32xbf16>
    %351 = arith.truncf %257 : vector<16x32xf32> to vector<16x32xbf16>
    %cst_96 = arith.constant dense<0.000000e+00> : vector<16x16xf32>
    %352 = tpu.matmul %350, %351, %cst_96 {dimension_numbers = #tpu.dot_dimension_numbers<[1], [1], [0], [0], [0, 0, 1, 0], [], []>} : vector<16x32xbf16>, vector<16x32xbf16>, vector<16x16xf32> -> vector<16x16xf32>
    %cst_97 = arith.constant 0.353553385 : f32
    %353 = vector.broadcast %cst_97 : f32 to vector<16x16xf32>
    %354 = arith.mulf %352, %353 : vector<16x16xf32>
    %cst_98 = arith.constant dense<0xFF800000> : vector<16xf32>
    %355 = vector.multi_reduction <maximumf>, %354, %cst_98 [1] : vector<16x16xf32> to vector<16xf32>
    %356 = vector.shape_cast %355 : vector<16xf32> to vector<16x1xf32>
    %357 = vector.broadcast %356 : vector<16x1xf32> to vector<16x16xf32>
    %358 = arith.subf %354, %357 : vector<16x16xf32>
    %359 = math.exp %358 : vector<16x16xf32>
    %cst_99 = arith.constant dense<0.000000e+00> : vector<16xf32>
    %360 = vector.multi_reduction <add>, %359, %cst_99 [1] : vector<16x16xf32> to vector<16xf32>
    %361 = vector.shape_cast %360 : vector<16xf32> to vector<16x1xf32>
    %362 = tpu.reciprocal %361 {approx = true} : vector<16x1xf32> -> vector<16x1xf32>
    %363 = vector.broadcast %362 : vector<16x1xf32> to vector<16x16xf32>
    %364 = arith.mulf %359, %363 : vector<16x16xf32>
    %365 = vector.broadcast %28 : vector<1x32xf32> to vector<16x32xf32>
    %366 = arith.mulf %264, %365 : vector<16x32xf32>
    %367 = arith.truncf %366 : vector<16x32xf32> to vector<16x32xbf16>
    %368 = arith.truncf %265 : vector<32x32xf32> to vector<32x32xbf16>
    %cst_100 = arith.constant dense<0.000000e+00> : vector<16x32xf32>
    %369 = tpu.matmul %367, %368, %cst_100 {dimension_numbers = #tpu.dot_dimension_numbers<[1], [0], [0], [1], [0, 0, 1, 1], [], []>} : vector<16x32xbf16>, vector<32x32xbf16>, vector<16x32xf32> -> vector<16x32xf32>
    %370 = arith.truncf %364 : vector<16x16xf32> to vector<16x16xbf16>
    %371 = arith.truncf %369 : vector<16x32xf32> to vector<16x32xbf16>
    %cst_101 = arith.constant dense<0.000000e+00> : vector<16x32xf32>
    %372 = tpu.matmul %370, %371, %cst_101 {dimension_numbers = #tpu.dot_dimension_numbers<[1], [0], [0], [1], [0, 0, 1, 1], [], []>} : vector<16x16xbf16>, vector<16x32xbf16>, vector<16x32xf32> -> vector<16x32xf32>
    %373 = arith.addf %347, %372 : vector<16x32xf32>
    %374 = arith.addf %243, %373 : vector<16x32xf32>
    %c28 = arith.constant 28 : index
    %c0_102 = arith.constant 0 : index
    %375 = vector.load %arg5[%c28, %c0_102] : memref<72x128xf32, #tpu.memory_space<vmem>>, vector<1x32xf32>
    %c29 = arith.constant 29 : index
    %c0_103 = arith.constant 0 : index
    %376 = vector.load %arg5[%c29, %c0_103] : memref<72x128xf32, #tpu.memory_space<vmem>>, vector<1x32xf32>
    %cst_104 = arith.constant dense<0.000000e+00> : vector<16xf32>
    %377 = vector.multi_reduction <add>, %374, %cst_104 [1] : vector<16x32xf32> to vector<16xf32>
    %378 = vector.shape_cast %377 : vector<16xf32> to vector<16x1xf32>
    %cst_105 = arith.constant 3.200000e+01 : f32
    %379 = vector.broadcast %cst_105 : f32 to vector<16x1xf32>
    %380 = arith.divf %378, %379 : vector<16x1xf32>
    %381 = vector.broadcast %380 : vector<16x1xf32> to vector<16x32xf32>
    %382 = arith.subf %374, %381 : vector<16x32xf32>
    %383 = arith.mulf %382, %382 : vector<16x32xf32>
    %cst_106 = arith.constant dense<0.000000e+00> : vector<16xf32>
    %384 = vector.multi_reduction <add>, %383, %cst_106 [1] : vector<16x32xf32> to vector<16xf32>
    %385 = vector.shape_cast %384 : vector<16xf32> to vector<16x1xf32>
    %cst_107 = arith.constant 3.200000e+01 : f32
    %386 = vector.broadcast %cst_107 : f32 to vector<16x1xf32>
    %387 = arith.divf %385, %386 : vector<16x1xf32>
    %388 = vector.broadcast %380 : vector<16x1xf32> to vector<16x32xf32>
    %389 = arith.subf %374, %388 : vector<16x32xf32>
    %cst_108 = arith.constant 9.99999974E-6 : f32
    %390 = vector.broadcast %cst_108 : f32 to vector<16x1xf32>
    %391 = arith.addf %387, %390 : vector<16x1xf32>
    %392 = math.rsqrt %391 : vector<16x1xf32>
    %393 = vector.broadcast %392 : vector<16x1xf32> to vector<16x32xf32>
    %394 = arith.mulf %389, %393 : vector<16x32xf32>
    %395 = vector.broadcast %375 : vector<1x32xf32> to vector<16x32xf32>
    %396 = arith.mulf %394, %395 : vector<16x32xf32>
    %397 = vector.broadcast %376 : vector<1x32xf32> to vector<16x32xf32>
    %398 = arith.addf %396, %397 : vector<16x32xf32>
    %c480 = arith.constant 480 : index
    %c0_109 = arith.constant 0 : index
    %399 = vector.load %arg4[%c480, %c0_109] : memref<1280x128xf32, #tpu.memory_space<vmem>>, vector<32x64xf32>
    %400 = arith.truncf %398 : vector<16x32xf32> to vector<16x32xbf16>
    %401 = arith.truncf %399 : vector<32x64xf32> to vector<32x64xbf16>
    %cst_110 = arith.constant dense<0.000000e+00> : vector<16x64xf32>
    %402 = tpu.matmul %400, %401, %cst_110 {dimension_numbers = #tpu.dot_dimension_numbers<[1], [0], [0], [1], [0, 0, 1, 1], [], []>} : vector<16x32xbf16>, vector<32x64xbf16>, vector<16x64xf32> -> vector<16x64xf32>
    %c32 = arith.constant 32 : index
    %c0_111 = arith.constant 0 : index
    %403 = vector.load %arg5[%c32, %c0_111] : memref<72x128xf32, #tpu.memory_space<vmem>>, vector<1x64xf32>
    %404 = vector.broadcast %403 : vector<1x64xf32> to vector<16x64xf32>
    %405 = arith.addf %402, %404 : vector<16x64xf32>
    %cst_112 = arith.constant 0.000000e+00 : f32
    %406 = vector.broadcast %cst_112 : f32 to vector<16x64xf32>
    %407 = arith.maximumf %405, %406 : vector<16x64xf32>
    %c512 = arith.constant 512 : index
    %c0_113 = arith.constant 0 : index
    %408 = vector.load %arg4[%c512, %c0_113] : memref<1280x128xf32, #tpu.memory_space<vmem>>, vector<64x32xf32>
    %409 = arith.truncf %407 : vector<16x64xf32> to vector<16x64xbf16>
    %410 = arith.truncf %408 : vector<64x32xf32> to vector<64x32xbf16>
    %cst_114 = arith.constant dense<0.000000e+00> : vector<16x32xf32>
    %411 = tpu.matmul %409, %410, %cst_114 {dimension_numbers = #tpu.dot_dimension_numbers<[1], [0], [0], [1], [0, 0, 1, 1], [], []>} : vector<16x64xbf16>, vector<64x32xbf16>, vector<16x32xf32> -> vector<16x32xf32>
    %c33 = arith.constant 33 : index
    %c0_115 = arith.constant 0 : index
    %412 = vector.load %arg5[%c33, %c0_115] : memref<72x128xf32, #tpu.memory_space<vmem>>, vector<1x32xf32>
    %413 = vector.broadcast %412 : vector<1x32xf32> to vector<16x32xf32>
    %414 = arith.addf %411, %413 : vector<16x32xf32>
    %415 = arith.addf %398, %414 : vector<16x32xf32>
    %c30 = arith.constant 30 : index
    %c0_116 = arith.constant 0 : index
    %416 = vector.load %arg5[%c30, %c0_116] : memref<72x128xf32, #tpu.memory_space<vmem>>, vector<1x32xf32>
    %c31 = arith.constant 31 : index
    %c0_117 = arith.constant 0 : index
    %417 = vector.load %arg5[%c31, %c0_117] : memref<72x128xf32, #tpu.memory_space<vmem>>, vector<1x32xf32>
    %cst_118 = arith.constant dense<0.000000e+00> : vector<16xf32>
    %418 = vector.multi_reduction <add>, %415, %cst_118 [1] : vector<16x32xf32> to vector<16xf32>
    %419 = vector.shape_cast %418 : vector<16xf32> to vector<16x1xf32>
    %cst_119 = arith.constant 3.200000e+01 : f32
    %420 = vector.broadcast %cst_119 : f32 to vector<16x1xf32>
    %421 = arith.divf %419, %420 : vector<16x1xf32>
    %422 = vector.broadcast %421 : vector<16x1xf32> to vector<16x32xf32>
    %423 = arith.subf %415, %422 : vector<16x32xf32>
    %424 = arith.mulf %423, %423 : vector<16x32xf32>
    %cst_120 = arith.constant dense<0.000000e+00> : vector<16xf32>
    %425 = vector.multi_reduction <add>, %424, %cst_120 [1] : vector<16x32xf32> to vector<16xf32>
    %426 = vector.shape_cast %425 : vector<16xf32> to vector<16x1xf32>
    %cst_121 = arith.constant 3.200000e+01 : f32
    %427 = vector.broadcast %cst_121 : f32 to vector<16x1xf32>
    %428 = arith.divf %426, %427 : vector<16x1xf32>
    %429 = vector.broadcast %421 : vector<16x1xf32> to vector<16x32xf32>
    %430 = arith.subf %415, %429 : vector<16x32xf32>
    %cst_122 = arith.constant 9.99999974E-6 : f32
    %431 = vector.broadcast %cst_122 : f32 to vector<16x1xf32>
    %432 = arith.addf %428, %431 : vector<16x1xf32>
    %433 = math.rsqrt %432 : vector<16x1xf32>
    %434 = vector.broadcast %433 : vector<16x1xf32> to vector<16x32xf32>
    %435 = arith.mulf %430, %434 : vector<16x32xf32>
    %436 = vector.broadcast %416 : vector<1x32xf32> to vector<16x32xf32>
    %437 = arith.mulf %435, %436 : vector<16x32xf32>
    %438 = vector.broadcast %417 : vector<1x32xf32> to vector<16x32xf32>
    %439 = arith.addf %437, %438 : vector<16x32xf32>
    %c0_123 = arith.constant 0 : index
    %c0_124 = arith.constant 0 : index
    %c0_125 = arith.constant 0 : index
    %440 = vector.load %arg6[%c0_123, %c0_124, %c0_125] : memref<1x16x32xf32, #tpu.memory_space<vmem>>, vector<1x16x32xf32>
    %441 = vector.shape_cast %440 : vector<1x16x32xf32> to vector<16x32xf32>
    %442 = vector.shape_cast %439 : vector<16x32xf32> to vector<1x16x32xf32>
    tpu.vector_store %arg6[%c0_123, %c0_124, %c0_125], %442 {strides = array<i32>} : memref<1x16x32xf32, #tpu.memory_space<vmem>>, vector<1x16x32xf32>,
    %c0_126 = arith.constant 0 : index
    %c0_127 = arith.constant 0 : index
    %c0_128 = arith.constant 0 : index
    %443 = vector.load %arg3[%c0_126, %c0_127, %c0_128] : memref<1x1x32xf32, #tpu.memory_space<vmem>>, vector<1x1x32xf32>
    %444 = vector.shape_cast %443 : vector<1x1x32xf32> to vector<1x32xf32>
    %c32_129 = arith.constant 32 : index
    %c0_130 = arith.constant 0 : index
    %445 = vector.load %arg4[%c32_129, %c0_130] : memref<1280x128xf32, #tpu.memory_space<vmem>>, vector<32x32xf32>
    %446 = arith.truncf %444 : vector<1x32xf32> to vector<1x32xbf16>
    %447 = arith.truncf %445 : vector<32x32xf32> to vector<32x32xbf16>
    %cst_131 = arith.constant dense<0.000000e+00> : vector<1x32xf32>
    %448 = tpu.matmul %446, %447, %cst_131 {dimension_numbers = #tpu.dot_dimension_numbers<[1], [0], [0], [1], [0, 0, 1, 1], [], []>} : vector<1x32xbf16>, vector<32x32xbf16>, vector<1x32xf32> -> vector<1x32xf32>
    %c12 = arith.constant 12 : index
    %c0_132 = arith.constant 0 : index
    %449 = vector.load %arg5[%c12, %c0_132] : memref<72x128xf32, #tpu.memory_space<vmem>>, vector<1x32xf32>
    %450 = arith.addf %448, %449 : vector<1x32xf32>
    %cst_133 = arith.constant 0.000000e+00 : f32
    %451 = vector.broadcast %cst_133 : f32 to vector<1x32xf32>
    %452 = arith.maximumf %450, %451 : vector<1x32xf32>
    %c64 = arith.constant 64 : index
    %c0_134 = arith.constant 0 : index
    %453 = vector.load %arg4[%c64, %c0_134] : memref<1280x128xf32, #tpu.memory_space<vmem>>, vector<32x32xf32>
    %454 = arith.truncf %452 : vector<1x32xf32> to vector<1x32xbf16>
    %455 = arith.truncf %453 : vector<32x32xf32> to vector<32x32xbf16>
    %cst_135 = arith.constant dense<0.000000e+00> : vector<1x32xf32>
    %456 = tpu.matmul %454, %455, %cst_135 {dimension_numbers = #tpu.dot_dimension_numbers<[1], [0], [0], [1], [0, 0, 1, 1], [], []>} : vector<1x32xbf16>, vector<32x32xbf16>, vector<1x32xf32> -> vector<1x32xf32>
    %c13 = arith.constant 13 : index
    %c0_136 = arith.constant 0 : index
    %457 = vector.load %arg5[%c13, %c0_136] : memref<72x128xf32, #tpu.memory_space<vmem>>, vector<1x32xf32>
    %458 = arith.addf %456, %457 : vector<1x32xf32>
    %c0_137 = arith.constant 0 : index
    %c0_138 = arith.constant 0 : index
    %c0_139 = arith.constant 0 : index
    %459 = vector.load %arg2[%c0_137, %c0_138, %c0_139] : memref<1x8x16xf32, #tpu.memory_space<vmem>>, vector<1x8x16xf32>
    %460 = vector.shape_cast %459 : vector<1x8x16xf32> to vector<8x16xf32>
    %c16_140 = arith.constant 16 : index
    %c0_141 = arith.constant 0 : index
    %461 = vector.load %arg4[%c16_140, %c0_141] : memref<1280x128xf32, #tpu.memory_space<vmem>>, vector<16x32xf32>
    %462 = arith.truncf %460 : vector<8x16xf32> to vector<8x16xbf16>
    %463 = arith.truncf %461 : vector<16x32xf32> to vector<16x32xbf16>
    %cst_142 = arith.constant dense<0.000000e+00> : vector<8x32xf32>
    %464 = tpu.matmul %462, %463, %cst_142 {dimension_numbers = #tpu.dot_dimension_numbers<[1], [0], [0], [1], [0, 0, 1, 1], [], []>} : vector<8x16xbf16>, vector<16x32xbf16>, vector<8x32xf32> -> vector<8x32xf32>
    %c11 = arith.constant 11 : index
    %c0_143 = arith.constant 0 : index
    %465 = vector.load %arg5[%c11, %c0_143] : memref<72x128xf32, #tpu.memory_space<vmem>>, vector<1x32xf32>
    %466 = vector.broadcast %465 : vector<1x32xf32> to vector<8x32xf32>
    %467 = arith.addf %464, %466 : vector<8x32xf32>
    %c0_144 = arith.constant 0 : index
    %c0_145 = arith.constant 0 : index
    %468 = vector.load %arg5[%c0_144, %c0_145] : memref<72x128xf32, #tpu.memory_space<vmem>>, vector<8x32xf32>
    %469 = arith.addf %467, %468 : vector<8x32xf32>
    %470 = vector.broadcast %458 : vector<1x32xf32> to vector<8x32xf32>
    %471 = arith.addf %469, %470 : vector<8x32xf32>
    %c576 = arith.constant 576 : index
    %c0_146 = arith.constant 0 : index
    %472 = vector.load %arg4[%c576, %c0_146] : memref<1280x128xf32, #tpu.memory_space<vmem>>, vector<32x32xf32>
    %473 = arith.truncf %471 : vector<8x32xf32> to vector<8x32xbf16>
    %474 = arith.truncf %472 : vector<32x32xf32> to vector<32x32xbf16>
    %cst_147 = arith.constant dense<0.000000e+00> : vector<8x32xf32>
    %475 = tpu.matmul %473, %474, %cst_147 {dimension_numbers = #tpu.dot_dimension_numbers<[1], [0], [0], [1], [0, 0, 1, 1], [], []>} : vector<8x32xbf16>, vector<32x32xbf16>, vector<8x32xf32> -> vector<8x32xf32>
    %c34 = arith.constant 34 : index
    %c0_148 = arith.constant 0 : index
    %476 = vector.load %arg5[%c34, %c0_148] : memref<72x128xf32, #tpu.memory_space<vmem>>, vector<1x32xf32>
    %477 = vector.broadcast %476 : vector<1x32xf32> to vector<8x32xf32>
    %478 = arith.addf %475, %477 : vector<8x32xf32>
    %c608 = arith.constant 608 : index
    %c0_149 = arith.constant 0 : index
    %479 = vector.load %arg4[%c608, %c0_149] : memref<1280x128xf32, #tpu.memory_space<vmem>>, vector<32x32xf32>
    %480 = arith.truncf %471 : vector<8x32xf32> to vector<8x32xbf16>
    %481 = arith.truncf %479 : vector<32x32xf32> to vector<32x32xbf16>
    %cst_150 = arith.constant dense<0.000000e+00> : vector<8x32xf32>
    %482 = tpu.matmul %480, %481, %cst_150 {dimension_numbers = #tpu.dot_dimension_numbers<[1], [0], [0], [1], [0, 0, 1, 1], [], []>} : vector<8x32xbf16>, vector<32x32xbf16>, vector<8x32xf32> -> vector<8x32xf32>
    %c35 = arith.constant 35 : index
    %c0_151 = arith.constant 0 : index
    %483 = vector.load %arg5[%c35, %c0_151] : memref<72x128xf32, #tpu.memory_space<vmem>>, vector<1x32xf32>
    %484 = vector.broadcast %483 : vector<1x32xf32> to vector<8x32xf32>
    %485 = arith.addf %482, %484 : vector<8x32xf32>
    %c640 = arith.constant 640 : index
    %c0_152 = arith.constant 0 : index
    %486 = vector.load %arg4[%c640, %c0_152] : memref<1280x128xf32, #tpu.memory_space<vmem>>, vector<32x32xf32>
    %487 = arith.truncf %471 : vector<8x32xf32> to vector<8x32xbf16>
    %488 = arith.truncf %486 : vector<32x32xf32> to vector<32x32xbf16>
    %cst_153 = arith.constant dense<0.000000e+00> : vector<8x32xf32>
    %489 = tpu.matmul %487, %488, %cst_153 {dimension_numbers = #tpu.dot_dimension_numbers<[1], [0], [0], [1], [0, 0, 1, 1], [], []>} : vector<8x32xbf16>, vector<32x32xbf16>, vector<8x32xf32> -> vector<8x32xf32>
    %c36 = arith.constant 36 : index
    %c0_154 = arith.constant 0 : index
    %490 = vector.load %arg5[%c36, %c0_154] : memref<72x128xf32, #tpu.memory_space<vmem>>, vector<1x32xf32>
    %491 = vector.broadcast %490 : vector<1x32xf32> to vector<8x32xf32>
    %492 = arith.addf %489, %491 : vector<8x32xf32>
    %c672 = arith.constant 672 : index
    %c0_155 = arith.constant 0 : index
    %493 = vector.load %arg4[%c672, %c0_155] : memref<1280x128xf32, #tpu.memory_space<vmem>>, vector<32x32xf32>
    %c37 = arith.constant 37 : index
    %c0_156 = arith.constant 0 : index
    %494 = vector.load %arg5[%c37, %c0_156] : memref<72x128xf32, #tpu.memory_space<vmem>>, vector<1x32xf32>
    %cst_157 = arith.constant 0.000000e+00 : f32
    %495 = vector.broadcast %cst_157 : f32 to vector<8x32xf32>
    %496 = vector.broadcast %494 : vector<1x32xf32> to vector<8x32xf32>
    %497 = arith.addf %495, %496 : vector<8x32xf32>
    %498 = vector.broadcast %7 : vector<1x32xf32> to vector<8x32xf32>
    %499 = arith.mulf %478, %498 : vector<8x32xf32>
    %500 = arith.truncf %499 : vector<8x32xf32> to vector<8x32xbf16>
    %501 = arith.truncf %485 : vector<8x32xf32> to vector<8x32xbf16>
    %cst_158 = arith.constant dense<0.000000e+00> : vector<8x8xf32>
    %502 = tpu.matmul %500, %501, %cst_158 {dimension_numbers = #tpu.dot_dimension_numbers<[1], [1], [0], [0], [0, 0, 1, 0], [], []>} : vector<8x32xbf16>, vector<8x32xbf16>, vector<8x8xf32> -> vector<8x8xf32>
    %cst_159 = arith.constant 0.353553385 : f32
    %503 = vector.broadcast %cst_159 : f32 to vector<8x8xf32>
    %504 = arith.mulf %502, %503 : vector<8x8xf32>
    %cst_160 = arith.constant dense<0xFF800000> : vector<8xf32>
    %505 = vector.multi_reduction <maximumf>, %504, %cst_160 [1] : vector<8x8xf32> to vector<8xf32>
    %506 = vector.shape_cast %505 : vector<8xf32> to vector<8x1xf32>
    %507 = vector.broadcast %506 : vector<8x1xf32> to vector<8x8xf32>
    %508 = arith.subf %504, %507 : vector<8x8xf32>
    %509 = math.exp %508 : vector<8x8xf32>
    %cst_161 = arith.constant dense<0.000000e+00> : vector<8xf32>
    %510 = vector.multi_reduction <add>, %509, %cst_161 [1] : vector<8x8xf32> to vector<8xf32>
    %511 = vector.shape_cast %510 : vector<8xf32> to vector<8x1xf32>
    %512 = tpu.reciprocal %511 {approx = true} : vector<8x1xf32> -> vector<8x1xf32>
    %513 = vector.broadcast %512 : vector<8x1xf32> to vector<8x8xf32>
    %514 = arith.mulf %509, %513 : vector<8x8xf32>
    %515 = vector.broadcast %7 : vector<1x32xf32> to vector<8x32xf32>
    %516 = arith.mulf %492, %515 : vector<8x32xf32>
    %517 = arith.truncf %516 : vector<8x32xf32> to vector<8x32xbf16>
    %518 = arith.truncf %493 : vector<32x32xf32> to vector<32x32xbf16>
    %cst_162 = arith.constant dense<0.000000e+00> : vector<8x32xf32>
    %519 = tpu.matmul %517, %518, %cst_162 {dimension_numbers = #tpu.dot_dimension_numbers<[1], [0], [0], [1], [0, 0, 1, 1], [], []>} : vector<8x32xbf16>, vector<32x32xbf16>, vector<8x32xf32> -> vector<8x32xf32>
    %520 = arith.truncf %514 : vector<8x8xf32> to vector<8x8xbf16>
    %521 = arith.truncf %519 : vector<8x32xf32> to vector<8x32xbf16>
    %cst_163 = arith.constant dense<0.000000e+00> : vector<8x32xf32>
    %522 = tpu.matmul %520, %521, %cst_163 {dimension_numbers = #tpu.dot_dimension_numbers<[1], [0], [0], [1], [0, 0, 1, 1], [], []>} : vector<8x8xbf16>, vector<8x32xbf16>, vector<8x32xf32> -> vector<8x32xf32>
    %523 = arith.addf %497, %522 : vector<8x32xf32>
    %524 = vector.broadcast %14 : vector<1x32xf32> to vector<8x32xf32>
    %525 = arith.mulf %478, %524 : vector<8x32xf32>
    %526 = arith.truncf %525 : vector<8x32xf32> to vector<8x32xbf16>
    %527 = arith.truncf %485 : vector<8x32xf32> to vector<8x32xbf16>
    %cst_164 = arith.constant dense<0.000000e+00> : vector<8x8xf32>
    %528 = tpu.matmul %526, %527, %cst_164 {dimension_numbers = #tpu.dot_dimension_numbers<[1], [1], [0], [0], [0, 0, 1, 0], [], []>} : vector<8x32xbf16>, vector<8x32xbf16>, vector<8x8xf32> -> vector<8x8xf32>
    %cst_165 = arith.constant 0.353553385 : f32
    %529 = vector.broadcast %cst_165 : f32 to vector<8x8xf32>
    %530 = arith.mulf %528, %529 : vector<8x8xf32>
    %cst_166 = arith.constant dense<0xFF800000> : vector<8xf32>
    %531 = vector.multi_reduction <maximumf>, %530, %cst_166 [1] : vector<8x8xf32> to vector<8xf32>
    %532 = vector.shape_cast %531 : vector<8xf32> to vector<8x1xf32>
    %533 = vector.broadcast %532 : vector<8x1xf32> to vector<8x8xf32>
    %534 = arith.subf %530, %533 : vector<8x8xf32>
    %535 = math.exp %534 : vector<8x8xf32>
    %cst_167 = arith.constant dense<0.000000e+00> : vector<8xf32>
    %536 = vector.multi_reduction <add>, %535, %cst_167 [1] : vector<8x8xf32> to vector<8xf32>
    %537 = vector.shape_cast %536 : vector<8xf32> to vector<8x1xf32>
    %538 = tpu.reciprocal %537 {approx = true} : vector<8x1xf32> -> vector<8x1xf32>
    %539 = vector.broadcast %538 : vector<8x1xf32> to vector<8x8xf32>
    %540 = arith.mulf %535, %539 : vector<8x8xf32>
    %541 = vector.broadcast %14 : vector<1x32xf32> to vector<8x32xf32>
    %542 = arith.mulf %492, %541 : vector<8x32xf32>
    %543 = arith.truncf %542 : vector<8x32xf32> to vector<8x32xbf16>
    %544 = arith.truncf %493 : vector<32x32xf32> to vector<32x32xbf16>
    %cst_168 = arith.constant dense<0.000000e+00> : vector<8x32xf32>
    %545 = tpu.matmul %543, %544, %cst_168 {dimension_numbers = #tpu.dot_dimension_numbers<[1], [0], [0], [1], [0, 0, 1, 1], [], []>} : vector<8x32xbf16>, vector<32x32xbf16>, vector<8x32xf32> -> vector<8x32xf32>
    %546 = arith.truncf %540 : vector<8x8xf32> to vector<8x8xbf16>
    %547 = arith.truncf %545 : vector<8x32xf32> to vector<8x32xbf16>
    %cst_169 = arith.constant dense<0.000000e+00> : vector<8x32xf32>
    %548 = tpu.matmul %546, %547, %cst_169 {dimension_numbers = #tpu.dot_dimension_numbers<[1], [0], [0], [1], [0, 0, 1, 1], [], []>} : vector<8x8xbf16>, vector<8x32xbf16>, vector<8x32xf32> -> vector<8x32xf32>
    %549 = arith.addf %523, %548 : vector<8x32xf32>
    %550 = vector.broadcast %21 : vector<1x32xf32> to vector<8x32xf32>
    %551 = arith.mulf %478, %550 : vector<8x32xf32>
    %552 = arith.truncf %551 : vector<8x32xf32> to vector<8x32xbf16>
    %553 = arith.truncf %485 : vector<8x32xf32> to vector<8x32xbf16>
    %cst_170 = arith.constant dense<0.000000e+00> : vector<8x8xf32>
    %554 = tpu.matmul %552, %553, %cst_170 {dimension_numbers = #tpu.dot_dimension_numbers<[1], [1], [0], [0], [0, 0, 1, 0], [], []>} : vector<8x32xbf16>, vector<8x32xbf16>, vector<8x8xf32> -> vector<8x8xf32>
    %cst_171 = arith.constant 0.353553385 : f32
    %555 = vector.broadcast %cst_171 : f32 to vector<8x8xf32>
    %556 = arith.mulf %554, %555 : vector<8x8xf32>
    %cst_172 = arith.constant dense<0xFF800000> : vector<8xf32>
    %557 = vector.multi_reduction <maximumf>, %556, %cst_172 [1] : vector<8x8xf32> to vector<8xf32>
    %558 = vector.shape_cast %557 : vector<8xf32> to vector<8x1xf32>
    %559 = vector.broadcast %558 : vector<8x1xf32> to vector<8x8xf32>
    %560 = arith.subf %556, %559 : vector<8x8xf32>
    %561 = math.exp %560 : vector<8x8xf32>
    %cst_173 = arith.constant dense<0.000000e+00> : vector<8xf32>
    %562 = vector.multi_reduction <add>, %561, %cst_173 [1] : vector<8x8xf32> to vector<8xf32>
    %563 = vector.shape_cast %562 : vector<8xf32> to vector<8x1xf32>
    %564 = tpu.reciprocal %563 {approx = true} : vector<8x1xf32> -> vector<8x1xf32>
    %565 = vector.broadcast %564 : vector<8x1xf32> to vector<8x8xf32>
    %566 = arith.mulf %561, %565 : vector<8x8xf32>
    %567 = vector.broadcast %21 : vector<1x32xf32> to vector<8x32xf32>
    %568 = arith.mulf %492, %567 : vector<8x32xf32>
    %569 = arith.truncf %568 : vector<8x32xf32> to vector<8x32xbf16>
    %570 = arith.truncf %493 : vector<32x32xf32> to vector<32x32xbf16>
    %cst_174 = arith.constant dense<0.000000e+00> : vector<8x32xf32>
    %571 = tpu.matmul %569, %570, %cst_174 {dimension_numbers = #tpu.dot_dimension_numbers<[1], [0], [0], [1], [0, 0, 1, 1], [], []>} : vector<8x32xbf16>, vector<32x32xbf16>, vector<8x32xf32> -> vector<8x32xf32>
    %572 = arith.truncf %566 : vector<8x8xf32> to vector<8x8xbf16>
    %573 = arith.truncf %571 : vector<8x32xf32> to vector<8x32xbf16>
    %cst_175 = arith.constant dense<0.000000e+00> : vector<8x32xf32>
    %574 = tpu.matmul %572, %573, %cst_175 {dimension_numbers = #tpu.dot_dimension_numbers<[1], [0], [0], [1], [0, 0, 1, 1], [], []>} : vector<8x8xbf16>, vector<8x32xbf16>, vector<8x32xf32> -> vector<8x32xf32>
    %575 = arith.addf %549, %574 : vector<8x32xf32>
    %576 = vector.broadcast %28 : vector<1x32xf32> to vector<8x32xf32>
    %577 = arith.mulf %478, %576 : vector<8x32xf32>
    %578 = arith.truncf %577 : vector<8x32xf32> to vector<8x32xbf16>
    %579 = arith.truncf %485 : vector<8x32xf32> to vector<8x32xbf16>
    %cst_176 = arith.constant dense<0.000000e+00> : vector<8x8xf32>
    %580 = tpu.matmul %578, %579, %cst_176 {dimension_numbers = #tpu.dot_dimension_numbers<[1], [1], [0], [0], [0, 0, 1, 0], [], []>} : vector<8x32xbf16>, vector<8x32xbf16>, vector<8x8xf32> -> vector<8x8xf32>
    %cst_177 = arith.constant 0.353553385 : f32
    %581 = vector.broadcast %cst_177 : f32 to vector<8x8xf32>
    %582 = arith.mulf %580, %581 : vector<8x8xf32>
    %cst_178 = arith.constant dense<0xFF800000> : vector<8xf32>
    %583 = vector.multi_reduction <maximumf>, %582, %cst_178 [1] : vector<8x8xf32> to vector<8xf32>
    %584 = vector.shape_cast %583 : vector<8xf32> to vector<8x1xf32>
    %585 = vector.broadcast %584 : vector<8x1xf32> to vector<8x8xf32>
    %586 = arith.subf %582, %585 : vector<8x8xf32>
    %587 = math.exp %586 : vector<8x8xf32>
    %cst_179 = arith.constant dense<0.000000e+00> : vector<8xf32>
    %588 = vector.multi_reduction <add>, %587, %cst_179 [1] : vector<8x8xf32> to vector<8xf32>
    %589 = vector.shape_cast %588 : vector<8xf32> to vector<8x1xf32>
    %590 = tpu.reciprocal %589 {approx = true} : vector<8x1xf32> -> vector<8x1xf32>
    %591 = vector.broadcast %590 : vector<8x1xf32> to vector<8x8xf32>
    %592 = arith.mulf %587, %591 : vector<8x8xf32>
    %593 = vector.broadcast %28 : vector<1x32xf32> to vector<8x32xf32>
    %594 = arith.mulf %492, %593 : vector<8x32xf32>
    %595 = arith.truncf %594 : vector<8x32xf32> to vector<8x32xbf16>
    %596 = arith.truncf %493 : vector<32x32xf32> to vector<32x32xbf16>
    %cst_180 = arith.constant dense<0.000000e+00> : vector<8x32xf32>
    %597 = tpu.matmul %595, %596, %cst_180 {dimension_numbers = #tpu.dot_dimension_numbers<[1], [0], [0], [1], [0, 0, 1, 1], [], []>} : vector<8x32xbf16>, vector<32x32xbf16>, vector<8x32xf32> -> vector<8x32xf32>
    %598 = arith.truncf %592 : vector<8x8xf32> to vector<8x8xbf16>
    %599 = arith.truncf %597 : vector<8x32xf32> to vector<8x32xbf16>
    %cst_181 = arith.constant dense<0.000000e+00> : vector<8x32xf32>
    %600 = tpu.matmul %598, %599, %cst_181 {dimension_numbers = #tpu.dot_dimension_numbers<[1], [0], [0], [1], [0, 0, 1, 1], [], []>} : vector<8x8xbf16>, vector<8x32xbf16>, vector<8x32xf32> -> vector<8x32xf32>
    %601 = arith.addf %575, %600 : vector<8x32xf32>
    %602 = arith.addf %471, %601 : vector<8x32xf32>
    %c42 = arith.constant 42 : index
    %c0_182 = arith.constant 0 : index
    %603 = vector.load %arg5[%c42, %c0_182] : memref<72x128xf32, #tpu.memory_space<vmem>>, vector<1x32xf32>
    %c43 = arith.constant 43 : index
    %c0_183 = arith.constant 0 : index
    %604 = vector.load %arg5[%c43, %c0_183] : memref<72x128xf32, #tpu.memory_space<vmem>>, vector<1x32xf32>
    %cst_184 = arith.constant dense<0.000000e+00> : vector<8xf32>
    %605 = vector.multi_reduction <add>, %602, %cst_184 [1] : vector<8x32xf32> to vector<8xf32>
    %606 = vector.shape_cast %605 : vector<8xf32> to vector<8x1xf32>
    %cst_185 = arith.constant 3.200000e+01 : f32
    %607 = vector.broadcast %cst_185 : f32 to vector<8x1xf32>
    %608 = arith.divf %606, %607 : vector<8x1xf32>
    %609 = vector.broadcast %608 : vector<8x1xf32> to vector<8x32xf32>
    %610 = arith.subf %602, %609 : vector<8x32xf32>
    %611 = arith.mulf %610, %610 : vector<8x32xf32>
    %cst_186 = arith.constant dense<0.000000e+00> : vector<8xf32>
    %612 = vector.multi_reduction <add>, %611, %cst_186 [1] : vector<8x32xf32> to vector<8xf32>
    %613 = vector.shape_cast %612 : vector<8xf32> to vector<8x1xf32>
    %cst_187 = arith.constant 3.200000e+01 : f32
    %614 = vector.broadcast %cst_187 : f32 to vector<8x1xf32>
    %615 = arith.divf %613, %614 : vector<8x1xf32>
    %616 = vector.broadcast %608 : vector<8x1xf32> to vector<8x32xf32>
    %617 = arith.subf %602, %616 : vector<8x32xf32>
    %cst_188 = arith.constant 9.99999974E-6 : f32
    %618 = vector.broadcast %cst_188 : f32 to vector<8x1xf32>
    %619 = arith.addf %615, %618 : vector<8x1xf32>
    %620 = math.rsqrt %619 : vector<8x1xf32>
    %621 = vector.broadcast %620 : vector<8x1xf32> to vector<8x32xf32>
    %622 = arith.mulf %617, %621 : vector<8x32xf32>
    %623 = vector.broadcast %603 : vector<1x32xf32> to vector<8x32xf32>
    %624 = arith.mulf %622, %623 : vector<8x32xf32>
    %625 = vector.broadcast %604 : vector<1x32xf32> to vector<8x32xf32>
    %626 = arith.addf %624, %625 : vector<8x32xf32>
    %c704 = arith.constant 704 : index
    %c0_189 = arith.constant 0 : index
    %627 = vector.load %arg4[%c704, %c0_189] : memref<1280x128xf32, #tpu.memory_space<vmem>>, vector<32x32xf32>
    %628 = arith.truncf %626 : vector<8x32xf32> to vector<8x32xbf16>
    %629 = arith.truncf %627 : vector<32x32xf32> to vector<32x32xbf16>
    %cst_190 = arith.constant dense<0.000000e+00> : vector<8x32xf32>
    %630 = tpu.matmul %628, %629, %cst_190 {dimension_numbers = #tpu.dot_dimension_numbers<[1], [0], [0], [1], [0, 0, 1, 1], [], []>} : vector<8x32xbf16>, vector<32x32xbf16>, vector<8x32xf32> -> vector<8x32xf32>
    %c38 = arith.constant 38 : index
    %c0_191 = arith.constant 0 : index
    %631 = vector.load %arg5[%c38, %c0_191] : memref<72x128xf32, #tpu.memory_space<vmem>>, vector<1x32xf32>
    %632 = vector.broadcast %631 : vector<1x32xf32> to vector<8x32xf32>
    %633 = arith.addf %630, %632 : vector<8x32xf32>
    %c736 = arith.constant 736 : index
    %c0_192 = arith.constant 0 : index
    %634 = vector.load %arg4[%c736, %c0_192] : memref<1280x128xf32, #tpu.memory_space<vmem>>, vector<32x32xf32>
    %635 = arith.truncf %439 : vector<16x32xf32> to vector<16x32xbf16>
    %636 = arith.truncf %634 : vector<32x32xf32> to vector<32x32xbf16>
    %cst_193 = arith.constant dense<0.000000e+00> : vector<16x32xf32>
    %637 = tpu.matmul %635, %636, %cst_193 {dimension_numbers = #tpu.dot_dimension_numbers<[1], [0], [0], [1], [0, 0, 1, 1], [], []>} : vector<16x32xbf16>, vector<32x32xbf16>, vector<16x32xf32> -> vector<16x32xf32>
    %c39 = arith.constant 39 : index
    %c0_194 = arith.constant 0 : index
    %638 = vector.load %arg5[%c39, %c0_194] : memref<72x128xf32, #tpu.memory_space<vmem>>, vector<1x32xf32>
    %639 = vector.broadcast %638 : vector<1x32xf32> to vector<16x32xf32>
    %640 = arith.addf %637, %639 : vector<16x32xf32>
    %c768 = arith.constant 768 : index
    %c0_195 = arith.constant 0 : index
    %641 = vector.load %arg4[%c768, %c0_195] : memref<1280x128xf32, #tpu.memory_space<vmem>>, vector<32x32xf32>
    %642 = arith.truncf %439 : vector<16x32xf32> to vector<16x32xbf16>
    %643 = arith.truncf %641 : vector<32x32xf32> to vector<32x32xbf16>
    %cst_196 = arith.constant dense<0.000000e+00> : vector<16x32xf32>
    %644 = tpu.matmul %642, %643, %cst_196 {dimension_numbers = #tpu.dot_dimension_numbers<[1], [0], [0], [1], [0, 0, 1, 1], [], []>} : vector<16x32xbf16>, vector<32x32xbf16>, vector<16x32xf32> -> vector<16x32xf32>
    %c40 = arith.constant 40 : index
    %c0_197 = arith.constant 0 : index
    %645 = vector.load %arg5[%c40, %c0_197] : memref<72x128xf32, #tpu.memory_space<vmem>>, vector<1x32xf32>
    %646 = vector.broadcast %645 : vector<1x32xf32> to vector<16x32xf32>
    %647 = arith.addf %644, %646 : vector<16x32xf32>
    %c800 = arith.constant 800 : index
    %c0_198 = arith.constant 0 : index
    %648 = vector.load %arg4[%c800, %c0_198] : memref<1280x128xf32, #tpu.memory_space<vmem>>, vector<32x32xf32>
    %c41 = arith.constant 41 : index
    %c0_199 = arith.constant 0 : index
    %649 = vector.load %arg5[%c41, %c0_199] : memref<72x128xf32, #tpu.memory_space<vmem>>, vector<1x32xf32>
    %cst_200 = arith.constant 0.000000e+00 : f32
    %650 = vector.broadcast %cst_200 : f32 to vector<8x32xf32>
    %651 = vector.broadcast %649 : vector<1x32xf32> to vector<8x32xf32>
    %652 = arith.addf %650, %651 : vector<8x32xf32>
    %653 = vector.broadcast %7 : vector<1x32xf32> to vector<8x32xf32>
    %654 = arith.mulf %633, %653 : vector<8x32xf32>
    %655 = arith.truncf %654 : vector<8x32xf32> to vector<8x32xbf16>
    %656 = arith.truncf %640 : vector<16x32xf32> to vector<16x32xbf16>
    %cst_201 = arith.constant dense<0.000000e+00> : vector<8x16xf32>
    %657 = tpu.matmul %655, %656, %cst_201 {dimension_numbers = #tpu.dot_dimension_numbers<[1], [1], [0], [0], [0, 0, 1, 0], [], []>} : vector<8x32xbf16>, vector<16x32xbf16>, vector<8x16xf32> -> vector<8x16xf32>
    %cst_202 = arith.constant 0.353553385 : f32
    %658 = vector.broadcast %cst_202 : f32 to vector<8x16xf32>
    %659 = arith.mulf %657, %658 : vector<8x16xf32>
    %cst_203 = arith.constant dense<0xFF800000> : vector<8xf32>
    %660 = vector.multi_reduction <maximumf>, %659, %cst_203 [1] : vector<8x16xf32> to vector<8xf32>
    %661 = vector.shape_cast %660 : vector<8xf32> to vector<8x1xf32>
    %662 = vector.broadcast %661 : vector<8x1xf32> to vector<8x16xf32>
    %663 = arith.subf %659, %662 : vector<8x16xf32>
    %664 = math.exp %663 : vector<8x16xf32>
    %cst_204 = arith.constant dense<0.000000e+00> : vector<8xf32>
    %665 = vector.multi_reduction <add>, %664, %cst_204 [1] : vector<8x16xf32> to vector<8xf32>
    %666 = vector.shape_cast %665 : vector<8xf32> to vector<8x1xf32>
    %667 = tpu.reciprocal %666 {approx = true} : vector<8x1xf32> -> vector<8x1xf32>
    %668 = vector.broadcast %667 : vector<8x1xf32> to vector<8x16xf32>
    %669 = arith.mulf %664, %668 : vector<8x16xf32>
    %670 = vector.broadcast %7 : vector<1x32xf32> to vector<16x32xf32>
    %671 = arith.mulf %647, %670 : vector<16x32xf32>
    %672 = arith.truncf %671 : vector<16x32xf32> to vector<16x32xbf16>
    %673 = arith.truncf %648 : vector<32x32xf32> to vector<32x32xbf16>
    %cst_205 = arith.constant dense<0.000000e+00> : vector<16x32xf32>
    %674 = tpu.matmul %672, %673, %cst_205 {dimension_numbers = #tpu.dot_dimension_numbers<[1], [0], [0], [1], [0, 0, 1, 1], [], []>} : vector<16x32xbf16>, vector<32x32xbf16>, vector<16x32xf32> -> vector<16x32xf32>
    %675 = arith.truncf %669 : vector<8x16xf32> to vector<8x16xbf16>
    %676 = arith.truncf %674 : vector<16x32xf32> to vector<16x32xbf16>
    %cst_206 = arith.constant dense<0.000000e+00> : vector<8x32xf32>
    %677 = tpu.matmul %675, %676, %cst_206 {dimension_numbers = #tpu.dot_dimension_numbers<[1], [0], [0], [1], [0, 0, 1, 1], [], []>} : vector<8x16xbf16>, vector<16x32xbf16>, vector<8x32xf32> -> vector<8x32xf32>
    %678 = arith.addf %652, %677 : vector<8x32xf32>
    %679 = vector.broadcast %14 : vector<1x32xf32> to vector<8x32xf32>
    %680 = arith.mulf %633, %679 : vector<8x32xf32>
    %681 = arith.truncf %680 : vector<8x32xf32> to vector<8x32xbf16>
    %682 = arith.truncf %640 : vector<16x32xf32> to vector<16x32xbf16>
    %cst_207 = arith.constant dense<0.000000e+00> : vector<8x16xf32>
    %683 = tpu.matmul %681, %682, %cst_207 {dimension_numbers = #tpu.dot_dimension_numbers<[1], [1], [0], [0], [0, 0, 1, 0], [], []>} : vector<8x32xbf16>, vector<16x32xbf16>, vector<8x16xf32> -> vector<8x16xf32>
    %cst_208 = arith.constant 0.353553385 : f32
    %684 = vector.broadcast %cst_208 : f32 to vector<8x16xf32>
    %685 = arith.mulf %683, %684 : vector<8x16xf32>
    %cst_209 = arith.constant dense<0xFF800000> : vector<8xf32>
    %686 = vector.multi_reduction <maximumf>, %685, %cst_209 [1] : vector<8x16xf32> to vector<8xf32>
    %687 = vector.shape_cast %686 : vector<8xf32> to vector<8x1xf32>
    %688 = vector.broadcast %687 : vector<8x1xf32> to vector<8x16xf32>
    %689 = arith.subf %685, %688 : vector<8x16xf32>
    %690 = math.exp %689 : vector<8x16xf32>
    %cst_210 = arith.constant dense<0.000000e+00> : vector<8xf32>
    %691 = vector.multi_reduction <add>, %690, %cst_210 [1] : vector<8x16xf32> to vector<8xf32>
    %692 = vector.shape_cast %691 : vector<8xf32> to vector<8x1xf32>
    %693 = tpu.reciprocal %692 {approx = true} : vector<8x1xf32> -> vector<8x1xf32>
    %694 = vector.broadcast %693 : vector<8x1xf32> to vector<8x16xf32>
    %695 = arith.mulf %690, %694 : vector<8x16xf32>
    %696 = vector.broadcast %14 : vector<1x32xf32> to vector<16x32xf32>
    %697 = arith.mulf %647, %696 : vector<16x32xf32>
    %698 = arith.truncf %697 : vector<16x32xf32> to vector<16x32xbf16>
    %699 = arith.truncf %648 : vector<32x32xf32> to vector<32x32xbf16>
    %cst_211 = arith.constant dense<0.000000e+00> : vector<16x32xf32>
    %700 = tpu.matmul %698, %699, %cst_211 {dimension_numbers = #tpu.dot_dimension_numbers<[1], [0], [0], [1], [0, 0, 1, 1], [], []>} : vector<16x32xbf16>, vector<32x32xbf16>, vector<16x32xf32> -> vector<16x32xf32>
    %701 = arith.truncf %695 : vector<8x16xf32> to vector<8x16xbf16>
    %702 = arith.truncf %700 : vector<16x32xf32> to vector<16x32xbf16>
    %cst_212 = arith.constant dense<0.000000e+00> : vector<8x32xf32>
    %703 = tpu.matmul %701, %702, %cst_212 {dimension_numbers = #tpu.dot_dimension_numbers<[1], [0], [0], [1], [0, 0, 1, 1], [], []>} : vector<8x16xbf16>, vector<16x32xbf16>, vector<8x32xf32> -> vector<8x32xf32>
    %704 = arith.addf %678, %703 : vector<8x32xf32>
    %705 = vector.broadcast %21 : vector<1x32xf32> to vector<8x32xf32>
    %706 = arith.mulf %633, %705 : vector<8x32xf32>
    %707 = arith.truncf %706 : vector<8x32xf32> to vector<8x32xbf16>
    %708 = arith.truncf %640 : vector<16x32xf32> to vector<16x32xbf16>
    %cst_213 = arith.constant dense<0.000000e+00> : vector<8x16xf32>
    %709 = tpu.matmul %707, %708, %cst_213 {dimension_numbers = #tpu.dot_dimension_numbers<[1], [1], [0], [0], [0, 0, 1, 0], [], []>} : vector<8x32xbf16>, vector<16x32xbf16>, vector<8x16xf32> -> vector<8x16xf32>
    %cst_214 = arith.constant 0.353553385 : f32
    %710 = vector.broadcast %cst_214 : f32 to vector<8x16xf32>
    %711 = arith.mulf %709, %710 : vector<8x16xf32>
    %cst_215 = arith.constant dense<0xFF800000> : vector<8xf32>
    %712 = vector.multi_reduction <maximumf>, %711, %cst_215 [1] : vector<8x16xf32> to vector<8xf32>
    %713 = vector.shape_cast %712 : vector<8xf32> to vector<8x1xf32>
    %714 = vector.broadcast %713 : vector<8x1xf32> to vector<8x16xf32>
    %715 = arith.subf %711, %714 : vector<8x16xf32>
    %716 = math.exp %715 : vector<8x16xf32>
    %cst_216 = arith.constant dense<0.000000e+00> : vector<8xf32>
    %717 = vector.multi_reduction <add>, %716, %cst_216 [1] : vector<8x16xf32> to vector<8xf32>
    %718 = vector.shape_cast %717 : vector<8xf32> to vector<8x1xf32>
    %719 = tpu.reciprocal %718 {approx = true} : vector<8x1xf32> -> vector<8x1xf32>
    %720 = vector.broadcast %719 : vector<8x1xf32> to vector<8x16xf32>
    %721 = arith.mulf %716, %720 : vector<8x16xf32>
    %722 = vector.broadcast %21 : vector<1x32xf32> to vector<16x32xf32>
    %723 = arith.mulf %647, %722 : vector<16x32xf32>
    %724 = arith.truncf %723 : vector<16x32xf32> to vector<16x32xbf16>
    %725 = arith.truncf %648 : vector<32x32xf32> to vector<32x32xbf16>
    %cst_217 = arith.constant dense<0.000000e+00> : vector<16x32xf32>
    %726 = tpu.matmul %724, %725, %cst_217 {dimension_numbers = #tpu.dot_dimension_numbers<[1], [0], [0], [1], [0, 0, 1, 1], [], []>} : vector<16x32xbf16>, vector<32x32xbf16>, vector<16x32xf32> -> vector<16x32xf32>
    %727 = arith.truncf %721 : vector<8x16xf32> to vector<8x16xbf16>
    %728 = arith.truncf %726 : vector<16x32xf32> to vector<16x32xbf16>
    %cst_218 = arith.constant dense<0.000000e+00> : vector<8x32xf32>
    %729 = tpu.matmul %727, %728, %cst_218 {dimension_numbers = #tpu.dot_dimension_numbers<[1], [0], [0], [1], [0, 0, 1, 1], [], []>} : vector<8x16xbf16>, vector<16x32xbf16>, vector<8x32xf32> -> vector<8x32xf32>
    %730 = arith.addf %704, %729 : vector<8x32xf32>
    %731 = vector.broadcast %28 : vector<1x32xf32> to vector<8x32xf32>
    %732 = arith.mulf %633, %731 : vector<8x32xf32>
    %733 = arith.truncf %732 : vector<8x32xf32> to vector<8x32xbf16>
    %734 = arith.truncf %640 : vector<16x32xf32> to vector<16x32xbf16>
    %cst_219 = arith.constant dense<0.000000e+00> : vector<8x16xf32>
    %735 = tpu.matmul %733, %734, %cst_219 {dimension_numbers = #tpu.dot_dimension_numbers<[1], [1], [0], [0], [0, 0, 1, 0], [], []>} : vector<8x32xbf16>, vector<16x32xbf16>, vector<8x16xf32> -> vector<8x16xf32>
    %cst_220 = arith.constant 0.353553385 : f32
    %736 = vector.broadcast %cst_220 : f32 to vector<8x16xf32>
    %737 = arith.mulf %735, %736 : vector<8x16xf32>
    %cst_221 = arith.constant dense<0xFF800000> : vector<8xf32>
    %738 = vector.multi_reduction <maximumf>, %737, %cst_221 [1] : vector<8x16xf32> to vector<8xf32>
    %739 = vector.shape_cast %738 : vector<8xf32> to vector<8x1xf32>
    %740 = vector.broadcast %739 : vector<8x1xf32> to vector<8x16xf32>
    %741 = arith.subf %737, %740 : vector<8x16xf32>
    %742 = math.exp %741 : vector<8x16xf32>
    %cst_222 = arith.constant dense<0.000000e+00> : vector<8xf32>
    %743 = vector.multi_reduction <add>, %742, %cst_222 [1] : vector<8x16xf32> to vector<8xf32>
    %744 = vector.shape_cast %743 : vector<8xf32> to vector<8x1xf32>
    %745 = tpu.reciprocal %744 {approx = true} : vector<8x1xf32> -> vector<8x1xf32>
    %746 = vector.broadcast %745 : vector<8x1xf32> to vector<8x16xf32>
    %747 = arith.mulf %742, %746 : vector<8x16xf32>
    %748 = vector.broadcast %28 : vector<1x32xf32> to vector<16x32xf32>
    %749 = arith.mulf %647, %748 : vector<16x32xf32>
    %750 = arith.truncf %749 : vector<16x32xf32> to vector<16x32xbf16>
    %751 = arith.truncf %648 : vector<32x32xf32> to vector<32x32xbf16>
    %cst_223 = arith.constant dense<0.000000e+00> : vector<16x32xf32>
    %752 = tpu.matmul %750, %751, %cst_223 {dimension_numbers = #tpu.dot_dimension_numbers<[1], [0], [0], [1], [0, 0, 1, 1], [], []>} : vector<16x32xbf16>, vector<32x32xbf16>, vector<16x32xf32> -> vector<16x32xf32>
    %753 = arith.truncf %747 : vector<8x16xf32> to vector<8x16xbf16>
    %754 = arith.truncf %752 : vector<16x32xf32> to vector<16x32xbf16>
    %cst_224 = arith.constant dense<0.000000e+00> : vector<8x32xf32>
    %755 = tpu.matmul %753, %754, %cst_224 {dimension_numbers = #tpu.dot_dimension_numbers<[1], [0], [0], [1], [0, 0, 1, 1], [], []>} : vector<8x16xbf16>, vector<16x32xbf16>, vector<8x32xf32> -> vector<8x32xf32>
    %756 = arith.addf %730, %755 : vector<8x32xf32>
    %757 = arith.addf %626, %756 : vector<8x32xf32>
    %c44 = arith.constant 44 : index
    %c0_225 = arith.constant 0 : index
    %758 = vector.load %arg5[%c44, %c0_225] : memref<72x128xf32, #tpu.memory_space<vmem>>, vector<1x32xf32>
    %c45 = arith.constant 45 : index
    %c0_226 = arith.constant 0 : index
    %759 = vector.load %arg5[%c45, %c0_226] : memref<72x128xf32, #tpu.memory_space<vmem>>, vector<1x32xf32>
    %cst_227 = arith.constant dense<0.000000e+00> : vector<8xf32>
    %760 = vector.multi_reduction <add>, %757, %cst_227 [1] : vector<8x32xf32> to vector<8xf32>
    %761 = vector.shape_cast %760 : vector<8xf32> to vector<8x1xf32>
    %cst_228 = arith.constant 3.200000e+01 : f32
    %762 = vector.broadcast %cst_228 : f32 to vector<8x1xf32>
    %763 = arith.divf %761, %762 : vector<8x1xf32>
    %764 = vector.broadcast %763 : vector<8x1xf32> to vector<8x32xf32>
    %765 = arith.subf %757, %764 : vector<8x32xf32>
    %766 = arith.mulf %765, %765 : vector<8x32xf32>
    %cst_229 = arith.constant dense<0.000000e+00> : vector<8xf32>
    %767 = vector.multi_reduction <add>, %766, %cst_229 [1] : vector<8x32xf32> to vector<8xf32>
    %768 = vector.shape_cast %767 : vector<8xf32> to vector<8x1xf32>
    %cst_230 = arith.constant 3.200000e+01 : f32
    %769 = vector.broadcast %cst_230 : f32 to vector<8x1xf32>
    %770 = arith.divf %768, %769 : vector<8x1xf32>
    %771 = vector.broadcast %763 : vector<8x1xf32> to vector<8x32xf32>
    %772 = arith.subf %757, %771 : vector<8x32xf32>
    %cst_231 = arith.constant 9.99999974E-6 : f32
    %773 = vector.broadcast %cst_231 : f32 to vector<8x1xf32>
    %774 = arith.addf %770, %773 : vector<8x1xf32>
    %775 = math.rsqrt %774 : vector<8x1xf32>
    %776 = vector.broadcast %775 : vector<8x1xf32> to vector<8x32xf32>
    %777 = arith.mulf %772, %776 : vector<8x32xf32>
    %778 = vector.broadcast %758 : vector<1x32xf32> to vector<8x32xf32>
    %779 = arith.mulf %777, %778 : vector<8x32xf32>
    %780 = vector.broadcast %759 : vector<1x32xf32> to vector<8x32xf32>
    %781 = arith.addf %779, %780 : vector<8x32xf32>
    %c832 = arith.constant 832 : index
    %c0_232 = arith.constant 0 : index
    %782 = vector.load %arg4[%c832, %c0_232] : memref<1280x128xf32, #tpu.memory_space<vmem>>, vector<32x64xf32>
    %783 = arith.truncf %781 : vector<8x32xf32> to vector<8x32xbf16>
    %784 = arith.truncf %782 : vector<32x64xf32> to vector<32x64xbf16>
    %cst_233 = arith.constant dense<0.000000e+00> : vector<8x64xf32>
    %785 = tpu.matmul %783, %784, %cst_233 {dimension_numbers = #tpu.dot_dimension_numbers<[1], [0], [0], [1], [0, 0, 1, 1], [], []>} : vector<8x32xbf16>, vector<32x64xbf16>, vector<8x64xf32> -> vector<8x64xf32>
    %c48 = arith.constant 48 : index
    %c0_234 = arith.constant 0 : index
    %786 = vector.load %arg5[%c48, %c0_234] : memref<72x128xf32, #tpu.memory_space<vmem>>, vector<1x64xf32>
    %787 = vector.broadcast %786 : vector<1x64xf32> to vector<8x64xf32>
    %788 = arith.addf %785, %787 : vector<8x64xf32>
    %cst_235 = arith.constant 0.000000e+00 : f32
    %789 = vector.broadcast %cst_235 : f32 to vector<8x64xf32>
    %790 = arith.maximumf %788, %789 : vector<8x64xf32>
    %c864 = arith.constant 864 : index
    %c0_236 = arith.constant 0 : index
    %791 = vector.load %arg4[%c864, %c0_236] : memref<1280x128xf32, #tpu.memory_space<vmem>>, vector<64x32xf32>
    %792 = arith.truncf %790 : vector<8x64xf32> to vector<8x64xbf16>
    %793 = arith.truncf %791 : vector<64x32xf32> to vector<64x32xbf16>
    %cst_237 = arith.constant dense<0.000000e+00> : vector<8x32xf32>
    %794 = tpu.matmul %792, %793, %cst_237 {dimension_numbers = #tpu.dot_dimension_numbers<[1], [0], [0], [1], [0, 0, 1, 1], [], []>} : vector<8x64xbf16>, vector<64x32xbf16>, vector<8x32xf32> -> vector<8x32xf32>
    %c49 = arith.constant 49 : index
    %c0_238 = arith.constant 0 : index
    %795 = vector.load %arg5[%c49, %c0_238] : memref<72x128xf32, #tpu.memory_space<vmem>>, vector<1x32xf32>
    %796 = vector.broadcast %795 : vector<1x32xf32> to vector<8x32xf32>
    %797 = arith.addf %794, %796 : vector<8x32xf32>
    %798 = arith.addf %781, %797 : vector<8x32xf32>
    %c46 = arith.constant 46 : index
    %c0_239 = arith.constant 0 : index
    %799 = vector.load %arg5[%c46, %c0_239] : memref<72x128xf32, #tpu.memory_space<vmem>>, vector<1x32xf32>
    %c47 = arith.constant 47 : index
    %c0_240 = arith.constant 0 : index
    %800 = vector.load %arg5[%c47, %c0_240] : memref<72x128xf32, #tpu.memory_space<vmem>>, vector<1x32xf32>
    %cst_241 = arith.constant dense<0.000000e+00> : vector<8xf32>
    %801 = vector.multi_reduction <add>, %798, %cst_241 [1] : vector<8x32xf32> to vector<8xf32>
    %802 = vector.shape_cast %801 : vector<8xf32> to vector<8x1xf32>
    %cst_242 = arith.constant 3.200000e+01 : f32
    %803 = vector.broadcast %cst_242 : f32 to vector<8x1xf32>
    %804 = arith.divf %802, %803 : vector<8x1xf32>
    %805 = vector.broadcast %804 : vector<8x1xf32> to vector<8x32xf32>
    %806 = arith.subf %798, %805 : vector<8x32xf32>
    %807 = arith.mulf %806, %806 : vector<8x32xf32>
    %cst_243 = arith.constant dense<0.000000e+00> : vector<8xf32>
    %808 = vector.multi_reduction <add>, %807, %cst_243 [1] : vector<8x32xf32> to vector<8xf32>
    %809 = vector.shape_cast %808 : vector<8xf32> to vector<8x1xf32>
    %cst_244 = arith.constant 3.200000e+01 : f32
    %810 = vector.broadcast %cst_244 : f32 to vector<8x1xf32>
    %811 = arith.divf %809, %810 : vector<8x1xf32>
    %812 = vector.broadcast %804 : vector<8x1xf32> to vector<8x32xf32>
    %813 = arith.subf %798, %812 : vector<8x32xf32>
    %cst_245 = arith.constant 9.99999974E-6 : f32
    %814 = vector.broadcast %cst_245 : f32 to vector<8x1xf32>
    %815 = arith.addf %811, %814 : vector<8x1xf32>
    %816 = math.rsqrt %815 : vector<8x1xf32>
    %817 = vector.broadcast %816 : vector<8x1xf32> to vector<8x32xf32>
    %818 = arith.mulf %813, %817 : vector<8x32xf32>
    %819 = vector.broadcast %799 : vector<1x32xf32> to vector<8x32xf32>
    %820 = arith.mulf %818, %819 : vector<8x32xf32>
    %821 = vector.broadcast %800 : vector<1x32xf32> to vector<8x32xf32>
    %822 = arith.addf %820, %821 : vector<8x32xf32>
    %c928 = arith.constant 928 : index
    %c0_246 = arith.constant 0 : index
    %823 = vector.load %arg4[%c928, %c0_246] : memref<1280x128xf32, #tpu.memory_space<vmem>>, vector<32x32xf32>
    %824 = arith.truncf %822 : vector<8x32xf32> to vector<8x32xbf16>
    %825 = arith.truncf %823 : vector<32x32xf32> to vector<32x32xbf16>
    %cst_247 = arith.constant dense<0.000000e+00> : vector<8x32xf32>
    %826 = tpu.matmul %824, %825, %cst_247 {dimension_numbers = #tpu.dot_dimension_numbers<[1], [0], [0], [1], [0, 0, 1, 1], [], []>} : vector<8x32xbf16>, vector<32x32xbf16>, vector<8x32xf32> -> vector<8x32xf32>
    %c50 = arith.constant 50 : index
    %c0_248 = arith.constant 0 : index
    %827 = vector.load %arg5[%c50, %c0_248] : memref<72x128xf32, #tpu.memory_space<vmem>>, vector<1x32xf32>
    %828 = vector.broadcast %827 : vector<1x32xf32> to vector<8x32xf32>
    %829 = arith.addf %826, %828 : vector<8x32xf32>
    %c960 = arith.constant 960 : index
    %c0_249 = arith.constant 0 : index
    %830 = vector.load %arg4[%c960, %c0_249] : memref<1280x128xf32, #tpu.memory_space<vmem>>, vector<32x32xf32>
    %831 = arith.truncf %822 : vector<8x32xf32> to vector<8x32xbf16>
    %832 = arith.truncf %830 : vector<32x32xf32> to vector<32x32xbf16>
    %cst_250 = arith.constant dense<0.000000e+00> : vector<8x32xf32>
    %833 = tpu.matmul %831, %832, %cst_250 {dimension_numbers = #tpu.dot_dimension_numbers<[1], [0], [0], [1], [0, 0, 1, 1], [], []>} : vector<8x32xbf16>, vector<32x32xbf16>, vector<8x32xf32> -> vector<8x32xf32>
    %c51 = arith.constant 51 : index
    %c0_251 = arith.constant 0 : index
    %834 = vector.load %arg5[%c51, %c0_251] : memref<72x128xf32, #tpu.memory_space<vmem>>, vector<1x32xf32>
    %835 = vector.broadcast %834 : vector<1x32xf32> to vector<8x32xf32>
    %836 = arith.addf %833, %835 : vector<8x32xf32>
    %c992 = arith.constant 992 : index
    %c0_252 = arith.constant 0 : index
    %837 = vector.load %arg4[%c992, %c0_252] : memref<1280x128xf32, #tpu.memory_space<vmem>>, vector<32x32xf32>
    %838 = arith.truncf %822 : vector<8x32xf32> to vector<8x32xbf16>
    %839 = arith.truncf %837 : vector<32x32xf32> to vector<32x32xbf16>
    %cst_253 = arith.constant dense<0.000000e+00> : vector<8x32xf32>
    %840 = tpu.matmul %838, %839, %cst_253 {dimension_numbers = #tpu.dot_dimension_numbers<[1], [0], [0], [1], [0, 0, 1, 1], [], []>} : vector<8x32xbf16>, vector<32x32xbf16>, vector<8x32xf32> -> vector<8x32xf32>
    %c52 = arith.constant 52 : index
    %c0_254 = arith.constant 0 : index
    %841 = vector.load %arg5[%c52, %c0_254] : memref<72x128xf32, #tpu.memory_space<vmem>>, vector<1x32xf32>
    %842 = vector.broadcast %841 : vector<1x32xf32> to vector<8x32xf32>
    %843 = arith.addf %840, %842 : vector<8x32xf32>
    %c1024 = arith.constant 1024 : index
    %c0_255 = arith.constant 0 : index
    %844 = vector.load %arg4[%c1024, %c0_255] : memref<1280x128xf32, #tpu.memory_space<vmem>>, vector<32x32xf32>
    %c53 = arith.constant 53 : index
    %c0_256 = arith.constant 0 : index
    %845 = vector.load %arg5[%c53, %c0_256] : memref<72x128xf32, #tpu.memory_space<vmem>>, vector<1x32xf32>
    %cst_257 = arith.constant 0.000000e+00 : f32
    %846 = vector.broadcast %cst_257 : f32 to vector<8x32xf32>
    %847 = vector.broadcast %845 : vector<1x32xf32> to vector<8x32xf32>
    %848 = arith.addf %846, %847 : vector<8x32xf32>
    %849 = vector.broadcast %7 : vector<1x32xf32> to vector<8x32xf32>
    %850 = arith.mulf %829, %849 : vector<8x32xf32>
    %851 = arith.truncf %850 : vector<8x32xf32> to vector<8x32xbf16>
    %852 = arith.truncf %836 : vector<8x32xf32> to vector<8x32xbf16>
    %cst_258 = arith.constant dense<0.000000e+00> : vector<8x8xf32>
    %853 = tpu.matmul %851, %852, %cst_258 {dimension_numbers = #tpu.dot_dimension_numbers<[1], [1], [0], [0], [0, 0, 1, 0], [], []>} : vector<8x32xbf16>, vector<8x32xbf16>, vector<8x8xf32> -> vector<8x8xf32>
    %cst_259 = arith.constant 0.353553385 : f32
    %854 = vector.broadcast %cst_259 : f32 to vector<8x8xf32>
    %855 = arith.mulf %853, %854 : vector<8x8xf32>
    %cst_260 = arith.constant dense<0xFF800000> : vector<8xf32>
    %856 = vector.multi_reduction <maximumf>, %855, %cst_260 [1] : vector<8x8xf32> to vector<8xf32>
    %857 = vector.shape_cast %856 : vector<8xf32> to vector<8x1xf32>
    %858 = vector.broadcast %857 : vector<8x1xf32> to vector<8x8xf32>
    %859 = arith.subf %855, %858 : vector<8x8xf32>
    %860 = math.exp %859 : vector<8x8xf32>
    %cst_261 = arith.constant dense<0.000000e+00> : vector<8xf32>
    %861 = vector.multi_reduction <add>, %860, %cst_261 [1] : vector<8x8xf32> to vector<8xf32>
    %862 = vector.shape_cast %861 : vector<8xf32> to vector<8x1xf32>
    %863 = tpu.reciprocal %862 {approx = true} : vector<8x1xf32> -> vector<8x1xf32>
    %864 = vector.broadcast %863 : vector<8x1xf32> to vector<8x8xf32>
    %865 = arith.mulf %860, %864 : vector<8x8xf32>
    %866 = vector.broadcast %7 : vector<1x32xf32> to vector<8x32xf32>
    %867 = arith.mulf %843, %866 : vector<8x32xf32>
    %868 = arith.truncf %867 : vector<8x32xf32> to vector<8x32xbf16>
    %869 = arith.truncf %844 : vector<32x32xf32> to vector<32x32xbf16>
    %cst_262 = arith.constant dense<0.000000e+00> : vector<8x32xf32>
    %870 = tpu.matmul %868, %869, %cst_262 {dimension_numbers = #tpu.dot_dimension_numbers<[1], [0], [0], [1], [0, 0, 1, 1], [], []>} : vector<8x32xbf16>, vector<32x32xbf16>, vector<8x32xf32> -> vector<8x32xf32>
    %871 = arith.truncf %865 : vector<8x8xf32> to vector<8x8xbf16>
    %872 = arith.truncf %870 : vector<8x32xf32> to vector<8x32xbf16>
    %cst_263 = arith.constant dense<0.000000e+00> : vector<8x32xf32>
    %873 = tpu.matmul %871, %872, %cst_263 {dimension_numbers = #tpu.dot_dimension_numbers<[1], [0], [0], [1], [0, 0, 1, 1], [], []>} : vector<8x8xbf16>, vector<8x32xbf16>, vector<8x32xf32> -> vector<8x32xf32>
    %874 = arith.addf %848, %873 : vector<8x32xf32>
    %875 = vector.broadcast %14 : vector<1x32xf32> to vector<8x32xf32>
    %876 = arith.mulf %829, %875 : vector<8x32xf32>
    %877 = arith.truncf %876 : vector<8x32xf32> to vector<8x32xbf16>
    %878 = arith.truncf %836 : vector<8x32xf32> to vector<8x32xbf16>
    %cst_264 = arith.constant dense<0.000000e+00> : vector<8x8xf32>
    %879 = tpu.matmul %877, %878, %cst_264 {dimension_numbers = #tpu.dot_dimension_numbers<[1], [1], [0], [0], [0, 0, 1, 0], [], []>} : vector<8x32xbf16>, vector<8x32xbf16>, vector<8x8xf32> -> vector<8x8xf32>
    %cst_265 = arith.constant 0.353553385 : f32
    %880 = vector.broadcast %cst_265 : f32 to vector<8x8xf32>
    %881 = arith.mulf %879, %880 : vector<8x8xf32>
    %cst_266 = arith.constant dense<0xFF800000> : vector<8xf32>
    %882 = vector.multi_reduction <maximumf>, %881, %cst_266 [1] : vector<8x8xf32> to vector<8xf32>
    %883 = vector.shape_cast %882 : vector<8xf32> to vector<8x1xf32>
    %884 = vector.broadcast %883 : vector<8x1xf32> to vector<8x8xf32>
    %885 = arith.subf %881, %884 : vector<8x8xf32>
    %886 = math.exp %885 : vector<8x8xf32>
    %cst_267 = arith.constant dense<0.000000e+00> : vector<8xf32>
    %887 = vector.multi_reduction <add>, %886, %cst_267 [1] : vector<8x8xf32> to vector<8xf32>
    %888 = vector.shape_cast %887 : vector<8xf32> to vector<8x1xf32>
    %889 = tpu.reciprocal %888 {approx = true} : vector<8x1xf32> -> vector<8x1xf32>
    %890 = vector.broadcast %889 : vector<8x1xf32> to vector<8x8xf32>
    %891 = arith.mulf %886, %890 : vector<8x8xf32>
    %892 = vector.broadcast %14 : vector<1x32xf32> to vector<8x32xf32>
    %893 = arith.mulf %843, %892 : vector<8x32xf32>
    %894 = arith.truncf %893 : vector<8x32xf32> to vector<8x32xbf16>
    %895 = arith.truncf %844 : vector<32x32xf32> to vector<32x32xbf16>
    %cst_268 = arith.constant dense<0.000000e+00> : vector<8x32xf32>
    %896 = tpu.matmul %894, %895, %cst_268 {dimension_numbers = #tpu.dot_dimension_numbers<[1], [0], [0], [1], [0, 0, 1, 1], [], []>} : vector<8x32xbf16>, vector<32x32xbf16>, vector<8x32xf32> -> vector<8x32xf32>
    %897 = arith.truncf %891 : vector<8x8xf32> to vector<8x8xbf16>
    %898 = arith.truncf %896 : vector<8x32xf32> to vector<8x32xbf16>
    %cst_269 = arith.constant dense<0.000000e+00> : vector<8x32xf32>
    %899 = tpu.matmul %897, %898, %cst_269 {dimension_numbers = #tpu.dot_dimension_numbers<[1], [0], [0], [1], [0, 0, 1, 1], [], []>} : vector<8x8xbf16>, vector<8x32xbf16>, vector<8x32xf32> -> vector<8x32xf32>
    %900 = arith.addf %874, %899 : vector<8x32xf32>
    %901 = vector.broadcast %21 : vector<1x32xf32> to vector<8x32xf32>
    %902 = arith.mulf %829, %901 : vector<8x32xf32>
    %903 = arith.truncf %902 : vector<8x32xf32> to vector<8x32xbf16>
    %904 = arith.truncf %836 : vector<8x32xf32> to vector<8x32xbf16>
    %cst_270 = arith.constant dense<0.000000e+00> : vector<8x8xf32>
    %905 = tpu.matmul %903, %904, %cst_270 {dimension_numbers = #tpu.dot_dimension_numbers<[1], [1], [0], [0], [0, 0, 1, 0], [], []>} : vector<8x32xbf16>, vector<8x32xbf16>, vector<8x8xf32> -> vector<8x8xf32>
    %cst_271 = arith.constant 0.353553385 : f32
    %906 = vector.broadcast %cst_271 : f32 to vector<8x8xf32>
    %907 = arith.mulf %905, %906 : vector<8x8xf32>
    %cst_272 = arith.constant dense<0xFF800000> : vector<8xf32>
    %908 = vector.multi_reduction <maximumf>, %907, %cst_272 [1] : vector<8x8xf32> to vector<8xf32>
    %909 = vector.shape_cast %908 : vector<8xf32> to vector<8x1xf32>
    %910 = vector.broadcast %909 : vector<8x1xf32> to vector<8x8xf32>
    %911 = arith.subf %907, %910 : vector<8x8xf32>
    %912 = math.exp %911 : vector<8x8xf32>
    %cst_273 = arith.constant dense<0.000000e+00> : vector<8xf32>
    %913 = vector.multi_reduction <add>, %912, %cst_273 [1] : vector<8x8xf32> to vector<8xf32>
    %914 = vector.shape_cast %913 : vector<8xf32> to vector<8x1xf32>
    %915 = tpu.reciprocal %914 {approx = true} : vector<8x1xf32> -> vector<8x1xf32>
    %916 = vector.broadcast %915 : vector<8x1xf32> to vector<8x8xf32>
    %917 = arith.mulf %912, %916 : vector<8x8xf32>
    %918 = vector.broadcast %21 : vector<1x32xf32> to vector<8x32xf32>
    %919 = arith.mulf %843, %918 : vector<8x32xf32>
    %920 = arith.truncf %919 : vector<8x32xf32> to vector<8x32xbf16>
    %921 = arith.truncf %844 : vector<32x32xf32> to vector<32x32xbf16>
    %cst_274 = arith.constant dense<0.000000e+00> : vector<8x32xf32>
    %922 = tpu.matmul %920, %921, %cst_274 {dimension_numbers = #tpu.dot_dimension_numbers<[1], [0], [0], [1], [0, 0, 1, 1], [], []>} : vector<8x32xbf16>, vector<32x32xbf16>, vector<8x32xf32> -> vector<8x32xf32>
    %923 = arith.truncf %917 : vector<8x8xf32> to vector<8x8xbf16>
    %924 = arith.truncf %922 : vector<8x32xf32> to vector<8x32xbf16>
    %cst_275 = arith.constant dense<0.000000e+00> : vector<8x32xf32>
    %925 = tpu.matmul %923, %924, %cst_275 {dimension_numbers = #tpu.dot_dimension_numbers<[1], [0], [0], [1], [0, 0, 1, 1], [], []>} : vector<8x8xbf16>, vector<8x32xbf16>, vector<8x32xf32> -> vector<8x32xf32>
    %926 = arith.addf %900, %925 : vector<8x32xf32>
    %927 = vector.broadcast %28 : vector<1x32xf32> to vector<8x32xf32>
    %928 = arith.mulf %829, %927 : vector<8x32xf32>
    %929 = arith.truncf %928 : vector<8x32xf32> to vector<8x32xbf16>
    %930 = arith.truncf %836 : vector<8x32xf32> to vector<8x32xbf16>
    %cst_276 = arith.constant dense<0.000000e+00> : vector<8x8xf32>
    %931 = tpu.matmul %929, %930, %cst_276 {dimension_numbers = #tpu.dot_dimension_numbers<[1], [1], [0], [0], [0, 0, 1, 0], [], []>} : vector<8x32xbf16>, vector<8x32xbf16>, vector<8x8xf32> -> vector<8x8xf32>
    %cst_277 = arith.constant 0.353553385 : f32
    %932 = vector.broadcast %cst_277 : f32 to vector<8x8xf32>
    %933 = arith.mulf %931, %932 : vector<8x8xf32>
    %cst_278 = arith.constant dense<0xFF800000> : vector<8xf32>
    %934 = vector.multi_reduction <maximumf>, %933, %cst_278 [1] : vector<8x8xf32> to vector<8xf32>
    %935 = vector.shape_cast %934 : vector<8xf32> to vector<8x1xf32>
    %936 = vector.broadcast %935 : vector<8x1xf32> to vector<8x8xf32>
    %937 = arith.subf %933, %936 : vector<8x8xf32>
    %938 = math.exp %937 : vector<8x8xf32>
    %cst_279 = arith.constant dense<0.000000e+00> : vector<8xf32>
    %939 = vector.multi_reduction <add>, %938, %cst_279 [1] : vector<8x8xf32> to vector<8xf32>
    %940 = vector.shape_cast %939 : vector<8xf32> to vector<8x1xf32>
    %941 = tpu.reciprocal %940 {approx = true} : vector<8x1xf32> -> vector<8x1xf32>
    %942 = vector.broadcast %941 : vector<8x1xf32> to vector<8x8xf32>
    %943 = arith.mulf %938, %942 : vector<8x8xf32>
    %944 = vector.broadcast %28 : vector<1x32xf32> to vector<8x32xf32>
    %945 = arith.mulf %843, %944 : vector<8x32xf32>
    %946 = arith.truncf %945 : vector<8x32xf32> to vector<8x32xbf16>
    %947 = arith.truncf %844 : vector<32x32xf32> to vector<32x32xbf16>
    %cst_280 = arith.constant dense<0.000000e+00> : vector<8x32xf32>
    %948 = tpu.matmul %946, %947, %cst_280 {dimension_numbers = #tpu.dot_dimension_numbers<[1], [0], [0], [1], [0, 0, 1, 1], [], []>} : vector<8x32xbf16>, vector<32x32xbf16>, vector<8x32xf32> -> vector<8x32xf32>
    %949 = arith.truncf %943 : vector<8x8xf32> to vector<8x8xbf16>
    %950 = arith.truncf %948 : vector<8x32xf32> to vector<8x32xbf16>
    %cst_281 = arith.constant dense<0.000000e+00> : vector<8x32xf32>
    %951 = tpu.matmul %949, %950, %cst_281 {dimension_numbers = #tpu.dot_dimension_numbers<[1], [0], [0], [1], [0, 0, 1, 1], [], []>} : vector<8x8xbf16>, vector<8x32xbf16>, vector<8x32xf32> -> vector<8x32xf32>
    %952 = arith.addf %926, %951 : vector<8x32xf32>
    %953 = arith.addf %822, %952 : vector<8x32xf32>
    %c58 = arith.constant 58 : index
    %c0_282 = arith.constant 0 : index
    %954 = vector.load %arg5[%c58, %c0_282] : memref<72x128xf32, #tpu.memory_space<vmem>>, vector<1x32xf32>
    %c59 = arith.constant 59 : index
    %c0_283 = arith.constant 0 : index
    %955 = vector.load %arg5[%c59, %c0_283] : memref<72x128xf32, #tpu.memory_space<vmem>>, vector<1x32xf32>
    %cst_284 = arith.constant dense<0.000000e+00> : vector<8xf32>
    %956 = vector.multi_reduction <add>, %953, %cst_284 [1] : vector<8x32xf32> to vector<8xf32>
    %957 = vector.shape_cast %956 : vector<8xf32> to vector<8x1xf32>
    %cst_285 = arith.constant 3.200000e+01 : f32
    %958 = vector.broadcast %cst_285 : f32 to vector<8x1xf32>
    %959 = arith.divf %957, %958 : vector<8x1xf32>
    %960 = vector.broadcast %959 : vector<8x1xf32> to vector<8x32xf32>
    %961 = arith.subf %953, %960 : vector<8x32xf32>
    %962 = arith.mulf %961, %961 : vector<8x32xf32>
    %cst_286 = arith.constant dense<0.000000e+00> : vector<8xf32>
    %963 = vector.multi_reduction <add>, %962, %cst_286 [1] : vector<8x32xf32> to vector<8xf32>
    %964 = vector.shape_cast %963 : vector<8xf32> to vector<8x1xf32>
    %cst_287 = arith.constant 3.200000e+01 : f32
    %965 = vector.broadcast %cst_287 : f32 to vector<8x1xf32>
    %966 = arith.divf %964, %965 : vector<8x1xf32>
    %967 = vector.broadcast %959 : vector<8x1xf32> to vector<8x32xf32>
    %968 = arith.subf %953, %967 : vector<8x32xf32>
    %cst_288 = arith.constant 9.99999974E-6 : f32
    %969 = vector.broadcast %cst_288 : f32 to vector<8x1xf32>
    %970 = arith.addf %966, %969 : vector<8x1xf32>
    %971 = math.rsqrt %970 : vector<8x1xf32>
    %972 = vector.broadcast %971 : vector<8x1xf32> to vector<8x32xf32>
    %973 = arith.mulf %968, %972 : vector<8x32xf32>
    %974 = vector.broadcast %954 : vector<1x32xf32> to vector<8x32xf32>
    %975 = arith.mulf %973, %974 : vector<8x32xf32>
    %976 = vector.broadcast %955 : vector<1x32xf32> to vector<8x32xf32>
    %977 = arith.addf %975, %976 : vector<8x32xf32>
    %c1056 = arith.constant 1056 : index
    %c0_289 = arith.constant 0 : index
    %978 = vector.load %arg4[%c1056, %c0_289] : memref<1280x128xf32, #tpu.memory_space<vmem>>, vector<32x32xf32>
    %979 = arith.truncf %977 : vector<8x32xf32> to vector<8x32xbf16>
    %980 = arith.truncf %978 : vector<32x32xf32> to vector<32x32xbf16>
    %cst_290 = arith.constant dense<0.000000e+00> : vector<8x32xf32>
    %981 = tpu.matmul %979, %980, %cst_290 {dimension_numbers = #tpu.dot_dimension_numbers<[1], [0], [0], [1], [0, 0, 1, 1], [], []>} : vector<8x32xbf16>, vector<32x32xbf16>, vector<8x32xf32> -> vector<8x32xf32>
    %c54 = arith.constant 54 : index
    %c0_291 = arith.constant 0 : index
    %982 = vector.load %arg5[%c54, %c0_291] : memref<72x128xf32, #tpu.memory_space<vmem>>, vector<1x32xf32>
    %983 = vector.broadcast %982 : vector<1x32xf32> to vector<8x32xf32>
    %984 = arith.addf %981, %983 : vector<8x32xf32>
    %c1088 = arith.constant 1088 : index
    %c0_292 = arith.constant 0 : index
    %985 = vector.load %arg4[%c1088, %c0_292] : memref<1280x128xf32, #tpu.memory_space<vmem>>, vector<32x32xf32>
    %986 = arith.truncf %439 : vector<16x32xf32> to vector<16x32xbf16>
    %987 = arith.truncf %985 : vector<32x32xf32> to vector<32x32xbf16>
    %cst_293 = arith.constant dense<0.000000e+00> : vector<16x32xf32>
    %988 = tpu.matmul %986, %987, %cst_293 {dimension_numbers = #tpu.dot_dimension_numbers<[1], [0], [0], [1], [0, 0, 1, 1], [], []>} : vector<16x32xbf16>, vector<32x32xbf16>, vector<16x32xf32> -> vector<16x32xf32>
    %c55 = arith.constant 55 : index
    %c0_294 = arith.constant 0 : index
    %989 = vector.load %arg5[%c55, %c0_294] : memref<72x128xf32, #tpu.memory_space<vmem>>, vector<1x32xf32>
    %990 = vector.broadcast %989 : vector<1x32xf32> to vector<16x32xf32>
    %991 = arith.addf %988, %990 : vector<16x32xf32>
    %c1120 = arith.constant 1120 : index
    %c0_295 = arith.constant 0 : index
    %992 = vector.load %arg4[%c1120, %c0_295] : memref<1280x128xf32, #tpu.memory_space<vmem>>, vector<32x32xf32>
    %993 = arith.truncf %439 : vector<16x32xf32> to vector<16x32xbf16>
    %994 = arith.truncf %992 : vector<32x32xf32> to vector<32x32xbf16>
    %cst_296 = arith.constant dense<0.000000e+00> : vector<16x32xf32>
    %995 = tpu.matmul %993, %994, %cst_296 {dimension_numbers = #tpu.dot_dimension_numbers<[1], [0], [0], [1], [0, 0, 1, 1], [], []>} : vector<16x32xbf16>, vector<32x32xbf16>, vector<16x32xf32> -> vector<16x32xf32>
    %c56 = arith.constant 56 : index
    %c0_297 = arith.constant 0 : index
    %996 = vector.load %arg5[%c56, %c0_297] : memref<72x128xf32, #tpu.memory_space<vmem>>, vector<1x32xf32>
    %997 = vector.broadcast %996 : vector<1x32xf32> to vector<16x32xf32>
    %998 = arith.addf %995, %997 : vector<16x32xf32>
    %c1152 = arith.constant 1152 : index
    %c0_298 = arith.constant 0 : index
    %999 = vector.load %arg4[%c1152, %c0_298] : memref<1280x128xf32, #tpu.memory_space<vmem>>, vector<32x32xf32>
    %c57 = arith.constant 57 : index
    %c0_299 = arith.constant 0 : index
    %1000 = vector.load %arg5[%c57, %c0_299] : memref<72x128xf32, #tpu.memory_space<vmem>>, vector<1x32xf32>
    %cst_300 = arith.constant 0.000000e+00 : f32
    %1001 = vector.broadcast %cst_300 : f32 to vector<8x32xf32>
    %1002 = vector.broadcast %1000 : vector<1x32xf32> to vector<8x32xf32>
    %1003 = arith.addf %1001, %1002 : vector<8x32xf32>
    %1004 = vector.broadcast %7 : vector<1x32xf32> to vector<8x32xf32>
    %1005 = arith.mulf %984, %1004 : vector<8x32xf32>
    %1006 = arith.truncf %1005 : vector<8x32xf32> to vector<8x32xbf16>
    %1007 = arith.truncf %991 : vector<16x32xf32> to vector<16x32xbf16>
    %cst_301 = arith.constant dense<0.000000e+00> : vector<8x16xf32>
    %1008 = tpu.matmul %1006, %1007, %cst_301 {dimension_numbers = #tpu.dot_dimension_numbers<[1], [1], [0], [0], [0, 0, 1, 0], [], []>} : vector<8x32xbf16>, vector<16x32xbf16>, vector<8x16xf32> -> vector<8x16xf32>
    %cst_302 = arith.constant 0.353553385 : f32
    %1009 = vector.broadcast %cst_302 : f32 to vector<8x16xf32>
    %1010 = arith.mulf %1008, %1009 : vector<8x16xf32>
    %cst_303 = arith.constant dense<0xFF800000> : vector<8xf32>
    %1011 = vector.multi_reduction <maximumf>, %1010, %cst_303 [1] : vector<8x16xf32> to vector<8xf32>
    %1012 = vector.shape_cast %1011 : vector<8xf32> to vector<8x1xf32>
    %1013 = vector.broadcast %1012 : vector<8x1xf32> to vector<8x16xf32>
    %1014 = arith.subf %1010, %1013 : vector<8x16xf32>
    %1015 = math.exp %1014 : vector<8x16xf32>
    %cst_304 = arith.constant dense<0.000000e+00> : vector<8xf32>
    %1016 = vector.multi_reduction <add>, %1015, %cst_304 [1] : vector<8x16xf32> to vector<8xf32>
    %1017 = vector.shape_cast %1016 : vector<8xf32> to vector<8x1xf32>
    %1018 = tpu.reciprocal %1017 {approx = true} : vector<8x1xf32> -> vector<8x1xf32>
    %1019 = vector.broadcast %1018 : vector<8x1xf32> to vector<8x16xf32>
    %1020 = arith.mulf %1015, %1019 : vector<8x16xf32>
    %1021 = vector.broadcast %7 : vector<1x32xf32> to vector<16x32xf32>
    %1022 = arith.mulf %998, %1021 : vector<16x32xf32>
    %1023 = arith.truncf %1022 : vector<16x32xf32> to vector<16x32xbf16>
    %1024 = arith.truncf %999 : vector<32x32xf32> to vector<32x32xbf16>
    %cst_305 = arith.constant dense<0.000000e+00> : vector<16x32xf32>
    %1025 = tpu.matmul %1023, %1024, %cst_305 {dimension_numbers = #tpu.dot_dimension_numbers<[1], [0], [0], [1], [0, 0, 1, 1], [], []>} : vector<16x32xbf16>, vector<32x32xbf16>, vector<16x32xf32> -> vector<16x32xf32>
    %1026 = arith.truncf %1020 : vector<8x16xf32> to vector<8x16xbf16>
    %1027 = arith.truncf %1025 : vector<16x32xf32> to vector<16x32xbf16>
    %cst_306 = arith.constant dense<0.000000e+00> : vector<8x32xf32>
    %1028 = tpu.matmul %1026, %1027, %cst_306 {dimension_numbers = #tpu.dot_dimension_numbers<[1], [0], [0], [1], [0, 0, 1, 1], [], []>} : vector<8x16xbf16>, vector<16x32xbf16>, vector<8x32xf32> -> vector<8x32xf32>
    %1029 = arith.addf %1003, %1028 : vector<8x32xf32>
    %1030 = vector.broadcast %14 : vector<1x32xf32> to vector<8x32xf32>
    %1031 = arith.mulf %984, %1030 : vector<8x32xf32>
    %1032 = arith.truncf %1031 : vector<8x32xf32> to vector<8x32xbf16>
    %1033 = arith.truncf %991 : vector<16x32xf32> to vector<16x32xbf16>
    %cst_307 = arith.constant dense<0.000000e+00> : vector<8x16xf32>
    %1034 = tpu.matmul %1032, %1033, %cst_307 {dimension_numbers = #tpu.dot_dimension_numbers<[1], [1], [0], [0], [0, 0, 1, 0], [], []>} : vector<8x32xbf16>, vector<16x32xbf16>, vector<8x16xf32> -> vector<8x16xf32>
    %cst_308 = arith.constant 0.353553385 : f32
    %1035 = vector.broadcast %cst_308 : f32 to vector<8x16xf32>
    %1036 = arith.mulf %1034, %1035 : vector<8x16xf32>
    %cst_309 = arith.constant dense<0xFF800000> : vector<8xf32>
    %1037 = vector.multi_reduction <maximumf>, %1036, %cst_309 [1] : vector<8x16xf32> to vector<8xf32>
    %1038 = vector.shape_cast %1037 : vector<8xf32> to vector<8x1xf32>
    %1039 = vector.broadcast %1038 : vector<8x1xf32> to vector<8x16xf32>
    %1040 = arith.subf %1036, %1039 : vector<8x16xf32>
    %1041 = math.exp %1040 : vector<8x16xf32>
    %cst_310 = arith.constant dense<0.000000e+00> : vector<8xf32>
    %1042 = vector.multi_reduction <add>, %1041, %cst_310 [1] : vector<8x16xf32> to vector<8xf32>
    %1043 = vector.shape_cast %1042 : vector<8xf32> to vector<8x1xf32>
    %1044 = tpu.reciprocal %1043 {approx = true} : vector<8x1xf32> -> vector<8x1xf32>
    %1045 = vector.broadcast %1044 : vector<8x1xf32> to vector<8x16xf32>
    %1046 = arith.mulf %1041, %1045 : vector<8x16xf32>
    %1047 = vector.broadcast %14 : vector<1x32xf32> to vector<16x32xf32>
    %1048 = arith.mulf %998, %1047 : vector<16x32xf32>
    %1049 = arith.truncf %1048 : vector<16x32xf32> to vector<16x32xbf16>
    %1050 = arith.truncf %999 : vector<32x32xf32> to vector<32x32xbf16>
    %cst_311 = arith.constant dense<0.000000e+00> : vector<16x32xf32>
    %1051 = tpu.matmul %1049, %1050, %cst_311 {dimension_numbers = #tpu.dot_dimension_numbers<[1], [0], [0], [1], [0, 0, 1, 1], [], []>} : vector<16x32xbf16>, vector<32x32xbf16>, vector<16x32xf32> -> vector<16x32xf32>
    %1052 = arith.truncf %1046 : vector<8x16xf32> to vector<8x16xbf16>
    %1053 = arith.truncf %1051 : vector<16x32xf32> to vector<16x32xbf16>
    %cst_312 = arith.constant dense<0.000000e+00> : vector<8x32xf32>
    %1054 = tpu.matmul %1052, %1053, %cst_312 {dimension_numbers = #tpu.dot_dimension_numbers<[1], [0], [0], [1], [0, 0, 1, 1], [], []>} : vector<8x16xbf16>, vector<16x32xbf16>, vector<8x32xf32> -> vector<8x32xf32>
    %1055 = arith.addf %1029, %1054 : vector<8x32xf32>
    %1056 = vector.broadcast %21 : vector<1x32xf32> to vector<8x32xf32>
    %1057 = arith.mulf %984, %1056 : vector<8x32xf32>
    %1058 = arith.truncf %1057 : vector<8x32xf32> to vector<8x32xbf16>
    %1059 = arith.truncf %991 : vector<16x32xf32> to vector<16x32xbf16>
    %cst_313 = arith.constant dense<0.000000e+00> : vector<8x16xf32>
    %1060 = tpu.matmul %1058, %1059, %cst_313 {dimension_numbers = #tpu.dot_dimension_numbers<[1], [1], [0], [0], [0, 0, 1, 0], [], []>} : vector<8x32xbf16>, vector<16x32xbf16>, vector<8x16xf32> -> vector<8x16xf32>
    %cst_314 = arith.constant 0.353553385 : f32
    %1061 = vector.broadcast %cst_314 : f32 to vector<8x16xf32>
    %1062 = arith.mulf %1060, %1061 : vector<8x16xf32>
    %cst_315 = arith.constant dense<0xFF800000> : vector<8xf32>
    %1063 = vector.multi_reduction <maximumf>, %1062, %cst_315 [1] : vector<8x16xf32> to vector<8xf32>
    %1064 = vector.shape_cast %1063 : vector<8xf32> to vector<8x1xf32>
    %1065 = vector.broadcast %1064 : vector<8x1xf32> to vector<8x16xf32>
    %1066 = arith.subf %1062, %1065 : vector<8x16xf32>
    %1067 = math.exp %1066 : vector<8x16xf32>
    %cst_316 = arith.constant dense<0.000000e+00> : vector<8xf32>
    %1068 = vector.multi_reduction <add>, %1067, %cst_316 [1] : vector<8x16xf32> to vector<8xf32>
    %1069 = vector.shape_cast %1068 : vector<8xf32> to vector<8x1xf32>
    %1070 = tpu.reciprocal %1069 {approx = true} : vector<8x1xf32> -> vector<8x1xf32>
    %1071 = vector.broadcast %1070 : vector<8x1xf32> to vector<8x16xf32>
    %1072 = arith.mulf %1067, %1071 : vector<8x16xf32>
    %1073 = vector.broadcast %21 : vector<1x32xf32> to vector<16x32xf32>
    %1074 = arith.mulf %998, %1073 : vector<16x32xf32>
    %1075 = arith.truncf %1074 : vector<16x32xf32> to vector<16x32xbf16>
    %1076 = arith.truncf %999 : vector<32x32xf32> to vector<32x32xbf16>
    %cst_317 = arith.constant dense<0.000000e+00> : vector<16x32xf32>
    %1077 = tpu.matmul %1075, %1076, %cst_317 {dimension_numbers = #tpu.dot_dimension_numbers<[1], [0], [0], [1], [0, 0, 1, 1], [], []>} : vector<16x32xbf16>, vector<32x32xbf16>, vector<16x32xf32> -> vector<16x32xf32>
    %1078 = arith.truncf %1072 : vector<8x16xf32> to vector<8x16xbf16>
    %1079 = arith.truncf %1077 : vector<16x32xf32> to vector<16x32xbf16>
    %cst_318 = arith.constant dense<0.000000e+00> : vector<8x32xf32>
    %1080 = tpu.matmul %1078, %1079, %cst_318 {dimension_numbers = #tpu.dot_dimension_numbers<[1], [0], [0], [1], [0, 0, 1, 1], [], []>} : vector<8x16xbf16>, vector<16x32xbf16>, vector<8x32xf32> -> vector<8x32xf32>
    %1081 = arith.addf %1055, %1080 : vector<8x32xf32>
    %1082 = vector.broadcast %28 : vector<1x32xf32> to vector<8x32xf32>
    %1083 = arith.mulf %984, %1082 : vector<8x32xf32>
    %1084 = arith.truncf %1083 : vector<8x32xf32> to vector<8x32xbf16>
    %1085 = arith.truncf %991 : vector<16x32xf32> to vector<16x32xbf16>
    %cst_319 = arith.constant dense<0.000000e+00> : vector<8x16xf32>
    %1086 = tpu.matmul %1084, %1085, %cst_319 {dimension_numbers = #tpu.dot_dimension_numbers<[1], [1], [0], [0], [0, 0, 1, 0], [], []>} : vector<8x32xbf16>, vector<16x32xbf16>, vector<8x16xf32> -> vector<8x16xf32>
    %cst_320 = arith.constant 0.353553385 : f32
    %1087 = vector.broadcast %cst_320 : f32 to vector<8x16xf32>
    %1088 = arith.mulf %1086, %1087 : vector<8x16xf32>
    %cst_321 = arith.constant dense<0xFF800000> : vector<8xf32>
    %1089 = vector.multi_reduction <maximumf>, %1088, %cst_321 [1] : vector<8x16xf32> to vector<8xf32>
    %1090 = vector.shape_cast %1089 : vector<8xf32> to vector<8x1xf32>
    %1091 = vector.broadcast %1090 : vector<8x1xf32> to vector<8x16xf32>
    %1092 = arith.subf %1088, %1091 : vector<8x16xf32>
    %1093 = math.exp %1092 : vector<8x16xf32>
    %cst_322 = arith.constant dense<0.000000e+00> : vector<8xf32>
    %1094 = vector.multi_reduction <add>, %1093, %cst_322 [1] : vector<8x16xf32> to vector<8xf32>
    %1095 = vector.shape_cast %1094 : vector<8xf32> to vector<8x1xf32>
    %1096 = tpu.reciprocal %1095 {approx = true} : vector<8x1xf32> -> vector<8x1xf32>
    %1097 = vector.broadcast %1096 : vector<8x1xf32> to vector<8x16xf32>
    %1098 = arith.mulf %1093, %1097 : vector<8x16xf32>
    %1099 = vector.broadcast %28 : vector<1x32xf32> to vector<16x32xf32>
    %1100 = arith.mulf %998, %1099 : vector<16x32xf32>
    %1101 = arith.truncf %1100 : vector<16x32xf32> to vector<16x32xbf16>
    %1102 = arith.truncf %999 : vector<32x32xf32> to vector<32x32xbf16>
    %cst_323 = arith.constant dense<0.000000e+00> : vector<16x32xf32>
    %1103 = tpu.matmul %1101, %1102, %cst_323 {dimension_numbers = #tpu.dot_dimension_numbers<[1], [0], [0], [1], [0, 0, 1, 1], [], []>} : vector<16x32xbf16>, vector<32x32xbf16>, vector<16x32xf32> -> vector<16x32xf32>
    %1104 = arith.truncf %1098 : vector<8x16xf32> to vector<8x16xbf16>
    %1105 = arith.truncf %1103 : vector<16x32xf32> to vector<16x32xbf16>
    %cst_324 = arith.constant dense<0.000000e+00> : vector<8x32xf32>
    %1106 = tpu.matmul %1104, %1105, %cst_324 {dimension_numbers = #tpu.dot_dimension_numbers<[1], [0], [0], [1], [0, 0, 1, 1], [], []>} : vector<8x16xbf16>, vector<16x32xbf16>, vector<8x32xf32> -> vector<8x32xf32>
    %1107 = arith.addf %1081, %1106 : vector<8x32xf32>
    %1108 = arith.addf %977, %1107 : vector<8x32xf32>
    %c60 = arith.constant 60 : index
    %c0_325 = arith.constant 0 : index
    %1109 = vector.load %arg5[%c60, %c0_325] : memref<72x128xf32, #tpu.memory_space<vmem>>, vector<1x32xf32>
    %c61 = arith.constant 61 : index
    %c0_326 = arith.constant 0 : index
    %1110 = vector.load %arg5[%c61, %c0_326] : memref<72x128xf32, #tpu.memory_space<vmem>>, vector<1x32xf32>
    %cst_327 = arith.constant dense<0.000000e+00> : vector<8xf32>
    %1111 = vector.multi_reduction <add>, %1108, %cst_327 [1] : vector<8x32xf32> to vector<8xf32>
    %1112 = vector.shape_cast %1111 : vector<8xf32> to vector<8x1xf32>
    %cst_328 = arith.constant 3.200000e+01 : f32
    %1113 = vector.broadcast %cst_328 : f32 to vector<8x1xf32>
    %1114 = arith.divf %1112, %1113 : vector<8x1xf32>
    %1115 = vector.broadcast %1114 : vector<8x1xf32> to vector<8x32xf32>
    %1116 = arith.subf %1108, %1115 : vector<8x32xf32>
    %1117 = arith.mulf %1116, %1116 : vector<8x32xf32>
    %cst_329 = arith.constant dense<0.000000e+00> : vector<8xf32>
    %1118 = vector.multi_reduction <add>, %1117, %cst_329 [1] : vector<8x32xf32> to vector<8xf32>
    %1119 = vector.shape_cast %1118 : vector<8xf32> to vector<8x1xf32>
    %cst_330 = arith.constant 3.200000e+01 : f32
    %1120 = vector.broadcast %cst_330 : f32 to vector<8x1xf32>
    %1121 = arith.divf %1119, %1120 : vector<8x1xf32>
    %1122 = vector.broadcast %1114 : vector<8x1xf32> to vector<8x32xf32>
    %1123 = arith.subf %1108, %1122 : vector<8x32xf32>
    %cst_331 = arith.constant 9.99999974E-6 : f32
    %1124 = vector.broadcast %cst_331 : f32 to vector<8x1xf32>
    %1125 = arith.addf %1121, %1124 : vector<8x1xf32>
    %1126 = math.rsqrt %1125 : vector<8x1xf32>
    %1127 = vector.broadcast %1126 : vector<8x1xf32> to vector<8x32xf32>
    %1128 = arith.mulf %1123, %1127 : vector<8x32xf32>
    %1129 = vector.broadcast %1109 : vector<1x32xf32> to vector<8x32xf32>
    %1130 = arith.mulf %1128, %1129 : vector<8x32xf32>
    %1131 = vector.broadcast %1110 : vector<1x32xf32> to vector<8x32xf32>
    %1132 = arith.addf %1130, %1131 : vector<8x32xf32>
    %c1184 = arith.constant 1184 : index
    %c0_332 = arith.constant 0 : index
    %1133 = vector.load %arg4[%c1184, %c0_332] : memref<1280x128xf32, #tpu.memory_space<vmem>>, vector<32x64xf32>
    %1134 = arith.truncf %1132 : vector<8x32xf32> to vector<8x32xbf16>
    %1135 = arith.truncf %1133 : vector<32x64xf32> to vector<32x64xbf16>
    %cst_333 = arith.constant dense<0.000000e+00> : vector<8x64xf32>
    %1136 = tpu.matmul %1134, %1135, %cst_333 {dimension_numbers = #tpu.dot_dimension_numbers<[1], [0], [0], [1], [0, 0, 1, 1], [], []>} : vector<8x32xbf16>, vector<32x64xbf16>, vector<8x64xf32> -> vector<8x64xf32>
    %c64_334 = arith.constant 64 : index
    %c0_335 = arith.constant 0 : index
    %1137 = vector.load %arg5[%c64_334, %c0_335] : memref<72x128xf32, #tpu.memory_space<vmem>>, vector<1x64xf32>
    %1138 = vector.broadcast %1137 : vector<1x64xf32> to vector<8x64xf32>
    %1139 = arith.addf %1136, %1138 : vector<8x64xf32>
    %cst_336 = arith.constant 0.000000e+00 : f32
    %1140 = vector.broadcast %cst_336 : f32 to vector<8x64xf32>
    %1141 = arith.maximumf %1139, %1140 : vector<8x64xf32>
    %c1216 = arith.constant 1216 : index
    %c0_337 = arith.constant 0 : index
    %1142 = vector.load %arg4[%c1216, %c0_337] : memref<1280x128xf32, #tpu.memory_space<vmem>>, vector<64x32xf32>
    %1143 = arith.truncf %1141 : vector<8x64xf32> to vector<8x64xbf16>
    %1144 = arith.truncf %1142 : vector<64x32xf32> to vector<64x32xbf16>
    %cst_338 = arith.constant dense<0.000000e+00> : vector<8x32xf32>
    %1145 = tpu.matmul %1143, %1144, %cst_338 {dimension_numbers = #tpu.dot_dimension_numbers<[1], [0], [0], [1], [0, 0, 1, 1], [], []>} : vector<8x64xbf16>, vector<64x32xbf16>, vector<8x32xf32> -> vector<8x32xf32>
    %c65 = arith.constant 65 : index
    %c0_339 = arith.constant 0 : index
    %1146 = vector.load %arg5[%c65, %c0_339] : memref<72x128xf32, #tpu.memory_space<vmem>>, vector<1x32xf32>
    %1147 = vector.broadcast %1146 : vector<1x32xf32> to vector<8x32xf32>
    %1148 = arith.addf %1145, %1147 : vector<8x32xf32>
    %1149 = arith.addf %1132, %1148 : vector<8x32xf32>
    %c62 = arith.constant 62 : index
    %c0_340 = arith.constant 0 : index
    %1150 = vector.load %arg5[%c62, %c0_340] : memref<72x128xf32, #tpu.memory_space<vmem>>, vector<1x32xf32>
    %c63 = arith.constant 63 : index
    %c0_341 = arith.constant 0 : index
    %1151 = vector.load %arg5[%c63, %c0_341] : memref<72x128xf32, #tpu.memory_space<vmem>>, vector<1x32xf32>
    %cst_342 = arith.constant dense<0.000000e+00> : vector<8xf32>
    %1152 = vector.multi_reduction <add>, %1149, %cst_342 [1] : vector<8x32xf32> to vector<8xf32>
    %1153 = vector.shape_cast %1152 : vector<8xf32> to vector<8x1xf32>
    %cst_343 = arith.constant 3.200000e+01 : f32
    %1154 = vector.broadcast %cst_343 : f32 to vector<8x1xf32>
    %1155 = arith.divf %1153, %1154 : vector<8x1xf32>
    %1156 = vector.broadcast %1155 : vector<8x1xf32> to vector<8x32xf32>
    %1157 = arith.subf %1149, %1156 : vector<8x32xf32>
    %1158 = arith.mulf %1157, %1157 : vector<8x32xf32>
    %cst_344 = arith.constant dense<0.000000e+00> : vector<8xf32>
    %1159 = vector.multi_reduction <add>, %1158, %cst_344 [1] : vector<8x32xf32> to vector<8xf32>
    %1160 = vector.shape_cast %1159 : vector<8xf32> to vector<8x1xf32>
    %cst_345 = arith.constant 3.200000e+01 : f32
    %1161 = vector.broadcast %cst_345 : f32 to vector<8x1xf32>
    %1162 = arith.divf %1160, %1161 : vector<8x1xf32>
    %1163 = vector.broadcast %1155 : vector<8x1xf32> to vector<8x32xf32>
    %1164 = arith.subf %1149, %1163 : vector<8x32xf32>
    %cst_346 = arith.constant 9.99999974E-6 : f32
    %1165 = vector.broadcast %cst_346 : f32 to vector<8x1xf32>
    %1166 = arith.addf %1162, %1165 : vector<8x1xf32>
    %1167 = math.rsqrt %1166 : vector<8x1xf32>
    %1168 = vector.broadcast %1167 : vector<8x1xf32> to vector<8x32xf32>
    %1169 = arith.mulf %1164, %1168 : vector<8x32xf32>
    %1170 = vector.broadcast %1150 : vector<1x32xf32> to vector<8x32xf32>
    %1171 = arith.mulf %1169, %1170 : vector<8x32xf32>
    %1172 = vector.broadcast %1151 : vector<1x32xf32> to vector<8x32xf32>
    %1173 = arith.addf %1171, %1172 : vector<8x32xf32>
    %c96 = arith.constant 96 : index
    %c0_347 = arith.constant 0 : index
    %1174 = vector.load %arg4[%c96, %c0_347] : memref<1280x128xf32, #tpu.memory_space<vmem>>, vector<32x128xf32>
    %1175 = arith.truncf %1173 : vector<8x32xf32> to vector<8x32xbf16>
    %1176 = arith.truncf %1174 : vector<32x128xf32> to vector<32x128xbf16>
    %cst_348 = arith.constant dense<0.000000e+00> : vector<8x128xf32>
    %1177 = tpu.matmul %1175, %1176, %cst_348 {dimension_numbers = #tpu.dot_dimension_numbers<[1], [0], [0], [1], [0, 0, 1, 1], [], []>} : vector<8x32xbf16>, vector<32x128xbf16>, vector<8x128xf32> -> vector<8x128xf32>
    %c8 = arith.constant 8 : index
    %c0_349 = arith.constant 0 : index
    %1178 = vector.load %arg5[%c8, %c0_349] : memref<72x128xf32, #tpu.memory_space<vmem>>, vector<1x128xf32>
    %1179 = vector.broadcast %1178 : vector<1x128xf32> to vector<8x128xf32>
    %1180 = arith.addf %1177, %1179 : vector<8x128xf32>
    %c0_350 = arith.constant 0 : index
    %c0_351 = arith.constant 0 : index
    %c0_352 = arith.constant 0 : index
    %1181 = vector.load %arg7[%c0_350, %c0_351, %c0_352] : memref<1x8x128xf32, #tpu.memory_space<vmem>>, vector<1x8x128xf32>
    %1182 = vector.shape_cast %1181 : vector<1x8x128xf32> to vector<8x128xf32>
    %1183 = vector.shape_cast %1180 : vector<8x128xf32> to vector<1x8x128xf32>
    tpu.vector_store %arg7[%c0_350, %c0_351, %c0_352], %1183 {strides = array<i32>} : memref<1x8x128xf32, #tpu.memory_space<vmem>>, vector<1x8x128xf32>,
    return
  }
  func.func @transform_0(%arg0: i32) -> (i32, i32, i32) {
    %c0_i32 = arith.constant 0 : i32
    %c0_i32_0 = arith.constant 0 : i32
    %c0_i32_1 = arith.constant 0 : i32
    return %arg0, %c0_i32, %c0_i32_0 : i32, i32, i32
  }
  func.func @transform_1(%arg0: i32) -> (i32, i32, i32) {
    %c0_i32 = arith.constant 0 : i32
    %c0_i32_0 = arith.constant 0 : i32
    %c0_i32_1 = arith.constant 0 : i32
    return %arg0, %c0_i32, %c0_i32_0 : i32, i32, i32
  }
  func.func @transform_2(%arg0: i32) -> (i32, i32, i32) {
    %c0_i32 = arith.constant 0 : i32
    %c0_i32_0 = arith.constant 0 : i32
    %c0_i32_1 = arith.constant 0 : i32
    return %arg0, %c0_i32, %c0_i32_0 : i32, i32, i32
  }
  func.func @transform_3(%arg0: i32) -> (i32, i32) {
    %c0_i32 = arith.constant 0 : i32
    %c0_i32_0 = arith.constant 0 : i32
    %c0_i32_1 = arith.constant 0 : i32
    return %c0_i32, %c0_i32_0 : i32, i32
  }
  func.func @transform_4(%arg0: i32) -> (i32, i32) {
    %c0_i32 = arith.constant 0 : i32
    %c0_i32_0 = arith.constant 0 : i32
    %c0_i32_1 = arith.constant 0 : i32
    return %c0_i32, %c0_i32_0 : i32, i32
  }
  func.func @transform_5(%arg0: i32) -> (i32, i32, i32) {
    %c0_i32 = arith.constant 0 : i32
    %c0_i32_0 = arith.constant 0 : i32
    %c0_i32_1 = arith.constant 0 : i32
    return %arg0, %c0_i32, %c0_i32_0 : i32, i32, i32
  }
  func.func @transform_6(%arg0: i32) -> (i32, i32, i32) {
    %c0_i32 = arith.constant 0 : i32
    %c0_i32_0 = arith.constant 0 : i32
    %c0_i32_1 = arith.constant 0 : i32
    return %arg0, %c0_i32, %c0_i32_0 : i32, i32, i32
  }
}

</mosaic_0001>

<bundles_post_ra>
// kernel: dmt_forward.1
= control target key start
LH: loop header
LB: loop body
LE: loop exit
PB: predicated region body
PF: predicated region fallthrough
CT: control target
= control target key end

     0   :  { %12 = vsyncpa [#allocation3], 0  ;;  %s9220_s0 = inlined_call_operand.vmem [shape: f32[2,16,16], index: 0, kind: input, shape index: {}]   ;;  %s9221_s1 = inlined_call_operand.vmem [shape: f32[2,8,16], index: 1, kind: input, shape index: {}]   ;;  %s9222_s2 = inlined_call_operand.vmem [shape: f32[2,1,32], index: 2, kind: input, shape index: {}]   ;;  %s9223_s3 = inlined_call_operand.hbm [shape: f32[1280,128], index: 3, kind: input, shape index: {}]   ;;  %s9224_s4 = inlined_call_operand.vmem [shape: f32[72,128], index: 4, kind: input, shape index: {}]   ;;  %s9225_s5 = inlined_call_operand.hbm [shape: f32[2,16,32], index: 5, kind: output, shape index: {0}]   ;;  %s9226_s6 = inlined_call_operand.vmem [shape: f32[2,8,128], index: 6, kind: output, shape index: {1}]  }
   0x1   :  { %13 = vsyncpa [#allocation4], 0 }
   0x2   :  { %15 = vsyncpa [#allocation4 + $0x1], 0  ;;  %s7890_s21 = smov 0   ;;  %s7892_s22 = smov 0  }
   0x3   :  { %s7894_s23 = smov 0   ;;  %s7896_s24 = smov 0  }
   0x4 LB: > { %s7911_s25 = sadd.s32 4294967295, %s7845_s24   ;;  %s6355_s26 = sadd.s32 4294967294, %s7845_s24   ;;  %s7845_s24 = sphi %s7896_s24, %s9234_s24   ;;  %s7841_s23 = sphi %s7894_s23, %s9233_s23   ;;  %s7837_s22 = sphi %s7892_s22, %s9232_s22   ;;  %s7833_s21 = sphi %s7890_s21, %s9231_s21  }
   0x5   : > { %s7915_s27 = sadd.s32 1, %s7845_s24   ;;  %s148_s28 = sadd.s32 1, %s7841_s23 }
   0x6   : > { %s145_s29 = ssub.s32 %s7845_s24, %s7915_s27  ;;  %p158_p0 = scmp.ne.s32.totalorder %s7841_s23, %s7837_s22 }
   0x7   : > { %p146_p1 = scmp.eq.s32.totalorder %s145_s29, 0  ;;  %p159_p2 = scmp.eq.s32.totalorder %s7911_s25, 1 }
   0x8   : > { %p164_p3 = scmp.ne.s32.totalorder %s7837_s22, %s7833_s21  ;;  %p165_p4 = scmp.eq.s32.totalorder %s6355_s26, 1 }
   0x9   : > { %s7926_s30 = scalar_select %p146_p1, %s7841_s23, %s148_s28  }
   0xa   : > { %p7928_p5 = por %p159_p2, %p158_p0  ;;  %p7932_p6 = por %p165_p4, %p164_p3 }
   0xb   : > { %p6356_p7 = scmp.ge.s32.totalorder %s7845_s24, 1  ;;  %p198_p8 = scmp.lt.s32.totalorder %s7845_s24, 3 }
   0xc   : > { %s9228_s8 = scalar_select %p7932_p6, 1, 0 }
   0xd   : > { %p7557_p9 = scmp.eq.s32.totalorder %s7911_s25, 0  ;;  %p7939_p10 = pnand %p6356_p7, %p198_p8 }
   0xe   : > { %s7847_s10 = smov [#allocation2]  }
   0xf   : > { %s210_s11 = sshll.u32 %s7847_s10, 4  ;;  %p7549_p11 = pneg %p7939_p10  ;;  %s211_s11 = int_to_ptr.vmem [resolvable:$true] %s210_s11 }
  0x10   : > { %s7766_s12 = scalar_lea.vmem %s211_s11, 20480  ;;  %p7774_p3 = scmp.lt.s32.totalorder %s211_s11, %s211_s11 }
  0x11   : > { %p7550_p12 = pnand %p7557_p9, %p7549_p11  ;;  %p7767_p0 = scmp.ne.s32.totalorder %s211_s11, %s7766_s12 }
  0x12   : > { %p7775_p4 = scmp.lt.s32.totalorder %s7766_s12, %s7766_s12 }
  0x13   : > { %p7757_p13 = pneg %p7550_p12 }
  0x14   : > { %p7776_p6 = por %p7775_p4, %p7774_p3 }
  0x15   : > { %p7769_p1 = pnand %p7767_p0, %p7757_p13 }
  0x17   : > { %p7770_p2 = pneg %p7769_p1 }
  0x19   : > { %p7777_p7 = pnand %p7776_p6, %p7770_p2 }
  0x1b   : > { %7780 = shalt.err (!%p7777_p7)
}
  0x1c   : > { %s7848_s13 = smov 128   ;;  %s7849_s14 = smov 8  }
  0x1d   : > { %7552 = dma.hbm_to_vmem [thread:$0]  (!%p7550_p12), %s9223_s3, 20480, %s211_s11, [#allocation3], %s7848_s13, %s7848_s13, %s7849_s14  }
  0x1e   : > { %250 = sbr.rel (%p7939_p10) target bundleno = 14749 (0x399d), region = 40 }
  0x23   : > { %7824 = dma.done.wait (%p7557_p9), [#allocation3], 20480  }
  0x24   : > { %7826 = vsyncadd (%p7557_p9), [#allocation3], 4294946816  ;;  %p291_p8 = scmp.lt.s32.totalorder %s7911_s25, 1  ;;  %v7850_v0 = vmov 0.0   ;;  %vm7851_vm0 = vmmov 0   ;;  %v332_v1 = vld [vmem:[#allocation2] sm:$0xff]  ;;  %v308_v19 = vlaneseq }
  0x25   : > { %6803 = vmatprep.subr.bf16.mxu0 %v7850_v0  ;;  %6805 = vmatprep.mubr.msk.bf16.mxu0 %vm7851_vm0, %v7850_v0  ;;  %v333_v2 = vld [vmem:[#allocation2 + $0x8] sm:$0xff]  ;;  %vm357_vm1 = vcmask 130048   ;;  %v404_v7 = vld [vmem:[#allocation2 + $0x90] sm:$0xff]  ;;  %v405_v8 = vld [vmem:[#allocation2 + $0x98] sm:$0xff]  ;;  %vm414_vm3 = vcmask 261120   ;;  %vm1362_vm14 = vcmask 523264  }
  0x26   : > { %s7961_s17 = scalar_select %p291_p8, %s7911_s25, 1  ;;  %6809 = vmatprep.subr.bf16.mxu1 %v7850_v0  ;;  %6813 = vmatprep.mubr.msk.bf16.mxu1 %vm7851_vm0, %v7850_v0  ;;  %v335_v4 = vpack.c.bf16 %v333_v2, %v332_v1  ;;  %v461_v9 = vld [vmem:[#allocation2 + $0xb0] sm:$0xff]  ;;  %v408_v10 = vpack.c.bf16 %v405_v8, %v404_v7  ;;  %v462_v11 = vld [vmem:[#allocation2 + $0xb8] sm:$0xff]  ;;  %v402_v13 = vld [vmem:[#allocation2 + $0x80] sm:$0xff]  ;;  %v7978_v20 = vshrl.u32 %v308_v19, 7  ;;  %v309_v43 = vand.u32 127, %v308_v19 }
  0x27   : > { %v464_v12 = vpack.c.bf16 %v462_v11, %v461_v9  ;;  %v403_v14 = vld [vmem:[#allocation2 + $0x88] sm:$0xff]  ;;  %v459_v15 = vld [vmem:[#allocation2 + $0xa0] sm:$0xff]  ;;  %v513_v26 = vld [vmem:[#allocation2 + $0xd0] sm:$0xff]  ;;  %vm2876_vm15 = vcmask 64512   ;;  %s282_s15 = sand.u32 1, %s7837_s22   ;;  %s6535_s10 = sshll.u32 %s7911_s25, 8 }
  0x28   : > { %s6534_s18 = sshll.u32 %s7961_s17, 4  ;;  %6804 = vmatpush3.bf16.msra.mxu0 %v335_v4  ;;  %6810 = vmatpush3.bf16.msra.mxu1 %v408_v10  ;;  %v407_v16 = vpack.c.bf16 %v403_v14, %v402_v13  ;;  %v460_v17 = vld [vmem:[#allocation2 + $0xa8] sm:$0xff]  ;;  %vm339_vm2 = vcmp.lt.s32.totalorder %v7978_v20, 6  ;;  %v514_v27 = vld [vmem:[#allocation2 + $0xd8] sm:$0xff]  ;;  %v511_v34 = vld [vmem:[#allocation2 + $0xc0] sm:$0xff]  ;;  %vm320_vm4 = vcmp.ge.s32.totalorder %v309_v43, 16  ;;  %s9166_s14 = scalar_lea.hbm %s9225_s5, %s6535_s10 }
  0x29   : > { %s295_s26 = scalar_lea.vmem %s9220_s0, %s6534_s18  ;;  %6817 = vmatprep.subr.bf16.mxu0 %v7850_v0  ;;  %6811 = vmatprep.subr.bf16.mxu1 %v7850_v0  ;;  %v463_v18 = vpack.c.bf16 %v460_v17, %v459_v15  ;;  %v6370_v21 = vld [vmem:[%s9224_s4 + $0x9] ss:$0 sm:$0xff]  ;;  %v6371_v22 = vld [vmem:[%s9224_s4 + $0xa] ss:$0 sm:$0xff]  ;;  %v516_v32 = vpack.c.bf16 %v514_v27, %v513_v26  ;;  %v565_v37 = vld [vmem:[#allocation2 + $0xf0] sm:$0xff]  ;;  %vm321_vm5 = vcmp.lt.s32.totalorder %v309_v43, 24  ;;  %s302_s18 = scalar_lea.vmem %s9222_s2, %s7961_s17 }
  0x2a   : > { %v330_v3 = vld [vmem:[%s295_s26] sm:$0xff]  ;;  %v331_v5 = vld [vmem:[%s295_s26 + $0x8] sm:$0xff]  ;;  %v355_v24 = vsel %vm339_vm2, %v6370_v21, %v6371_v22  ;;  %v566_v38 = vld [vmem:[#allocation2 + $0xf8] sm:$0xff]  ;;  %vm325_vm6 = vcmp.ge.s32.totalorder %v309_v43, 24  ;;  %vm326_vm7 = vcmp.lt.s32.totalorder %v309_v43, 32  ;;  %vm311_vm10 = vcmp.lt.s32.totalorder %v309_v43, 8 }
  0x2b   : > { %v334_v6 = vpack.c.bf16 %v331_v5, %v330_v3  ;;  %v512_v35 = vld [vmem:[#allocation2 + $0xc8] sm:$0xff]  ;;  %v8004_v39 = vpack.c.bf16 %v566_v38, %v565_v37  ;;  %v563_v40 = vld [vmem:[#allocation2 + $0xe0] sm:$0xff]  ;;  %vm322_vm8 = vmand %vm320_vm4, %vm321_vm5  ;;  %vm315_vm11 = vcmp.ge.s32.totalorder %v309_v43, 8  ;;  %vm316_vm12 = vcmp.lt.s32.totalorder %v309_v43, 16  ;;  %s6364_s29 = sshll.u32 %s7961_s17, 3  ;;  %s6361_s19 = sshll.u32 %s282_s15, 4 }
  0x2c   : > { %6812 = vmatpush3.bf16.msra.mxu1 %v407_v16  ;;  %v515_v36 = vpack.c.bf16 %v512_v35, %v511_v34  ;;  %v564_v41 = vld [vmem:[#allocation2 + $0xe8] sm:$0xff]  ;;  %vm327_vm9 = vmand %vm325_vm6, %vm326_vm7  ;;  %v8019_v51 = vsel %vm322_vm8, 1.0, %v7850_v0  ;;  %v6377_v1 = vld [vmem:[%s9224_s4 + $0x10] ss:$0 sm:$0xff]  ;;  %s299_s11 = scalar_lea.vmem %s9221_s1, %s6364_s29  ;;  %vm2940_vm2 = vcmask 1043456   ;;  %s8629_s28 = scalar_lea.vmem [#allocation5], %s6361_s19 }
  0x2d   : > { %6806 = vmatmul.mubr.msk.bf16.vlgmr.msra.gmra.mxu0 %vm357_vm1, %v334_v6  ;;  %6825 = vmatprep.subr.bf16.mxu1 %v7850_v0  ;;  %v8008_v42 = vpack.c.bf16 %v564_v41, %v563_v40  ;;  %v6373_v44 = vld [vmem:[%s9224_s4 + $0xe] ss:$0 sm:$0xff]  ;;  %v6375_v50 = vld [vmem:[%s9224_s4 + $0xf] ss:$0 sm:$0xff]  ;;  %v8022_v52 = vsel %vm327_vm9, 1.0, %v7850_v0  ;;  %v8044_v6 = vsel %vm311_vm10, 1.0, %v7850_v0  ;;  %vm317_vm13 = vmand %vm315_vm11, %vm316_vm12 }
  0x2e   : > { %6821 = vmatprep.mubr.msk.bf16.mxu0 %vm7851_vm0, %v7850_v0  ;;  %6818 = vmatpush3.bf16.msra.mxu0 %v464_v12  ;;  %v8054_v12 = vsel %vm317_vm13, 1.0, %v7850_v0  ;;  %s9172_s16 = scalar_lea.sflag [#allocation4], %s282_s15  ;;  %s7852_s25 = smov [#allocation5]  }
  0x2f   : > { %6819 = vmatprep.subr.bf16.mxu0 %v7850_v0 }
  0x32   : > { %6820 = vmatpush3.bf16.msra.mxu0 %v463_v18 }
  0x33   : > { %6833 = vmatprep.subr.bf16.mxu0 %v7850_v0 }
  0xed   : > { %v395_v23 = vpop.f32.mrf.mxu0 }
  0xee   : > { %v7987_v29 = vadd.f32 %v395_v23, %v355_v24 }
  0xef   : > { %v6807_v25 = vpop.f32.mrf.mxu0 }
  0xf1   : > { %v398_v28 = vpop.f32.mrf.mxu0 }
  0xf2   : > { %v7989_v30 = vadd.f32 %v6371_v22, %v398_v28 }
  0xf3   : > { %v6808_v31 = vpop.f32.mrf.mxu0 }
  0xf4   : > { %v406_v33 = vpack.c.bf16 %v7989_v30, %v7987_v29 }
  0xf6   : > { %6814 = vmatmul.mubr.msk.bf16.vlgmr.msra.gmra.mxu1 %vm414_vm3, %v406_v33  ;;  %6822 = vmatmul.mubr.msk.bf16.vlgmr.msra.gmra.mxu0 %vm414_vm3, %v406_v33 }
  0xf7   : > { %6826 = vmatpush3.bf16.msra.mxu1 %v516_v32  ;;  %6829 = vmatprep.mubr.msk.bf16.mxu1 %vm7851_vm0, %v7850_v0 }
  0xf8   : > { %6827 = vmatprep.subr.bf16.mxu1 %v7850_v0  ;;  %6835 = vmatprep.mubr.msk.bf16.mxu0 %vm7851_vm0, %v7850_v0 }
  0xfb   : > { %6828 = vmatpush3.bf16.msra.mxu1 %v515_v36 }
  0xfc   : > { %6839 = vmatprep.subr.bf16.mxu1 %v7850_v0 }
  0xfe   : > { %6830 = vmatmul.mubr.msk.bf16.vlgmr.msra.gmra.mxu1 %vm414_vm3, %v406_v33 }
  0xff   : > { %6843 = vmatprep.mubr.msk.bf16.mxu1 %vm7851_vm0, %v7850_v0  ;;  %6840 = vmatpush3.bf16.msra.mxu1 %v8004_v39 }
 0x100   : > { %6841 = vmatprep.subr.bf16.mxu1 %v7850_v0 }
 0x103   : > { %6842 = vmatpush3.bf16.msra.mxu1 %v8008_v42 }
 0x104   : > { %6853 = vmatprep.subr.bf16.mxu1 %v7850_v0 }
 0x1b6   : > { %v452_v45 = vpop.f32.mrf.mxu1  ;;  %v504_v46 = vpop.f32.mrf.mxu0 }
 0x1b7   : > { %v453_v49 = vadd.f32 %v6373_v44, %v452_v45  ;;  %v505_v57 = vadd.f32 %v6375_v50, %v504_v46 }
 0x1b8   : > { %v6815_v47 = vpop.f32.mrf.mxu1  ;;  %v6823_v48 = vpop.f32.mrf.mxu0 }
 0x1b9   : > { %v8025_v60 = vmul.f32 %v8019_v51, %v453_v49  ;;  %v8028_v61 = vmul.f32 %v8022_v52, %v453_v49  ;;  %v573_v13 = vmul.f32 %v8044_v6, %v453_v49  ;;  %v745_v33 = vmul.f32 %v8054_v12, %v453_v49 }
 0x1ba   : > { %v455_v53 = vpop.f32.mrf.mxu1  ;;  %v507_v54 = vpop.f32.mrf.mxu0 }
 0x1bb   : > { %v456_v55 = vadd.f32 %v6373_v44, %v455_v53  ;;  %v508_v56 = vadd.f32 %v6375_v50, %v507_v54 }
 0x1bc   : > { %v6816_v58 = vpop.f32.mrf.mxu1  ;;  %v6824_v59 = vpop.f32.mrf.mxu0 }
 0x1bd   : > { %v8031_v62 = vmul.f32 %v8019_v51, %v456_v55  ;;  %v8034_v63 = vmul.f32 %v8022_v52, %v456_v55  ;;  %v576_v2 = vpack.c.bf16 %v508_v56, %v505_v57  ;;  %v574_v10 = vmul.f32 %v8044_v6, %v456_v55 }
 0x1be   : > { %v556_v3 = vpop.f32.mrf.mxu1  ;;  %v746_v32 = vmul.f32 %v8054_v12, %v456_v55 }
 0x1bf   : > { %v913_v4 = vpack.c.bf16 %v8031_v62, %v8025_v60  ;;  %v1079_v5 = vpack.c.bf16 %v8034_v63, %v8028_v61  ;;  %v557_v7 = vadd.f32 %v6377_v1, %v556_v3  ;;  %v8048_v9 = vsel %vm414_vm3, %v576_v2, 0  ;;  %v6379_v63 = vld [vmem:[%s9224_s4 + $0x11] ss:$0 sm:$0xff] }
 0x1c0   : > { %v6831_v8 = vpop.f32.mrf.mxu1  ;;  %6834 = vmatpush3.bf16.xpose.msra.mxu0 %v8048_v9  ;;  %v575_v25 = vpack.c.bf16 %v574_v10, %v573_v13  ;;  %v747_v34 = vpack.c.bf16 %v746_v32, %v745_v33 }
 0x1c1   : > { %6847 = vmatprep.subr.bf16.mxu0 %v7850_v0  ;;  %v648_v15 = vmul.f32 %v8044_v6, %v557_v7  ;;  %v8059_v16 = vmul.f32 %v8054_v12, %v557_v7  ;;  %v8062_v17 = vmul.f32 %v8019_v51, %v557_v7  ;;  %v8065_v18 = vmul.f32 %v8022_v52, %v557_v7 }
 0x1c2   : > { %v559_v11 = vpop.f32.mrf.mxu1 }
 0x1c3   : > { %v560_v14 = vadd.f32 %v6377_v1, %v559_v11 }
 0x1c4   : > { %v6832_v19 = vpop.f32.mrf.mxu1 }
 0x1c5   : > { %v649_v21 = vmul.f32 %v8044_v6, %v560_v14  ;;  %v8069_v22 = vmul.f32 %v8054_v12, %v560_v14  ;;  %v8072_v23 = vmul.f32 %v8019_v51, %v560_v14  ;;  %v8075_v24 = vmul.f32 %v8022_v52, %v560_v14 }
 0x1c7   : > { %v650_v26 = vpack.c.bf16 %v649_v21, %v648_v15  ;;  %v818_v27 = vpack.c.bf16 %v8069_v22, %v8059_v16  ;;  %v984_v28 = vpack.c.bf16 %v8072_v23, %v8062_v17  ;;  %v1150_v31 = vpack.c.bf16 %v8075_v24, %v8065_v18  ;;  %6836 = vmatmul.mubr.msk.bf16.vlgmr.msra.gmra.mxu0 %vm414_vm3, %v575_v25 }
 0x1c8   : > { %6849 = vmatprep.mubr.msk.bf16.mxu0 %vm7851_vm0, %v7850_v0 }
 0x1c9   : > { %6844 = vmatmul.mubr.msk.bf16.vlgmr.msra.gmra.mxu1 %vm414_vm3, %v650_v26 }
 0x1ca   : > { %6854 = vmatpush3.bf16.xpose.msra.mxu1 %v8048_v9  ;;  %6855 = vmatprep.mubr.msk.bf16.mxu1 %vm7851_vm0, %v7850_v0 }
 0x1cb   : > { %6867 = vmatprep.subr.bf16.mxu1 %v7850_v0 }
 0x1d1   : > { %6856 = vmatmul.mubr.msk.bf16.vlgmr.msra.gmra.mxu1 %vm414_vm3, %v747_v34 }
 0x1d2   : > { %6869 = vmatprep.mubr.msk.bf16.mxu1 %vm7851_vm0, %v7850_v0 }
 0x287   : > { %v617_v35 = vpop.f32.mrf.mxu0 }
 0x288   : > { %v624_v36 = vmul.f32 0.35355338, %v617_v35 }
 0x289   : > { %v690_v37 = vpop.f32.mrf.mxu1  ;;  %v6837_v38 = vpop.f32.mrf.mxu0 }
 0x28a   : > { %v626_v41 = vsel %vm357_vm1, %v624_v36, -inf }
 0x28b   : > { %v6845_v40 = vpop.f32.mrf.mxu1  ;;  %627 = vmax.xlane.f32.xlu0 %v626_v41  ;;  %v620_v43 = vpop.f32.mrf.mxu0 }
 0x28c   : > { %v625_v44 = vmul.f32 0.35355338, %v620_v43 }
 0x28d   : > { %v693_v45 = vpop.f32.mrf.mxu1  ;;  %v6838_v46 = vpop.f32.mrf.mxu0 }
 0x28e   : > { %v698_v47 = vpack.c.bf16 %v693_v45, %v690_v37  ;;  %v629_v49 = vsel %vm357_vm1, %v625_v44, -inf }
 0x28f   : > { %v6846_v48 = vpop.f32.mrf.mxu1  ;;  %630 = vmax.xlane.f32.xlu0 %v629_v49 }
 0x290   : > { %6848 = vmatpush3.bf16.msra.mxu0 %v698_v47 }
 0x291   : > { %v785_v50 = vpop.f32.mrf.mxu1  ;;  %6859 = vmatprep.subr.bf16.mxu0 %v7850_v0 }
 0x292   : > { %v792_v53 = vmul.f32 0.35355338, %v785_v50 }
 0x293   : > { %v6857_v54 = vpop.f32.mrf.mxu1 }
 0x294   : > { %v794_v55 = vsel %vm357_vm1, %v792_v53, -inf }
 0x295   : > { %v788_v56 = vpop.f32.mrf.mxu1  ;;  %795 = vmax.xlane.f32.xlu0 %v794_v55 }
 0x296   : > { %v793_v19 = vmul.f32 0.35355338, %v788_v56 }
 0x297   : > { %v6858_v57 = vpop.f32.mrf.mxu1 }
 0x298   : > { %v797_v26 = vsel %vm357_vm1, %v793_v19, -inf }
 0x314   : > { %v628_v58 = vpop.xlane.xlu0 %627 }
 0x315   : > { %v632_v59 = vsub.f32 %v624_v36, %v628_v58 }
 0x317   : > { %v634_v1 = vmul.f32 1.442695, %v632_v59 }
 0x318   : > { %v631_v2 = vpop.xlane.xlu0 %630 }
 0x319   : > { %7599 = vpow2.f32 %v634_v1  ;;  %v633_v3 = vsub.f32 %v625_v44, %v631_v2 }
 0x31b   : > { %v636_v7 = vmul.f32 1.442695, %v633_v3 }
 0x31d   : > { %7601 = vpow2.f32 %v636_v7 }
 0x31e   : > { %v796_v8 = vpop.xlane.xlu0 %795 }
 0x31f   : > { %v800_v10 = vsub.f32 %v792_v53, %v796_v8 }
 0x321   : > { %v802_v11 = vmul.f32 1.442695, %v800_v10 }
 0x323   : > { %7603 = vpow2.f32 %v802_v11 }
 0x326   : > { %v7600_v13 = vpop.eup %7599 }
 0x327   : > { %v638_v14 = vsel %vm357_vm1, %v7600_v13, 0.0 }
 0x328   : > { %639 = vadd.xlane.f32.xlu1 %v638_v14 }
 0x32a   : > { %v7602_v15 = vpop.eup %7601 }
 0x32b   : > { %v641_v21 = vsel %vm357_vm1, %v7602_v15, 0.0 }
 0x32c   : > { %642 = vadd.xlane.f32.xlu1 %v641_v21 }
 0x330   : > { %v7604_v25 = vpop.eup %7603  ;;  %798 = vmax.xlane.f32.xlu1 %v797_v26 }
 0x331   : > { %v806_v32 = vsel %vm357_vm1, %v7604_v25, 0.0 }
 0x332   : > { %807 = vadd.xlane.f32.xlu0 %v806_v32 }
 0x3b1   : > { %v640_v33 = vpop.xlane.xlu1 %639 }
 0x3b2   : > { %7605 = vrcp.f32 %v640_v33 }
 0x3b5   : > { %v643_v34 = vpop.xlane.xlu1 %642 }
 0x3b6   : > { %7607 = vrcp.f32 %v643_v34 }
 0x3b9   : > { %v799_v35 = vpop.xlane.xlu1 %798 }
 0x3ba   : > { %v801_v36 = vsub.f32 %v793_v19, %v799_v35 }
 0x3bb   : > { %v808_v48 = vpop.xlane.xlu0 %807 }
 0x3bc   : > { %v804_v37 = vmul.f32 1.442695, %v801_v36 }
 0x3be   : > { %7609 = vpow2.f32 %v804_v37 }
 0x3bf   : > { %v7606_v38 = vpop.eup %7605 }
 0x3c0   : > { %v646_v41 = vmul.f32 %v7606_v38, %v7600_v13 }
 0x3c3   : > { %v7608_v40 = vpop.eup %7607 }
 0x3c4   : > { %v647_v43 = vmul.f32 %v7608_v40, %v7602_v15 }
 0x3c6   : > { %v697_v44 = vpack.c.bf16 %v647_v43, %v646_v41 }
 0x3c8   : > { %6850 = vmatmul.mubr.msk.bf16.vlgmr.msra.gmra.mxu0 %vm357_vm1, %v697_v44 }
 0x3c9   : > { %6860 = vmatpush3.bf16.msra.mxu0 %v8004_v39  ;;  %6863 = vmatprep.mubr.msk.bf16.mxu0 %vm7851_vm0, %v7850_v0 }
 0x3ca   : > { %6861 = vmatprep.subr.bf16.mxu0 %v7850_v0 }
 0x3cb   : > { %v7610_v45 = vpop.eup %7609 }
 0x3cc   : > { %v809_v46 = vsel %vm357_vm1, %v7610_v45, 0.0 }
 0x3cd   : > { %6862 = vmatpush3.bf16.msra.mxu0 %v8008_v42  ;;  %810 = vadd.xlane.f32.xlu1 %v809_v46 }
 0x3ce   : > { %6873 = vmatprep.subr.bf16.mxu0 %v7850_v0 }
 0x3d0   : > { %6864 = vmatmul.mubr.msk.bf16.vlgmr.msra.gmra.mxu0 %vm414_vm3, %v818_v27 }
 0x3d1   : > { %6874 = vmatpush3.bf16.xpose.msra.mxu0 %v8048_v9  ;;  %6875 = vmatprep.mubr.msk.bf16.mxu0 %vm7851_vm0, %v7850_v0 }
 0x3d2   : > { %6887 = vmatprep.subr.bf16.mxu0 %v7850_v0 }
 0x3d8   : > { %6876 = vmatmul.mubr.msk.bf16.vlgmr.msra.gmra.mxu0 %vm414_vm3, %v913_v4 }
 0x3d9   : > { %6889 = vmatprep.mubr.msk.bf16.mxu0 %vm7851_vm0, %v7850_v0 }
 0x456   : > { %v811_v47 = vpop.xlane.xlu1 %810 }
 0x457   : > { %7611 = vrcp.f32 %v811_v47 }
 0x458   : > { %7613 = vrcp.f32 %v808_v48 }
 0x464   : > { %v7612_v53 = vpop.eup %7611 }
 0x465   : > { %v7614_v55 = vpop.eup %7613  ;;  %v815_v57 = vmul.f32 %v7612_v53, %v7610_v45 }
 0x466   : > { %v814_v4 = vmul.f32 %v7614_v55, %v7604_v25 }
 0x468   : > { %v863_v59 = vpack.c.bf16 %v815_v57, %v814_v4 }
 0x488   : > { %v736_v16 = vpop.f32.mrf.mxu0 }
 0x48a   : > { %v6851_v22 = vpop.f32.mrf.mxu0 }
 0x48c   : > { %v739_v27 = vpop.f32.mrf.mxu0 }
 0x48d   : > { %v744_v33 = vadd.f32 %v6379_v63, %v739_v27 }
 0x48e   : > { %v6852_v49 = vpop.f32.mrf.mxu0 }
 0x490   : > { %v856_v50 = vpop.f32.mrf.mxu0 }
 0x492   : > { %v6865_v54 = vpop.f32.mrf.mxu0 }
 0x494   : > { %v859_v56 = vpop.f32.mrf.mxu0 }
 0x495   : > { %v864_v60 = vpack.c.bf16 %v859_v56, %v856_v50 }
 0x496   : > { %v6866_v62 = vpop.f32.mrf.mxu0 }
 0x497   : > { %6868 = vmatpush3.bf16.msra.mxu1 %v864_v60 }
 0x498   : > { %v951_v58 = vpop.f32.mrf.mxu0  ;;  %6879 = vmatprep.subr.bf16.mxu1 %v7850_v0 }
 0x499   : > { %v958_v1 = vmul.f32 0.35355338, %v951_v58 }
 0x49a   : > { %6870 = vmatmul.mubr.msk.bf16.vlgmr.msra.gmra.mxu1 %vm357_vm1, %v863_v59  ;;  %v6877_v2 = vpop.f32.mrf.mxu0 }
 0x49b   : > { %6880 = vmatpush3.bf16.msra.mxu1 %v8004_v39  ;;  %v960_v3 = vsel %vm357_vm1, %v958_v1, -inf  ;;  %6883 = vmatprep.mubr.msk.bf16.mxu1 %vm7851_vm0, %v7850_v0 }
 0x49c   : > { %961 = vmax.xlane.f32.xlu0 %v960_v3  ;;  %v954_v7 = vpop.f32.mrf.mxu0  ;;  %6881 = vmatprep.subr.bf16.mxu1 %v7850_v0 }
 0x49d   : > { %v959_v8 = vmul.f32 0.35355338, %v954_v7 }
 0x49e   : > { %v6878_v10 = vpop.f32.mrf.mxu0 }
 0x49f   : > { %6882 = vmatpush3.bf16.msra.mxu1 %v8008_v42  ;;  %v963_v11 = vsel %vm357_vm1, %v959_v8, -inf }
 0x4a0   : > { %964 = vmax.xlane.f32.xlu1 %v963_v11  ;;  %6893 = vmatprep.subr.bf16.mxu1 %v7850_v0 }
 0x4a2   : > { %6884 = vmatmul.mubr.msk.bf16.vlgmr.msra.gmra.mxu1 %vm414_vm3, %v984_v28 }
 0x4a3   : > { %6894 = vmatpush3.bf16.xpose.msra.mxu1 %v8048_v9  ;;  %6895 = vmatprep.mubr.msk.bf16.mxu1 %vm7851_vm0, %v7850_v0 }
 0x4a4   : > { %6907 = vmatprep.subr.bf16.mxu1 %v7850_v0 }
 0x4aa   : > { %6896 = vmatmul.mubr.msk.bf16.vlgmr.msra.gmra.mxu1 %vm414_vm3, %v1079_v5  ;;  %v743_v5 = vadd.f32 %v6379_v63, %v736_v16 }
 0x4ab   : > { %6909 = vmatprep.mubr.msk.bf16.mxu1 %vm7851_vm0, %v7850_v0 }
 0x525   : > { %v962_v13 = vpop.xlane.xlu0 %961 }
 0x526   : > { %v966_v14 = vsub.f32 %v958_v1, %v962_v13 }
 0x528   : > { %v968_v17 = vmul.f32 1.442695, %v966_v14 }
 0x529   : > { %v965_v23 = vpop.xlane.xlu1 %964 }
 0x52a   : > { %7615 = vpow2.f32 %v968_v17  ;;  %v967_v28 = vsub.f32 %v959_v8, %v965_v23 }
 0x52c   : > { %v970_v9 = vmul.f32 1.442695, %v967_v28 }
 0x52e   : > { %7617 = vpow2.f32 %v970_v9 }
 0x537   : > { %v7616_v15 = vpop.eup %7615 }
 0x538   : > { %v972_v19 = vsel %vm357_vm1, %v7616_v15, 0.0 }
 0x539   : > { %973 = vadd.xlane.f32.xlu0 %v972_v19 }
 0x53b   : > { %v7618_v21 = vpop.eup %7617 }
 0x53c   : > { %v975_v61 = vsel %vm357_vm1, %v7618_v21, 0.0 }
 0x53d   : > { %976 = vadd.xlane.f32.xlu1 %v975_v61 }
 0x55a   : > { %v902_v25 = vpop.f32.mrf.mxu1 }
 0x55b   : > { %v909_v26 = vadd.f32 %v902_v25, %v743_v5 }
 0x55c   : > { %v6871_v32 = vpop.f32.mrf.mxu1 }
 0x55e   : > { %v905_v34 = vpop.f32.mrf.mxu1 }
 0x55f   : > { %v910_v35 = vadd.f32 %v905_v34, %v744_v33 }
 0x560   : > { %v6872_v36 = vpop.f32.mrf.mxu1 }
 0x562   : > { %v1022_v37 = vpop.f32.mrf.mxu1 }
 0x564   : > { %v6885_v38 = vpop.f32.mrf.mxu1 }
 0x566   : > { %v1025_v40 = vpop.f32.mrf.mxu1 }
 0x567   : > { %v1030_v41 = vpack.c.bf16 %v1025_v40, %v1022_v37 }
 0x568   : > { %v6886_v43 = vpop.f32.mrf.mxu1 }
 0x569   : > { %6888 = vmatpush3.bf16.msra.mxu0 %v1030_v41 }
 0x56a   : > { %v1117_v44 = vpop.f32.mrf.mxu1  ;;  %6899 = vmatprep.subr.bf16.mxu0 %v7850_v0 }
 0x56b   : > { %v1124_v45 = vmul.f32 0.35355338, %v1117_v44 }
 0x56c   : > { %v6897_v46 = vpop.f32.mrf.mxu1 }
 0x56d   : > { %v1126_v47 = vsel %vm357_vm1, %v1124_v45, -inf }
 0x56e   : > { %v1120_v48 = vpop.f32.mrf.mxu1  ;;  %1127 = vmax.xlane.f32.xlu0 %v1126_v47 }
 0x56f   : > { %v1125_v16 = vmul.f32 0.35355338, %v1120_v48 }
 0x570   : > { %v6898_v22 = vpop.f32.mrf.mxu1 }
 0x571   : > { %v1129_v27 = vsel %vm357_vm1, %v1125_v16, -inf  ;;  %v1288_v22 = vld [vmem:[#allocation2 + $0x110] sm:$0xff] }
 0x572   : > { %1130 = vmax.xlane.f32.xlu1 %v1129_v27  ;;  %v1289_v27 = vld [vmem:[#allocation2 + $0x118] sm:$0xff] }
 0x5c2   : > { %v974_v49 = vpop.xlane.xlu0 %973 }
 0x5c3   : > { %7619 = vrcp.f32 %v974_v49  ;;  %v1286_v49 = vld [vmem:[#allocation2 + $0x100] sm:$0xff] }
 0x5c6   : > { %v977_v50 = vpop.xlane.xlu1 %976 }
 0x5c7   : > { %7621 = vrcp.f32 %v977_v50  ;;  %v1287_v50 = vld [vmem:[#allocation2 + $0x108] sm:$0xff] }
 0x5d0   : > { %v7620_v53 = vpop.eup %7619 }
 0x5d1   : > { %v980_v55 = vmul.f32 %v7620_v53, %v7616_v15  ;;  %v1291_v53 = vpack.c.bf16 %v1287_v50, %v1286_v49 }
 0x5d4   : > { %v7622_v54 = vpop.eup %7621 }
 0x5d5   : > { %v981_v56 = vmul.f32 %v7622_v54, %v7618_v21  ;;  %v1350_v54 = vld [vmem:[#allocation2 + $0x150] sm:$0xff] }
 0x5d7   : > { %v1029_v57 = vpack.c.bf16 %v981_v56, %v980_v55  ;;  %v1351_v55 = vld [vmem:[#allocation2 + $0x158] sm:$0xff] }
 0x5d8   : > { %v1356_v56 = vpack.c.bf16 %v1351_v55, %v1350_v54 }
 0x5d9   : > { %6890 = vmatmul.mubr.msk.bf16.vlgmr.msra.gmra.mxu0 %vm357_vm1, %v1029_v57 }
 0x5da   : > { %6900 = vmatpush3.bf16.msra.mxu0 %v8004_v39  ;;  %6903 = vmatprep.mubr.msk.bf16.mxu0 %vm7851_vm0, %v7850_v0 }
 0x5db   : > { %6901 = vmatprep.subr.bf16.mxu0 %v7850_v0 }
 0x5de   : > { %6902 = vmatpush3.bf16.msra.mxu0 %v8008_v42 }
 0x5df   : > { %6913 = vmatprep.subr.bf16.mxu0 %v7850_v0 }
 0x5e1   : > { %6904 = vmatmul.mubr.msk.bf16.vlgmr.msra.gmra.mxu0 %vm414_vm3, %v1150_v31 }
 0x5e2   : > { %6917 = vmatprep.mubr.msk.bf16.mxu0 %vm7851_vm0, %v7850_v0 }
 0x5f7   : > { %v1128_v60 = vpop.xlane.xlu0 %1127 }
 0x5f8   : > { %v1132_v62 = vsub.f32 %v1124_v45, %v1128_v60 }
 0x5fa   : > { %v1134_v39 = vmul.f32 1.442695, %v1132_v62 }
 0x5fb   : > { %v1131_v4 = vpop.xlane.xlu1 %1130 }
 0x5fc   : > { %7623 = vpow2.f32 %v1134_v39  ;;  %v1133_v58 = vsub.f32 %v1125_v16, %v1131_v4 }
 0x5fe   : > { %v1136_v59 = vmul.f32 1.442695, %v1133_v58 }
 0x600   : > { %7625 = vpow2.f32 %v1136_v59 }
 0x609   : > { %v7624_v1 = vpop.eup %7623 }
 0x60a   : > { %v1138_v42 = vsel %vm357_vm1, %v7624_v1, 0.0 }
 0x60b   : > { %1139 = vadd.xlane.f32.xlu0 %v1138_v42  ;;  %v6392_v42 = vld [vmem:[%s9224_s4 + $0x12] ss:$0 sm:$0xff] }
 0x60d   : > { %v7626_v2 = vpop.eup %7625 }
 0x60e   : > { %v1141_v18 = vsel %vm357_vm1, %v7626_v2, 0.0 }
 0x60f   : > { %1142 = vadd.xlane.f32.xlu1 %v1141_v18 }
 0x694   : > { %v1140_v24 = vpop.xlane.xlu0 %1139 }
 0x695   : > { %7627 = vrcp.f32 %v1140_v24 }
 0x698   : > { %v1143_v31 = vpop.xlane.xlu1 %1142 }
 0x699   : > { %7629 = vrcp.f32 %v1143_v31  ;;  %v1068_v3 = vpop.f32.mrf.mxu0  ;;  %v6393_v31 = vld [vmem:[%s9224_s4 + $0x13] ss:$0 sm:$0xff] }
 0x69a   : > { %v1075_v7 = vadd.f32 %v1068_v3, %v909_v26 }
 0x69b   : > { %v6891_v8 = vpop.f32.mrf.mxu0 }
 0x69d   : > { %v1071_v10 = vpop.f32.mrf.mxu0 }
 0x69e   : > { %v1076_v11 = vadd.f32 %v1071_v10, %v910_v35 }
 0x69f   : > { %v6892_v13 = vpop.f32.mrf.mxu0 }
 0x6a0   : > { %v1349_v13 = vld [vmem:[#allocation2 + $0x148] sm:$0xff] }
 0x6a1   : > { %v1188_v14 = vpop.f32.mrf.mxu0 }
 0x6a2   : > { %v7628_v23 = vpop.eup %7627 }
 0x6a3   : > { %v6905_v17 = vpop.f32.mrf.mxu0  ;;  %v1146_v21 = vmul.f32 %v7628_v23, %v7624_v1  ;;  %v1347_v23 = vld [vmem:[#allocation2 + $0x138] sm:$0xff] }
 0x6a4   : > { %v1346_v17 = vld [vmem:[#allocation2 + $0x130] sm:$0xff] }
 0x6a5   : > { %v1191_v28 = vpop.f32.mrf.mxu0 }
 0x6a6   : > { %v7630_v9 = vpop.eup %7629  ;;  %v1196_v15 = vpack.c.bf16 %v1191_v28, %v1188_v14  ;;  %v1354_v28 = vpack.c.bf16 %v1347_v23, %v1346_v17 }
 0x6a7   : > { %v6906_v19 = vpop.f32.mrf.mxu0  ;;  %v1147_v61 = vmul.f32 %v7630_v9, %v7626_v2  ;;  %v1344_v9 = vld [vmem:[#allocation2 + $0x120] sm:$0xff] }
 0x6a8   : > { %6908 = vmatpush3.bf16.msra.mxu1 %v1196_v15  ;;  %v1345_v15 = vld [vmem:[#allocation2 + $0x128] sm:$0xff] }
 0x6a9   : > { %v1195_v63 = vpack.c.bf16 %v1147_v61, %v1146_v21  ;;  %6921 = vmatprep.subr.bf16.mxu1 %v7850_v0  ;;  %v1353_v19 = vpack.c.bf16 %v1345_v15, %v1344_v9  ;;  %v6394_v21 = vld [vmem:[%s9224_s4 + $0x16] ss:$0 sm:$0xff]  ;;  %v6399_v9 = vld [vmem:[%s9224_s4 + $0x15] ss:$0 sm:$0xff] }
 0x6ab   : > { %6910 = vmatmul.mubr.msk.bf16.vlgmr.msra.gmra.mxu1 %vm357_vm1, %v1195_v63 }
 0x6ac   : > { %6929 = vmatprep.mubr.msk.bf16.mxu1 %vm7851_vm0, %v7850_v0  ;;  %6922 = vmatpush3.bf16.msra.mxu1 %v1356_v56  ;;  %v1451_v56 = vld [vmem:[#allocation2 + $0x170] sm:$0xff] }
 0x6ad   : > { %6923 = vmatprep.subr.bf16.mxu1 %v7850_v0 }
 0x76b   : > { %v1234_v5 = vpop.f32.mrf.mxu1 }
 0x76c   : > { %v1241_v25 = vadd.f32 %v1234_v5, %v1075_v7 }
 0x76d   : > { %v6911_v26 = vpop.f32.mrf.mxu1 }
 0x76e   : > { %v1243_v32 = vadd.f32 %v1241_v25, %v7987_v29 }
 0x76f   : > { %v1237_v33 = vpop.f32.mrf.mxu1 }
 0x770   : > { %v1242_v34 = vadd.f32 %v1237_v33, %v1076_v11  ;;  %v1247_v35 = vsel %vm414_vm3, %v1243_v32, 0.0  ;;  %v1348_v11 = vld [vmem:[#allocation2 + $0x140] sm:$0xff] }
 0x771   : > { %1248 = vadd.xlane.f32.xlu0 %v1247_v35  ;;  %v6912_v36 = vpop.f32.mrf.mxu1  ;;  %v1355_v14 = vpack.c.bf16 %v1349_v13, %v1348_v11 }
 0x772   : > { %v1244_v37 = vadd.f32 %v1242_v34, %v7989_v30  ;;  %v1292_v30 = vpack.c.bf16 %v1289_v27, %v1288_v22  ;;  %v6396_v36 = vld [vmem:[%s9224_s4 + $0x17] ss:$0 sm:$0xff] }
 0x773   : > { %6924 = vmatpush3.bf16.msra.mxu1 %v1355_v14  ;;  %v6398_v14 = vld [vmem:[%s9224_s4 + $0x14] ss:$0 sm:$0xff] }
 0x774   : > { %v1250_v38 = vsel %vm414_vm3, %v1244_v37, 0.0  ;;  %6914 = vmatpush3.bf16.msra.mxu0 %v1292_v30  ;;  %6925 = vmatprep.subr.bf16.mxu1 %v7850_v0 }
 0x775   : > { %1251 = vadd.xlane.f32.xlu1 %v1250_v38  ;;  %6915 = vmatprep.subr.bf16.mxu0 %v7850_v0 }
 0x777   : > { %6926 = vmatpush3.bf16.msra.mxu1 %v1354_v28 }
 0x778   : > { %6916 = vmatpush3.bf16.msra.mxu0 %v1291_v53  ;;  %6927 = vmatprep.subr.bf16.mxu1 %v7850_v0 }
 0x779   : > { %6933 = vmatprep.subr.bf16.mxu0 %v7850_v0 }
 0x77b   : > { %6928 = vmatpush3.bf16.msra.mxu1 %v1353_v19  ;;  %v1507_v19 = vld [vmem:[#allocation2 + $0x190] sm:$0xff] }
 0x77c   : > { %6949 = vmatprep.subr.bf16.mxu1 %v7850_v0 }
 0x7fa   : > { %v1249_v40 = vpop.xlane.xlu0 %1248 }
 0x7fb   : > { %v1254_v41 = vmul.f32 0.03125, %v1249_v40 }
 0x7fd   : > { %v1256_v43 = vsub.f32 %v1243_v32, %v1254_v41 }
 0x7fe   : > { %v1252_v44 = vpop.xlane.xlu1 %1251 }
 0x7ff   : > { %v1255_v45 = vmul.f32 0.03125, %v1252_v44  ;;  %v1258_v46 = vmul.f32 %v1256_v43, %v1256_v43 }
 0x801   : > { %v1257_v47 = vsub.f32 %v1244_v37, %v1255_v45  ;;  %v1260_v29 = vsel %vm414_vm3, %v1258_v46, 0.0 }
 0x802   : > { %1261 = vadd.xlane.f32.xlu0 %v1260_v29 }
 0x803   : > { %v1259_v48 = vmul.f32 %v1257_v47, %v1257_v47 }
 0x805   : > { %v1263_v16 = vsel %vm414_vm3, %v1259_v48, 0.0 }
 0x806   : > { %1264 = vadd.xlane.f32.xlu1 %v1263_v16 }
 0x88b   : > { %v1262_v57 = vpop.xlane.xlu0 %1261 }
 0x88c   : > { %v1266_v60 = vmul.f32 0.03125, %v1262_v57  ;;  %v1452_v57 = vld [vmem:[#allocation2 + $0x178] sm:$0xff] }
 0x88e   : > { %v1268_v62 = vadd.f32 1e-05, %v1266_v60  ;;  %v1559_v60 = vld [vmem:[#allocation2 + $0x1b0] sm:$0xff] }
 0x88f   : > { %v1265_v39 = vpop.xlane.xlu1 %1264 }
 0x890   : > { %7631 = vrsqrt.f32 %v1268_v62  ;;  %v1267_v4 = vmul.f32 0.03125, %v1265_v39  ;;  %v1455_v62 = vpack.c.bf16 %v1452_v57, %v1451_v56  ;;  %v1560_v39 = vld [vmem:[#allocation2 + $0x1b8] sm:$0xff] }
 0x892   : > { %v1269_v58 = vadd.f32 1e-05, %v1267_v4  ;;  %v1449_v4 = vld [vmem:[#allocation2 + $0x160] sm:$0xff] }
 0x894   : > { %7633 = vrsqrt.f32 %v1269_v58  ;;  %v1450_v58 = vld [vmem:[#allocation2 + $0x168] sm:$0xff] }
 0x89d   : > { %v7632_v59 = vpop.eup %7631 }
 0x89e   : > { %v1272_v1 = vmul.f32 %v7632_v59, %v1256_v43  ;;  %v1562_v59 = vpack.c.bf16 %v1560_v39, %v1559_v60 }
 0x8a0   : > { %v1278_v24 = vmul.f32 %v6392_v42, %v1272_v1  ;;  %v1557_v1 = vld [vmem:[#allocation2 + $0x1a0] sm:$0xff] }
 0x8a1   : > { %v7634_v2 = vpop.eup %7633 }
 0x8a2   : > { %v1273_v18 = vmul.f32 %v7634_v2, %v1257_v47  ;;  %v1284_v7 = vadd.f32 %v6393_v31, %v1278_v24  ;;  %v1454_v2 = vpack.c.bf16 %v1450_v58, %v1449_v4 }
 0x8a4   : > { %v1279_v3 = vmul.f32 %v6392_v42, %v1273_v18  ;;  %v1558_v42 = vld [vmem:[#allocation2 + $0x1a8] sm:$0xff] }
 0x8a5   : > { %v1561_v18 = vpack.c.bf16 %v1558_v42, %v1557_v1 }
 0x8a6   : > { %v1285_v8 = vadd.f32 %v6393_v31, %v1279_v3 }
 0x8a8   : > { %v1290_v10 = vpack.c.bf16 %v1285_v8, %v1284_v7 }
 0x8aa   : > { %6918 = vmatmul.mubr.msk.bf16.vlgmr.msra.gmra.mxu0 %vm414_vm3, %v1290_v10 }
 0x8ab   : > { %6937 = vmatprep.mubr.msk.bf16.mxu0 %vm7851_vm0, %v7850_v0  ;;  %6934 = vmatpush3.bf16.msra.mxu0 %v1455_v62 }
 0x8ac   : > { %6935 = vmatprep.subr.bf16.mxu0 %v7850_v0 }
 0x8af   : > { %6936 = vmatpush3.bf16.msra.mxu0 %v1454_v2 }
 0x8b0   : > { %6941 = vmatprep.subr.bf16.mxu0 %v7850_v0 }
 0x96a   : > { %v1335_v61 = vpop.f32.mrf.mxu0 }
 0x96b   : > { %v1336_v5 = vadd.f32 %v6394_v21, %v1335_v61 }
 0x96c   : > { %v6919_v63 = vpop.f32.mrf.mxu0 }
 0x96d   : > { %v1342_v33 = vmax.f32 %v1336_v5, 0.0 }
 0x96e   : > { %v1338_v25 = vpop.f32.mrf.mxu0 }
 0x96f   : > { %v1339_v26 = vadd.f32 %v6394_v21, %v1338_v25  ;;  %v1508_v21 = vld [vmem:[#allocation2 + $0x198] sm:$0xff] }
 0x970   : > { %v6920_v32 = vpop.f32.mrf.mxu0  ;;  %v1510_v5 = vpack.c.bf16 %v1508_v21, %v1507_v19 }
 0x971   : > { %v1343_v34 = vmax.f32 %v1339_v26, 0.0  ;;  %v1505_v26 = vld [vmem:[#allocation2 + $0x180] sm:$0xff]  ;;  %v1506_v32 = vld [vmem:[#allocation2 + $0x188] sm:$0xff] }
 0x973   : > { %v1352_v35 = vpack.c.bf16 %v1343_v34, %v1342_v33  ;;  %v1509_v33 = vpack.c.bf16 %v1506_v32, %v1505_v26  ;;  %v1611_v34 = vld [vmem:[#allocation2 + $0x1d0] sm:$0xff] }
 0x975   : > { %6930 = vmatmul.mubr.msk.bf16.vlgmr.msra.gmra.mxu1 %vm1362_vm14, %v1352_v35  ;;  %v1612_v35 = vld [vmem:[#allocation2 + $0x1d8] sm:$0xff] }
 0x976   : > { %6953 = vmatprep.mubr.msk.bf16.mxu1 %vm7851_vm0, %v7850_v0  ;;  %6950 = vmatpush3.bf16.msra.mxu1 %v1562_v59 }
 0x977   : > { %6951 = vmatprep.subr.bf16.mxu1 %v7850_v0 }
 0x97a   : > { %6952 = vmatpush3.bf16.msra.mxu1 %v1561_v18 }
 0x97b   : > { %6963 = vmatprep.subr.bf16.mxu1 %v7850_v0 }
 0xa35   : > { %v1400_v37 = vpop.f32.mrf.mxu1 }
 0xa36   : > { %v1401_v38 = vadd.f32 %v6396_v36, %v1400_v37  ;;  %v1609_v37 = vld [vmem:[#allocation2 + $0x1c0] sm:$0xff] }
 0xa37   : > { %v6931_v40 = vpop.f32.mrf.mxu1 }
 0xa38   : > { %v1407_v41 = vadd.f32 %v1401_v38, %v1284_v7  ;;  %v1610_v38 = vld [vmem:[#allocation2 + $0x1c8] sm:$0xff] }
 0xa39   : > { %v1403_v43 = vpop.f32.mrf.mxu1  ;;  %v8242_v40 = vpack.c.bf16 %v1610_v38, %v1609_v37 }
 0xa3a   : > { %v1404_v44 = vadd.f32 %v6396_v36, %v1403_v43  ;;  %v1411_v45 = vsel %vm414_vm3, %v1407_v41, 0.0  ;;  %v8238_v36 = vpack.c.bf16 %v1612_v35, %v1611_v34  ;;  %v6404_v43 = vld [vmem:[%s9224_s4 + $0x1a] ss:$0 sm:$0xff] }
 0xa3b   : > { %1412 = vadd.xlane.f32.xlu0 %v1411_v45  ;;  %v6932_v46 = vpop.f32.mrf.mxu1 }
 0xa3c   : > { %v1408_v47 = vadd.f32 %v1404_v44, %v1285_v8 }
 0xa3e   : > { %v1414_v29 = vsel %vm414_vm3, %v1408_v47, 0.0 }
 0xa3f   : > { %1415 = vadd.xlane.f32.xlu1 %v1414_v29 }
 0xac4   : > { %v1413_v48 = vpop.xlane.xlu0 %1412 }
 0xac5   : > { %v1417_v16 = vmul.f32 0.03125, %v1413_v48 }
 0xac7   : > { %v1419_v22 = vsub.f32 %v1407_v41, %v1417_v16  ;;  %v6400_v41 = vld [vmem:[%s9224_s4 + $0x18] ss:$0 sm:$0xff] }
 0xac8   : > { %v1416_v27 = vpop.xlane.xlu1 %1415 }
 0xac9   : > { %v1418_v30 = vmul.f32 0.03125, %v1416_v27  ;;  %v1421_v49 = vmul.f32 %v1419_v22, %v1419_v22 }
 0xacb   : > { %v1420_v50 = vsub.f32 %v1408_v47, %v1418_v30  ;;  %v1423_v53 = vsel %vm414_vm3, %v1421_v49, 0.0 }
 0xacc   : > { %1424 = vadd.xlane.f32.xlu0 %v1423_v53 }
 0xacd   : > { %v1422_v54 = vmul.f32 %v1420_v50, %v1420_v50 }
 0xacf   : > { %v1426_v55 = vsel %vm414_vm3, %v1422_v54, 0.0 }
 0xad0   : > { %1427 = vadd.xlane.f32.xlu1 %v1426_v55 }
 0xb55   : > { %v1425_v24 = vpop.xlane.xlu0 %1424 }
 0xb56   : > { %v1429_v31 = vmul.f32 0.03125, %v1425_v24 }
 0xb58   : > { %v1431_v3 = vadd.f32 1e-05, %v1429_v31 }
 0xb59   : > { %v1428_v7 = vpop.xlane.xlu1 %1427 }
 0xb5a   : > { %7635 = vrsqrt.f32 %v1431_v3  ;;  %v1430_v8 = vmul.f32 0.03125, %v1428_v7 }
 0xb5c   : > { %v1432_v10 = vadd.f32 1e-05, %v1430_v8  ;;  %v6402_v8 = vld [vmem:[%s9224_s4 + $0x19] ss:$0 sm:$0xff] }
 0xb5e   : > { %7637 = vrsqrt.f32 %v1432_v10 }
 0xb67   : > { %v7636_v11 = vpop.eup %7635 }
 0xb68   : > { %v1435_v13 = vmul.f32 %v7636_v11, %v1419_v22 }
 0xb6a   : > { %v1441_v28 = vmul.f32 %v6398_v14, %v1435_v13 }
 0xb6b   : > { %v7638_v17 = vpop.eup %7637 }
 0xb6c   : > { %v1436_v23 = vmul.f32 %v7638_v17, %v1420_v50  ;;  %v8221_v61 = vadd.f32 %v6399_v9, %v1441_v28 }
 0xb6e   : > { %v1442_v15 = vmul.f32 %v6398_v14, %v1436_v23 }
 0xb70   : > { %v8223_v63 = vadd.f32 %v6399_v9, %v1442_v15 }
 0xb72   : > { %v1453_v25 = vpack.c.bf16 %v8223_v63, %v8221_v61 }
 0xb74   : > { %6938 = vmatmul.mubr.msk.bf16.vlgmr.msra.gmra.mxu0 %vm414_vm3, %v1453_v25  ;;  %6954 = vmatmul.mubr.msk.bf16.vlgmr.msra.gmra.mxu1 %vm414_vm3, %v1453_v25 }
 0xb75   : > { %6942 = vmatpush3.bf16.msra.mxu0 %v1510_v5  ;;  %6945 = vmatprep.mubr.msk.bf16.mxu0 %vm7851_vm0, %v7850_v0 }
 0xb76   : > { %6943 = vmatprep.subr.bf16.mxu0 %v7850_v0  ;;  %6967 = vmatprep.mubr.msk.bf16.mxu1 %vm7851_vm0, %v7850_v0 }
 0xb77   : > { %6964 = vmatpush3.bf16.msra.mxu1 %v8238_v36 }
 0xb78   : > { %6965 = vmatprep.subr.bf16.mxu1 %v7850_v0 }
 0xb79   : > { %6944 = vmatpush3.bf16.msra.mxu0 %v1509_v33 }
 0xb7a   : > { %6957 = vmatprep.subr.bf16.mxu0 %v7850_v0 }
 0xb7b   : > { %6966 = vmatpush3.bf16.msra.mxu1 %v8242_v40 }
 0xb7c   : > { %6946 = vmatmul.mubr.msk.bf16.vlgmr.msra.gmra.mxu0 %vm414_vm3, %v1453_v25  ;;  %6977 = vmatprep.subr.bf16.mxu1 %v7850_v0 }
 0xb7d   : > { %6959 = vmatprep.mubr.msk.bf16.mxu0 %vm7851_vm0, %v7850_v0 }
 0xc34   : > { %v1498_v44 = vpop.f32.mrf.mxu0  ;;  %v1602_v45 = vpop.f32.mrf.mxu1 }
 0xc35   : > { %v1499_v46 = vadd.f32 %v6400_v41, %v1498_v44  ;;  %v1603_v47 = vadd.f32 %v6404_v43, %v1602_v45 }
 0xc36   : > { %v6939_v29 = vpop.f32.mrf.mxu0  ;;  %v6955_v48 = vpop.f32.mrf.mxu1 }
 0xc37   : > { %v8253_v49 = vmul.f32 %v8019_v51, %v1499_v46  ;;  %v8256_v50 = vmul.f32 %v8022_v52, %v1499_v46  ;;  %v1694_v53 = vmul.f32 %v8044_v6, %v1603_v47  ;;  %v8260_v54 = vmul.f32 %v8054_v12, %v1603_v47 }
 0xc38   : > { %v1501_v16 = vpop.f32.mrf.mxu0  ;;  %v1605_v22 = vpop.f32.mrf.mxu1  ;;  %v8263_v57 = vmul.f32 %v8019_v51, %v1603_v47  ;;  %v8266_v60 = vmul.f32 %v8022_v52, %v1603_v47  ;;  %v1619_v19 = vmul.f32 %v8044_v6, %v1499_v46  ;;  %v1791_v21 = vmul.f32 %v8054_v12, %v1499_v46 }
 0xc39   : > { %v1502_v27 = vadd.f32 %v6400_v41, %v1501_v16  ;;  %v1606_v30 = vadd.f32 %v6404_v43, %v1605_v22 }
 0xc3a   : > { %v6940_v55 = vpop.f32.mrf.mxu0  ;;  %v6956_v56 = vpop.f32.mrf.mxu1 }
 0xc3b   : > { %v8269_v62 = vmul.f32 %v8019_v51, %v1502_v27  ;;  %v8272_v39 = vmul.f32 %v8022_v52, %v1502_v27  ;;  %v1695_v4 = vmul.f32 %v8044_v6, %v1606_v30  ;;  %v8276_v58 = vmul.f32 %v8054_v12, %v1606_v30 }
 0xc3c   : > { %v8279_v59 = vmul.f32 %v8019_v51, %v1606_v30  ;;  %v8282_v1 = vmul.f32 %v8022_v52, %v1606_v30  ;;  %v1550_v42 = vpop.f32.mrf.mxu0  ;;  %v1620_v9 = vmul.f32 %v8044_v6, %v1502_v27  ;;  %v1792_v15 = vmul.f32 %v8054_v12, %v1502_v27 }
 0xc3d   : > { %v1959_v2 = vpack.c.bf16 %v8269_v62, %v8253_v49  ;;  %v2125_v18 = vpack.c.bf16 %v8272_v39, %v8256_v50  ;;  %v1696_v24 = vpack.c.bf16 %v1695_v4, %v1694_v53  ;;  %v1864_v31 = vpack.c.bf16 %v8276_v58, %v8260_v54  ;;  %v6406_v39 = vld [vmem:[%s9224_s4 + $0x1b] ss:$0 sm:$0xff] }
 0xc3e   : > { %v2030_v3 = vpack.c.bf16 %v8279_v59, %v8263_v57  ;;  %v2196_v7 = vpack.c.bf16 %v8282_v1, %v8266_v60  ;;  %v6947_v10 = vpop.f32.mrf.mxu0  ;;  %v1551_v13 = vadd.f32 %v6402_v8, %v1550_v42  ;;  %v1621_v5 = vpack.c.bf16 %v1620_v9, %v1619_v19 }
 0xc3f   : > { %6968 = vmatmul.mubr.msk.bf16.vlgmr.msra.gmra.mxu1 %vm414_vm3, %v1696_v24  ;;  %v1793_v25 = vpack.c.bf16 %v1792_v15, %v1791_v21 }
 0xc40   : > { %v1553_v11 = vpop.f32.mrf.mxu0  ;;  %6979 = vmatprep.mubr.msk.bf16.mxu1 %vm7851_vm0, %v7850_v0 }
 0xc41   : > { %v1554_v14 = vadd.f32 %v6402_v8, %v1553_v11 }
 0xc42   : > { %v6948_v17 = vpop.f32.mrf.mxu0 }
 0xc43   : > { %v1622_v23 = vpack.c.bf16 %v1554_v14, %v1551_v13 }
 0xc45   : > { %v8301_v28 = vsel %vm414_vm3, %v1622_v23, 0 }
 0xc46   : > { %6958 = vmatpush3.bf16.xpose.msra.mxu0 %v8301_v28  ;;  %6978 = vmatpush3.bf16.xpose.msra.mxu1 %v8301_v28 }
 0xc47   : > { %6971 = vmatprep.subr.bf16.mxu0 %v7850_v0  ;;  %6991 = vmatprep.subr.bf16.mxu1 %v7850_v0 }
 0xc4d   : > { %6960 = vmatmul.mubr.msk.bf16.vlgmr.msra.gmra.mxu0 %vm414_vm3, %v1621_v5  ;;  %6980 = vmatmul.mubr.msk.bf16.vlgmr.msra.gmra.mxu1 %vm414_vm3, %v1793_v25 }
 0xc4e   : > { %6973 = vmatprep.mubr.msk.bf16.mxu0 %vm7851_vm0, %v7850_v0  ;;  %6993 = vmatprep.mubr.msk.bf16.mxu1 %vm7851_vm0, %v7850_v0 }
 0xcff   : > { %v1736_v26 = vpop.f32.mrf.mxu1 }
 0xd01   : > { %v6969_v32 = vpop.f32.mrf.mxu1 }
 0xd03   : > { %v1739_v33 = vpop.f32.mrf.mxu1 }
 0xd04   : > { %v1744_v34 = vpack.c.bf16 %v1739_v33, %v1736_v26 }
 0xd05   : > { %v6970_v35 = vpop.f32.mrf.mxu1 }
 0xd06   : > { %6972 = vmatpush3.bf16.msra.mxu0 %v1744_v34 }
 0xd07   : > { %6983 = vmatprep.subr.bf16.mxu0 %v7850_v0 }
 0xd0d   : > { %v1663_v37 = vpop.f32.mrf.mxu0  ;;  %v1831_v38 = vpop.f32.mrf.mxu1 }
 0xd0e   : > { %v1670_v41 = vmul.f32 0.35355338, %v1663_v37  ;;  %v1838_v24 = vmul.f32 0.35355338, %v1831_v38 }
 0xd0f   : > { %v6961_v43 = vpop.f32.mrf.mxu0  ;;  %v6981_v44 = vpop.f32.mrf.mxu1 }
 0xd10   : > { %v1672_v45 = vsel %vm357_vm1, %v1670_v41, -inf  ;;  %v1840_v13 = vsel %vm357_vm1, %v1838_v24, -inf }
 0xd11   : > { %v1834_v46 = vpop.f32.mrf.mxu1  ;;  %1673 = vmax.xlane.f32.xlu0 %v1672_v45  ;;  %v1666_v47 = vpop.f32.mrf.mxu0 }
 0xd12   : > { %v1671_v29 = vmul.f32 0.35355338, %v1666_v47  ;;  %v1839_v11 = vmul.f32 0.35355338, %v1834_v46 }
 0xd13   : > { %v6962_v48 = vpop.f32.mrf.mxu0  ;;  %v6982_v16 = vpop.f32.mrf.mxu1 }
 0xd14   : > { %v1675_v22 = vsel %vm357_vm1, %v1671_v29, -inf  ;;  %v1843_v17 = vsel %vm357_vm1, %v1839_v11, -inf }
 0xd15   : > { %1676 = vmax.xlane.f32.xlu1 %v1675_v22 }
 0xd9a   : > { %v1674_v27 = vpop.xlane.xlu0 %1673 }
 0xd9b   : > { %v1678_v30 = vsub.f32 %v1670_v41, %v1674_v27 }
 0xd9d   : > { %v1680_v53 = vmul.f32 1.442695, %v1678_v30 }
 0xd9e   : > { %v1677_v55 = vpop.xlane.xlu1 %1676 }
 0xd9f   : > { %7639 = vpow2.f32 %v1680_v53  ;;  %v1679_v56 = vsub.f32 %v1671_v29, %v1677_v55 }
 0xda1   : > { %v1682_v4 = vmul.f32 1.442695, %v1679_v56 }
 0xda3   : > { %7641 = vpow2.f32 %v1682_v4 }
 0xdac   : > { %v7640_v42 = vpop.eup %7639 }
 0xdad   : > { %v1684_v8 = vsel %vm357_vm1, %v7640_v42, 0.0 }
 0xdae   : > { %1685 = vadd.xlane.f32.xlu0 %v1684_v8 }
 0xdb0   : > { %v7642_v10 = vpop.eup %7641 }
 0xdb1   : > { %v1687_v14 = vsel %vm357_vm1, %v7642_v10, 0.0 }
 0xdb2   : > { %1841 = vmax.xlane.f32.xlu0 %v1840_v13  ;;  %1688 = vadd.xlane.f32.xlu1 %v1687_v14 }
 0xdb6   : > { %1844 = vmax.xlane.f32.xlu1 %v1843_v17 }
 0xe37   : > { %v1686_v23 = vpop.xlane.xlu0 %1685 }
 0xe38   : > { %7643 = vrcp.f32 %v1686_v23 }
 0xe3b   : > { %v1842_v9 = vpop.xlane.xlu0 %1841  ;;  %v1689_v15 = vpop.xlane.xlu1 %1688 }
 0xe3c   : > { %v1846_v19 = vsub.f32 %v1838_v24, %v1842_v9  ;;  %7645 = vrcp.f32 %v1689_v15 }
 0xe3e   : > { %v1848_v21 = vmul.f32 1.442695, %v1846_v19 }
 0xe3f   : > { %v1845_v5 = vpop.xlane.xlu1 %1844 }
 0xe40   : > { %7647 = vpow2.f32 %v1848_v21  ;;  %v1847_v25 = vsub.f32 %v1839_v11, %v1845_v5 }
 0xe42   : > { %v1850_v26 = vmul.f32 1.442695, %v1847_v25 }
 0xe44   : > { %7649 = vpow2.f32 %v1850_v26 }
 0xe45   : > { %v7644_v32 = vpop.eup %7643 }
 0xe46   : > { %v1692_v34 = vmul.f32 %v7644_v32, %v7640_v42 }
 0xe49   : > { %v7646_v33 = vpop.eup %7645 }
 0xe4a   : > { %v1693_v35 = vmul.f32 %v7646_v33, %v7642_v10 }
 0xe4c   : > { %v1743_v37 = vpack.c.bf16 %v1693_v35, %v1692_v34 }
 0xe4d   : > { %v7648_v38 = vpop.eup %7647 }
 0xe4e   : > { %6974 = vmatmul.mubr.msk.bf16.vlgmr.msra.gmra.mxu0 %vm357_vm1, %v1743_v37  ;;  %v1852_v41 = vsel %vm357_vm1, %v7648_v38, 0.0 }
 0xe4f   : > { %6984 = vmatpush3.bf16.msra.mxu0 %v8238_v36  ;;  %1853 = vadd.xlane.f32.xlu0 %v1852_v41 }
 0xe50   : > { %6985 = vmatprep.subr.bf16.mxu0 %v7850_v0  ;;  %6987 = vmatprep.mubr.msk.bf16.mxu0 %vm7851_vm0, %v7850_v0 }
 0xe51   : > { %v7650_v43 = vpop.eup %7649 }
 0xe52   : > { %v1855_v44 = vsel %vm357_vm1, %v7650_v43, 0.0 }
 0xe53   : > { %6986 = vmatpush3.bf16.msra.mxu0 %v8242_v40  ;;  %1856 = vadd.xlane.f32.xlu1 %v1855_v44 }
 0xe54   : > { %6997 = vmatprep.subr.bf16.mxu0 %v7850_v0 }
 0xe56   : > { %6988 = vmatmul.mubr.msk.bf16.vlgmr.msra.gmra.mxu0 %vm414_vm3, %v1864_v31 }
 0xe57   : > { %6998 = vmatpush3.bf16.xpose.msra.mxu0 %v8301_v28  ;;  %6999 = vmatprep.mubr.msk.bf16.mxu0 %vm7851_vm0, %v7850_v0 }
 0xe58   : > { %7011 = vmatprep.subr.bf16.mxu0 %v7850_v0 }
 0xe5e   : > { %7000 = vmatmul.mubr.msk.bf16.vlgmr.msra.gmra.mxu0 %vm414_vm3, %v1959_v2 }
 0xe5f   : > { %7013 = vmatprep.mubr.msk.bf16.mxu0 %vm7851_vm0, %v7850_v0 }
 0xed8   : > { %v1854_v46 = vpop.xlane.xlu0 %1853 }
 0xedc   : > { %v1857_v45 = vpop.xlane.xlu1 %1856 }
 0xedd   : > { %7651 = vrcp.f32 %v1857_v45 }
 0xede   : > { %7653 = vrcp.f32 %v1854_v46 }
 0xeea   : > { %v7652_v48 = vpop.eup %7651 }
 0xeeb   : > { %v7654_v22 = vpop.eup %7653  ;;  %v1861_v30 = vmul.f32 %v7652_v48, %v7650_v43 }
 0xeec   : > { %v1860_v2 = vmul.f32 %v7654_v22, %v7648_v38 }
 0xeee   : > { %v1909_v55 = vpack.c.bf16 %v1861_v30, %v1860_v2 }
 0xf0e   : > { %v1782_v54 = vpop.f32.mrf.mxu0 }
 0xf10   : > { %v6975_v58 = vpop.f32.mrf.mxu0 }
 0xf12   : > { %v1785_v31 = vpop.f32.mrf.mxu0 }
 0xf13   : > { %v1790_v5 = vadd.f32 %v6406_v39, %v1785_v31 }
 0xf14   : > { %v6976_v47 = vpop.f32.mrf.mxu0 }
 0xf16   : > { %v1902_v29 = vpop.f32.mrf.mxu0 }
 0xf18   : > { %v6989_v16 = vpop.f32.mrf.mxu0 }
 0xf1a   : > { %v1905_v27 = vpop.f32.mrf.mxu0 }
 0xf1b   : > { %v1910_v49 = vpack.c.bf16 %v1905_v27, %v1902_v29 }
 0xf1c   : > { %v6990_v62 = vpop.f32.mrf.mxu0 }
 0xf1d   : > { %6992 = vmatpush3.bf16.msra.mxu1 %v1910_v49 }
 0xf1e   : > { %v1997_v53 = vpop.f32.mrf.mxu0  ;;  %7003 = vmatprep.subr.bf16.mxu1 %v7850_v0 }
 0xf1f   : > { %v2004_v56 = vmul.f32 0.35355338, %v1997_v53 }
 0xf20   : > { %6994 = vmatmul.mubr.msk.bf16.vlgmr.msra.gmra.mxu1 %vm357_vm1, %v1909_v55  ;;  %v7001_v4 = vpop.f32.mrf.mxu0 }
 0xf21   : > { %7004 = vmatpush3.bf16.msra.mxu1 %v8238_v36  ;;  %v2006_v42 = vsel %vm357_vm1, %v2004_v56, -inf  ;;  %7007 = vmatprep.mubr.msk.bf16.mxu1 %vm7851_vm0, %v7850_v0 }
 0xf22   : > { %2007 = vmax.xlane.f32.xlu0 %v2006_v42  ;;  %v2000_v24 = vpop.f32.mrf.mxu0  ;;  %7005 = vmatprep.subr.bf16.mxu1 %v7850_v0 }
 0xf23   : > { %v2005_v8 = vmul.f32 0.35355338, %v2000_v24 }
 0xf24   : > { %v7002_v10 = vpop.f32.mrf.mxu0 }
 0xf25   : > { %7006 = vmatpush3.bf16.msra.mxu1 %v8242_v40  ;;  %v2009_v11 = vsel %vm357_vm1, %v2005_v8, -inf }
 0xf26   : > { %2010 = vmax.xlane.f32.xlu1 %v2009_v11  ;;  %7017 = vmatprep.subr.bf16.mxu1 %v7850_v0 }
 0xf28   : > { %7008 = vmatmul.mubr.msk.bf16.vlgmr.msra.gmra.mxu1 %vm414_vm3, %v2030_v3 }
 0xf29   : > { %7018 = vmatpush3.bf16.xpose.msra.mxu1 %v8301_v28  ;;  %7019 = vmatprep.mubr.msk.bf16.mxu1 %vm7851_vm0, %v7850_v0 }
 0xf2a   : > { %7031 = vmatprep.subr.bf16.mxu1 %v7850_v0 }
 0xf30   : > { %7020 = vmatmul.mubr.msk.bf16.vlgmr.msra.gmra.mxu1 %vm414_vm3, %v2125_v18  ;;  %v1789_v18 = vadd.f32 %v6406_v39, %v1782_v54 }
 0xf31   : > { %7033 = vmatprep.mubr.msk.bf16.mxu1 %vm7851_vm0, %v7850_v0 }
 0xfab   : > { %v2008_v13 = vpop.xlane.xlu0 %2007 }
 0xfac   : > { %v2012_v14 = vsub.f32 %v2004_v56, %v2008_v13 }
 0xfae   : > { %v2014_v57 = vmul.f32 1.442695, %v2012_v14 }
 0xfaf   : > { %v2011_v59 = vpop.xlane.xlu1 %2010 }
 0xfb0   : > { %7655 = vpow2.f32 %v2014_v57  ;;  %v2013_v3 = vsub.f32 %v2005_v8, %v2011_v59 }
 0xfb2   : > { %v2016_v28 = vmul.f32 1.442695, %v2013_v3 }
 0xfb4   : > { %7657 = vpow2.f32 %v2016_v28 }
 0xfbd   : > { %v7656_v17 = vpop.eup %7655 }
 0xfbe   : > { %v2018_v23 = vsel %vm357_vm1, %v7656_v17, 0.0 }
 0xfbf   : > { %2019 = vadd.xlane.f32.xlu0 %v2018_v23 }
 0xfc1   : > { %v7658_v9 = vpop.eup %7657 }
 0xfc2   : > { %v2021_v50 = vsel %vm357_vm1, %v7658_v9, 0.0 }
 0xfc3   : > { %2022 = vadd.xlane.f32.xlu1 %v2021_v50 }
 0xfe0   : > { %v1948_v15 = vpop.f32.mrf.mxu1 }
 0xfe1   : > { %v1955_v19 = vadd.f32 %v1948_v15, %v1789_v18 }
 0xfe2   : > { %v6995_v21 = vpop.f32.mrf.mxu1 }
 0xfe4   : > { %v1951_v25 = vpop.f32.mrf.mxu1 }
 0xfe5   : > { %v1956_v26 = vadd.f32 %v1951_v25, %v1790_v5 }
 0xfe6   : > { %v6996_v32 = vpop.f32.mrf.mxu1 }
 0xfe8   : > { %v2068_v33 = vpop.f32.mrf.mxu1 }
 0xfea   : > { %v7009_v34 = vpop.f32.mrf.mxu1 }
 0xfec   : > { %v2071_v35 = vpop.f32.mrf.mxu1 }
 0xfed   : > { %v2076_v37 = vpack.c.bf16 %v2071_v35, %v2068_v33 }
 0xfee   : > { %v7010_v38 = vpop.f32.mrf.mxu1 }
 0xfef   : > { %7012 = vmatpush3.bf16.msra.mxu0 %v2076_v37 }
 0xff0   : > { %v2163_v41 = vpop.f32.mrf.mxu1  ;;  %7023 = vmatprep.subr.bf16.mxu0 %v7850_v0 }
 0xff1   : > { %v2170_v43 = vmul.f32 0.35355338, %v2163_v41 }
 0xff2   : > { %v7021_v44 = vpop.f32.mrf.mxu1 }
 0xff3   : > { %v2172_v45 = vsel %vm357_vm1, %v2170_v43, -inf }
 0xff4   : > { %v2166_v46 = vpop.f32.mrf.mxu1  ;;  %2173 = vmax.xlane.f32.xlu0 %v2172_v45 }
 0xff5   : > { %v2171_v54 = vmul.f32 0.35355338, %v2166_v46 }
 0xff6   : > { %v7022_v58 = vpop.f32.mrf.mxu1 }
 0xff7   : > { %v2175_v31 = vsel %vm357_vm1, %v2171_v54, -inf  ;;  %v2333_v58 = vld [vmem:[#allocation2 + $0x1f0] sm:$0xff] }
 0xff8   : > { %2176 = vmax.xlane.f32.xlu1 %v2175_v31  ;;  %v2334_v31 = vld [vmem:[#allocation2 + $0x1f8] sm:$0xff] }
0x1048   : > { %v2020_v47 = vpop.xlane.xlu0 %2019 }
0x1049   : > { %7659 = vrcp.f32 %v2020_v47  ;;  %v2337_v47 = vpack.c.bf16 %v2334_v31, %v2333_v58  ;;  %v2503_v58 = vld [vmem:[%s9224_s4 + $0xc] sm:$0x1] }
0x104c   : > { %v2023_v29 = vpop.xlane.xlu1 %2022 }
0x104d   : > { %7661 = vrcp.f32 %v2023_v29  ;;  %v2332_v29 = vld [vmem:[#allocation2 + $0x1e8] sm:$0xff] }
0x1056   : > { %v7660_v48 = vpop.eup %7659 }
0x1057   : > { %v2026_v22 = vmul.f32 %v7660_v48, %v7656_v17 }
0x105a   : > { %v7662_v16 = vpop.eup %7661 }
0x105b   : > { %v2027_v27 = vmul.f32 %v7662_v16, %v7658_v9  ;;  %v2395_v16 = vld [vmem:[#allocation2 + $0x230] sm:$0xff] }
0x105d   : > { %v2075_v30 = vpack.c.bf16 %v2027_v27, %v2026_v22  ;;  %v2396_v22 = vld [vmem:[#allocation2 + $0x238] sm:$0xff] }
0x105e   : > { %v2401_v27 = vpack.c.bf16 %v2396_v22, %v2395_v16 }
0x105f   : > { %7014 = vmatmul.mubr.msk.bf16.vlgmr.msra.gmra.mxu0 %vm357_vm1, %v2075_v30 }
0x1060   : > { %7024 = vmatpush3.bf16.msra.mxu0 %v8238_v36  ;;  %7027 = vmatprep.mubr.msk.bf16.mxu0 %vm7851_vm0, %v7850_v0 }
0x1061   : > { %7025 = vmatprep.subr.bf16.mxu0 %v7850_v0 }
0x1064   : > { %7026 = vmatpush3.bf16.msra.mxu0 %v8242_v40 }
0x1065   : > { %7037 = vmatprep.subr.bf16.mxu0 %v7850_v0 }
0x1067   : > { %7028 = vmatmul.mubr.msk.bf16.vlgmr.msra.gmra.mxu0 %vm414_vm3, %v2196_v7 }
0x1068   : > { %7041 = vmatprep.mubr.msk.bf16.mxu0 %vm7851_vm0, %v7850_v0  ;;  %7038 = vmatpush3.bf16.msra.mxu0 %v2337_v47 }
0x1069   : > { %7039 = vmatprep.subr.bf16.mxu0 %v7850_v0 }
0x107d   : > { %v2174_v49 = vpop.xlane.xlu0 %2173 }
0x107e   : > { %v2178_v62 = vsub.f32 %v2170_v43, %v2174_v49 }
0x1080   : > { %v2180_v36 = vmul.f32 1.442695, %v2178_v62 }
0x1081   : > { %v2177_v2 = vpop.xlane.xlu1 %2176 }
0x1082   : > { %7663 = vpow2.f32 %v2180_v36  ;;  %v2179_v53 = vsub.f32 %v2171_v54, %v2177_v2 }
0x1084   : > { %v2182_v55 = vmul.f32 1.442695, %v2179_v53 }
0x1086   : > { %7665 = vpow2.f32 %v2182_v55 }
0x108f   : > { %v7664_v56 = vpop.eup %7663 }
0x1090   : > { %v2184_v40 = vsel %vm357_vm1, %v7664_v56, 0.0 }
0x1091   : > { %2185 = vadd.xlane.f32.xlu0 %v2184_v40  ;;  %v6419_v40 = vld [vmem:[%s9224_s4 + $0x1c] ss:$0 sm:$0xff] }
0x1093   : > { %v7666_v4 = vpop.eup %7665 }
0x1094   : > { %v2187_v60 = vsel %vm357_vm1, %v7666_v4, 0.0 }
0x1095   : > { %2188 = vadd.xlane.f32.xlu1 %v2187_v60 }
0x111a   : > { %v2186_v1 = vpop.xlane.xlu0 %2185 }
0x111b   : > { %7667 = vrcp.f32 %v2186_v1 }
0x111e   : > { %v2189_v7 = vpop.xlane.xlu1 %2188 }
0x111f   : > { %7669 = vrcp.f32 %v2189_v7  ;;  %v2114_v42 = vpop.f32.mrf.mxu0  ;;  %v6420_v7 = vld [vmem:[%s9224_s4 + $0x1d] ss:$0 sm:$0xff] }
0x1120   : > { %v2121_v24 = vadd.f32 %v2114_v42, %v1955_v19 }
0x1121   : > { %v7015_v8 = vpop.f32.mrf.mxu0 }
0x1122   : > { %v2499_v8 = vld [vmem:[#allocation2 + $0x38] sm:$0xff] }
0x1123   : > { %v2117_v10 = vpop.f32.mrf.mxu0 }
0x1124   : > { %v2122_v11 = vadd.f32 %v2117_v10, %v1956_v26 }
0x1125   : > { %v7016_v13 = vpop.f32.mrf.mxu0 }
0x1127   : > { %v2234_v14 = vpop.f32.mrf.mxu0 }
0x1128   : > { %v7668_v59 = vpop.eup %7667 }
0x1129   : > { %v7029_v57 = vpop.f32.mrf.mxu0  ;;  %v2192_v9 = vmul.f32 %v7668_v59, %v7664_v56  ;;  %v2497_v59 = vld [vmem:[#allocation2 + $0x28] sm:$0xff] }
0x112a   : > { %v2496_v57 = vld [vmem:[#allocation2 + $0x20] sm:$0xff] }
0x112b   : > { %v2237_v3 = vpop.f32.mrf.mxu0 }
0x112c   : > { %v7670_v28 = vpop.eup %7669  ;;  %v2242_v17 = vpack.c.bf16 %v2237_v3, %v2234_v14  ;;  %v2501_v3 = vpack.c.bf16 %v2497_v59, %v2496_v57  ;;  %v2555_v59 = vld [vmem:[%s9224_s4 + $0xd] sm:$0x1] }
0x112d   : > { %v7030_v23 = vpop.f32.mrf.mxu0  ;;  %v2193_v50 = vmul.f32 %v7670_v28, %v7666_v4  ;;  %v2495_v28 = vld [vmem:[%s302_s18] sm:$0x1] }
0x112e   : > { %7032 = vmatpush3.bf16.msra.mxu1 %v2242_v17  ;;  %v2500_v17 = vpack.c.bf16 %v2495_v28, %v2495_v28  ;;  %v2393_v23 = vld [vmem:[#allocation2 + $0x220] sm:$0xff] }
0x112f   : > { %v2241_v39 = vpack.c.bf16 %v2193_v50, %v2192_v9  ;;  %7045 = vmatprep.subr.bf16.mxu1 %v7850_v0  ;;  %v2394_v9 = vld [vmem:[#allocation2 + $0x228] sm:$0xff] }
0x1130   : > { %v2400_v50 = vpack.c.bf16 %v2394_v9, %v2393_v23 }
0x1131   : > { %7034 = vmatmul.mubr.msk.bf16.vlgmr.msra.gmra.mxu1 %vm357_vm1, %v2241_v39  ;;  %v2391_v39 = vld [vmem:[#allocation2 + $0x210] sm:$0xff] }
0x1132   : > { %7053 = vmatprep.mubr.msk.bf16.mxu1 %vm7851_vm0, %v7850_v0  ;;  %7046 = vmatpush3.bf16.msra.mxu1 %v2401_v27 }
0x1133   : > { %7047 = vmatprep.subr.bf16.mxu1 %v7850_v0 }
0x1136   : > { %7048 = vmatpush3.bf16.msra.mxu1 %v2400_v50  ;;  %v2656_v50 = vsub.s32 0, %v7978_v20 }
0x1137   : > { %7049 = vmatprep.subr.bf16.mxu1 %v7850_v0 }
0x11f1   : > { %v2280_v18 = vpop.f32.mrf.mxu1 }
0x11f2   : > { %v2287_v15 = vadd.f32 %v2280_v18, %v2121_v24  ;;  %v2498_v24 = vld [vmem:[#allocation2 + $0x30] sm:$0xff]  ;;  %v2392_v18 = vld [vmem:[#allocation2 + $0x218] sm:$0xff] }
0x11f3   : > { %v7035_v19 = vpop.f32.mrf.mxu1  ;;  %v2502_v13 = vpack.c.bf16 %v2499_v8, %v2498_v24  ;;  %v2715_v8 = vld [vmem:[#allocation2 + $0x268] sm:$0xff] }
0x11f4   : > { %v2289_v21 = vadd.f32 %v2287_v15, %v8221_v61  ;;  %v2399_v15 = vpack.c.bf16 %v2392_v18, %v2391_v39  ;;  %v2389_v19 = vld [vmem:[#allocation2 + $0x200] sm:$0xff] }
0x11f5   : > { %v2283_v5 = vpop.f32.mrf.mxu1 }
0x11f6   : > { %v2288_v25 = vadd.f32 %v2283_v5, %v2122_v11  ;;  %v2293_v26 = vsel %vm414_vm3, %v2289_v21, 0.0  ;;  %7050 = vmatpush3.bf16.msra.mxu1 %v2399_v15  ;;  %v2550_v5 = vld [vmem:[#allocation2 + $0x50] sm:$0xff]  ;;  %v6429_v15 = vld [vmem:[%s9224_s4 + $0xb] ss:$0 sm:$0xff] }
0x11f7   : > { %2294 = vadd.xlane.f32.xlu0 %v2293_v26  ;;  %v7036_v32 = vpop.f32.mrf.mxu1  ;;  %7051 = vmatprep.subr.bf16.mxu1 %v7850_v0  ;;  %v2551_v26 = vld [vmem:[#allocation2 + $0x58] sm:$0xff] }
0x11f8   : > { %v2290_v33 = vadd.f32 %v2288_v25, %v8223_v63  ;;  %v2331_v63 = vld [vmem:[#allocation2 + $0x1e0] sm:$0xff]  ;;  %v2554_v32 = vpack.c.bf16 %v2551_v26, %v2550_v5 }
0x11f9   : > { %v2336_v48 = vpack.c.bf16 %v2332_v29, %v2331_v63  ;;  %v2652_v5 = vld [vmem:[%s9224_s4] sm:$0xff] }
0x11fa   : > { %v2296_v34 = vsel %vm414_vm3, %v2290_v33, 0.0 }
0x11fb   : > { %2297 = vadd.xlane.f32.xlu1 %v2296_v34  ;;  %7040 = vmatpush3.bf16.msra.mxu0 %v2336_v48  ;;  %v2549_v34 = vld [vmem:[#allocation2 + $0x48] sm:$0xff] }
0x11fc   : > { %7057 = vmatprep.subr.bf16.mxu0 %v7850_v0 }
0x1280   : > { %v2295_v35 = vpop.xlane.xlu0 %2294 }
0x1281   : > { %v2299_v37 = vmul.f32 0.03125, %v2295_v35 }
0x1283   : > { %v2301_v38 = vsub.f32 %v2289_v21, %v2299_v37  ;;  %v2390_v21 = vld [vmem:[#allocation2 + $0x208] sm:$0xff]  ;;  %v6421_v37 = vld [vmem:[%s9224_s4 + $0x20] ss:$0 sm:$0xff] }
0x1284   : > { %v2298_v41 = vpop.xlane.xlu1 %2297  ;;  %v2398_v25 = vpack.c.bf16 %v2390_v21, %v2389_v19 }
0x1285   : > { %v2300_v43 = vmul.f32 0.03125, %v2298_v41  ;;  %v2303_v44 = vmul.f32 %v2301_v38, %v2301_v38 }
0x1286   : > { %7052 = vmatpush3.bf16.msra.mxu1 %v2398_v25 }
0x1287   : > { %v2302_v45 = vsub.f32 %v2290_v33, %v2300_v43  ;;  %v2305_v61 = vsel %vm414_vm3, %v2303_v44, 0.0  ;;  %v2548_v33 = vld [vmem:[#allocation2 + $0x40] sm:$0xff]  ;;  %7073 = vmatprep.subr.bf16.mxu1 %v7850_v0 }
0x1288   : > { %2306 = vadd.xlane.f32.xlu0 %v2305_v61  ;;  %v2553_v35 = vpack.c.bf16 %v2549_v34, %v2548_v33  ;;  %v2600_v61 = vld [vmem:[#allocation2 + $0x10] sm:$0xff] }
0x1289   : > { %v2304_v46 = vmul.f32 %v2302_v45, %v2302_v45 }
0x128b   : > { %v2308_v54 = vsel %vm414_vm3, %v2304_v46, 0.0  ;;  %v2601_v46 = vld [vmem:[#allocation2 + $0x18] sm:$0xff] }
0x128c   : > { %2309 = vadd.xlane.f32.xlu1 %v2308_v54  ;;  %v2603_v29 = vpack.c.bf16 %v2601_v46, %v2600_v61  ;;  %v2766_v61 = vld [vmem:[#allocation2 + $0x288] sm:$0xff] }
0x1311   : > { %v2307_v30 = vpop.xlane.xlu0 %2306 }
0x1312   : > { %v2311_v49 = vmul.f32 0.03125, %v2307_v30 }
0x1314   : > { %v2313_v62 = vadd.f32 1e-05, %v2311_v49  ;;  %v2599_v49 = vld [vmem:[%s299_s11] sm:$0xff]  ;;  %s6233_s11 = sshll.u32 %s8629_s28, 4  ;;  %s9168_s11 = int_to_ptr.vmem [resolvable:$true] %s6233_s11 }
0x1315   : > { %v2310_v36 = vpop.xlane.xlu1 %2309  ;;  %s7781_s18 = scalar_lea.vmem %s9168_s11, 256 }
0x1316   : > { %7671 = vrsqrt.f32 %v2313_v62  ;;  %v2312_v2 = vmul.f32 0.03125, %v2310_v36  ;;  %p7782_p6 = scmp.ne.s32.totalorder %s9168_s11, %s7781_s18 }
0x1318   : > { %v2314_v53 = vadd.f32 1e-05, %v2312_v2  ;;  %v2602_v2 = vpack.c.bf16 %v2599_v49, %v2599_v49  ;;  %p7783_p9 = pnand %p7782_p6, %p7928_p5 }
0x131a   : > { %7673 = vrsqrt.f32 %v2314_v53  ;;  %v2661_v53 = vld [vmem:[#allocation2 + $0x250] sm:$0xff]  ;;  %p7784_p10 = pneg %p7783_p9 }
0x1323   : > { %v7672_v55 = vpop.eup %7671 }
0x1324   : > { %v2317_v56 = vmul.f32 %v7672_v55, %v2301_v38  ;;  %v2662_v55 = vld [vmem:[#allocation2 + $0x258] sm:$0xff] }
0x1326   : > { %v2323_v1 = vmul.f32 %v6419_v40, %v2317_v56  ;;  %v2665_v56 = vpack.c.bf16 %v2662_v55, %v2661_v53 }
0x1327   : > { %v7674_v4 = vpop.eup %7673 }
0x1328   : > { %v2318_v60 = vmul.f32 %v7674_v4, %v2302_v45  ;;  %v8413_v10 = vadd.f32 %v6420_v7, %v2323_v1  ;;  %v2717_v4 = vld [vmem:[#allocation2 + $0x278] sm:$0xff]  ;;  %v2659_v1 = vld [vmem:[#allocation2 + $0x240] sm:$0xff] }
0x132a   : > { %v2324_v42 = vmul.f32 %v6419_v40, %v2318_v60  ;;  %v2716_v40 = vld [vmem:[#allocation2 + $0x270] sm:$0xff] }
0x132b   : > { %v2719_v60 = vpack.c.bf16 %v2717_v4, %v2716_v40 }
0x132c   : > { %v8415_v11 = vadd.f32 %v6420_v7, %v2324_v42  ;;  %v2660_v7 = vld [vmem:[#allocation2 + $0x248] sm:$0xff]  ;;  %v2714_v42 = vld [vmem:[#allocation2 + $0x260] sm:$0xff] }
0x132d   : > { %v2664_v24 = vpack.c.bf16 %v2660_v7, %v2659_v1 }
0x132e   : > { %v2335_v14 = vpack.c.bf16 %v8415_v11, %v8413_v10 }
0x1330   : > { %7042 = vmatmul.mubr.msk.bf16.vlgmr.msra.gmra.mxu0 %vm414_vm3, %v2335_v14 }
0x1331   : > { %7058 = vmatpush3.bf16.msra.mxu0 %v2502_v13  ;;  %7061 = vmatprep.mubr.msk.bf16.mxu0 %vm7851_vm0, %v7850_v0  ;;  %v2718_v13 = vpack.c.bf16 %v2715_v8, %v2714_v42 }
0x1332   : > { %7059 = vmatprep.subr.bf16.mxu0 %v7850_v0 }
0x1335   : > { %7060 = vmatpush3.bf16.msra.mxu0 %v2501_v3  ;;  %v8470_v3 = vld [vmem:[%s9224_s4 + $0x21] ss:$0 sm:$0xff] }
0x1336   : > { %7065 = vmatprep.subr.bf16.mxu0 %v7850_v0 }
0x1338   : > { %7062 = vmatmul.mubr.msk.bf16.vlgmr.msra.gmra.mxu0 %vm414_vm3, %v2500_v17 }
0x1339   : > { %7069 = vmatprep.mubr.msk.bf16.mxu0 %vm7851_vm0, %v7850_v0  ;;  %7066 = vmatpush3.bf16.msra.mxu0 %v2554_v32 }
0x133a   : > { %7067 = vmatprep.subr.bf16.mxu0 %v7850_v0 }
0x133d   : > { %7068 = vmatpush3.bf16.msra.mxu0 %v2553_v35  ;;  %v2767_v35 = vld [vmem:[#allocation2 + $0x290] sm:$0xff] }
0x133e   : > { %7079 = vmatprep.subr.bf16.mxu0 %v7850_v0 }
0x13f0   : > { %v2380_v38 = vpop.f32.mrf.mxu0 }
0x13f1   : > { %v2381_v43 = vadd.f32 %v6421_v37, %v2380_v38 }
0x13f2   : > { %v7043_v41 = vpop.f32.mrf.mxu0 }
0x13f3   : > { %v2387_v31 = vmax.f32 %v2381_v43, 0.0 }
0x13f4   : > { %v2383_v44 = vpop.f32.mrf.mxu0 }
0x13f5   : > { %v2384_v45 = vadd.f32 %v6421_v37, %v2383_v44  ;;  %v2768_v37 = vld [vmem:[#allocation2 + $0x298] sm:$0xff] }
0x13f6   : > { %v7044_v54 = vpop.f32.mrf.mxu0  ;;  %v2770_v43 = vpack.c.bf16 %v2768_v37, %v2767_v35 }
0x13f7   : > { %v2388_v63 = vmax.f32 %v2384_v45, 0.0  ;;  %v2765_v45 = vld [vmem:[#allocation2 + $0x280] sm:$0xff]  ;;  %v2818_v54 = vld [vmem:[#allocation2 + $0x2b0] sm:$0xff] }
0x13f8   : > { %v2541_v47 = vpop.f32.mrf.mxu0  ;;  %v2769_v46 = vpack.c.bf16 %v2766_v61, %v2765_v45 }
0x13f9   : > { %v2397_v48 = vpack.c.bf16 %v2388_v63, %v2387_v31  ;;  %v2542_v16 = vadd.f32 %v2541_v47, %v2503_v58  ;;  %v2819_v58 = vld [vmem:[#allocation2 + $0x2b8] sm:$0xff]  ;;  %v2816_v63 = vld [vmem:[#allocation2 + $0x2a0] sm:$0xff]  ;;  %v2817_v47 = vld [vmem:[#allocation2 + $0x2a8] sm:$0xff] }
0x13fa   : > { %v7063_v22 = vpop.f32.mrf.mxu0  ;;  %v8497_v31 = vpack.c.bf16 %v2819_v58, %v2818_v54 }
0x13fb   : > { %v2547_v27 = vmax.f32 %v2542_v16, 0.0  ;;  %7054 = vmatmul.mubr.msk.bf16.vlgmr.msra.gmra.mxu1 %vm1362_vm14, %v2397_v48  ;;  %v6433_v48 = vld [vmem:[%s9224_s4 + $0x23] ss:$0 sm:$0xff] }
0x13fc   : > { %v2544_v30 = vpop.f32.mrf.mxu0  ;;  %7074 = vmatpush3.bf16.msra.mxu1 %v2603_v29  ;;  %7075 = vmatprep.mubr.msk.bf16.mxu1 %vm7851_vm0, %v7850_v0  ;;  %v8501_v29 = vpack.c.bf16 %v2817_v47, %v2816_v63 }
0x13fd   : > { %v2552_v62 = vpack.c.bf16 %v2547_v27, %v2547_v27  ;;  %7087 = vmatprep.subr.bf16.mxu1 %v7850_v0  ;;  %v6431_v27 = vld [vmem:[%s9224_s4 + $0x22] ss:$0 sm:$0xff] }
0x13fe   : > { %v7064_v36 = vpop.f32.mrf.mxu0 }
0x13ff   : > { %7070 = vmatmul.mubr.msk.bf16.vlgmr.msra.gmra.mxu0 %vm414_vm3, %v2552_v62 }
0x1400   : > { %7083 = vmatprep.mubr.msk.bf16.mxu0 %vm7851_vm0, %v7850_v0  ;;  %7080 = vmatpush3.bf16.msra.mxu0 %v2665_v56 }
0x1401   : > { %7081 = vmatprep.subr.bf16.mxu0 %v7850_v0 }
0x1403   : > { %7076 = vmatmul.mubr.msk.bf16.vlgmr.msra.gmra.mxu1 %vm357_vm1, %v2602_v2 }
0x1404   : > { %7091 = vmatprep.mubr.msk.bf16.mxu1 %vm7851_vm0, %v7850_v0  ;;  %7088 = vmatpush3.bf16.msra.mxu1 %v2719_v60  ;;  %v6435_v60 = vld [vmem:[%s9224_s4 + $0x24] ss:$0 sm:$0xff] }
0x1405   : > { %7089 = vmatprep.subr.bf16.mxu1 %v7850_v0  ;;  %7082 = vmatpush3.bf16.msra.mxu0 %v2664_v24 }
0x1406   : > { %7095 = vmatprep.subr.bf16.mxu0 %v7850_v0 }
0x1408   : > { %7090 = vmatpush3.bf16.msra.mxu1 %v2718_v13 }
0x1409   : > { %7103 = vmatprep.subr.bf16.mxu1 %v7850_v0 }
0x14bb   : > { %v8462_v14 = vpop.f32.mrf.mxu1 }
0x14bd   : > { %v7055_v57 = vpop.f32.mrf.mxu1 }
0x14bf   : > { %v2447_v28 = vpop.f32.mrf.mxu1  ;;  %v2593_v17 = vpop.f32.mrf.mxu0 }
0x14c0   : > { %v8473_v23 = vadd.f32 %v8470_v3, %v2447_v28  ;;  %v2594_v9 = vadd.f32 %v2593_v17, %v2555_v59 }
0x14c1   : > { %v7056_v39 = vpop.f32.mrf.mxu1  ;;  %v7071_v18 = vpop.f32.mrf.mxu0 }
0x14c2   : > { %v2657_v25 = vrot.slane %v2594_v9, %v2656_v50 }
0x14c3   : > { %v2596_v19 = vpop.f32.mrf.mxu0  ;;  %v2646_v21 = vpop.f32.mrf.mxu1 }
0x14c4   : > { %v2647_v26 = vadd.f32 %v6429_v15, %v2646_v21 }
0x14c5   : > { %v7072_v32 = vpop.f32.mrf.mxu0  ;;  %v7077_v33 = vpop.f32.mrf.mxu1 }
0x14c6   : > { %v2653_v34 = vadd.f32 %v2652_v5, %v2647_v26 }
0x14c7   : > { %v2649_v20 = vpop.f32.mrf.mxu1 }
0x14c8   : > { %v8482_v38 = vadd.f32 %v2657_v25, %v2653_v34 }
0x14c9   : > { %v7078_v41 = vpop.f32.mrf.mxu1 }
0x14ca   : > { %v2663_v44 = vpack.c.bf16 %v8482_v38, %v8482_v38 }
0x14cc   : > { %7084 = vmatmul.mubr.msk.bf16.vlgmr.msra.gmra.mxu0 %vm414_vm3, %v2663_v44  ;;  %7092 = vmatmul.mubr.msk.bf16.vlgmr.msra.gmra.mxu1 %vm414_vm3, %v2663_v44 }
0x14cd   : > { %7096 = vmatpush3.bf16.msra.mxu0 %v2770_v43  ;;  %7099 = vmatprep.mubr.msk.bf16.mxu0 %vm7851_vm0, %v7850_v0 }
0x14ce   : > { %7097 = vmatprep.subr.bf16.mxu0 %v7850_v0  ;;  %7105 = vmatprep.mubr.msk.bf16.mxu1 %vm7851_vm0, %v7850_v0 }
0x14d1   : > { %7098 = vmatpush3.bf16.msra.mxu0 %v2769_v46 }
0x14d2   : > { %7109 = vmatprep.subr.bf16.mxu0 %v7850_v0 }
0x14d4   : > { %7100 = vmatmul.mubr.msk.bf16.vlgmr.msra.gmra.mxu0 %vm414_vm3, %v2663_v44 }
0x14d5   : > { %7113 = vmatprep.mubr.msk.bf16.mxu0 %vm7851_vm0, %v7850_v0  ;;  %7110 = vmatpush3.bf16.msra.mxu0 %v8497_v31 }
0x14d6   : > { %7111 = vmatprep.subr.bf16.mxu0 %v7850_v0 }
0x14d9   : > { %7112 = vmatpush3.bf16.msra.mxu0 %v8501_v29 }
0x14da   : > { %7123 = vmatprep.subr.bf16.mxu0 %v7850_v0 }
0x158c   : > { %v2708_v16 = vpop.f32.mrf.mxu0  ;;  %v2759_v22 = vpop.f32.mrf.mxu1 }
0x158d   : > { %v2760_v30 = vadd.f32 %v6433_v48, %v2759_v22  ;;  %v8511_v36 = vadd.f32 %v6431_v27, %v2708_v16 }
0x158e   : > { %v7085_v49 = vpop.f32.mrf.mxu0  ;;  %v7093_v62 = vpop.f32.mrf.mxu1 }
0x158f   : > { %v2828_v2 = vpack.c.bf16 %v2760_v30, %v2760_v30  ;;  %v2826_v1 = vmul.f32 %v8044_v6, %v8511_v36  ;;  %v2985_v17 = vmul.f32 %v8054_v12, %v8511_v36 }
0x1590   : > { %v2711_v53 = vpop.f32.mrf.mxu0  ;;  %v2762_v55 = vpop.f32.mrf.mxu1 }
0x1591   : > { %v8514_v56 = vsel %vm414_vm3, %v2828_v2, 0  ;;  %v2827_v13 = vpack.c.bf16 %v2826_v1, %v2826_v1  ;;  %v2986_v9 = vpack.c.bf16 %v2985_v17, %v2985_v17  ;;  %v3136_v55 = vmul.f32 %v8019_v51, %v8511_v36 }
0x1592   : > { %v7086_v40 = vpop.f32.mrf.mxu0  ;;  %v7094_v4 = vpop.f32.mrf.mxu1  ;;  %7104 = vmatpush3.bf16.xpose.msra.mxu1 %v8514_v56 }
0x1593   : > { %7117 = vmatprep.subr.bf16.mxu1 %v7850_v0  ;;  %v3137_v40 = vpack.c.bf16 %v3136_v55, %v3136_v55 }
0x1594   : > { %v2810_v7 = vpop.f32.mrf.mxu0 }
0x1595   : > { %v8523_v42 = vadd.f32 %v6435_v60, %v2810_v7 }
0x1596   : > { %v7101_v24 = vpop.f32.mrf.mxu0 }
0x1597   : > { %v2888_v8 = vmul.f32 %v8044_v6, %v8523_v42  ;;  %v3042_v2 = vmul.f32 %v8054_v12, %v8523_v42 }
0x1598   : > { %v2813_v57 = vpop.f32.mrf.mxu0 }
0x1599   : > { %v2889_v59 = vpack.c.bf16 %v2888_v8, %v2888_v8  ;;  %7106 = vmatmul.mubr.msk.bf16.vlgmr.msra.gmra.mxu1 %vm414_vm3, %v2827_v13  ;;  %v3043_v53 = vpack.c.bf16 %v3042_v2, %v3042_v2 }
0x159a   : > { %v7102_v28 = vpop.f32.mrf.mxu0  ;;  %7119 = vmatprep.mubr.msk.bf16.mxu1 %vm7851_vm0, %v7850_v0 }
0x159b   : > { %7114 = vmatmul.mubr.msk.bf16.vlgmr.msra.gmra.mxu0 %vm414_vm3, %v2889_v59 }
0x159c   : > { %7124 = vmatpush3.bf16.xpose.msra.mxu0 %v8514_v56  ;;  %7125 = vmatprep.mubr.msk.bf16.mxu0 %vm7851_vm0, %v7850_v0 }
0x159d   : > { %7137 = vmatprep.subr.bf16.mxu0 %v7850_v0 }
0x15a3   : > { %7126 = vmatmul.mubr.msk.bf16.vlgmr.msra.gmra.mxu0 %vm414_vm3, %v2986_v9 }
0x15a4   : > { %7139 = vmatprep.mubr.msk.bf16.mxu0 %vm7851_vm0, %v7850_v0 }
0x1659   : > { %v2869_v50 = vpop.f32.mrf.mxu1 }
0x165a   : > { %v2875_v39 = vmul.f32 0.35355338, %v2869_v50 }
0x165b   : > { %v2929_v18 = vpop.f32.mrf.mxu0  ;;  %v7107_v15 = vpop.f32.mrf.mxu1 }
0x165c   : > { %v2936_v19 = vpack.c.bf16 %v2929_v18, %v2929_v18  ;;  %v2877_v21 = vsel %vm2876_vm15, %v2875_v39, -inf  ;;  %v3193_v15 = vmul.f32 %v8019_v51, %v8523_v42 }
0x165d   : > { %v7115_v5 = vpop.f32.mrf.mxu0  ;;  %2878 = vmax.xlane.f32.xlu0 %v2877_v21  ;;  %v2872_v26 = vpop.f32.mrf.mxu1 }
0x165e   : > { %v2942_v25 = vsel %vm2940_vm2, %v2936_v19, 0  ;;  %v3194_v26 = vpack.c.bf16 %v3193_v15, %v3193_v15 }
0x165f   : > { %v2932_v32 = vpop.f32.mrf.mxu0  ;;  %7118 = vmatpush3.bf16.msra.mxu1 %v2942_v25  ;;  %v7108_v33 = vpop.f32.mrf.mxu1 }
0x1660   : > { %7129 = vmatprep.subr.bf16.mxu1 %v7850_v0  ;;  %v3287_v33 = vmul.f32 %v8022_v52, %v8511_v36  ;;  %v6437_v36 = vld [vmem:[%s9224_s4 + $0x25] ss:$0 sm:$0xff] }
0x1661   : > { %v7116_v34 = vpop.f32.mrf.mxu0 }
0x1662   : > { %v3288_v34 = vpack.c.bf16 %v3287_v33, %v3287_v33 }
0x1663   : > { %v3024_v35 = vpop.f32.mrf.mxu0 }
0x1664   : > { %v3030_v37 = vmul.f32 0.35355338, %v3024_v35 }
0x1665   : > { %v7127_v20 = vpop.f32.mrf.mxu0 }
0x1666   : > { %v3031_v41 = vsel %vm2876_vm15, %v3030_v37, -inf }
0x1667   : > { %3032 = vmax.xlane.f32.xlu0 %v3031_v41  ;;  %v3027_v43 = vpop.f32.mrf.mxu0 }
0x1669   : > { %v7128_v44 = vpop.f32.mrf.mxu0 }
0x16e6   : > { %v2879_v45 = vpop.xlane.xlu0 %2878 }
0x16e7   : > { %v2880_v61 = vsub.f32 %v2875_v39, %v2879_v45 }
0x16e9   : > { %v2881_v46 = vmul.f32 1.442695, %v2880_v61 }
0x16eb   : > { %7675 = vpow2.f32 %v2881_v46 }
0x16f0   : > { %v3033_v54 = vpop.xlane.xlu0 %3032 }
0x16f1   : > { %v3034_v58 = vsub.f32 %v3030_v37, %v3033_v54 }
0x16f3   : > { %v3035_v63 = vmul.f32 1.442695, %v3034_v58 }
0x16f5   : > { %7677 = vpow2.f32 %v3035_v63 }
0x16f8   : > { %v7676_v47 = vpop.eup %7675 }
0x16f9   : > { %v2883_v48 = vsel %vm2876_vm15, %v7676_v47, 0.0 }
0x16fa   : > { %2884 = vadd.xlane.f32.xlu1 %v2883_v48 }
0x1702   : > { %v7678_v16 = vpop.eup %7677 }
0x1703   : > { %v3037_v22 = vsel %vm2876_vm15, %v7678_v16, 0.0 }
0x1704   : > { %3038 = vadd.xlane.f32.xlu1 %v3037_v22 }
0x1783   : > { %v2885_v27 = vpop.xlane.xlu1 %2884 }
0x1784   : > { %7679 = vrcp.f32 %v2885_v27  ;;  %v2445_v27 = vadd.f32 %v8470_v3, %v8462_v14 }
0x178d   : > { %v3039_v4 = vpop.xlane.xlu1 %3038 }
0x178e   : > { %7681 = vrcp.f32 %v3039_v4 }
0x1791   : > { %v7680_v30 = vpop.eup %7679 }
0x1792   : > { %v2887_v49 = vmul.f32 %v7680_v30, %v7676_v47 }
0x1794   : > { %v2935_v62 = vpack.c.bf16 %v2887_v49, %v2887_v49 }
0x1796   : > { %7120 = vmatmul.mubr.msk.bf16.vlgmr.msra.gmra.mxu1 %vm2876_vm15, %v2935_v62 }
0x1797   : > { %7130 = vmatpush3.bf16.msra.mxu1 %v8497_v31  ;;  %7133 = vmatprep.mubr.msk.bf16.mxu1 %vm7851_vm0, %v7850_v0 }
0x1798   : > { %7131 = vmatprep.subr.bf16.mxu1 %v7850_v0 }
0x179b   : > { %7132 = vmatpush3.bf16.msra.mxu1 %v8501_v29  ;;  %v7682_v24 = vpop.eup %7681 }
0x179c   : > { %7143 = vmatprep.subr.bf16.mxu1 %v7850_v0  ;;  %v3041_v59 = vmul.f32 %v7682_v24, %v7678_v16 }
0x179e   : > { %7134 = vmatmul.mubr.msk.bf16.vlgmr.msra.gmra.mxu1 %vm414_vm3, %v3043_v53  ;;  %v3087_v50 = vpack.c.bf16 %v3041_v59, %v3041_v59  ;;  %v2451_v53 = vadd.f32 %v2445_v27, %v8413_v10  ;;  %v3344_v10 = vmul.f32 %v8022_v52, %v8523_v42 }
0x179f   : > { %7144 = vmatpush3.bf16.xpose.msra.mxu1 %v8514_v56  ;;  %7145 = vmatprep.mubr.msk.bf16.mxu1 %vm7851_vm0, %v7850_v0 }
0x17a0   : > { %7157 = vmatprep.subr.bf16.mxu1 %v7850_v0  ;;  %v2455_v4 = vsel %vm414_vm3, %v2451_v53, 0.0  ;;  %v3345_v14 = vpack.c.bf16 %v3344_v10, %v3344_v10 }
0x17a6   : > { %7146 = vmatmul.mubr.msk.bf16.vlgmr.msra.gmra.mxu1 %vm414_vm3, %v3137_v40 }
0x17a7   : > { %7159 = vmatprep.mubr.msk.bf16.mxu1 %vm7851_vm0, %v7850_v0 }
0x1856   : > { %v2978_v60 = vpop.f32.mrf.mxu1 }
0x1857   : > { %v2984_v43 = vadd.f32 %v6437_v36, %v2978_v60 }
0x1858   : > { %v7121_v1 = vpop.f32.mrf.mxu1 }
0x185a   : > { %v2981_v7 = vpop.f32.mrf.mxu1 }
0x185c   : > { %v7122_v8 = vpop.f32.mrf.mxu1 }
0x185e   : > { %v3081_v13 = vpop.f32.mrf.mxu1 }
0x185f   : > { %v3088_v57 = vpack.c.bf16 %v3081_v13, %v3081_v13 }
0x1860   : > { %v7135_v28 = vpop.f32.mrf.mxu1 }
0x1861   : > { %v3093_v17 = vsel %vm2940_vm2, %v3088_v57, 0 }
0x1862   : > { %v3084_v9 = vpop.f32.mrf.mxu1  ;;  %7138 = vmatpush3.bf16.msra.mxu0 %v3093_v17 }
0x1863   : > { %7149 = vmatprep.subr.bf16.mxu0 %v7850_v0 }
0x1864   : > { %v7136_v39 = vpop.f32.mrf.mxu1 }
0x1865   : > { %7140 = vmatmul.mubr.msk.bf16.vlgmr.msra.gmra.mxu0 %vm2876_vm15, %v3087_v50 }
0x1866   : > { %v3175_v18 = vpop.f32.mrf.mxu1  ;;  %7150 = vmatpush3.bf16.msra.mxu0 %v8497_v31  ;;  %7153 = vmatprep.mubr.msk.bf16.mxu0 %vm7851_vm0, %v7850_v0 }
0x1867   : > { %v3181_v19 = vmul.f32 0.35355338, %v3175_v18  ;;  %7151 = vmatprep.subr.bf16.mxu0 %v7850_v0 }
0x1868   : > { %v7147_v21 = vpop.f32.mrf.mxu1 }
0x1869   : > { %v3182_v5 = vsel %vm2876_vm15, %v3181_v19, -inf }
0x186a   : > { %v3178_v25 = vpop.f32.mrf.mxu1  ;;  %3183 = vmax.xlane.f32.xlu0 %v3182_v5  ;;  %7152 = vmatpush3.bf16.msra.mxu0 %v8501_v29 }
0x186b   : > { %7163 = vmatprep.subr.bf16.mxu0 %v7850_v0 }
0x186c   : > { %v7148_v32 = vpop.f32.mrf.mxu1 }
0x186d   : > { %7154 = vmatmul.mubr.msk.bf16.vlgmr.msra.gmra.mxu0 %vm414_vm3, %v3194_v26 }
0x186e   : > { %7164 = vmatpush3.bf16.xpose.msra.mxu0 %v8514_v56  ;;  %7165 = vmatprep.mubr.msk.bf16.mxu0 %vm7851_vm0, %v7850_v0 }
0x186f   : > { %7177 = vmatprep.subr.bf16.mxu0 %v7850_v0 }
0x1875   : > { %7166 = vmatmul.mubr.msk.bf16.vlgmr.msra.gmra.mxu0 %vm414_vm3, %v3288_v34 }
0x1876   : > { %7179 = vmatprep.mubr.msk.bf16.mxu0 %vm7851_vm0, %v7850_v0 }
0x18f3   : > { %v3184_v35 = vpop.xlane.xlu0 %3183 }
0x18f4   : > { %v3185_v37 = vsub.f32 %v3181_v19, %v3184_v35 }
0x18f6   : > { %v3186_v20 = vmul.f32 1.442695, %v3185_v37 }
0x18f8   : > { %7683 = vpow2.f32 %v3186_v20 }
0x1905   : > { %v7684_v41 = vpop.eup %7683 }
0x1906   : > { %v3188_v56 = vsel %vm2876_vm15, %v7684_v41, 0.0 }
0x1907   : > { %3189 = vadd.xlane.f32.xlu1 %v3188_v56 }
0x1925   : > { %v3129_v44 = vpop.f32.mrf.mxu0 }
0x1926   : > { %v3135_v45 = vadd.f32 %v3129_v44, %v2984_v43  ;;  %v6425_v44 = vld [vmem:[%s9224_s4 + $0x1e] ss:$0 sm:$0xff] }
0x1927   : > { %v7141_v61 = vpop.f32.mrf.mxu0 }
0x1928   : > { %v6426_v61 = vld [vmem:[%s9224_s4 + $0x1f] ss:$0 sm:$0xff] }
0x1929   : > { %v3132_v46 = vpop.f32.mrf.mxu0 }
0x192b   : > { %v7142_v54 = vpop.f32.mrf.mxu0 }
0x192d   : > { %v3232_v58 = vpop.f32.mrf.mxu0 }
0x192e   : > { %v3239_v63 = vpack.c.bf16 %v3232_v58, %v3232_v58 }
0x192f   : > { %v7155_v47 = vpop.f32.mrf.mxu0 }
0x1930   : > { %v3244_v48 = vsel %vm2940_vm2, %v3239_v63, 0 }
0x1931   : > { %v3235_v16 = vpop.f32.mrf.mxu0  ;;  %7158 = vmatpush3.bf16.msra.mxu1 %v3244_v48 }
0x1932   : > { %7169 = vmatprep.subr.bf16.mxu1 %v7850_v0 }
0x1933   : > { %v7156_v22 = vpop.f32.mrf.mxu0 }
0x1935   : > { %v3326_v30 = vpop.f32.mrf.mxu0 }
0x1936   : > { %v3332_v49 = vmul.f32 0.35355338, %v3326_v30 }
0x1937   : > { %v7167_v62 = vpop.f32.mrf.mxu0 }
0x1938   : > { %v3333_v2 = vsel %vm2876_vm15, %v3332_v49, -inf }
0x1939   : > { %3334 = vmax.xlane.f32.xlu0 %v3333_v2  ;;  %v3329_v55 = vpop.f32.mrf.mxu0 }
0x193a   : > { %v3522_v55 = vld [vmem:[#allocation2 + $0x2f8] sm:$0xff] }
0x193b   : > { %v7168_v40 = vpop.f32.mrf.mxu0 }
0x193d   : > { %2456 = vadd.xlane.f32.xlu0 %v2455_v4  ;;  %v3519_v4 = vld [vmem:[#allocation2 + $0x2e0] sm:$0xff] }
0x1990   : > { %v3190_v60 = vpop.xlane.xlu1 %3189 }
0x1991   : > { %7685 = vrcp.f32 %v3190_v60  ;;  %v3520_v60 = vld [vmem:[#allocation2 + $0x2e8] sm:$0xff] }
0x199e   : > { %v7686_v1 = vpop.eup %7685 }
0x199f   : > { %v3192_v7 = vmul.f32 %v7686_v1, %v7684_v41  ;;  %v3524_v1 = vpack.c.bf16 %v3520_v60, %v3519_v4 }
0x19a1   : > { %v3238_v24 = vpack.c.bf16 %v3192_v7, %v3192_v7 }
0x19a3   : > { %7160 = vmatmul.mubr.msk.bf16.vlgmr.msra.gmra.mxu1 %vm2876_vm15, %v3238_v24 }
0x19a4   : > { %7170 = vmatpush3.bf16.msra.mxu1 %v8497_v31  ;;  %7173 = vmatprep.mubr.msk.bf16.mxu1 %vm7851_vm0, %v7850_v0 }
0x19a5   : > { %7171 = vmatprep.subr.bf16.mxu1 %v7850_v0 }
0x19a8   : > { %7172 = vmatpush3.bf16.msra.mxu1 %v8501_v29  ;;  %v2452_v29 = vadd.f32 %v8473_v23, %v8415_v11 }
0x19a9   : > { %7183 = vmatprep.subr.bf16.mxu1 %v7850_v0 }
0x19aa   : > { %v2458_v17 = vsel %vm414_vm3, %v2452_v29, 0.0 }
0x19ab   : > { %7174 = vmatmul.mubr.msk.bf16.vlgmr.msra.gmra.mxu1 %vm414_vm3, %v3345_v14 }
0x19ac   : > { %7187 = vmatprep.mubr.msk.bf16.mxu1 %vm7851_vm0, %v7850_v0 }
0x19c2   : > { %v3335_v3 = vpop.xlane.xlu0 %3334 }
0x19c3   : > { %v3336_v31 = vsub.f32 %v3332_v49, %v3335_v3 }
0x19c5   : > { %v3337_v8 = vmul.f32 1.442695, %v3336_v31 }
0x19c6   : > { %v2457_v13 = vpop.xlane.xlu0 %2456 }
0x19c7   : > { %7687 = vpow2.f32 %v3337_v8  ;;  %v2461_v57 = vmul.f32 0.03125, %v2457_v13 }
0x19c9   : > { %v2463_v42 = vsub.f32 %v2451_v53, %v2461_v57  ;;  %v3521_v53 = vld [vmem:[#allocation2 + $0x2f0] sm:$0xff] }
0x19ca   : > { %v3525_v40 = vpack.c.bf16 %v3522_v55, %v3521_v53 }
0x19cb   : > { %v2465_v9 = vmul.f32 %v2463_v42, %v2463_v42 }
0x19cd   : > { %v2467_v50 = vsel %vm414_vm3, %v2465_v9, 0.0 }
0x19d4   : > { %v7688_v59 = vpop.eup %7687 }
0x19d5   : > { %v3339_v28 = vsel %vm2876_vm15, %v7688_v59, 0.0 }
0x19d6   : > { %3340 = vadd.xlane.f32.xlu1 %v3339_v28 }
0x19da   : > { %2459 = vadd.xlane.f32.xlu1 %v2458_v17  ;;  %v3467_v17 = vld [vmem:[#allocation2 + $0x2d8] sm:$0xff] }
0x19de   : > { %2468 = vadd.xlane.f32.xlu1 %v2467_v50  ;;  %v3464_v50 = vld [vmem:[#allocation2 + $0x2c0] sm:$0xff] }
0x1a5f   : > { %v3341_v39 = vpop.xlane.xlu1 %3340 }
0x1a60   : > { %7689 = vrcp.f32 %v3341_v39  ;;  %v3465_v39 = vld [vmem:[#allocation2 + $0x2c8] sm:$0xff] }
0x1a63   : > { %v3280_v18 = vpop.f32.mrf.mxu1  ;;  %v2460_v15 = vpop.xlane.xlu1 %2459 }
0x1a64   : > { %v3286_v19 = vadd.f32 %v3280_v18, %v3135_v45  ;;  %v2462_v58 = vmul.f32 0.03125, %v2460_v15  ;;  %v3469_v18 = vpack.c.bf16 %v3465_v39, %v3464_v50 }
0x1a65   : > { %v7161_v21 = vpop.f32.mrf.mxu1 }
0x1a66   : > { %v2464_v47 = vsub.f32 %v2452_v29, %v2462_v58  ;;  %v3466_v29 = vld [vmem:[#allocation2 + $0x2d0] sm:$0xff] }
0x1a67   : > { %v3283_v5 = vpop.f32.mrf.mxu1  ;;  %v2469_v25 = vpop.xlane.xlu1 %2468  ;;  %v3470_v9 = vpack.c.bf16 %v3467_v17, %v3466_v29 }
0x1a68   : > { %v2473_v26 = vmul.f32 0.03125, %v2469_v25  ;;  %v2466_v49 = vmul.f32 %v2464_v47, %v2464_v47  ;;  %v6450_v25 = vld [vmem:[%s9224_s4 + $0x2a] ss:$0 sm:$0xff] }
0x1a69   : > { %v7162_v32 = vpop.f32.mrf.mxu1  ;;  %7184 = vmatpush3.bf16.msra.mxu1 %v3470_v9 }
0x1a6a   : > { %v2475_v11 = vadd.f32 1e-05, %v2473_v26  ;;  %v2470_v2 = vsel %vm414_vm3, %v2466_v49, 0.0  ;;  %7185 = vmatprep.subr.bf16.mxu1 %v7850_v0  ;;  %v6451_v32 = vld [vmem:[%s9224_s4 + $0x2b] ss:$0 sm:$0xff] }
0x1a6b   : > { %v3383_v23 = vpop.f32.mrf.mxu1  ;;  %v6452_v49 = vld [vmem:[%s9224_s4 + $0x26] ss:$0 sm:$0xff] }
0x1a6c   : > { %7691 = vrsqrt.f32 %v2475_v11  ;;  %v3390_v33 = vpack.c.bf16 %v3383_v23, %v3383_v23  ;;  %v3577_v23 = vld [vmem:[#allocation2 + $0x310] sm:$0xff] }
0x1a6d   : > { %v7690_v34 = vpop.eup %7689  ;;  %v7175_v35 = vpop.f32.mrf.mxu1  ;;  %7186 = vmatpush3.bf16.msra.mxu1 %v3469_v18 }
0x1a6e   : > { %v3395_v37 = vsel %vm2940_vm2, %v3390_v33, 0  ;;  %v3343_v20 = vmul.f32 %v7690_v34, %v7688_v59  ;;  %7199 = vmatprep.subr.bf16.mxu1 %v7850_v0  ;;  %v3578_v33 = vld [vmem:[#allocation2 + $0x318] sm:$0xff] }
0x1a6f   : > { %v3386_v41 = vpop.f32.mrf.mxu1  ;;  %7178 = vmatpush3.bf16.msra.mxu0 %v3395_v37  ;;  %v3580_v35 = vpack.c.bf16 %v3578_v33, %v3577_v23 }
0x1a70   : > { %v3389_v56 = vpack.c.bf16 %v3343_v20, %v3343_v20  ;;  %7191 = vmatprep.subr.bf16.mxu0 %v7850_v0  ;;  %v3575_v20 = vld [vmem:[#allocation2 + $0x300] sm:$0xff]  ;;  %v3576_v41 = vld [vmem:[#allocation2 + $0x308] sm:$0xff] }
0x1a71   : > { %v7176_v36 = vpop.f32.mrf.mxu1 }
0x1a72   : > { %7180 = vmatmul.mubr.msk.bf16.vlgmr.msra.gmra.mxu0 %vm2876_vm15, %v3389_v56  ;;  %v3579_v56 = vpack.c.bf16 %v3576_v41, %v3575_v20 }
0x1a73   : > { %7195 = vmatprep.mubr.msk.bf16.mxu0 %vm7851_vm0, %v7850_v0  ;;  %7192 = vmatpush3.bf16.msra.mxu0 %v3525_v40 }
0x1a74   : > { %7193 = vmatprep.subr.bf16.mxu0 %v7850_v0 }
0x1a77   : > { %7194 = vmatpush3.bf16.msra.mxu0 %v3524_v1  ;;  %v6456_v1 = vld [vmem:[%s9224_s4 + $0x28] ss:$0 sm:$0xff] }
0x1a78   : > { %7207 = vmatprep.subr.bf16.mxu0 %v7850_v0 }
0x1a79   : > { %v7692_v43 = vpop.eup %7691 }
0x1a7a   : > { %v2479_v45 = vmul.f32 %v7692_v43, %v2463_v42  ;;  %v6454_v43 = vld [vmem:[%s9224_s4 + $0x27] ss:$0 sm:$0xff] }
0x1a7c   : > { %v2485_v46 = vmul.f32 %v6425_v44, %v2479_v45 }
0x1a7e   : > { %v2491_v54 = vadd.f32 %v6426_v61, %v2485_v46 }
0x1a80   : > { %2493 = vst.msk [vmem:[%s8629_s28] sm:$0xff] %vm414_vm3, %v2491_v54 }
0x1b32   : > { %v3431_v63 = vpop.f32.mrf.mxu0 }
0x1b33   : > { %v3437_v48 = vadd.f32 %v3431_v63, %v3286_v19 }
0x1b34   : > { %v7181_v16 = vpop.f32.mrf.mxu0 }
0x1b35   : > { %v3438_v22 = vadd.f32 %v3437_v48, %v8482_v38  ;;  %v3630_v48 = vld [vmem:[#allocation2 + $0x338] sm:$0xff] }
0x1b36   : > { %v3434_v27 = vpop.f32.mrf.mxu0 }
0x1b37   : > { %v3441_v30 = vsel %vm414_vm3, %v3438_v22, 0.0  ;;  %v3628_v27 = vld [vmem:[#allocation2 + $0x328] sm:$0xff] }
0x1b38   : > { %3442 = vadd.xlane.f32.xlu0 %v3441_v30  ;;  %v7182_v62 = vpop.f32.mrf.mxu0 }
0x1b3c   : > { %2471 = vadd.xlane.f32.xlu0 %v2470_v2 }
0x1bc1   : > { %v3443_v38 = vpop.xlane.xlu0 %3442 }
0x1bc2   : > { %v3444_v7 = vmul.f32 0.03125, %v3443_v38 }
0x1bc4   : > { %v3445_v24 = vsub.f32 %v3438_v22, %v3444_v7  ;;  %v3627_v22 = vld [vmem:[#allocation2 + $0x320] sm:$0xff] }
0x1bc5   : > { %v2472_v10 = vpop.xlane.xlu0 %2471  ;;  %v8680_v30 = vpack.c.bf16 %v3628_v27, %v3627_v22 }
0x1bc6   : > { %v2474_v14 = vmul.f32 0.03125, %v2472_v10  ;;  %v3446_v3 = vmul.f32 %v3445_v24, %v3445_v24 }
0x1bc8   : > { %v2476_v31 = vadd.f32 1e-05, %v2474_v14  ;;  %v3447_v8 = vsel %vm414_vm3, %v3446_v3, 0.0 }
0x1bc9   : > { %3448 = vadd.xlane.f32.xlu1 %v3447_v8 }
0x1bca   : > { %7693 = vrsqrt.f32 %v2476_v31 }
0x1bd7   : > { %v7694_v13 = vpop.eup %7693 }
0x1bd8   : > { %v2480_v57 = vmul.f32 %v7694_v13, %v2464_v47  ;;  %v3629_v47 = vld [vmem:[#allocation2 + $0x330] sm:$0xff] }
0x1bd9   : > { %v8676_v16 = vpack.c.bf16 %v3630_v48, %v3629_v47 }
0x1bda   : > { %v2486_v59 = vmul.f32 %v6425_v44, %v2480_v57 }
0x1bdc   : > { %v2492_v42 = vadd.f32 %v6426_v61, %v2486_v59 }
0x1bde   : > { %v8639_v28 = vpack.c.bf16 %v2492_v42, %v2491_v54  ;;  %2494 = vst.msk [vmem:[%s8629_s28 + $0x8] sm:$0xff] %vm414_vm3, %v2492_v42  ;;  %s7785_s28 = sshll.u32 %s7852_s25, 4  ;;  %s7786_s28 = int_to_ptr.vmem [resolvable:$false] %s7785_s28 }
0x1bdf   : > { %s7787_s19 = scalar_lea.vmem %s7786_s28, 512  ;;  %p7788_p11 = scmp.lt.s32.totalorder %s9168_s11, %s7786_s28 }
0x1be0   : > { %7196 = vmatmul.mubr.msk.bf16.vlgmr.msra.gmra.mxu0 %vm414_vm3, %v8639_v28  ;;  %p7789_p12 = scmp.lt.s32.totalorder %s7787_s19, %s7781_s18 }
0x1be1   : > { %7209 = vmatprep.mubr.msk.bf16.mxu0 %vm7851_vm0, %v7850_v0 }
0x1be2   : > { %p7790_p13 = por %p7789_p12, %p7788_p11 }
0x1be4   : > { %p7791_p0 = pnand %p7790_p13, %p7784_p10 }
0x1c52   : > { %v3449_v15 = vpop.xlane.xlu1 %3448 }
0x1c53   : > { %v3450_v19 = vmul.f32 0.03125, %v3449_v15 }
0x1c55   : > { %v3451_v21 = vadd.f32 1e-05, %v3450_v19 }
0x1c57   : > { %7695 = vrsqrt.f32 %v3451_v21 }
0x1c64   : > { %v7696_v5 = vpop.eup %7695 }
0x1c65   : > { %v3453_v26 = vmul.f32 %v7696_v5, %v3445_v24 }
0x1c67   : > { %v3458_v11 = vmul.f32 %v6450_v25, %v3453_v26 }
0x1c69   : > { %v8655_v34 = vadd.f32 %v6451_v32, %v3458_v11 }
0x1c6b   : > { %v3468_v37 = vpack.c.bf16 %v8655_v34, %v8655_v34 }
0x1c6d   : > { %7188 = vmatmul.mubr.msk.bf16.vlgmr.msra.gmra.mxu1 %vm414_vm3, %v3468_v37 }
0x1c6e   : > { %7200 = vmatpush3.bf16.msra.mxu1 %v3580_v35  ;;  %7203 = vmatprep.mubr.msk.bf16.mxu1 %vm7851_vm0, %v7850_v0 }
0x1c6f   : > { %7201 = vmatprep.subr.bf16.mxu1 %v7850_v0 }
0x1c72   : > { %7202 = vmatpush3.bf16.msra.mxu1 %v3579_v56 }
0x1c73   : > { %7213 = vmatprep.subr.bf16.mxu1 %v7850_v0 }
0x1c75   : > { %7204 = vmatmul.mubr.msk.bf16.vlgmr.msra.gmra.mxu1 %vm414_vm3, %v8639_v28 }
0x1c76   : > { %7217 = vmatprep.mubr.msk.bf16.mxu1 %vm7851_vm0, %v7850_v0  ;;  %7214 = vmatpush3.bf16.msra.mxu1 %v8676_v16 }
0x1c77   : > { %7215 = vmatprep.subr.bf16.mxu1 %v7850_v0 }
0x1c7a   : > { %7216 = vmatpush3.bf16.msra.mxu1 %v8680_v30 }
0x1c7b   : > { %7227 = vmatprep.subr.bf16.mxu1 %v7850_v0 }
0x1ca0   : > { %v3568_v36 = vpop.f32.mrf.mxu0 }
0x1ca1   : > { %v3569_v61 = vadd.f32 %v6454_v43, %v3568_v36 }
0x1ca2   : > { %v7197_v44 = vpop.f32.mrf.mxu0 }
0x1ca4   : > { %v3571_v45 = vpop.f32.mrf.mxu0 }
0x1ca5   : > { %v3572_v46 = vadd.f32 %v6454_v43, %v3571_v45 }
0x1ca6   : > { %v7198_v54 = vpop.f32.mrf.mxu0 }
0x1ca7   : > { %v3639_v58 = vpack.c.bf16 %v3572_v46, %v3569_v61 }
0x1ca9   : > { %v8672_v63 = vsel %vm414_vm3, %v3639_v58, 0 }
0x1caa   : > { %7208 = vmatpush3.bf16.xpose.msra.mxu0 %v8672_v63 }
0x1cab   : > { %7221 = vmatprep.subr.bf16.mxu0 %v7850_v0 }
0x1d2d   : > { %v3513_v62 = vpop.f32.mrf.mxu1 }
0x1d2e   : > { %v8687_v2 = vadd.f32 %v6452_v49, %v3513_v62 }
0x1d2f   : > { %v7189_v53 = vpop.f32.mrf.mxu1 }
0x1d30   : > { %v3637_v55 = vmul.f32 %v8044_v6, %v8687_v2  ;;  %v3793_v15 = vmul.f32 %v8054_v12, %v8687_v2 }
0x1d31   : > { %v3516_v40 = vpop.f32.mrf.mxu1 }
0x1d32   : > { %v3638_v4 = vpack.c.bf16 %v3637_v55, %v3637_v55  ;;  %v3794_v19 = vpack.c.bf16 %v3793_v15, %v3793_v15 }
0x1d33   : > { %v7190_v60 = vpop.f32.mrf.mxu1 }
0x1d34   : > { %7210 = vmatmul.mubr.msk.bf16.vlgmr.msra.gmra.mxu0 %vm414_vm3, %v3638_v4  ;;  %v3943_v60 = vmul.f32 %v8019_v51, %v8687_v2 }
0x1d35   : > { %v3620_v38 = vpop.f32.mrf.mxu1  ;;  %7223 = vmatprep.mubr.msk.bf16.mxu0 %vm7851_vm0, %v7850_v0 }
0x1d36   : > { %v3621_v7 = vadd.f32 %v6456_v1, %v3620_v38 }
0x1d37   : > { %v7205_v24 = vpop.f32.mrf.mxu1 }
0x1d38   : > { %v3698_v3 = vmul.f32 %v8044_v6, %v3621_v7  ;;  %v8699_v31 = vmul.f32 %v8054_v12, %v3621_v7  ;;  %v8702_v8 = vmul.f32 %v8019_v51, %v3621_v7  ;;  %v8705_v13 = vmul.f32 %v8022_v52, %v3621_v7 }
0x1d39   : > { %v3623_v10 = vpop.f32.mrf.mxu1 }
0x1d3a   : > { %v3624_v14 = vadd.f32 %v6456_v1, %v3623_v10  ;;  %v3944_v1 = vpack.c.bf16 %v3943_v60, %v3943_v60 }
0x1d3b   : > { %v7206_v57 = vpop.f32.mrf.mxu1 }
0x1d3c   : > { %v3699_v59 = vmul.f32 %v8044_v6, %v3624_v14  ;;  %v3851_v42 = vmul.f32 %v8054_v12, %v3624_v14  ;;  %v8710_v29 = vmul.f32 %v8019_v51, %v3624_v14  ;;  %v8713_v17 = vmul.f32 %v8022_v52, %v3624_v14 }
0x1d3e   : > { %v3700_v9 = vpack.c.bf16 %v3699_v59, %v3698_v3  ;;  %v3852_v50 = vpack.c.bf16 %v3851_v42, %v8699_v31  ;;  %v4002_v39 = vpack.c.bf16 %v8710_v29, %v8702_v8  ;;  %v4152_v18 = vpack.c.bf16 %v8713_v17, %v8705_v13 }
0x1d40   : > { %7218 = vmatmul.mubr.msk.bf16.vlgmr.msra.gmra.mxu1 %vm414_vm3, %v3700_v9 }
0x1d41   : > { %7228 = vmatpush3.bf16.xpose.msra.mxu1 %v8672_v63  ;;  %7229 = vmatprep.mubr.msk.bf16.mxu1 %vm7851_vm0, %v7850_v0 }
0x1d42   : > { %7241 = vmatprep.subr.bf16.mxu1 %v7850_v0 }
0x1d48   : > { %7230 = vmatmul.mubr.msk.bf16.vlgmr.msra.gmra.mxu1 %vm414_vm3, %v3794_v19 }
0x1d49   : > { %7243 = vmatprep.mubr.msk.bf16.mxu1 %vm7851_vm0, %v7850_v0 }
0x1df4   : > { %v3680_v21 = vpop.f32.mrf.mxu0 }
0x1df5   : > { %v3686_v5 = vmul.f32 0.35355338, %v3680_v21 }
0x1df6   : > { %v7211_v25 = vpop.f32.mrf.mxu0 }
0x1df7   : > { %v3687_v26 = vsel %vm357_vm1, %v3686_v5, -inf }
0x1df8   : > { %3688 = vmax.xlane.f32.xlu0 %v3687_v26  ;;  %v3683_v32 = vpop.f32.mrf.mxu0 }
0x1dfa   : > { %v7212_v11 = vpop.f32.mrf.mxu0 }
0x1dfb   : > { %v4093_v11 = vmul.f32 %v8022_v52, %v8687_v2  ;;  %v6458_v2 = vld [vmem:[%s9224_s4 + $0x29] ss:$0 sm:$0xff] }
0x1e00   : > { %v3740_v23 = vpop.f32.mrf.mxu1 }
0x1e02   : > { %v7219_v33 = vpop.f32.mrf.mxu1 }
0x1e04   : > { %v3743_v35 = vpop.f32.mrf.mxu1 }
0x1e05   : > { %v3748_v37 = vpack.c.bf16 %v3743_v35, %v3740_v23  ;;  %v4094_v23 = vpack.c.bf16 %v4093_v11, %v4093_v11 }
0x1e06   : > { %v7220_v20 = vpop.f32.mrf.mxu1 }
0x1e07   : > { %7222 = vmatpush3.bf16.msra.mxu0 %v3748_v37 }
0x1e08   : > { %v3832_v41 = vpop.f32.mrf.mxu1  ;;  %7233 = vmatprep.subr.bf16.mxu0 %v7850_v0 }
0x1e09   : > { %v3838_v56 = vmul.f32 0.35355338, %v3832_v41 }
0x1e0a   : > { %v7231_v36 = vpop.f32.mrf.mxu1 }
0x1e0b   : > { %v3839_v43 = vsel %vm357_vm1, %v3838_v56, -inf }
0x1e0c   : > { %v3835_v44 = vpop.f32.mrf.mxu1  ;;  %3840 = vmax.xlane.f32.xlu0 %v3839_v43 }
0x1e0e   : > { %v7232_v45 = vpop.f32.mrf.mxu1 }
0x1e81   : > { %v3689_v61 = vpop.xlane.xlu0 %3688 }
0x1e82   : > { %v3690_v46 = vsub.f32 %v3686_v5, %v3689_v61 }
0x1e84   : > { %v3691_v54 = vmul.f32 1.442695, %v3690_v46 }
0x1e86   : > { %7697 = vpow2.f32 %v3691_v54 }
0x1e93   : > { %v7698_v58 = vpop.eup %7697 }
0x1e94   : > { %v3693_v47 = vsel %vm357_vm1, %v7698_v58, 0.0 }
0x1e95   : > { %3694 = vadd.xlane.f32.xlu1 %v3693_v47  ;;  %v3841_v48 = vpop.xlane.xlu0 %3840 }
0x1e96   : > { %v3842_v22 = vsub.f32 %v3838_v56, %v3841_v48 }
0x1e98   : > { %v3843_v27 = vmul.f32 1.442695, %v3842_v22 }
0x1e9a   : > { %7699 = vpow2.f32 %v3843_v27 }
0x1ea7   : > { %v7700_v49 = vpop.eup %7699 }
0x1ea8   : > { %v3845_v62 = vsel %vm357_vm1, %v7700_v49, 0.0 }
0x1ea9   : > { %3846 = vadd.xlane.f32.xlu1 %v3845_v62 }
0x1f1e   : > { %v3695_v53 = vpop.xlane.xlu1 %3694 }
0x1f1f   : > { %7701 = vrcp.f32 %v3695_v53 }
0x1f2c   : > { %v7702_v55 = vpop.eup %7701 }
0x1f2d   : > { %v3697_v40 = vmul.f32 %v7702_v55, %v7698_v58 }
0x1f2f   : > { %v3747_v4 = vpack.c.bf16 %v3697_v40, %v3697_v40 }
0x1f31   : > { %7224 = vmatmul.mubr.msk.bf16.vlgmr.msra.gmra.mxu0 %vm357_vm1, %v3747_v4 }
0x1f32   : > { %7234 = vmatpush3.bf16.msra.mxu0 %v8676_v16  ;;  %7237 = vmatprep.mubr.msk.bf16.mxu0 %vm7851_vm0, %v7850_v0  ;;  %v3847_v38 = vpop.xlane.xlu1 %3846 }
0x1f33   : > { %7235 = vmatprep.subr.bf16.mxu0 %v7850_v0  ;;  %7703 = vrcp.f32 %v3847_v38 }
0x1f36   : > { %7236 = vmatpush3.bf16.msra.mxu0 %v8680_v30 }
0x1f37   : > { %7247 = vmatprep.subr.bf16.mxu0 %v7850_v0 }
0x1f39   : > { %7238 = vmatmul.mubr.msk.bf16.vlgmr.msra.gmra.mxu0 %vm414_vm3, %v3852_v50 }
0x1f3a   : > { %7248 = vmatpush3.bf16.xpose.msra.mxu0 %v8672_v63  ;;  %7249 = vmatprep.mubr.msk.bf16.mxu0 %vm7851_vm0, %v7850_v0 }
0x1f3b   : > { %7261 = vmatprep.subr.bf16.mxu0 %v7850_v0 }
0x1f40   : > { %v7704_v31 = vpop.eup %7703 }
0x1f41   : > { %7250 = vmatmul.mubr.msk.bf16.vlgmr.msra.gmra.mxu0 %vm414_vm3, %v3944_v1  ;;  %v3849_v59 = vmul.f32 %v7704_v31, %v7700_v49 }
0x1f42   : > { %7263 = vmatprep.mubr.msk.bf16.mxu0 %vm7851_vm0, %v7850_v0 }
0x1f43   : > { %v3897_v15 = vpack.c.bf16 %v3849_v59, %v3849_v59 }
0x1ff1   : > { %v3786_v7 = vpop.f32.mrf.mxu0 }
0x1ff2   : > { %v3792_v35 = vadd.f32 %v6458_v2, %v3786_v7  ;;  %v4270_v2 = vld [vmem:[#allocation2 + $0x348] sm:$0xff] }
0x1ff3   : > { %v7225_v24 = vpop.f32.mrf.mxu0 }
0x1ff5   : > { %v3789_v10 = vpop.f32.mrf.mxu0 }
0x1ff7   : > { %v7226_v14 = vpop.f32.mrf.mxu0 }
0x1ff9   : > { %v3890_v3 = vpop.f32.mrf.mxu0 }
0x1ffb   : > { %v7239_v57 = vpop.f32.mrf.mxu0 }
0x1ffd   : > { %v3893_v42 = vpop.f32.mrf.mxu0 }
0x1ffe   : > { %v3898_v9 = vpack.c.bf16 %v3893_v42, %v3890_v3 }
0x1fff   : > { %v7240_v50 = vpop.f32.mrf.mxu0 }
0x2000   : > { %7242 = vmatpush3.bf16.msra.mxu1 %v3898_v9 }
0x2001   : > { %v3982_v19 = vpop.f32.mrf.mxu0  ;;  %7253 = vmatprep.subr.bf16.mxu1 %v7850_v0 }
0x2002   : > { %v3988_v21 = vmul.f32 0.35355338, %v3982_v19 }
0x2003   : > { %7244 = vmatmul.mubr.msk.bf16.vlgmr.msra.gmra.mxu1 %vm357_vm1, %v3897_v15  ;;  %v7251_v5 = vpop.f32.mrf.mxu0 }
0x2004   : > { %7254 = vmatpush3.bf16.msra.mxu1 %v8676_v16  ;;  %v3989_v25 = vsel %vm357_vm1, %v3988_v21, -inf  ;;  %7257 = vmatprep.mubr.msk.bf16.mxu1 %vm7851_vm0, %v7850_v0 }
0x2005   : > { %3990 = vmax.xlane.f32.xlu0 %v3989_v25  ;;  %v3985_v26 = vpop.f32.mrf.mxu0  ;;  %7255 = vmatprep.subr.bf16.mxu1 %v7850_v0 }
0x2007   : > { %v7252_v32 = vpop.f32.mrf.mxu0 }
0x2008   : > { %7256 = vmatpush3.bf16.msra.mxu1 %v8680_v30 }
0x2009   : > { %7267 = vmatprep.subr.bf16.mxu1 %v7850_v0 }
0x200b   : > { %7258 = vmatmul.mubr.msk.bf16.vlgmr.msra.gmra.mxu1 %vm414_vm3, %v4002_v39 }
0x200c   : > { %7268 = vmatpush3.bf16.xpose.msra.mxu1 %v8672_v63  ;;  %7269 = vmatprep.mubr.msk.bf16.mxu1 %vm7851_vm0, %v7850_v0 }
0x200d   : > { %7281 = vmatprep.subr.bf16.mxu1 %v7850_v0 }
0x2013   : > { %7270 = vmatmul.mubr.msk.bf16.vlgmr.msra.gmra.mxu1 %vm414_vm3, %v4094_v23 }
0x2014   : > { %7283 = vmatprep.mubr.msk.bf16.mxu1 %vm7851_vm0, %v7850_v0 }
0x208e   : > { %v3991_v33 = vpop.xlane.xlu0 %3990 }
0x208f   : > { %v3992_v8 = vsub.f32 %v3988_v21, %v3991_v33 }
0x2091   : > { %v3993_v29 = vmul.f32 1.442695, %v3992_v8  ;;  %v4271_v8 = vld [vmem:[#allocation2 + $0x350] sm:$0xff] }
0x2093   : > { %7705 = vpow2.f32 %v3993_v29  ;;  %v4272_v29 = vld [vmem:[#allocation2 + $0x358] sm:$0xff] }
0x20a0   : > { %v7706_v39 = vpop.eup %7705 }
0x20a1   : > { %v3995_v63 = vsel %vm357_vm1, %v7706_v39, 0.0 }
0x20a2   : > { %3996 = vadd.xlane.f32.xlu1 %v3995_v63  ;;  %v4269_v63 = vld [vmem:[#allocation2 + $0x340] sm:$0xff] }
0x20c3   : > { %v3936_v37 = vpop.f32.mrf.mxu1 }
0x20c4   : > { %v3942_v20 = vadd.f32 %v3936_v37, %v3792_v35  ;;  %v4331_v35 = vld [vmem:[#allocation2 + $0x390] sm:$0xff]  ;;  %v4332_v37 = vld [vmem:[#allocation2 + $0x398] sm:$0xff] }
0x20c5   : > { %v7245_v41 = vpop.f32.mrf.mxu1 }
0x20c6   : > { %v4337_v41 = vpack.c.bf16 %v4332_v37, %v4331_v35  ;;  %v6477_v37 = vld [vmem:[%s9224_s4 + $0x2e] ss:$0 sm:$0xff] }
0x20c7   : > { %v3939_v56 = vpop.f32.mrf.mxu1 }
0x20c8   : > { %v4330_v56 = vld [vmem:[#allocation2 + $0x388] sm:$0xff] }
0x20c9   : > { %v7246_v36 = vpop.f32.mrf.mxu1 }
0x20cb   : > { %v4040_v43 = vpop.f32.mrf.mxu1 }
0x20cd   : > { %v7259_v44 = vpop.f32.mrf.mxu1 }
0x20cf   : > { %v4043_v45 = vpop.f32.mrf.mxu1 }
0x20d0   : > { %v4048_v61 = vpack.c.bf16 %v4043_v45, %v4040_v43 }
0x20d1   : > { %v7260_v46 = vpop.f32.mrf.mxu1 }
0x20d2   : > { %7262 = vmatpush3.bf16.msra.mxu0 %v4048_v61  ;;  %v6471_v46 = vld [vmem:[%s9224_s4 + $0x2c] ss:$0 sm:$0xff] }
0x20d3   : > { %v4132_v54 = vpop.f32.mrf.mxu1  ;;  %7273 = vmatprep.subr.bf16.mxu0 %v7850_v0 }
0x20d4   : > { %v4138_v58 = vmul.f32 0.35355338, %v4132_v54 }
0x20d5   : > { %v7271_v47 = vpop.f32.mrf.mxu1 }
0x20d6   : > { %v4139_v48 = vsel %vm357_vm1, %v4138_v58, -inf }
0x20d7   : > { %v4135_v22 = vpop.f32.mrf.mxu1  ;;  %4140 = vmax.xlane.f32.xlu0 %v4139_v48 }
0x20d9   : > { %v7272_v27 = vpop.f32.mrf.mxu1 }
0x20da   : > { %v4327_v27 = vld [vmem:[#allocation2 + $0x370] sm:$0xff] }
0x212b   : > { %v3997_v49 = vpop.xlane.xlu1 %3996 }
0x212c   : > { %7707 = vrcp.f32 %v3997_v49  ;;  %v4328_v49 = vld [vmem:[#allocation2 + $0x378] sm:$0xff] }
0x2139   : > { %v7708_v62 = vpop.eup %7707 }
0x213a   : > { %v3999_v53 = vmul.f32 %v7708_v62, %v7706_v39  ;;  %v4275_v39 = vpack.c.bf16 %v4272_v29, %v4271_v8  ;;  %v4335_v62 = vpack.c.bf16 %v4328_v49, %v4327_v27  ;;  %v4519_v29 = vld [vmem:[#allocation2 + $0x3e8] sm:$0xff]  ;;  %v4569_v27 = vld [vmem:[#allocation2 + $0x400] sm:$0xff] }
0x213b   : > { %v4570_v49 = vld [vmem:[#allocation2 + $0x408] sm:$0xff] }
0x213c   : > { %v4047_v55 = vpack.c.bf16 %v3999_v53, %v3999_v53  ;;  %v4325_v53 = vld [vmem:[#allocation2 + $0x360] sm:$0xff] }
0x213e   : > { %7264 = vmatmul.mubr.msk.bf16.vlgmr.msra.gmra.mxu0 %vm357_vm1, %v4047_v55  ;;  %v4326_v55 = vld [vmem:[#allocation2 + $0x368] sm:$0xff] }
0x213f   : > { %7274 = vmatpush3.bf16.msra.mxu0 %v8676_v16  ;;  %7277 = vmatprep.mubr.msk.bf16.mxu0 %vm7851_vm0, %v7850_v0 }
0x2140   : > { %7275 = vmatprep.subr.bf16.mxu0 %v7850_v0 }
0x2143   : > { %7276 = vmatpush3.bf16.msra.mxu0 %v8680_v30 }
0x2144   : > { %7287 = vmatprep.subr.bf16.mxu0 %v7850_v0 }
0x2146   : > { %7278 = vmatmul.mubr.msk.bf16.vlgmr.msra.gmra.mxu0 %vm414_vm3, %v4152_v18 }
0x2147   : > { %7291 = vmatprep.mubr.msk.bf16.mxu0 %vm7851_vm0, %v7850_v0  ;;  %7288 = vmatpush3.bf16.msra.mxu0 %v4275_v39 }
0x2148   : > { %7289 = vmatprep.subr.bf16.mxu0 %v7850_v0 }
0x2160   : > { %v4141_v40 = vpop.xlane.xlu0 %4140 }
0x2161   : > { %v4142_v4 = vsub.f32 %v4138_v58, %v4141_v40  ;;  %v6472_v58 = vld [vmem:[%s9224_s4 + $0x2d] ss:$0 sm:$0xff]  ;;  %v4334_v40 = vpack.c.bf16 %v4326_v55, %v4325_v53  ;;  %v6483_v53 = vld [vmem:[%s9224_s4 + $0x34] ss:$0 sm:$0xff] }
0x2163   : > { %v4143_v16 = vmul.f32 1.442695, %v4142_v4  ;;  %v6473_v4 = vld [vmem:[%s9224_s4 + $0x30] ss:$0 sm:$0xff] }
0x2165   : > { %7709 = vpow2.f32 %v4143_v16 }
0x2172   : > { %v7710_v60 = vpop.eup %7709 }
0x2173   : > { %v4145_v1 = vsel %vm357_vm1, %v7710_v60, 0.0 }
0x2174   : > { %4146 = vadd.xlane.f32.xlu1 %v4145_v1 }
0x21fd   : > { %v4147_v38 = vpop.xlane.xlu1 %4146 }
0x21fe   : > { %7711 = vrcp.f32 %v4147_v38  ;;  %v4086_v30 = vpop.f32.mrf.mxu0 }
0x21ff   : > { %v4092_v7 = vadd.f32 %v4086_v30, %v3942_v20  ;;  %v4329_v20 = vld [vmem:[#allocation2 + $0x380] sm:$0xff] }
0x2200   : > { %v7265_v24 = vpop.f32.mrf.mxu0  ;;  %v4336_v36 = vpack.c.bf16 %v4330_v56, %v4329_v20 }
0x2202   : > { %v4089_v10 = vpop.f32.mrf.mxu0 }
0x2203   : > { %v6475_v10 = vld [vmem:[%s9224_s4 + $0x31] ss:$0 sm:$0xff] }
0x2204   : > { %v7266_v13 = vpop.f32.mrf.mxu0 }
0x2206   : > { %v4190_v17 = vpop.f32.mrf.mxu0 }
0x2208   : > { %v7279_v18 = vpop.f32.mrf.mxu0 }
0x220a   : > { %v4193_v14 = vpop.f32.mrf.mxu0 }
0x220b   : > { %v7712_v3 = vpop.eup %7711  ;;  %v4198_v31 = vpack.c.bf16 %v4193_v14, %v4190_v17 }
0x220c   : > { %v4149_v57 = vmul.f32 %v7712_v3, %v7710_v60  ;;  %v7280_v59 = vpop.f32.mrf.mxu0 }
0x220d   : > { %7282 = vmatpush3.bf16.msra.mxu1 %v4198_v31 }
0x220e   : > { %v4197_v42 = vpack.c.bf16 %v4149_v57, %v4149_v57  ;;  %7295 = vmatprep.subr.bf16.mxu1 %v7850_v0 }
0x2210   : > { %7284 = vmatmul.mubr.msk.bf16.vlgmr.msra.gmra.mxu1 %vm357_vm1, %v4197_v42 }
0x2211   : > { %7303 = vmatprep.mubr.msk.bf16.mxu1 %vm7851_vm0, %v7850_v0  ;;  %7296 = vmatpush3.bf16.msra.mxu1 %v4337_v41  ;;  %v6478_v41 = vld [vmem:[%s9224_s4 + $0x2f] ss:$0 sm:$0xff] }
0x2212   : > { %7297 = vmatprep.subr.bf16.mxu1 %v7850_v0 }
0x2215   : > { %7298 = vmatpush3.bf16.msra.mxu1 %v4336_v36  ;;  %v4469_v36 = vld [vmem:[#allocation2 + $0x3d0] sm:$0xff] }
0x2216   : > { %7299 = vmatprep.subr.bf16.mxu1 %v7850_v0 }
0x2219   : > { %7300 = vmatpush3.bf16.msra.mxu1 %v4335_v62  ;;  %v8856_v62 = vpack.c.bf16 %v4570_v49, %v4569_v27 }
0x221a   : > { %7301 = vmatprep.subr.bf16.mxu1 %v7850_v0 }
0x221d   : > { %7302 = vmatpush3.bf16.msra.mxu1 %v4334_v40 }
0x221e   : > { %7323 = vmatprep.subr.bf16.mxu1 %v7850_v0 }
0x22d0   : > { %v4236_v9 = vpop.f32.mrf.mxu1 }
0x22d1   : > { %v4242_v50 = vadd.f32 %v4236_v9, %v4092_v7 }
0x22d2   : > { %v7285_v15 = vpop.f32.mrf.mxu1 }
0x22d3   : > { %v4243_v19 = vadd.f32 %v4242_v50, %v8655_v34  ;;  %v4274_v34 = vpack.c.bf16 %v4270_v2, %v4269_v63 }
0x22d4   : > { %v4239_v21 = vpop.f32.mrf.mxu1 }
0x22d5   : > { %v4246_v5 = vsel %vm414_vm3, %v4243_v19, 0.0  ;;  %7290 = vmatpush3.bf16.msra.mxu0 %v4274_v34  ;;  %v4415_v21 = vld [vmem:[#allocation2 + $0x3b8] sm:$0xff] }
0x22d6   : > { %4247 = vadd.xlane.f32.xlu0 %v4246_v5  ;;  %v7286_v25 = vpop.f32.mrf.mxu1  ;;  %7307 = vmatprep.subr.bf16.mxu0 %v7850_v0  ;;  %v4520_v5 = vld [vmem:[#allocation2 + $0x3f0] sm:$0xff] }
0x235f   : > { %v4248_v26 = vpop.xlane.xlu0 %4247 }
0x2360   : > { %v4249_v32 = vmul.f32 0.03125, %v4248_v26  ;;  %v4521_v26 = vld [vmem:[#allocation2 + $0x3f8] sm:$0xff] }
0x2362   : > { %v4250_v11 = vsub.f32 %v4243_v19, %v4249_v32  ;;  %v4414_v19 = vld [vmem:[#allocation2 + $0x3b0] sm:$0xff]  ;;  %v4523_v32 = vpack.c.bf16 %v4521_v26, %v4520_v5 }
0x2363   : > { %v4418_v25 = vpack.c.bf16 %v4415_v21, %v4414_v19 }
0x2364   : > { %v4251_v23 = vmul.f32 %v4250_v11, %v4250_v11 }
0x2366   : > { %v4252_v33 = vsel %vm414_vm3, %v4251_v23, 0.0  ;;  %v4413_v23 = vld [vmem:[#allocation2 + $0x3a8] sm:$0xff] }
0x2367   : > { %4253 = vadd.xlane.f32.xlu1 %v4252_v33  ;;  %v4518_v33 = vld [vmem:[#allocation2 + $0x3e0] sm:$0xff] }
0x2368   : > { %v4522_v39 = vpack.c.bf16 %v4519_v29, %v4518_v33 }
0x23f0   : > { %v4254_v43 = vpop.xlane.xlu1 %4253 }
0x23f1   : > { %v4255_v44 = vmul.f32 0.03125, %v4254_v43  ;;  %v4470_v43 = vld [vmem:[#allocation2 + $0x3d8] sm:$0xff] }
0x23f3   : > { %v4256_v45 = vadd.f32 1e-05, %v4255_v44 }
0x23f5   : > { %7713 = vrsqrt.f32 %v4256_v45  ;;  %v4472_v45 = vpack.c.bf16 %v4470_v43, %v4469_v36 }
0x2402   : > { %v7714_v61 = vpop.eup %7713 }
0x2403   : > { %v4258_v54 = vmul.f32 %v7714_v61, %v4250_v11  ;;  %v4412_v11 = vld [vmem:[#allocation2 + $0x3a0] sm:$0xff] }
0x2404   : > { %v4417_v8 = vpack.c.bf16 %v4413_v23, %v4412_v11 }
0x2405   : > { %v4263_v47 = vmul.f32 %v6471_v46, %v4258_v54  ;;  %v4467_v46 = vld [vmem:[#allocation2 + $0x3c0] sm:$0xff]  ;;  %v4468_v54 = vld [vmem:[#allocation2 + $0x3c8] sm:$0xff] }
0x2407   : > { %v4268_v48 = vadd.f32 %v6472_v58, %v4263_v47  ;;  %v4471_v58 = vpack.c.bf16 %v4468_v54, %v4467_v46  ;;  %v4571_v47 = vld [vmem:[#allocation2 + $0x410] sm:$0xff] }
0x2409   : > { %v4273_v22 = vpack.c.bf16 %v4268_v48, %v4268_v48 }
0x240b   : > { %7292 = vmatmul.mubr.msk.bf16.vlgmr.msra.gmra.mxu0 %vm414_vm3, %v4273_v22 }
0x240c   : > { %7311 = vmatprep.mubr.msk.bf16.mxu0 %vm7851_vm0, %v7850_v0  ;;  %7308 = vmatpush3.bf16.msra.mxu0 %v4418_v25 }
0x240d   : > { %7309 = vmatprep.subr.bf16.mxu0 %v7850_v0 }
0x2410   : > { %7310 = vmatpush3.bf16.msra.mxu0 %v4417_v8 }
0x2411   : > { %7315 = vmatprep.subr.bf16.mxu0 %v7850_v0 }
0x24cb   : > { %v4318_v16 = vpop.f32.mrf.mxu0 }
0x24cc   : > { %v4319_v60 = vadd.f32 %v6473_v4, %v4318_v16 }
0x24cd   : > { %v7293_v1 = vpop.f32.mrf.mxu0 }
0x24ce   : > { %v4324_v38 = vmax.f32 %v4319_v60, 0.0 }
0x24cf   : > { %v4321_v30 = vpop.f32.mrf.mxu0 }
0x24d0   : > { %v4333_v7 = vpack.c.bf16 %v4324_v38, %v4324_v38 }
0x24d1   : > { %v7294_v24 = vpop.f32.mrf.mxu0 }
0x24d2   : > { %7304 = vmatmul.mubr.msk.bf16.vlgmr.msra.gmra.mxu1 %vm1362_vm14, %v4333_v7 }
0x24d3   : > { %7327 = vmatprep.mubr.msk.bf16.mxu1 %vm7851_vm0, %v7850_v0  ;;  %7324 = vmatpush3.bf16.msra.mxu1 %v4523_v32 }
0x24d4   : > { %7325 = vmatprep.subr.bf16.mxu1 %v7850_v0 }
0x24d7   : > { %7326 = vmatpush3.bf16.msra.mxu1 %v4522_v39 }
0x24d8   : > { %7337 = vmatprep.subr.bf16.mxu1 %v7850_v0 }
0x2592   : > { %v4380_v13 = vpop.f32.mrf.mxu1 }
0x2593   : > { %v4381_v17 = vadd.f32 %v6475_v10, %v4380_v13  ;;  %v6481_v13 = vld [vmem:[%s9224_s4 + $0x33] ss:$0 sm:$0xff] }
0x2594   : > { %v7305_v18 = vpop.f32.mrf.mxu1 }
0x2595   : > { %v4386_v14 = vadd.f32 %v4381_v17, %v4268_v48  ;;  %v4572_v48 = vld [vmem:[#allocation2 + $0x418] sm:$0xff]  ;;  %v6479_v17 = vld [vmem:[%s9224_s4 + $0x32] ss:$0 sm:$0xff] }
0x2596   : > { %v4383_v3 = vpop.f32.mrf.mxu1  ;;  %v8852_v22 = vpack.c.bf16 %v4572_v48, %v4571_v47 }
0x2597   : > { %v4389_v31 = vsel %vm414_vm3, %v4386_v14, 0.0 }
0x2598   : > { %4390 = vadd.xlane.f32.xlu0 %v4389_v31  ;;  %v7306_v57 = vpop.f32.mrf.mxu1 }
0x2621   : > { %v4391_v59 = vpop.xlane.xlu0 %4390 }
0x2622   : > { %v4392_v42 = vmul.f32 0.03125, %v4391_v59 }
0x2624   : > { %v4393_v9 = vsub.f32 %v4386_v14, %v4392_v42 }
0x2626   : > { %v4394_v50 = vmul.f32 %v4393_v9, %v4393_v9 }
0x2628   : > { %v4395_v15 = vsel %vm414_vm3, %v4394_v50, 0.0 }
0x2629   : > { %4396 = vadd.xlane.f32.xlu1 %v4395_v15 }
0x26b2   : > { %v4397_v63 = vpop.xlane.xlu1 %4396 }
0x26b3   : > { %v4398_v2 = vmul.f32 0.03125, %v4397_v63 }
0x26b5   : > { %v4399_v34 = vadd.f32 1e-05, %v4398_v2 }
0x26b7   : > { %7715 = vrsqrt.f32 %v4399_v34 }
0x26c4   : > { %v7716_v35 = vpop.eup %7715 }
0x26c5   : > { %v4401_v20 = vmul.f32 %v7716_v35, %v4393_v9 }
0x26c7   : > { %v4406_v56 = vmul.f32 %v6477_v37, %v4401_v20 }
0x26c9   : > { %v8837_v44 = vadd.f32 %v6478_v41, %v4406_v56 }
0x26cb   : > { %v4416_v61 = vpack.c.bf16 %v8837_v44, %v8837_v44 }
0x26cd   : > { %7312 = vmatmul.mubr.msk.bf16.vlgmr.msra.gmra.mxu0 %vm414_vm3, %v4416_v61  ;;  %7328 = vmatmul.mubr.msk.bf16.vlgmr.msra.gmra.mxu1 %vm414_vm3, %v4416_v61 }
0x26ce   : > { %7316 = vmatpush3.bf16.msra.mxu0 %v4472_v45  ;;  %7319 = vmatprep.mubr.msk.bf16.mxu0 %vm7851_vm0, %v7850_v0 }
0x26cf   : > { %7317 = vmatprep.subr.bf16.mxu0 %v7850_v0  ;;  %7341 = vmatprep.mubr.msk.bf16.mxu1 %vm7851_vm0, %v7850_v0 }
0x26d0   : > { %7338 = vmatpush3.bf16.msra.mxu1 %v8852_v22 }
0x26d1   : > { %7339 = vmatprep.subr.bf16.mxu1 %v7850_v0 }
0x26d2   : > { %7318 = vmatpush3.bf16.msra.mxu0 %v4471_v58 }
0x26d3   : > { %7331 = vmatprep.subr.bf16.mxu0 %v7850_v0 }
0x26d4   : > { %7340 = vmatpush3.bf16.msra.mxu1 %v8856_v62 }
0x26d5   : > { %7320 = vmatmul.mubr.msk.bf16.vlgmr.msra.gmra.mxu0 %vm414_vm3, %v4416_v61  ;;  %7351 = vmatprep.subr.bf16.mxu1 %v7850_v0 }
0x26d6   : > { %7333 = vmatprep.mubr.msk.bf16.mxu0 %vm7851_vm0, %v7850_v0 }
0x278d   : > { %v4461_v55 = vpop.f32.mrf.mxu0  ;;  %v4563_v40 = vpop.f32.mrf.mxu1 }
0x278e   : > { %v8863_v4 = vadd.f32 %v6483_v53, %v4563_v40  ;;  %v8876_v31 = vadd.f32 %v6479_v17, %v4461_v55 }
0x278f   : > { %v7313_v16 = vpop.f32.mrf.mxu0  ;;  %v7329_v60 = vpop.f32.mrf.mxu1 }
0x2790   : > { %v4640_v1 = vmul.f32 %v8044_v6, %v8863_v4  ;;  %v4579_v50 = vmul.f32 %v8044_v6, %v8876_v31  ;;  %v4736_v15 = vmul.f32 %v8054_v12, %v8876_v31  ;;  %v4793_v16 = vmul.f32 %v8054_v12, %v8863_v4 }
0x2791   : > { %v4464_v38 = vpop.f32.mrf.mxu0  ;;  %v4566_v30 = vpop.f32.mrf.mxu1 }
0x2792   : > { %v4641_v7 = vpack.c.bf16 %v4640_v1, %v4640_v1  ;;  %v4580_v19 = vpack.c.bf16 %v4579_v50, %v4579_v50  ;;  %v4737_v21 = vpack.c.bf16 %v4736_v15, %v4736_v15  ;;  %v4794_v60 = vpack.c.bf16 %v4793_v16, %v4793_v16 }
0x2793   : > { %v7314_v24 = vpop.f32.mrf.mxu0  ;;  %v7330_v10 = vpop.f32.mrf.mxu1  ;;  %v4887_v1 = vmul.f32 %v8019_v51, %v8876_v31 }
0x2794   : > { %7342 = vmatmul.mubr.msk.bf16.vlgmr.msra.gmra.mxu1 %vm414_vm3, %v4641_v7 }
0x2795   : > { %v4512_v18 = vpop.f32.mrf.mxu0  ;;  %7353 = vmatprep.mubr.msk.bf16.mxu1 %vm7851_vm0, %v7850_v0  ;;  %v4888_v38 = vpack.c.bf16 %v4887_v1, %v4887_v1  ;;  %v5095_v1 = vmul.f32 %v8022_v52, %v8863_v4 }
0x2796   : > { %v4513_v14 = vadd.f32 %v6481_v13, %v4512_v18 }
0x2797   : > { %v7321_v3 = vpop.f32.mrf.mxu0 }
0x2798   : > { %v4581_v57 = vpack.c.bf16 %v4513_v14, %v4513_v14 }
0x2799   : > { %v4515_v59 = vpop.f32.mrf.mxu0 }
0x279a   : > { %v8879_v42 = vsel %vm414_vm3, %v4581_v57, 0 }
0x279b   : > { %v7322_v9 = vpop.f32.mrf.mxu0  ;;  %7332 = vmatpush3.bf16.xpose.msra.mxu0 %v8879_v42  ;;  %7352 = vmatpush3.bf16.xpose.msra.mxu1 %v8879_v42 }
0x279c   : > { %7345 = vmatprep.subr.bf16.mxu0 %v7850_v0  ;;  %7365 = vmatprep.subr.bf16.mxu1 %v7850_v0 }
0x27a2   : > { %7334 = vmatmul.mubr.msk.bf16.vlgmr.msra.gmra.mxu0 %vm414_vm3, %v4580_v19  ;;  %7354 = vmatmul.mubr.msk.bf16.vlgmr.msra.gmra.mxu1 %vm414_vm3, %v4737_v21  ;;  %v4944_v21 = vmul.f32 %v8019_v51, %v8863_v4 }
0x27a3   : > { %7347 = vmatprep.mubr.msk.bf16.mxu0 %vm7851_vm0, %v7850_v0  ;;  %7367 = vmatprep.mubr.msk.bf16.mxu1 %vm7851_vm0, %v7850_v0 }
0x2854   : > { %v4681_v5 = vpop.f32.mrf.mxu1 }
0x2855   : > { %v4688_v25 = vpack.c.bf16 %v4681_v5, %v4681_v5 }
0x2856   : > { %v7343_v26 = vpop.f32.mrf.mxu1 }
0x2857   : > { %v4693_v32 = vsel %vm2940_vm2, %v4688_v25, 0 }
0x2858   : > { %v4684_v11 = vpop.f32.mrf.mxu1  ;;  %7346 = vmatpush3.bf16.msra.mxu0 %v4693_v32 }
0x2859   : > { %7357 = vmatprep.subr.bf16.mxu0 %v7850_v0  ;;  %v4945_v11 = vpack.c.bf16 %v4944_v21, %v4944_v21 }
0x285a   : > { %v7344_v23 = vpop.f32.mrf.mxu1 }
0x2862   : > { %v4622_v33 = vpop.f32.mrf.mxu0  ;;  %v4775_v8 = vpop.f32.mrf.mxu1 }
0x2863   : > { %v4628_v29 = vmul.f32 0.35355338, %v4622_v33  ;;  %v4781_v2 = vmul.f32 0.35355338, %v4775_v8  ;;  %v5038_v33 = vmul.f32 %v8022_v52, %v8876_v31  ;;  %v6485_v31 = vld [vmem:[%s9224_s4 + $0x35] ss:$0 sm:$0xff] }
0x2864   : > { %v7335_v39 = vpop.f32.mrf.mxu0  ;;  %v7355_v63 = vpop.f32.mrf.mxu1 }
0x2865   : > { %v4629_v34 = vsel %vm2876_vm15, %v4628_v29, -inf  ;;  %v4782_v56 = vsel %vm2876_vm15, %v4781_v2, -inf  ;;  %v5039_v8 = vpack.c.bf16 %v5038_v33, %v5038_v33 }
0x2866   : > { %v4778_v35 = vpop.f32.mrf.mxu1  ;;  %4630 = vmax.xlane.f32.xlu0 %v4629_v34  ;;  %v4625_v37 = vpop.f32.mrf.mxu0 }
0x2868   : > { %v7336_v20 = vpop.f32.mrf.mxu0  ;;  %v7356_v41 = vpop.f32.mrf.mxu1 }
0x286a   : > { %4783 = vmax.xlane.f32.xlu0 %v4782_v56 }
0x28ef   : > { %v4631_v36 = vpop.xlane.xlu0 %4630 }
0x28f0   : > { %v4632_v43 = vsub.f32 %v4628_v29, %v4631_v36 }
0x28f2   : > { %v4633_v45 = vmul.f32 1.442695, %v4632_v43 }
0x28f3   : > { %v4784_v61 = vpop.xlane.xlu0 %4783 }
0x28f4   : > { %7717 = vpow2.f32 %v4633_v45  ;;  %v4785_v46 = vsub.f32 %v4781_v2, %v4784_v61 }
0x28f6   : > { %v4786_v54 = vmul.f32 1.442695, %v4785_v46 }
0x28f8   : > { %7719 = vpow2.f32 %v4786_v54 }
0x2901   : > { %v7718_v58 = vpop.eup %7717 }
0x2902   : > { %v4635_v47 = vsel %vm2876_vm15, %v7718_v58, 0.0 }
0x2903   : > { %4636 = vadd.xlane.f32.xlu1 %v4635_v47 }
0x2905   : > { %v7720_v48 = vpop.eup %7719 }
0x2906   : > { %v4788_v27 = vsel %vm2876_vm15, %v7720_v48, 0.0 }
0x2907   : > { %4789 = vadd.xlane.f32.xlu1 %v4788_v27 }
0x298c   : > { %v4637_v49 = vpop.xlane.xlu1 %4636 }
0x298d   : > { %7721 = vrcp.f32 %v4637_v49 }
0x2990   : > { %v4790_v30 = vpop.xlane.xlu1 %4789 }
0x2991   : > { %7723 = vrcp.f32 %v4790_v30 }
0x299a   : > { %v7722_v53 = vpop.eup %7721 }
0x299b   : > { %v4639_v55 = vmul.f32 %v7722_v53, %v7718_v58 }
0x299d   : > { %v4687_v40 = vpack.c.bf16 %v4639_v55, %v4639_v55 }
0x299e   : > { %v7724_v13 = vpop.eup %7723 }
0x299f   : > { %7348 = vmatmul.mubr.msk.bf16.vlgmr.msra.gmra.mxu0 %vm2876_vm15, %v4687_v40  ;;  %v4792_v14 = vmul.f32 %v7724_v13, %v7720_v48 }
0x29a0   : > { %7358 = vmatpush3.bf16.msra.mxu0 %v8852_v22  ;;  %7361 = vmatprep.mubr.msk.bf16.mxu0 %vm7851_vm0, %v7850_v0 }
0x29a1   : > { %7359 = vmatprep.subr.bf16.mxu0 %v7850_v0  ;;  %v4838_v50 = vpack.c.bf16 %v4792_v14, %v4792_v14 }
0x29a4   : > { %7360 = vmatpush3.bf16.msra.mxu0 %v8856_v62 }
0x29a5   : > { %7371 = vmatprep.subr.bf16.mxu0 %v7850_v0 }
0x29a7   : > { %7362 = vmatmul.mubr.msk.bf16.vlgmr.msra.gmra.mxu0 %vm414_vm3, %v4794_v60 }
0x29a8   : > { %7372 = vmatpush3.bf16.xpose.msra.mxu0 %v8879_v42  ;;  %7373 = vmatprep.mubr.msk.bf16.mxu0 %vm7851_vm0, %v7850_v0 }
0x29a9   : > { %7385 = vmatprep.subr.bf16.mxu0 %v7850_v0 }
0x29af   : > { %7374 = vmatmul.mubr.msk.bf16.vlgmr.msra.gmra.mxu0 %vm414_vm3, %v4888_v38  ;;  %v5096_v38 = vpack.c.bf16 %v5095_v1, %v5095_v1 }
0x29b0   : > { %7387 = vmatprep.mubr.msk.bf16.mxu0 %vm7851_vm0, %v7850_v0 }
0x2a5f   : > { %v4729_v7 = vpop.f32.mrf.mxu0 }
0x2a60   : > { %v4735_v34 = vadd.f32 %v6485_v31, %v4729_v7 }
0x2a61   : > { %v7349_v24 = vpop.f32.mrf.mxu0 }
0x2a63   : > { %v4732_v10 = vpop.f32.mrf.mxu0 }
0x2a65   : > { %v7350_v17 = vpop.f32.mrf.mxu0 }
0x2a67   : > { %v4832_v18 = vpop.f32.mrf.mxu0 }
0x2a68   : > { %v4839_v3 = vpack.c.bf16 %v4832_v18, %v4832_v18 }
0x2a69   : > { %v7363_v57 = vpop.f32.mrf.mxu0 }
0x2a6a   : > { %v4844_v59 = vsel %vm2940_vm2, %v4839_v3, 0 }
0x2a6b   : > { %v4835_v9 = vpop.f32.mrf.mxu0  ;;  %7366 = vmatpush3.bf16.msra.mxu1 %v4844_v59  ;;  %v5272_v59 = vld [vmem:[#allocation2 + $0x450] sm:$0xff] }
0x2a6c   : > { %7377 = vmatprep.subr.bf16.mxu1 %v7850_v0  ;;  %v5273_v9 = vld [vmem:[#allocation2 + $0x458] sm:$0xff] }
0x2a6d   : > { %v7364_v15 = vpop.f32.mrf.mxu0 }
0x2a6e   : > { %7368 = vmatmul.mubr.msk.bf16.vlgmr.msra.gmra.mxu1 %vm2876_vm15, %v4838_v50 }
0x2a6f   : > { %v4926_v19 = vpop.f32.mrf.mxu0  ;;  %7378 = vmatpush3.bf16.msra.mxu1 %v8852_v22  ;;  %7381 = vmatprep.mubr.msk.bf16.mxu1 %vm7851_vm0, %v7850_v0 }
0x2a70   : > { %v4932_v5 = vmul.f32 0.35355338, %v4926_v19  ;;  %7379 = vmatprep.subr.bf16.mxu1 %v7850_v0 }
0x2a71   : > { %v7375_v25 = vpop.f32.mrf.mxu0 }
0x2a72   : > { %v4933_v26 = vsel %vm2876_vm15, %v4932_v5, -inf  ;;  %v5275_v25 = vpack.c.bf16 %v5273_v9, %v5272_v59  ;;  %v5374_v9 = vld [vmem:[#allocation2 + $0x480] sm:$0xff] }
0x2a73   : > { %7380 = vmatpush3.bf16.msra.mxu1 %v8856_v62  ;;  %4934 = vmax.xlane.f32.xlu0 %v4933_v26  ;;  %v4929_v32 = vpop.f32.mrf.mxu0 }
0x2a74   : > { %7391 = vmatprep.subr.bf16.mxu1 %v7850_v0  ;;  %v5270_v32 = vld [vmem:[#allocation2 + $0x440] sm:$0xff] }
0x2a75   : > { %v7376_v23 = vpop.f32.mrf.mxu0 }
0x2a76   : > { %7382 = vmatmul.mubr.msk.bf16.vlgmr.msra.gmra.mxu1 %vm414_vm3, %v4945_v11  ;;  %v5271_v11 = vld [vmem:[#allocation2 + $0x448] sm:$0xff] }
0x2a77   : > { %7392 = vmatpush3.bf16.xpose.msra.mxu1 %v8879_v42  ;;  %7393 = vmatprep.mubr.msk.bf16.mxu1 %vm7851_vm0, %v7850_v0  ;;  %v5274_v33 = vpack.c.bf16 %v5271_v11, %v5270_v32 }
0x2a78   : > { %7405 = vmatprep.subr.bf16.mxu1 %v7850_v0 }
0x2a7e   : > { %7394 = vmatmul.mubr.msk.bf16.vlgmr.msra.gmra.mxu1 %vm414_vm3, %v5039_v8 }
0x2a7f   : > { %7407 = vmatprep.mubr.msk.bf16.mxu1 %vm7851_vm0, %v7850_v0 }
0x2afc   : > { %v4935_v29 = vpop.xlane.xlu0 %4934 }
0x2afd   : > { %v4936_v39 = vsub.f32 %v4932_v5, %v4935_v29 }
0x2aff   : > { %v4937_v63 = vmul.f32 1.442695, %v4936_v39 }
0x2b01   : > { %7725 = vpow2.f32 %v4937_v63 }
0x2b0e   : > { %v7726_v2 = vpop.eup %7725 }
0x2b0f   : > { %v4939_v42 = vsel %vm2876_vm15, %v7726_v2, 0.0 }
0x2b10   : > { %4940 = vadd.xlane.f32.xlu1 %v4939_v42 }
0x2b2e   : > { %v4880_v35 = vpop.f32.mrf.mxu1 }
0x2b2f   : > { %v4886_v37 = vadd.f32 %v4880_v35, %v4735_v34  ;;  %v6502_v35 = vld [vmem:[%s9224_s4 + $0x37] ss:$0 sm:$0xff] }
0x2b30   : > { %v7369_v20 = vpop.f32.mrf.mxu1 }
0x2b32   : > { %v4883_v41 = vpop.f32.mrf.mxu1 }
0x2b34   : > { %v7370_v56 = vpop.f32.mrf.mxu1 }
0x2b36   : > { %v4983_v36 = vpop.f32.mrf.mxu1 }
0x2b37   : > { %v4990_v43 = vpack.c.bf16 %v4983_v36, %v4983_v36 }
0x2b38   : > { %v7383_v45 = vpop.f32.mrf.mxu1 }
0x2b39   : > { %v4995_v61 = vsel %vm2940_vm2, %v4990_v43, 0 }
0x2b3a   : > { %v4986_v46 = vpop.f32.mrf.mxu1  ;;  %7386 = vmatpush3.bf16.msra.mxu0 %v4995_v61 }
0x2b3b   : > { %7397 = vmatprep.subr.bf16.mxu0 %v7850_v0 }
0x2b3c   : > { %v7384_v54 = vpop.f32.mrf.mxu1 }
0x2b3e   : > { %v5077_v58 = vpop.f32.mrf.mxu1 }
0x2b3f   : > { %v5083_v47 = vmul.f32 0.35355338, %v5077_v58 }
0x2b40   : > { %v7395_v48 = vpop.f32.mrf.mxu1 }
0x2b41   : > { %v5084_v27 = vsel %vm2876_vm15, %v5083_v47, -inf  ;;  %v5218_v48 = vld [vmem:[#allocation2 + $0x438] sm:$0xff] }
0x2b42   : > { %v5080_v49 = vpop.f32.mrf.mxu1  ;;  %5085 = vmax.xlane.f32.xlu0 %v5084_v27 }
0x2b43   : > { %v5215_v49 = vld [vmem:[#allocation2 + $0x420] sm:$0xff] }
0x2b44   : > { %v7396_v53 = vpop.f32.mrf.mxu1 }
0x2b45   : > { %v5216_v53 = vld [vmem:[#allocation2 + $0x428] sm:$0xff] }
0x2b99   : > { %v4941_v55 = vpop.xlane.xlu1 %4940 }
0x2b9a   : > { %7727 = vrcp.f32 %v4941_v55  ;;  %v5220_v55 = vpack.c.bf16 %v5216_v53, %v5215_v49 }
0x2ba7   : > { %v7728_v40 = vpop.eup %7727 }
0x2ba8   : > { %v4943_v16 = vmul.f32 %v7728_v40, %v7726_v2 }
0x2baa   : > { %v4989_v60 = vpack.c.bf16 %v4943_v16, %v4943_v16 }
0x2bac   : > { %7388 = vmatmul.mubr.msk.bf16.vlgmr.msra.gmra.mxu0 %vm2876_vm15, %v4989_v60 }
0x2bad   : > { %7398 = vmatpush3.bf16.msra.mxu0 %v8852_v22  ;;  %7401 = vmatprep.mubr.msk.bf16.mxu0 %vm7851_vm0, %v7850_v0 }
0x2bae   : > { %7399 = vmatprep.subr.bf16.mxu0 %v7850_v0 }
0x2bb1   : > { %7400 = vmatpush3.bf16.msra.mxu0 %v8856_v62 }
0x2bb2   : > { %7411 = vmatprep.subr.bf16.mxu0 %v7850_v0 }
0x2bb4   : > { %7402 = vmatmul.mubr.msk.bf16.vlgmr.msra.gmra.mxu0 %vm414_vm3, %v5096_v38  ;;  %v6498_v38 = vld [vmem:[%s9224_s4 + $0x3a] ss:$0 sm:$0xff] }
0x2bb5   : > { %7415 = vmatprep.mubr.msk.bf16.mxu0 %vm7851_vm0, %v7850_v0 }
0x2bcb   : > { %v5086_v30 = vpop.xlane.xlu0 %5085 }
0x2bcc   : > { %v5087_v22 = vsub.f32 %v5083_v47, %v5086_v30  ;;  %v5217_v47 = vld [vmem:[#allocation2 + $0x430] sm:$0xff] }
0x2bcd   : > { %v5221_v27 = vpack.c.bf16 %v5218_v48, %v5217_v47 }
0x2bce   : > { %v5088_v7 = vmul.f32 1.442695, %v5087_v22  ;;  %v6499_v22 = vld [vmem:[%s9224_s4 + $0x3b] ss:$0 sm:$0xff] }
0x2bcf   : > { %7412 = vmatpush3.bf16.msra.mxu0 %v5221_v27 }
0x2bd0   : > { %7729 = vpow2.f32 %v5088_v7  ;;  %7413 = vmatprep.subr.bf16.mxu0 %v7850_v0 }
0x2bd3   : > { %7414 = vmatpush3.bf16.msra.mxu0 %v5220_v55 }
0x2bd4   : > { %7427 = vmatprep.subr.bf16.mxu0 %v7850_v0 }
0x2bdd   : > { %v7730_v24 = vpop.eup %7729 }
0x2bde   : > { %v5090_v10 = vsel %vm2876_vm15, %v7730_v24, 0.0 }
0x2bdf   : > { %5091 = vadd.xlane.f32.xlu1 %v5090_v10  ;;  %v5325_v10 = vld [vmem:[#allocation2 + $0x478] sm:$0xff] }
0x2c68   : > { %v5092_v4 = vpop.xlane.xlu1 %5091 }
0x2c69   : > { %7731 = vrcp.f32 %v5092_v4 }
0x2c6c   : > { %v5031_v13 = vpop.f32.mrf.mxu0 }
0x2c6d   : > { %v5037_v62 = vadd.f32 %v5031_v13, %v4886_v37 }
0x2c6e   : > { %v7389_v17 = vpop.f32.mrf.mxu0 }
0x2c6f   : > { %v5322_v17 = vld [vmem:[#allocation2 + $0x460] sm:$0xff] }
0x2c70   : > { %v5034_v18 = vpop.f32.mrf.mxu0 }
0x2c71   : > { %v5323_v18 = vld [vmem:[#allocation2 + $0x468] sm:$0xff] }
0x2c72   : > { %v7390_v14 = vpop.f32.mrf.mxu0 }
0x2c73   : > { %v5326_v14 = vpack.c.bf16 %v5323_v18, %v5322_v17 }
0x2c74   : > { %v5134_v3 = vpop.f32.mrf.mxu0 }
0x2c75   : > { %v5141_v57 = vpack.c.bf16 %v5134_v3, %v5134_v3  ;;  %v5376_v3 = vld [vmem:[#allocation2 + $0x490] sm:$0xff] }
0x2c76   : > { %v7732_v50 = vpop.eup %7731  ;;  %v7403_v15 = vpop.f32.mrf.mxu0 }
0x2c77   : > { %v5094_v19 = vmul.f32 %v7732_v50, %v7730_v24  ;;  %v5146_v21 = vsel %vm2940_vm2, %v5141_v57, 0  ;;  %v5324_v24 = vld [vmem:[#allocation2 + $0x470] sm:$0xff]  ;;  %v5377_v57 = vld [vmem:[#allocation2 + $0x498] sm:$0xff]  ;;  %v5375_v50 = vld [vmem:[#allocation2 + $0x488] sm:$0xff] }
0x2c78   : > { %v5137_v5 = vpop.f32.mrf.mxu0  ;;  %7406 = vmatpush3.bf16.msra.mxu1 %v5146_v21  ;;  %v5327_v13 = vpack.c.bf16 %v5325_v10, %v5324_v24  ;;  %v9005_v59 = vpack.c.bf16 %v5377_v57, %v5376_v3  ;;  %v9009_v15 = vpack.c.bf16 %v5375_v50, %v5374_v9 }
0x2c79   : > { %v5140_v26 = vpack.c.bf16 %v5094_v19, %v5094_v19  ;;  %7419 = vmatprep.subr.bf16.mxu1 %v7850_v0 }
0x2c7a   : > { %v7404_v23 = vpop.f32.mrf.mxu0 }
0x2c7b   : > { %7408 = vmatmul.mubr.msk.bf16.vlgmr.msra.gmra.mxu1 %vm2876_vm15, %v5140_v26  ;;  %v6504_v23 = vld [vmem:[%s9224_s4 + $0x38] ss:$0 sm:$0xff] }
0x2c7c   : > { %7420 = vmatpush3.bf16.msra.mxu1 %v5275_v25  ;;  %7423 = vmatprep.mubr.msk.bf16.mxu1 %vm7851_vm0, %v7850_v0 }
0x2c7d   : > { %7421 = vmatprep.subr.bf16.mxu1 %v7850_v0 }
0x2c80   : > { %7422 = vmatpush3.bf16.msra.mxu1 %v5274_v33 }
0x2c81   : > { %7435 = vmatprep.subr.bf16.mxu1 %v7850_v0 }
0x2c83   : > { %7424 = vmatmul.mubr.msk.bf16.vlgmr.msra.gmra.mxu1 %vm414_vm3, %v8639_v28 }
0x2c84   : > { %7437 = vmatprep.mubr.msk.bf16.mxu1 %vm7851_vm0, %v7850_v0 }
0x2d3b   : > { %v5182_v8 = vpop.f32.mrf.mxu1 }
0x2d3c   : > { %v5188_v29 = vadd.f32 %v5182_v8, %v5037_v62 }
0x2d3d   : > { %v7409_v39 = vpop.f32.mrf.mxu1 }
0x2d3e   : > { %v5189_v63 = vadd.f32 %v5188_v29, %v8837_v44 }
0x2d3f   : > { %v5185_v2 = vpop.f32.mrf.mxu1 }
0x2d40   : > { %v5192_v42 = vsel %vm414_vm3, %v5189_v63, 0.0 }
0x2d41   : > { %5193 = vadd.xlane.f32.xlu0 %v5192_v42  ;;  %v7410_v31 = vpop.f32.mrf.mxu1 }
0x2d43   : > { %v5315_v34 = vpop.f32.mrf.mxu1 }
0x2d44   : > { %v5316_v41 = vadd.f32 %v6502_v35, %v5315_v34 }
0x2d45   : > { %v7425_v37 = vpop.f32.mrf.mxu1 }
0x2d47   : > { %v5318_v20 = vpop.f32.mrf.mxu1 }
0x2d48   : > { %v5319_v56 = vadd.f32 %v6502_v35, %v5318_v20 }
0x2d49   : > { %v7426_v36 = vpop.f32.mrf.mxu1 }
0x2d4a   : > { %v5386_v43 = vpack.c.bf16 %v5319_v56, %v5316_v41 }
0x2d4c   : > { %v8979_v45 = vsel %vm414_vm3, %v5386_v43, 0 }
0x2d4d   : > { %7436 = vmatpush3.bf16.xpose.msra.mxu1 %v8979_v45 }
0x2d4e   : > { %7449 = vmatprep.subr.bf16.mxu1 %v7850_v0 }
0x2dca   : > { %v5194_v44 = vpop.xlane.xlu0 %5193 }
0x2dcb   : > { %v5195_v61 = vmul.f32 0.03125, %v5194_v44 }
0x2dcd   : > { %v5196_v46 = vsub.f32 %v5189_v63, %v5195_v61 }
0x2dcf   : > { %v5197_v54 = vmul.f32 %v5196_v46, %v5196_v46 }
0x2dd1   : > { %v5198_v58 = vsel %vm414_vm3, %v5197_v54, 0.0 }
0x2dd2   : > { %5199 = vadd.xlane.f32.xlu1 %v5198_v58 }
0x2e5b   : > { %v5200_v40 = vpop.xlane.xlu1 %5199 }
0x2e5c   : > { %v5201_v16 = vmul.f32 0.03125, %v5200_v40 }
0x2e5e   : > { %v5202_v60 = vadd.f32 1e-05, %v5201_v16 }
0x2e60   : > { %7733 = vrsqrt.f32 %v5202_v60 }
0x2e6d   : > { %v7734_v1 = vpop.eup %7733 }
0x2e6e   : > { %v5204_v30 = vmul.f32 %v7734_v1, %v5196_v46 }
0x2e70   : > { %v5209_v7 = vmul.f32 %v6498_v38, %v5204_v30 }
0x2e72   : > { %v8992_v4 = vadd.f32 %v6499_v22, %v5209_v7 }
0x2e74   : > { %v5219_v62 = vpack.c.bf16 %v8992_v4, %v8992_v4 }
0x2e76   : > { %7416 = vmatmul.mubr.msk.bf16.vlgmr.msra.gmra.mxu0 %vm414_vm3, %v5219_v62 }
0x2e77   : > { %7428 = vmatpush3.bf16.msra.mxu0 %v5327_v13  ;;  %7431 = vmatprep.mubr.msk.bf16.mxu0 %vm7851_vm0, %v7850_v0 }
0x2e78   : > { %7429 = vmatprep.subr.bf16.mxu0 %v7850_v0 }
0x2e7b   : > { %7430 = vmatpush3.bf16.msra.mxu0 %v5326_v14 }
0x2e7c   : > { %7441 = vmatprep.subr.bf16.mxu0 %v7850_v0 }
0x2e7e   : > { %7432 = vmatmul.mubr.msk.bf16.vlgmr.msra.gmra.mxu0 %vm414_vm3, %v8639_v28  ;;  %v6500_v28 = vld [vmem:[%s9224_s4 + $0x36] ss:$0 sm:$0xff] }
0x2e7f   : > { %7445 = vmatprep.mubr.msk.bf16.mxu0 %vm7851_vm0, %v7850_v0  ;;  %7442 = vmatpush3.bf16.msra.mxu0 %v9005_v59 }
0x2e80   : > { %7443 = vmatprep.subr.bf16.mxu0 %v7850_v0 }
0x2e83   : > { %7444 = vmatpush3.bf16.msra.mxu0 %v9009_v15 }
0x2e84   : > { %7455 = vmatprep.subr.bf16.mxu0 %v7850_v0 }
0x2f36   : > { %v5264_v19 = vpop.f32.mrf.mxu0 }
0x2f37   : > { %v9016_v21 = vadd.f32 %v6500_v28, %v5264_v19 }
0x2f38   : > { %v7417_v5 = vpop.f32.mrf.mxu0 }
0x2f39   : > { %v5384_v25 = vmul.f32 %v8044_v6, %v9016_v21 }
0x2f3a   : > { %v5267_v26 = vpop.f32.mrf.mxu0 }
0x2f3b   : > { %v5385_v32 = vpack.c.bf16 %v5384_v25, %v5384_v25  ;;  %v5690_v25 = vmul.f32 %v8019_v51, %v9016_v21 }
0x2f3c   : > { %v7418_v11 = vpop.f32.mrf.mxu0 }
0x2f3d   : > { %7438 = vmatmul.mubr.msk.bf16.vlgmr.msra.gmra.mxu1 %vm414_vm3, %v5385_v32  ;;  %v5691_v26 = vpack.c.bf16 %v5690_v25, %v5690_v25 }
0x2f3e   : > { %v5367_v33 = vpop.f32.mrf.mxu0  ;;  %7451 = vmatprep.mubr.msk.bf16.mxu1 %vm7851_vm0, %v7850_v0 }
0x2f3f   : > { %v5368_v8 = vadd.f32 %v6504_v23, %v5367_v33 }
0x2f40   : > { %v7433_v29 = vpop.f32.mrf.mxu0 }
0x2f41   : > { %v5445_v2 = vmul.f32 %v8044_v6, %v5368_v8  ;;  %v9028_v42 = vmul.f32 %v8054_v12, %v5368_v8  ;;  %v9031_v31 = vmul.f32 %v8019_v51, %v5368_v8  ;;  %v9034_v34 = vmul.f32 %v8022_v52, %v5368_v8 }
0x2f42   : > { %v5370_v39 = vpop.f32.mrf.mxu0 }
0x2f43   : > { %v5371_v63 = vadd.f32 %v6504_v23, %v5370_v39 }
0x2f44   : > { %v7434_v35 = vpop.f32.mrf.mxu0 }
0x2f45   : > { %v5446_v37 = vmul.f32 %v8044_v6, %v5371_v63  ;;  %v5598_v20 = vmul.f32 %v8054_v12, %v5371_v63  ;;  %v9039_v41 = vmul.f32 %v8019_v51, %v5371_v63  ;;  %v9042_v56 = vmul.f32 %v8022_v52, %v5371_v63 }
0x2f46   : > { %v5540_v6 = vmul.f32 %v8054_v12, %v9016_v21 }
0x2f47   : > { %v5447_v36 = vpack.c.bf16 %v5446_v37, %v5445_v2  ;;  %v5599_v43 = vpack.c.bf16 %v5598_v20, %v9028_v42  ;;  %v5749_v44 = vpack.c.bf16 %v9039_v41, %v9031_v31  ;;  %v5899_v61 = vpack.c.bf16 %v9042_v56, %v9034_v34 }
0x2f48   : > { %v5541_v46 = vpack.c.bf16 %v5540_v6, %v5540_v6 }
0x2f49   : > { %7446 = vmatmul.mubr.msk.bf16.vlgmr.msra.gmra.mxu0 %vm414_vm3, %v5447_v36 }
0x2f4a   : > { %7456 = vmatpush3.bf16.xpose.msra.mxu0 %v8979_v45  ;;  %7457 = vmatprep.mubr.msk.bf16.mxu0 %vm7851_vm0, %v7850_v0 }
0x2f4b   : > { %7469 = vmatprep.subr.bf16.mxu0 %v7850_v0 }
0x2f51   : > { %7458 = vmatmul.mubr.msk.bf16.vlgmr.msra.gmra.mxu0 %vm414_vm3, %v5541_v46 }
0x2f52   : > { %7471 = vmatprep.mubr.msk.bf16.mxu0 %vm7851_vm0, %v7850_v0 }
0x2ffd   : > { %v5427_v54 = vpop.f32.mrf.mxu1 }
0x2ffe   : > { %v5433_v58 = vmul.f32 0.35355338, %v5427_v54 }
0x2fff   : > { %v7439_v47 = vpop.f32.mrf.mxu1 }
0x3000   : > { %v5434_v48 = vsel %vm357_vm1, %v5433_v58, -inf }
0x3001   : > { %5435 = vmax.xlane.f32.xlu0 %v5434_v48  ;;  %v5430_v27 = vpop.f32.mrf.mxu1 }
0x3003   : > { %v7440_v49 = vpop.f32.mrf.mxu1 }
0x3009   : > { %v5487_v53 = vpop.f32.mrf.mxu0 }
0x300b   : > { %v7447_v55 = vpop.f32.mrf.mxu0 }
0x300d   : > { %v5490_v40 = vpop.f32.mrf.mxu0 }
0x300e   : > { %v5495_v12 = vpack.c.bf16 %v5490_v40, %v5487_v53 }
0x300f   : > { %v7448_v16 = vpop.f32.mrf.mxu0 }
0x3010   : > { %7450 = vmatpush3.bf16.msra.mxu1 %v5495_v12 }
0x3011   : > { %v5579_v60 = vpop.f32.mrf.mxu0  ;;  %7461 = vmatprep.subr.bf16.mxu1 %v7850_v0 }
0x3012   : > { %v5585_v1 = vmul.f32 0.35355338, %v5579_v60 }
0x3013   : > { %v7459_v38 = vpop.f32.mrf.mxu0 }
0x3014   : > { %v5586_v30 = vsel %vm357_vm1, %v5585_v1, -inf }
0x3015   : > { %5587 = vmax.xlane.f32.xlu0 %v5586_v30  ;;  %v5582_v22 = vpop.f32.mrf.mxu0 }
0x3017   : > { %v7460_v7 = vpop.f32.mrf.mxu0 }
0x308a   : > { %v5436_v24 = vpop.xlane.xlu0 %5435 }
0x308b   : > { %v5437_v10 = vsub.f32 %v5433_v58, %v5436_v24  ;;  %v5840_v58 = vmul.f32 %v8022_v52, %v9016_v21  ;;  %v6506_v52 = vld [vmem:[%s9224_s4 + $0x39] ss:$0 sm:$0xff] }
0x308d   : > { %v5438_v13 = vmul.f32 1.442695, %v5437_v10  ;;  %v5841_v47 = vpack.c.bf16 %v5840_v58, %v5840_v58 }
0x308f   : > { %7735 = vpow2.f32 %v5438_v13 }
0x309c   : > { %v7736_v62 = vpop.eup %7735 }
0x309d   : > { %v5440_v17 = vsel %vm357_vm1, %v7736_v62, 0.0 }
0x309e   : > { %5441 = vadd.xlane.f32.xlu1 %v5440_v17  ;;  %v5588_v18 = vpop.xlane.xlu0 %5587 }
0x309f   : > { %v5589_v14 = vsub.f32 %v5585_v1, %v5588_v18 }
0x30a1   : > { %v5590_v3 = vmul.f32 1.442695, %v5589_v14 }
0x30a3   : > { %7737 = vpow2.f32 %v5590_v3 }
0x30b0   : > { %v7738_v57 = vpop.eup %7737 }
0x30b1   : > { %v5592_v9 = vsel %vm357_vm1, %v7738_v57, 0.0 }
0x30b2   : > { %5593 = vadd.xlane.f32.xlu1 %v5592_v9 }
0x3127   : > { %v5442_v50 = vpop.xlane.xlu1 %5441 }
0x3128   : > { %7739 = vrcp.f32 %v5442_v50 }
0x3135   : > { %v7740_v28 = vpop.eup %7739 }
0x3136   : > { %v5444_v19 = vmul.f32 %v7740_v28, %v7736_v62 }
0x3138   : > { %v5494_v5 = vpack.c.bf16 %v5444_v19, %v5444_v19 }
0x313a   : > { %7452 = vmatmul.mubr.msk.bf16.vlgmr.msra.gmra.mxu1 %vm357_vm1, %v5494_v5 }
0x313b   : > { %7462 = vmatpush3.bf16.msra.mxu1 %v9005_v59  ;;  %7465 = vmatprep.mubr.msk.bf16.mxu1 %vm7851_vm0, %v7850_v0  ;;  %v5594_v32 = vpop.xlane.xlu1 %5593 }
0x313c   : > { %7463 = vmatprep.subr.bf16.mxu1 %v7850_v0  ;;  %7741 = vrcp.f32 %v5594_v32 }
0x313f   : > { %7464 = vmatpush3.bf16.msra.mxu1 %v9009_v15 }
0x3140   : > { %7475 = vmatprep.subr.bf16.mxu1 %v7850_v0 }
0x3142   : > { %7466 = vmatmul.mubr.msk.bf16.vlgmr.msra.gmra.mxu1 %vm414_vm3, %v5599_v43 }
0x3143   : > { %7476 = vmatpush3.bf16.xpose.msra.mxu1 %v8979_v45  ;;  %7477 = vmatprep.mubr.msk.bf16.mxu1 %vm7851_vm0, %v7850_v0 }
0x3144   : > { %7489 = vmatprep.subr.bf16.mxu1 %v7850_v0 }
0x3149   : > { %v7742_v39 = vpop.eup %7741 }
0x314a   : > { %7478 = vmatmul.mubr.msk.bf16.vlgmr.msra.gmra.mxu1 %vm414_vm3, %v5691_v26  ;;  %v5596_v2 = vmul.f32 %v7742_v39, %v7738_v57 }
0x314b   : > { %7491 = vmatprep.mubr.msk.bf16.mxu1 %vm7851_vm0, %v7850_v0 }
0x314c   : > { %v5644_v37 = vpack.c.bf16 %v5596_v2, %v5596_v2 }
0x31fa   : > { %v5533_v11 = vpop.f32.mrf.mxu1 }
0x31fb   : > { %v5539_v21 = vadd.f32 %v6506_v52, %v5533_v11  ;;  %v6077_v52 = vld [vmem:[#allocation2 + $0x4e8] sm:$0xff] }
0x31fc   : > { %v7453_v23 = vpop.f32.mrf.mxu1 }
0x31fe   : > { %v5536_v33 = vpop.f32.mrf.mxu1 }
0x3200   : > { %v7454_v8 = vpop.f32.mrf.mxu1 }
0x3202   : > { %v5637_v29 = vpop.f32.mrf.mxu1 }
0x3204   : > { %v7467_v63 = vpop.f32.mrf.mxu1 }
0x3206   : > { %v5640_v42 = vpop.f32.mrf.mxu1 }
0x3207   : > { %v5645_v51 = vpack.c.bf16 %v5640_v42, %v5637_v29 }
0x3208   : > { %v7468_v35 = vpop.f32.mrf.mxu1 }
0x3209   : > { %7470 = vmatpush3.bf16.msra.mxu0 %v5645_v51 }
0x320a   : > { %v5729_v20 = vpop.f32.mrf.mxu1  ;;  %7481 = vmatprep.subr.bf16.mxu0 %v7850_v0 }
0x320b   : > { %v5735_v36 = vmul.f32 0.35355338, %v5729_v20 }
0x320c   : > { %7472 = vmatmul.mubr.msk.bf16.vlgmr.msra.gmra.mxu0 %vm357_vm1, %v5644_v37  ;;  %v7479_v43 = vpop.f32.mrf.mxu1 }
0x320d   : > { %7482 = vmatpush3.bf16.msra.mxu0 %v9005_v59  ;;  %v5736_v6 = vsel %vm357_vm1, %v5735_v36, -inf  ;;  %7485 = vmatprep.mubr.msk.bf16.mxu0 %vm7851_vm0, %v7850_v0 }
0x320e   : > { %v5732_v46 = vpop.f32.mrf.mxu1  ;;  %5737 = vmax.xlane.f32.xlu0 %v5736_v6  ;;  %7483 = vmatprep.subr.bf16.mxu0 %v7850_v0 }
0x320f   : > { %v6018_v46 = vld [vmem:[#allocation2 + $0x4b0] sm:$0xff] }
0x3210   : > { %v7480_v54 = vpop.f32.mrf.mxu1 }
0x3211   : > { %7484 = vmatpush3.bf16.msra.mxu0 %v9009_v15  ;;  %v6019_v54 = vld [vmem:[#allocation2 + $0x4b8] sm:$0xff] }
0x3212   : > { %7495 = vmatprep.subr.bf16.mxu0 %v7850_v0  ;;  %v6022_v58 = vpack.c.bf16 %v6019_v54, %v6018_v46 }
0x3214   : > { %7486 = vmatmul.mubr.msk.bf16.vlgmr.msra.gmra.mxu0 %vm414_vm3, %v5749_v44 }
0x3215   : > { %7496 = vmatpush3.bf16.xpose.msra.mxu0 %v8979_v45  ;;  %7497 = vmatprep.mubr.msk.bf16.mxu0 %vm7851_vm0, %v7850_v0 }
0x3216   : > { %7509 = vmatprep.subr.bf16.mxu0 %v7850_v0 }
0x321c   : > { %7498 = vmatmul.mubr.msk.bf16.vlgmr.msra.gmra.mxu0 %vm414_vm3, %v5841_v47  ;;  %v6016_v47 = vld [vmem:[#allocation2 + $0x4a0] sm:$0xff] }
0x321d   : > { %7511 = vmatprep.mubr.msk.bf16.mxu0 %vm7851_vm0, %v7850_v0 }
0x3297   : > { %v5738_v48 = vpop.xlane.xlu0 %5737 }
0x3298   : > { %v5739_v31 = vsub.f32 %v5735_v36, %v5738_v48  ;;  %v6017_v48 = vld [vmem:[#allocation2 + $0x4a8] sm:$0xff] }
0x329a   : > { %v5740_v41 = vmul.f32 1.442695, %v5739_v31  ;;  %v6078_v31 = vld [vmem:[#allocation2 + $0x4f0] sm:$0xff] }
0x329c   : > { %7743 = vpow2.f32 %v5740_v41  ;;  %v6079_v41 = vld [vmem:[#allocation2 + $0x4f8] sm:$0xff] }
0x32a9   : > { %v7744_v44 = vpop.eup %7743 }
0x32aa   : > { %v5742_v45 = vsel %vm357_vm1, %v7744_v44, 0.0 }
0x32ab   : > { %5743 = vadd.xlane.f32.xlu1 %v5742_v45  ;;  %v6084_v45 = vpack.c.bf16 %v6079_v41, %v6078_v31 }
0x32cc   : > { %v5683_v27 = vpop.f32.mrf.mxu0 }
0x32cd   : > { %v5689_v49 = vadd.f32 %v5683_v27, %v5539_v21 }
0x32ce   : > { %v7473_v53 = vpop.f32.mrf.mxu0 }
0x32d0   : > { %v5686_v55 = vpop.f32.mrf.mxu0 }
0x32d2   : > { %v7474_v40 = vpop.f32.mrf.mxu0 }
0x32d3   : > { %v6519_v40 = vld [vmem:[%s9224_s4 + $0x3c] ss:$0 sm:$0xff] }
0x32d4   : > { %v5787_v12 = vpop.f32.mrf.mxu0 }
0x32d6   : > { %v7487_v16 = vpop.f32.mrf.mxu0 }
0x32d7   : > { %v6520_v16 = vld [vmem:[%s9224_s4 + $0x3d] ss:$0 sm:$0xff] }
0x32d8   : > { %v5790_v60 = vpop.f32.mrf.mxu0 }
0x32d9   : > { %v5795_v1 = vpack.c.bf16 %v5790_v60, %v5787_v12 }
0x32da   : > { %v7488_v38 = vpop.f32.mrf.mxu0 }
0x32db   : > { %7490 = vmatpush3.bf16.msra.mxu1 %v5795_v1 }
0x32dc   : > { %v5879_v30 = vpop.f32.mrf.mxu0  ;;  %7501 = vmatprep.subr.bf16.mxu1 %v7850_v0 }
0x32dd   : > { %v5885_v22 = vmul.f32 0.35355338, %v5879_v30  ;;  %v6074_v30 = vld [vmem:[#allocation2 + $0x4d0] sm:$0xff] }
0x32de   : > { %v7499_v7 = vpop.f32.mrf.mxu0 }
0x32df   : > { %v5886_v24 = vsel %vm357_vm1, %v5885_v22, -inf }
0x32e0   : > { %5887 = vmax.xlane.f32.xlu0 %v5886_v24  ;;  %v5882_v10 = vpop.f32.mrf.mxu0  ;;  %v6072_v24 = vld [vmem:[#allocation2 + $0x4c0] sm:$0xff] }
0x32e1   : > { %v6073_v10 = vld [vmem:[#allocation2 + $0x4c8] sm:$0xff] }
0x32e2   : > { %v7500_v13 = vpop.f32.mrf.mxu0 }
0x32e3   : > { %v6081_v13 = vpack.c.bf16 %v6073_v10, %v6072_v24 }
0x3334   : > { %v5744_v62 = vpop.xlane.xlu1 %5743 }
0x3335   : > { %7745 = vrcp.f32 %v5744_v62  ;;  %v6521_v62 = vld [vmem:[%s9224_s4 + $0x40] ss:$0 sm:$0xff] }
0x3342   : > { %v7746_v17 = vpop.eup %7745 }
0x3343   : > { %v5746_v18 = vmul.f32 %v7746_v17, %v7744_v44  ;;  %v6076_v44 = vld [vmem:[#allocation2 + $0x4e0] sm:$0xff] }
0x3344   : > { %v6083_v21 = vpack.c.bf16 %v6077_v52, %v6076_v44 }
0x3345   : > { %v5794_v14 = vpack.c.bf16 %v5746_v18, %v5746_v18 }
0x3347   : > { %7492 = vmatmul.mubr.msk.bf16.vlgmr.msra.gmra.mxu1 %vm357_vm1, %v5794_v14 }
0x3348   : > { %7502 = vmatpush3.bf16.msra.mxu1 %v9005_v59  ;;  %7505 = vmatprep.mubr.msk.bf16.mxu1 %vm7851_vm0, %v7850_v0 }
0x3349   : > { %7503 = vmatprep.subr.bf16.mxu1 %v7850_v0 }
0x334c   : > { %7504 = vmatpush3.bf16.msra.mxu1 %v9009_v15 }
0x334d   : > { %7515 = vmatprep.subr.bf16.mxu1 %v7850_v0 }
0x334f   : > { %7506 = vmatmul.mubr.msk.bf16.vlgmr.msra.gmra.mxu1 %vm414_vm3, %v5899_v61 }
0x3350   : > { %7519 = vmatprep.mubr.msk.bf16.mxu1 %vm7851_vm0, %v7850_v0  ;;  %7516 = vmatpush3.bf16.msra.mxu1 %v6022_v58 }
0x3351   : > { %7517 = vmatprep.subr.bf16.mxu1 %v7850_v0 }
0x3369   : > { %v5888_v3 = vpop.xlane.xlu0 %5887 }
0x336a   : > { %v5889_v57 = vsub.f32 %v5885_v22, %v5888_v3  ;;  %v6075_v22 = vld [vmem:[#allocation2 + $0x4d8] sm:$0xff] }
0x336b   : > { %v6082_v7 = vpack.c.bf16 %v6075_v22, %v6074_v30 }
0x336c   : > { %v5890_v59 = vmul.f32 1.442695, %v5889_v57 }
0x336e   : > { %7747 = vpow2.f32 %v5890_v59 }
0x337b   : > { %v7748_v9 = vpop.eup %7747 }
0x337c   : > { %v5892_v50 = vsel %vm357_vm1, %v7748_v9, 0.0 }
0x337d   : > { %5893 = vadd.xlane.f32.xlu1 %v5892_v50  ;;  %v6523_v50 = vld [vmem:[%s9224_s4 + $0x41] ss:$0 sm:$0xff] }
0x3406   : > { %v5894_v28 = vpop.xlane.xlu1 %5893 }
0x3407   : > { %7749 = vrcp.f32 %v5894_v28  ;;  %v5833_v15 = vpop.f32.mrf.mxu1 }
0x3408   : > { %v5839_v19 = vadd.f32 %v5833_v15, %v5689_v49 }
0x3409   : > { %v7493_v5 = vpop.f32.mrf.mxu1 }
0x340b   : > { %v5836_v25 = vpop.f32.mrf.mxu1 }
0x340d   : > { %v7494_v34 = vpop.f32.mrf.mxu1 }
0x340f   : > { %v5937_v56 = vpop.f32.mrf.mxu1 }
0x3411   : > { %v7507_v61 = vpop.f32.mrf.mxu1 }
0x3413   : > { %v5940_v26 = vpop.f32.mrf.mxu1 }
0x3414   : > { %v7750_v32 = vpop.eup %7749  ;;  %v5945_v11 = vpack.c.bf16 %v5940_v26, %v5937_v56 }
0x3415   : > { %v5896_v23 = vmul.f32 %v7750_v32, %v7748_v9  ;;  %v7508_v33 = vpop.f32.mrf.mxu1 }
0x3416   : > { %7510 = vmatpush3.bf16.msra.mxu0 %v5945_v11  ;;  %v6161_v33 = vld [vmem:[#allocation2 + $0x70] sm:$0xff] }
0x3417   : > { %v5944_v8 = vpack.c.bf16 %v5896_v23, %v5896_v23  ;;  %7523 = vmatprep.subr.bf16.mxu0 %v7850_v0 }
0x3419   : > { %7512 = vmatmul.mubr.msk.bf16.vlgmr.msra.gmra.mxu0 %vm357_vm1, %v5944_v8  ;;  %v6162_v8 = vld [vmem:[#allocation2 + $0x78] sm:$0xff] }
0x341a   : > { %7531 = vmatprep.mubr.msk.bf16.mxu0 %vm7851_vm0, %v7850_v0  ;;  %7524 = vmatpush3.bf16.msra.mxu0 %v6084_v45 }
0x341b   : > { %7525 = vmatprep.subr.bf16.mxu0 %v7850_v0 }
0x341e   : > { %7526 = vmatpush3.bf16.msra.mxu0 %v6083_v21 }
0x341f   : > { %7527 = vmatprep.subr.bf16.mxu0 %v7850_v0 }
0x3422   : > { %7528 = vmatpush3.bf16.msra.mxu0 %v6082_v7 }
0x3423   : > { %7529 = vmatprep.subr.bf16.mxu0 %v7850_v0 }
0x3426   : > { %7530 = vmatpush3.bf16.msra.mxu0 %v6081_v13 }
0x34d9   : > { %v5983_v29 = vpop.f32.mrf.mxu0 }
0x34da   : > { %v5989_v39 = vadd.f32 %v5983_v29, %v5839_v19  ;;  %v6165_v29 = vpack.c.bf16 %v6162_v8, %v6161_v33 }
0x34db   : > { %v7513_v63 = vpop.f32.mrf.mxu0 }
0x34dc   : > { %v5990_v2 = vadd.f32 %v5989_v39, %v8992_v4  ;;  %v6021_v4 = vpack.c.bf16 %v6017_v48, %v6016_v47  ;;  %v6159_v39 = vld [vmem:[#allocation2 + $0x60] sm:$0xff]  ;;  %v6160_v63 = vld [vmem:[#allocation2 + $0x68] sm:$0xff] }
0x34dd   : > { %v5986_v42 = vpop.f32.mrf.mxu0 }
0x34de   : > { %v5993_v51 = vsel %vm414_vm3, %v5990_v2, 0.0  ;;  %7518 = vmatpush3.bf16.msra.mxu1 %v6021_v4 }
0x34df   : > { %5994 = vadd.xlane.f32.xlu0 %v5993_v51  ;;  %v7514_v35 = vpop.f32.mrf.mxu0  ;;  %7535 = vmatprep.subr.bf16.mxu1 %v7850_v0 }
0x3568   : > { %v5995_v37 = vpop.xlane.xlu0 %5994 }
0x3569   : > { %v5996_v20 = vmul.f32 0.03125, %v5995_v37 }
0x356b   : > { %v5997_v36 = vsub.f32 %v5990_v2, %v5996_v20  ;;  %v6164_v2 = vpack.c.bf16 %v6160_v63, %v6159_v39  ;;  %v6525_v20 = vld [vmem:[%s9224_s4 + $0x3e] ss:$0 sm:$0xff] }
0x356d   : > { %v5998_v43 = vmul.f32 %v5997_v36, %v5997_v36 }
0x356f   : > { %v5999_v6 = vsel %vm414_vm3, %v5998_v43, 0.0  ;;  %v6526_v43 = vld [vmem:[%s9224_s4 + $0x3f] ss:$0 sm:$0xff] }
0x3570   : > { %6000 = vadd.xlane.f32.xlu1 %v5999_v6 }
0x35f9   : > { %v6001_v27 = vpop.xlane.xlu1 %6000 }
0x35fa   : > { %v6002_v49 = vmul.f32 0.03125, %v6001_v27 }
0x35fc   : > { %v6003_v53 = vadd.f32 1e-05, %v6002_v49 }
0x35fe   : > { %7751 = vrsqrt.f32 %v6003_v53 }
0x360b   : > { %v7752_v55 = vpop.eup %7751 }
0x360c   : > { %v6005_v12 = vmul.f32 %v7752_v55, %v5997_v36 }
0x360e   : > { %v6010_v60 = vmul.f32 %v6519_v40, %v6005_v12 }
0x3610   : > { %v6015_v1 = vadd.f32 %v6520_v16, %v6010_v60 }
0x3612   : > { %v6020_v38 = vpack.c.bf16 %v6015_v1, %v6015_v1 }
0x3614   : > { %7520 = vmatmul.mubr.msk.bf16.vlgmr.msra.gmra.mxu1 %vm414_vm3, %v6020_v38 }
0x3615   : > { %7539 = vmatprep.mubr.msk.bf16.mxu1 %vm7851_vm0, %v7850_v0  ;;  %7536 = vmatpush3.bf16.msra.mxu1 %v6165_v29 }
0x3616   : > { %7537 = vmatprep.subr.bf16.mxu1 %v7850_v0 }
0x3619   : > { %7538 = vmatpush3.bf16.msra.mxu1 %v6164_v2 }
0x36d4   : > { %v6065_v17 = vpop.f32.mrf.mxu1 }
0x36d5   : > { %v6066_v18 = vadd.f32 %v6521_v62, %v6065_v17 }
0x36d6   : > { %v7521_v14 = vpop.f32.mrf.mxu1 }
0x36d7   : > { %v6071_v3 = vmax.f32 %v6066_v18, 0.0 }
0x36d8   : > { %v6068_v57 = vpop.f32.mrf.mxu1 }
0x36d9   : > { %v6080_v59 = vpack.c.bf16 %v6071_v3, %v6071_v3 }
0x36da   : > { %v7522_v9 = vpop.f32.mrf.mxu1 }
0x36db   : > { %7532 = vmatmul.mubr.msk.bf16.vlgmr.msra.gmra.mxu0 %vm1362_vm14, %v6080_v59 }
0x379b   : > { %v6127_v28 = vpop.f32.mrf.mxu0 }
0x379c   : > { %v6128_v15 = vadd.f32 %v6523_v50, %v6127_v28 }
0x379d   : > { %v7533_v19 = vpop.f32.mrf.mxu0 }
0x379e   : > { %v6133_v5 = vadd.f32 %v6128_v15, %v6015_v1 }
0x379f   : > { %v6130_v25 = vpop.f32.mrf.mxu0 }
0x37a0   : > { %v6136_v34 = vsel %vm414_vm3, %v6133_v5, 0.0 }
0x37a1   : > { %6137 = vadd.xlane.f32.xlu0 %v6136_v34  ;;  %v7534_v56 = vpop.f32.mrf.mxu0 }
0x382a   : > { %v6138_v61 = vpop.xlane.xlu0 %6137 }
0x382b   : > { %v6139_v26 = vmul.f32 0.03125, %v6138_v61 }
0x382d   : > { %v6140_v32 = vsub.f32 %v6133_v5, %v6139_v26 }
0x382f   : > { %v6141_v11 = vmul.f32 %v6140_v32, %v6140_v32 }
0x3831   : > { %v6142_v23 = vsel %vm414_vm3, %v6141_v11, 0.0 }
0x3832   : > { %6143 = vadd.xlane.f32.xlu1 %v6142_v23 }
0x38bb   : > { %v6144_v42 = vpop.xlane.xlu1 %6143 }
0x38bc   : > { %v6145_v51 = vmul.f32 0.03125, %v6144_v42 }
0x38be   : > { %v6146_v35 = vadd.f32 1e-05, %v6145_v51 }
0x38c0   : > { %7753 = vrsqrt.f32 %v6146_v35 }
0x38cd   : > { %v7754_v37 = vpop.eup %7753 }
0x38ce   : > { %v6148_v36 = vmul.f32 %v7754_v37, %v6140_v32 }
0x38d0   : > { %v6153_v0 = vmul.f32 %v6525_v20, %v6148_v36 }
0x38d2   : > { %v6158_v6 = vadd.f32 %v6526_v43, %v6153_v0 }
0x38d4   : > { %v6163_v46 = vpack.c.bf16 %v6158_v6, %v6158_v6 }
0x38d6   : > { %7540 = vmatmul.mubr.msk.bf16.vlgmr.msra.gmra.mxu1 %vm414_vm3, %v6163_v46 }
0x38d7   : > { %7794 = shalt.err (!%p7791_p0)
}
0x38d8   : > { %s7795_s15 = scalar_lea.hbm %s9166_s14, 256  ;;  %s7799_s9 = scalar_lea.hbm %s9225_s5, 512 }
0x38d9   : > { %p7796_p1 = scmp.ne.s32.totalorder %s9166_s14, %s7795_s15  ;;  %p7800_p4 = scmp.lt.s32.totalorder %s9166_s14, %s9225_s5 }
0x38da   : > { %p7801_p7 = scmp.lt.s32.totalorder %s7799_s9, %s7795_s15 }
0x38db   : > { %p7797_p2 = pnand %p7796_p1, %p7928_p5 }
0x38dc   : > { %p7802_p8 = por %p7801_p7, %p7800_p4 }
0x38dd   : > { %p7798_p3 = pneg %p7797_p2 }
0x38df   : > { %p7803_p6 = pnand %p7802_p8, %p7798_p3 }
0x38e1   : > { %7806 = shalt.err (!%p7803_p6)
}
0x38e2   : > { %s7853_s13 = smov 128   ;;  %s7854_s18 = smov 8   ;;  %v6527_v54 = vld [vmem:[%s9224_s4 + $0x8] ss:$0 sm:$0xff] }
0x38e3   : > { %7547 = dma.vmem_to_hbm [thread:$0]  (%p7928_p5), %s9168_s11, 256, %s9166_s14, %s9172_s16, %s7853_s13, %s7853_s13, %s7854_s18  }
0x38e4   : > { %s306_s15 = scalar_lea.vmem %s9226_s6, %s6364_s29 }
0x3996   : > { %v6208_v58 = vpop.f32.mrf.mxu1 }
0x3997   : > { %v6209_v47 = vadd.f32 %v6527_v54, %v6208_v58 }
0x3998   : > { %v7541_v48 = vpop.f32.mrf.mxu1 }
0x3999   : > { %6214 = vst [vmem:[%s306_s15] sm:$0xff] %v6209_v47 }
0x399a   : > { %v6211_v4 = vpop.f32.mrf.mxu1 }
0x399c   : > { %v7542_v31 = vpop.f32.mrf.mxu1 }
0x399d PF: > { %p7559_p5 = scmp.ge.s32.totalorder %s7845_s24, 2  ;;  %s6251_s7 = sand.u32 1, %s7833_s21  }
0x399e   : > { %p9230_p9 = scmp.ne.s32.totalorder %s9228_s8, 0  ;;  %s6252_s17 = scalar_lea.sflag [#allocation4], %s6251_s7 }
0x39a0   : > { %p7554_p10 = pnand %p7559_p5, %p9230_p9 }
0x39a2   : > { %p7555_p11 = pneg %p7554_p10 }
0x39a4   : > { %7828 = dma.done.wait (%p7555_p11), %s6252_s17, 256  }
0x39a5   : > { %7830 = vsyncadd (%p7555_p11), %s6252_s17, 4294967040  ;;  %p18_p12 = scmp.ge.s32.totalorder %s7915_s27, 4   ;;  %s9231_s21 = smov %s7837_s22 }
0x39a6   : > { %s9232_s22 = smov %s7841_s23  ;;  %s9233_s23 = smov %s7926_s30 }
0x39a7   : > { %s9234_s24 = smov %s7915_s27  ;;  %20 = sbr.rel (!%p18_p12) target bundleno = 4 (0x4), region = 98 }
0x39ac   :  { %6264 = vsyncpa [#allocation3], 1 }
0x39ad   :  { %6266 = vsyncpa [#allocation3 + $0x1], 1 }
0x39ae   :  { %6267 = vsyncpa [#allocation4], 1 }
0x39af   :  { %6269 = vsyncpa [#allocation4 + $0x1], 1 }

</bundles_post_ra>
